<compile_context>
chip_gen: v7x
topology: tpu7x:2x2x1
jax: 0.10.0
libtpu: 0.0.40
codegen_flags: <defaults>
</compile_context>

<pallas_src>
import functools

import jax
import jax.numpy as jnp
from jax import lax
from jax.experimental import pallas as pl
from jax.experimental.pallas import tpu as pltpu

BF16 = jnp.bfloat16
F32 = jnp.float32

HP = 128  # hidden dim padded to one full 128-lane vreg (logical hidden = 64)

# Row layout of the packed (11, HP) f32 "hvec" parameter slab.
(R_MLP_B1, R_MLP_B2, R_MLP_G1, R_MLP_BE1, R_MLP_B3, R_MLP_G2, R_MLP_BE2,
 R_B_GOUT, R_LB_G1, R_LB_BE1, R_LB_B5, N_HROWS) = range(12)

# Row layout of the packed (12, 6H) f32 "svec" parameter slab.
(R_LB_B1, R_LB_G2, R_LB_BE2, R_LB_B2, R_LB_G3, R_LB_BE3, R_LB_B3,
 R_LB_G4, R_LB_BE4, R_LB_B4, R_LB_G5, R_LB_BE5, N_SROWS) = range(13)

# Index layout of the SMEM scalar vector (a_bias occupies S_ABIAS0 .. +n_iter-1).
(S_MLP_P1, S_MLP_P2, S_B_REL, S_LB_P2, S_LB_P3, S_LB_P4, S_LB_P5, S_ABIAS0) = range(8)


# ----------------------------- in-kernel helpers -----------------------------

def _bn(h, gamma, beta, eps=1e-5):
    # BatchNorm1d (training mode, biased variance) folded into one FMA:
    # scale = gamma*rsqrt(var+eps); shift = beta - mu*scale.  rsqrt -> EUP slot.
    mu = jnp.mean(h, axis=0, keepdims=True)
    var = jnp.mean((h - mu) ** 2, axis=0, keepdims=True)
    scale = gamma * lax.rsqrt(var + eps)
    return h * scale + (beta - mu * scale)


def _prelu(h, a):
    # a is a scalar (PyTorch PReLU with a single parameter), splat on the VPU.
    return jnp.where(h >= 0.0, h, a * h)


def _mm(a_bf, b_bf):
    # bf16 MXU matmul with f32 accumulation; operands are already bf16.
    return jnp.dot(a_bf, b_bf, preferred_element_type=F32)


# ------------------------------ fused kernel ----------------------------------

def drug_encoder_kernel(
    # graph data
    x_in, ea_in, s0, s1, t1, a_lg, bmatT_f,
    # dense bf16 weights (VMEM)
    mlp_w1, mlp_w2, mlp_w3, lin_u_w, lin_v_w, lin_edge_w, w_rr, w_gout, a_blk,
    # packed f32 vector params (VMEM) and scalars (SMEM)
    hvec, svec, scal,
    # LinearBlock weights, left in HBM and DMA'd manually so the copy overlaps
    lb1_hbm, lb2_hbm, lb3_hbm, lb4_hbm, lb5_hbm,
    # output
    o_ref,
    # scratch: VMEM landing buffers for the LinearBlock weights + DMA semaphores
    lbw1, lbw2, lbw3, lbw4, lbw5, dma_sems,
    *, n_iter, n_graphs):

    # ---- 0) scalar reads first (before any DMA wait), then kick off the
    #         LinearBlock weight copies; they hide behind stages 1-4.
    mlp_p1 = scal[S_MLP_P1]
    mlp_p2 = scal[S_MLP_P2]
    b_rel = scal[S_B_REL]
    lb_p2 = scal[S_LB_P2]
    lb_p3 = scal[S_LB_P3]
    lb_p4 = scal[S_LB_P4]
    lb_p5 = scal[S_LB_P5]

    copies = [
        pltpu.make_async_copy(src, dst, dma_sems.at[i])
        for i, (src, dst) in enumerate(
            [(lb1_hbm, lbw1), (lb2_hbm, lbw2), (lb3_hbm, lbw3),
             (lb4_hbm, lbw4), (lb5_hbm, lbw5)])
    ]
    for cp in copies:
        cp.start()

    hv = hvec[...]                                                 # [11, HP] f32
    sv = svec[...]                                                 # [12, 6H] f32

    # ---- 1) node MLP: Linear -> PReLU -> Linear -> BN -> PReLU -> Linear -> BN
    h = _mm(x_in[...].astype(BF16), mlp_w1[...]) + hv[R_MLP_B1:R_MLP_B1 + 1, :]
    h = _prelu(h, mlp_p1)
    h = _mm(h.astype(BF16), mlp_w2[...]) + hv[R_MLP_B2:R_MLP_B2 + 1, :]
    h = _bn(h, hv[R_MLP_G1:R_MLP_G1 + 1, :], hv[R_MLP_BE1:R_MLP_BE1 + 1, :])
    h = _prelu(h, mlp_p2)
    h = _mm(h.astype(BF16), mlp_w3[...]) + hv[R_MLP_B3:R_MLP_B3 + 1, :]
    x = _bn(h, hv[R_MLP_G2:R_MLP_G2 + 1, :], hv[R_MLP_BE2:R_MLP_BE2 + 1, :])  # [N,HP]

    # ---- 2) initial directed-edge features -----------------------------------
    x_bf = x.astype(BF16)
    eu = _mm(x_bf, lin_u_w[...])                                   # [N, HP]
    ev = _mm(x_bf, lin_v_w[...])                                   # [N, HP]
    euv = _mm(ea_in[...].astype(BF16), lin_edge_w[...])            # [E, HP]
    edge_attr = (_mm(s0[...], eu.astype(BF16)) +
                 _mm(s1[...], ev.astype(BF16)) + euv) / 3.0        # [E, HP] f32

    # ---- 3) DMPNN iterations (fully unrolled; everything stays in VMEM/vregs)
    a_lg_v = a_lg[...]                                             # [E, E] bf16
    w_rr_v = w_rr[...]                                             # [HP, 2] bf16 (rel|root)
    w_gout_v = w_gout[...]
    b_gout = hv[R_B_GOUT:R_B_GOUT + 1, :]
    bT = bmatT_f[...]                                              # [E, B] f32 one-hot

    out = edge_attr
    out_bf = edge_attr.astype(BF16)
    out_list = []
    gout_list = []
    for _ in range(n_iter):
        # line-graph message passing (scatter-add == incidence matmul)
        out = edge_attr + _mm(a_lg_v, out_bf)                      # [E, HP] f32
        out_bf = out.astype(BF16)          # one bf16 cast per iteration, reused 3x
        out_list.append(out)

        # SAGPooling score via GraphConv(H->1); lin_rel & lin_root fused into one
        # [HP,2] weight; lin_rel reassociated: (A @ out) @ w == A @ (out @ w).
        s2 = _mm(out_bf, w_rr_v)                                   # [E, 2]
        prop = _mm(a_lg_v, s2.astype(BF16))                        # [E, 2]
        score = prop[:, 0:1] + s2[:, 1:2] + b_rel                  # [E, 1]

        # per-graph softmax over edges (torch_geometric.utils.softmax)
        masked = jnp.where(bT > 0.0, score, -1e30)                 # [E, B]
        maxg = jnp.max(masked, axis=0, keepdims=True)              # [1, B]
        max_e = jnp.sum(bT * maxg, axis=1, keepdims=True)          # [E, 1]
        exp_s = jnp.exp(score - max_e)                             # [E, 1]
        sumg = jnp.sum(bT * exp_s, axis=0, keepdims=True)          # [1, B]
        sum_e = jnp.sum(bT * sumg, axis=1, keepdims=True)          # [E, 1]
        alpha = exp_s / (sum_e + 1e-16)                            # [E, 1] f32

        # attention-weighted global add pool, exact f32 on the VPU (B is small;
        # for large batches switch back to an MXU matmul with a 0/1 bmat).
        weighted = alpha * out                                     # [E, HP] f32
        gout = jnp.concatenate(
            [jnp.sum(bT[:, b:b + 1] * weighted, axis=0, keepdims=True)
             for b in range(n_graphs)], axis=0)                    # [B, HP] f32
        gout_t = jnp.tanh(_mm(gout.astype(BF16), w_gout_v) + b_gout)
        gout_list.append(gout_t)

    # ---- 4) iteration attention: ONE matmul over concatenated gouts against the
    #         block-diagonal `a` (replaces T narrow per-iteration matmuls).
    g_cat = jnp.concatenate(gout_list, axis=1).astype(BF16)        # [B, T*HP]
    scores = _mm(g_cat, a_blk[...])                                # [B, T] f32
    t_iota = lax.broadcasted_iota(jnp.int32, (1, n_iter), 1)
    a_bias = jnp.zeros((1, n_iter), F32)
    for t in range(n_iter):
        a_bias = a_bias + jnp.where(t_iota == t, scal[S_ABIAS0 + t], 0.0)
    scores = scores + a_bias
    m = jnp.max(scores, axis=1, keepdims=True)
    e = jnp.exp(scores - m)
    p = e / jnp.sum(e, axis=1, keepdims=True)                      # [B, T] f32

    # repeat_interleave of p over edges: exact f32 select on the VPU (no MXU).
    edge_p = bT[:, 0:1] * p[0:1, :]
    for b in range(1, n_graphs):
        edge_p = edge_p + bT[:, b:b + 1] * p[b:b + 1, :]           # [E, T] f32

    acc = out_list[0] * edge_p[:, 0:1]
    for t in range(1, n_iter):
        acc = acc + out_list[t] * edge_p[:, t:t + 1]               # [E, HP] f32

    x2 = x + _mm(t1[...], acc.astype(BF16))                        # [N, HP]

    # ---- 5) LinearBlock: lin1; x=(lin3(lin2(x))+x)/2; x=(lin4(x)+x)/2; lin5
    for cp in copies:
        cp.wait()                          # DMAs were hidden behind stages 1-4

    h = _mm(_bn(x2, hv[R_LB_G1:R_LB_G1 + 1, :],
                hv[R_LB_BE1:R_LB_BE1 + 1, :]).astype(BF16),
            lbw1[...]) + sv[R_LB_B1:R_LB_B1 + 1, :]
    h2 = _mm(_prelu(_bn(h, sv[R_LB_G2:R_LB_G2 + 1, :],
                        sv[R_LB_BE2:R_LB_BE2 + 1, :]), lb_p2).astype(BF16),
             lbw2[...]) + sv[R_LB_B2:R_LB_B2 + 1, :]
    h3 = _mm(_prelu(_bn(h2, sv[R_LB_G3:R_LB_G3 + 1, :],
                        sv[R_LB_BE3:R_LB_BE3 + 1, :]), lb_p3).astype(BF16),
             lbw3[...]) + sv[R_LB_B3:R_LB_B3 + 1, :]
    h = (h3 + h) * 0.5
    h4 = _mm(_prelu(_bn(h, sv[R_LB_G4:R_LB_G4 + 1, :],
                        sv[R_LB_BE4:R_LB_BE4 + 1, :]), lb_p4).astype(BF16),
             lbw4[...]) + sv[R_LB_B4:R_LB_B4 + 1, :]
    h = (h4 + h) * 0.5
    o = _mm(_prelu(_bn(h, sv[R_LB_G5:R_LB_G5 + 1, :],
                       sv[R_LB_BE5:R_LB_BE5 + 1, :]), lb_p5).astype(BF16),
            lbw5[...]) + hv[R_LB_B5:R_LB_B5 + 1, :]
    o_ref[...] = o.astype(o_ref.dtype)                             # lane-dense store


# --------------------------------- wrapper ------------------------------------

def _pad_cols(a, to):
    pad = to - a.shape[-1]
    return a if pad == 0 else jnp.pad(a, [(0, 0)] * (a.ndim - 1) + [(0, pad)])


def _pad_rows(a, to):
    pad = to - a.shape[0]
    return a if pad == 0 else jnp.pad(a, [(0, pad)] + [(0, 0)] * (a.ndim - 1))


def drug_encoder_forward(params, x, edge_attr, S0, S1, T1, A_lg, bmatT,
                         *, hidden, n_iter):
    assert hidden <= HP
    N = x.shape[0]
    B = bmatT.shape[1]
    snd = 6 * hidden

    pc = lambda w: _pad_cols(w, HP)
    pr = lambda w: _pad_rows(w, HP)

    # -- pack / pad parameters (all tiny ops; fused by XLA outside the kernel) --
    mlp_w1 = pc(params["mlp_w1"]).astype(BF16)
    mlp_w2 = pr(pc(params["mlp_w2"])).astype(BF16)
    mlp_w3 = pr(pc(params["mlp_w3"])).astype(BF16)
    lin_u_w = pr(pc(params["lin_u_w"])).astype(BF16)
    lin_v_w = pr(pc(params["lin_v_w"])).astype(BF16)
    lin_edge_w = pc(params["lin_edge_w"]).astype(BF16)
    w_rr = pr(jnp.concatenate([params["w_rel"], params["w_root"]], axis=1)).astype(BF16)
    w_gout = pr(pc(params["w_gout"])).astype(BF16)

    a_pad = pr(params["a"])                                        # [HP, T]
    a_blk = jnp.zeros((n_iter * HP, n_iter), F32)
    for t in range(n_iter):
        a_blk = a_blk.at[t * HP:(t + 1) * HP, t].set(a_pad[:, t])
    a_blk = a_blk.astype(BF16)                                     # block-diag a

    lb_w1 = pr(params["lb_w1"]).astype(BF16)                       # [HP, 6H]
    lb_w2 = params["lb_w2"].astype(BF16)
    lb_w3 = params["lb_w3"].astype(BF16)
    lb_w4 = params["lb_w4"].astype(BF16)
    lb_w5 = pc(params["lb_w5"]).astype(BF16)                       # [6H, HP]

    hvec = jnp.concatenate([
        pc(params["mlp_b1"]), pc(params["mlp_b2"]), pc(params["mlp_g1"]),
        pc(params["mlp_be1"]), pc(params["mlp_b3"]), pc(params["mlp_g2"]),
        pc(params["mlp_be2"]), pc(params["b_gout"]), pc(params["lb_g1"]),
        pc(params["lb_be1"]), pc(params["lb_b5"]),
    ], axis=0).astype(F32)                                         # [11, HP]

    svec = jnp.concatenate([
        params["lb_b1"], params["lb_g2"], params["lb_be2"], params["lb_b2"],
        params["lb_g3"], params["lb_be3"], params["lb_b3"],
        params["lb_g4"], params["lb_be4"], params["lb_b4"],
        params["lb_g5"], params["lb_be5"],
    ], axis=0).astype(F32)                                         # [12, 6H]

    scal = jnp.concatenate([
        jnp.stack([params["mlp_p1"], params["mlp_p2"], params["b_rel"],
                   params["lb_p2"], params["lb_p3"], params["lb_p4"],
                   params["lb_p5"]]),
        params["a_bias"].reshape(-1),
    ]).astype(F32)                                                 # [7 + T]

    vmem = pl.BlockSpec(memory_space=pltpu.MemorySpace.VMEM)
    smem = pl.BlockSpec(memory_space=pltpu.MemorySpace.SMEM)
    hbm = pl.BlockSpec(memory_space=pl.ANY)

    kernel = functools.partial(drug_encoder_kernel, n_iter=n_iter, n_graphs=B)
    out = pl.pallas_call(
        kernel,
        out_shape=jax.ShapeDtypeStruct((N, HP), F32),
        in_specs=[vmem] * 18 + [smem] + [hbm] * 5,
        out_specs=vmem,
        scratch_shapes=[
            pltpu.VMEM((HP, snd), BF16),
            pltpu.VMEM((snd, snd), BF16),
            pltpu.VMEM((snd, snd), BF16),
            pltpu.VMEM((snd, snd), BF16),
            pltpu.VMEM((snd, HP), BF16),
            pltpu.SemaphoreType.DMA((5,)),
        ],
        # Tiny working set; 48 MiB is safe headroom even on v7x's 64 MiB VMEM.
        compiler_params=pltpu.CompilerParams(vmem_limit_bytes=48 * 1024 * 1024),
    )(x, edge_attr, S0, S1, T1, A_lg, bmatT,
      mlp_w1, mlp_w2, mlp_w3, lin_u_w, lin_v_w, lin_edge_w, w_rr, w_gout, a_blk,
      hvec, svec, scal,
      lb_w1, lb_w2, lb_w3, lb_w4, lb_w5)
    return out[:, :hidden]


# --------------------------- deterministic parameters --------------------------

def init_params(key, in_dim, edge_dim, hidden, n_iter):
    snd = 6 * hidden
    keys = iter(jax.random.split(key, 64))

    def dense(i, o):
        return jax.random.normal(next(keys), (i, o), F32) / jnp.sqrt(jnp.float32(i))

    def bias(d, scale=0.01):
        return jax.random.normal(next(keys), (1, d), F32) * scale

    ones = lambda d: jnp.ones((1, d), F32)
    zeros = lambda d: jnp.zeros((1, d), F32)
    prelu = lambda: jnp.full((), 0.25, F32)

    p = {}
    # DrugEncoder.mlp
    p["mlp_w1"], p["mlp_b1"], p["mlp_p1"] = dense(in_dim, hidden), bias(hidden), prelu()
    p["mlp_w2"], p["mlp_b2"] = dense(hidden, hidden), bias(hidden)
    p["mlp_g1"], p["mlp_be1"], p["mlp_p2"] = ones(hidden), zeros(hidden), prelu()
    p["mlp_w3"], p["mlp_b3"] = dense(hidden, hidden), bias(hidden)
    p["mlp_g2"], p["mlp_be2"] = ones(hidden), zeros(hidden)

    # DMPNN
    p["lin_u_w"] = dense(hidden, hidden)
    p["lin_v_w"] = dense(hidden, hidden)
    p["lin_edge_w"] = dense(edge_dim, hidden)
    # SAGPooling's internal GraphConv(hidden -> 1): lin_rel (with bias) + lin_root
    p["w_rel"] = dense(hidden, 1)
    p["b_rel"] = jax.random.normal(next(keys), (), F32) * 0.01
    p["w_root"] = dense(hidden, 1)
    p["w_gout"], p["b_gout"] = dense(hidden, hidden), bias(hidden)
    stdv = (6.0 / (hidden + n_iter)) ** 0.5
    p["a"] = jax.random.uniform(next(keys), (hidden, n_iter), F32, -stdv, stdv)
    p["a_bias"] = jnp.zeros((n_iter,), F32)

    # LinearBlock
    p["lb_g1"], p["lb_be1"] = ones(hidden), zeros(hidden)
    p["lb_w1"], p["lb_b1"] = dense(hidden, snd), bias(snd)
    for i in (2, 3, 4):
        p[f"lb_g{i}"], p[f"lb_be{i}"], p[f"lb_p{i}"] = ones(snd), zeros(snd), prelu()
        p[f"lb_w{i}"], p[f"lb_b{i}"] = dense(snd, snd), bias(snd)
    p["lb_g5"], p["lb_be5"], p["lb_p5"] = ones(snd), zeros(snd), prelu()
    p["lb_w5"], p["lb_b5"] = dense(snd, hidden), bias(hidden)
    return p


# ----------------------------------- main --------------------------------------

if __name__ == "__main__":
    B = 2                      # graphs in the batch
    npg = 8                    # nodes per graph
    N = B * npg                # 16 nodes
    in_dim, edge_in_dim, hidden, n_iter = 16, 8, 64, 4

    # Deterministic topology: per graph, a ring (i -> i+1) plus chords (i -> i+3).
    src_l, dst_l, eb_l = [], [], []
    for g in range(B):
        o = g * npg
        for i in range(npg):
            src_l += [o + i, o + i]
            dst_l += [o + (i + 1) % npg, o + (i + 3) % npg]
            eb_l += [g, g]
    src = jnp.asarray(src_l, jnp.int32)
    dst = jnp.asarray(dst_l, jnp.int32)
    edge_batch = jnp.asarray(eb_l, jnp.int32)
    E = int(src.shape[0])                                    # 32 directed edges

    # Line graph: edge a -> edge b iff dst(a) == src(b) and src(a) != dst(b).
    conn = (dst[:, None] == src[None, :]) & (src[:, None] != dst[None, :])
    lg_src, lg_dst = jnp.nonzero(conn)

    # Dense 0/1 incidence matrices (exact in bf16) for the MXU; the edge->graph
    # one-hot stays f32 because it is only used for exact VPU selects/sums.
    A_lg = jnp.zeros((E, E), F32).at[lg_dst, lg_src].add(1.0).astype(BF16)
    S0 = jax.nn.one_hot(src, N, dtype=BF16)                  # [E, N] gather src
    S1 = jax.nn.one_hot(dst, N, dtype=BF16)                  # [E, N] gather dst
    T1 = S1.T                                                # [N, E] scatter->dst
    bmatT = jax.nn.one_hot(edge_batch, B, dtype=F32)         # [E, B] f32

    key = jax.random.PRNGKey(0)
    kx, ke, kp = jax.random.split(key, 3)
    x = jax.random.normal(kx, (N, in_dim), F32)
    edge_attr = jax.random.normal(ke, (E, edge_in_dim), F32)
    params = init_params(kp, in_dim, edge_in_dim, hidden, n_iter)

    fwd = jax.jit(functools.partial(drug_encoder_forward, hidden=hidden, n_iter=n_iter))
    out = fwd(params, x, edge_attr, S0, S1, T1, A_lg, bmatT)
    out = jax.block_until_ready(out)

    assert out.shape == (N, hidden), out.shape
    assert bool(jnp.all(jnp.isfinite(out)))
    print("KERNEL_OK")
</pallas_src>

<mosaic_0001>
module attributes {stable_mosaic.version = 11 : i64} {
  func.func @drug_encoder_kernel(%arg0: memref<16x16xf32, #tpu.memory_space<vmem>>, %arg1: memref<32x8xf32, #tpu.memory_space<vmem>>, %arg2: memref<32x16xbf16, #tpu.memory_space<vmem>>, %arg3: memref<32x16xbf16, #tpu.memory_space<vmem>>, %arg4: memref<16x32xbf16, #tpu.memory_space<vmem>>, %arg5: memref<32x32xbf16, #tpu.memory_space<vmem>>, %arg6: memref<32x2xf32, #tpu.memory_space<vmem>>, %arg7: memref<16x128xbf16, #tpu.memory_space<vmem>>, %arg8: memref<128x128xbf16, #tpu.memory_space<vmem>>, %arg9: memref<128x128xbf16, #tpu.memory_space<vmem>>, %arg10: memref<128x128xbf16, #tpu.memory_space<vmem>>, %arg11: memref<128x128xbf16, #tpu.memory_space<vmem>>, %arg12: memref<8x128xbf16, #tpu.memory_space<vmem>>, %arg13: memref<128x2xbf16, #tpu.memory_space<vmem>>, %arg14: memref<128x128xbf16, #tpu.memory_space<vmem>>, %arg15: memref<512x4xbf16, #tpu.memory_space<vmem>>, %arg16: memref<11x128xf32, #tpu.memory_space<vmem>>, %arg17: memref<12x384xf32, #tpu.memory_space<vmem>>, %arg18: memref<11xf32, #tpu.memory_space<smem>>, %arg19: memref<128x384xbf16, #tpu.memory_space<any>>, %arg20: memref<384x384xbf16, #tpu.memory_space<any>>, %arg21: memref<384x384xbf16, #tpu.memory_space<any>>, %arg22: memref<384x384xbf16, #tpu.memory_space<any>>, %arg23: memref<384x128xbf16, #tpu.memory_space<any>>, %arg24: memref<16x128xf32, #tpu.memory_space<vmem>>, %arg25: memref<128x384xbf16, #tpu.memory_space<vmem>>, %arg26: memref<384x384xbf16, #tpu.memory_space<vmem>>, %arg27: memref<384x384xbf16, #tpu.memory_space<vmem>>, %arg28: memref<384x384xbf16, #tpu.memory_space<vmem>>, %arg29: memref<384x128xbf16, #tpu.memory_space<vmem>>, %arg30: memref<5x!tpu.dma_semaphore, #tpu.memory_space<semaphore_mem>>) attributes {dimension_semantics = [], scalar_prefetch = 0 : i64, scratch_operands = 6 : i64, tpu.core_type = #tpu.core_type<tc>} {
    %c0 = arith.constant 0 : index
    %0 = memref.load %arg18[%c0] : memref<11xf32, #tpu.memory_space<smem>>
    %c1 = arith.constant 1 : index
    %1 = memref.load %arg18[%c1] : memref<11xf32, #tpu.memory_space<smem>>
    %c2 = arith.constant 2 : index
    %2 = memref.load %arg18[%c2] : memref<11xf32, #tpu.memory_space<smem>>
    %c3 = arith.constant 3 : index
    %3 = memref.load %arg18[%c3] : memref<11xf32, #tpu.memory_space<smem>>
    %c4 = arith.constant 4 : index
    %4 = memref.load %arg18[%c4] : memref<11xf32, #tpu.memory_space<smem>>
    %c5 = arith.constant 5 : index
    %5 = memref.load %arg18[%c5] : memref<11xf32, #tpu.memory_space<smem>>
    %c6 = arith.constant 6 : index
    %6 = memref.load %arg18[%c6] : memref<11xf32, #tpu.memory_space<smem>>
    %c0_i32 = arith.constant 0 : i32
    %7 = tpu.memref_slice %arg30[%c0_i32] : memref<5x!tpu.dma_semaphore, #tpu.memory_space<semaphore_mem>> -> memref<1x!tpu.dma_semaphore, #tpu.memory_space<semaphore_mem>>
    %8 = tpu.memref_squeeze %7 : memref<1x!tpu.dma_semaphore, #tpu.memory_space<semaphore_mem>> -> memref<!tpu.dma_semaphore, #tpu.memory_space<semaphore_mem>>
    tpu.enqueue_dma source(%arg19 : memref<128x384xbf16, #tpu.memory_space<any>>) target(%arg25 : memref<128x384xbf16, #tpu.memory_space<vmem>>) target_semaphore(%8 : memref<!tpu.dma_semaphore, #tpu.memory_space<semaphore_mem>>)
    %c1_i32 = arith.constant 1 : i32
    %9 = tpu.memref_slice %arg30[%c1_i32] : memref<5x!tpu.dma_semaphore, #tpu.memory_space<semaphore_mem>> -> memref<1x!tpu.dma_semaphore, #tpu.memory_space<semaphore_mem>>
    %10 = tpu.memref_squeeze %9 : memref<1x!tpu.dma_semaphore, #tpu.memory_space<semaphore_mem>> -> memref<!tpu.dma_semaphore, #tpu.memory_space<semaphore_mem>>
    tpu.enqueue_dma source(%arg20 : memref<384x384xbf16, #tpu.memory_space<any>>) target(%arg26 : memref<384x384xbf16, #tpu.memory_space<vmem>>) target_semaphore(%10 : memref<!tpu.dma_semaphore, #tpu.memory_space<semaphore_mem>>)
    %c2_i32 = arith.constant 2 : i32
    %11 = tpu.memref_slice %arg30[%c2_i32] : memref<5x!tpu.dma_semaphore, #tpu.memory_space<semaphore_mem>> -> memref<1x!tpu.dma_semaphore, #tpu.memory_space<semaphore_mem>>
    %12 = tpu.memref_squeeze %11 : memref<1x!tpu.dma_semaphore, #tpu.memory_space<semaphore_mem>> -> memref<!tpu.dma_semaphore, #tpu.memory_space<semaphore_mem>>
    tpu.enqueue_dma source(%arg21 : memref<384x384xbf16, #tpu.memory_space<any>>) target(%arg27 : memref<384x384xbf16, #tpu.memory_space<vmem>>) target_semaphore(%12 : memref<!tpu.dma_semaphore, #tpu.memory_space<semaphore_mem>>)
    %c3_i32 = arith.constant 3 : i32
    %13 = tpu.memref_slice %arg30[%c3_i32] : memref<5x!tpu.dma_semaphore, #tpu.memory_space<semaphore_mem>> -> memref<1x!tpu.dma_semaphore, #tpu.memory_space<semaphore_mem>>
    %14 = tpu.memref_squeeze %13 : memref<1x!tpu.dma_semaphore, #tpu.memory_space<semaphore_mem>> -> memref<!tpu.dma_semaphore, #tpu.memory_space<semaphore_mem>>
    tpu.enqueue_dma source(%arg22 : memref<384x384xbf16, #tpu.memory_space<any>>) target(%arg28 : memref<384x384xbf16, #tpu.memory_space<vmem>>) target_semaphore(%14 : memref<!tpu.dma_semaphore, #tpu.memory_space<semaphore_mem>>)
    %c4_i32 = arith.constant 4 : i32
    %15 = tpu.memref_slice %arg30[%c4_i32] : memref<5x!tpu.dma_semaphore, #tpu.memory_space<semaphore_mem>> -> memref<1x!tpu.dma_semaphore, #tpu.memory_space<semaphore_mem>>
    %16 = tpu.memref_squeeze %15 : memref<1x!tpu.dma_semaphore, #tpu.memory_space<semaphore_mem>> -> memref<!tpu.dma_semaphore, #tpu.memory_space<semaphore_mem>>
    tpu.enqueue_dma source(%arg23 : memref<384x128xbf16, #tpu.memory_space<any>>) target(%arg29 : memref<384x128xbf16, #tpu.memory_space<vmem>>) target_semaphore(%16 : memref<!tpu.dma_semaphore, #tpu.memory_space<semaphore_mem>>)
    %c0_0 = arith.constant 0 : index
    %c0_1 = arith.constant 0 : index
    %17 = vector.load %arg16[%c0_0, %c0_1] : memref<11x128xf32, #tpu.memory_space<vmem>>, vector<11x128xf32>
    %c0_2 = arith.constant 0 : index
    %c0_3 = arith.constant 0 : index
    %18 = vector.load %arg17[%c0_2, %c0_3] : memref<12x384xf32, #tpu.memory_space<vmem>>, vector<12x384xf32>
    %c0_4 = arith.constant 0 : index
    %c0_5 = arith.constant 0 : index
    %19 = vector.load %arg0[%c0_4, %c0_5] : memref<16x16xf32, #tpu.memory_space<vmem>>, vector<16x16xf32>
    %20 = arith.truncf %19 : vector<16x16xf32> to vector<16x16xbf16>
    %c0_6 = arith.constant 0 : index
    %c0_7 = arith.constant 0 : index
    %21 = vector.load %arg7[%c0_6, %c0_7] : memref<16x128xbf16, #tpu.memory_space<vmem>>, vector<16x128xbf16>
    %cst = arith.constant dense<0.000000e+00> : vector<16x128xf32>
    %22 = tpu.matmul %20, %21, %cst {dimension_numbers = #tpu.dot_dimension_numbers<[1], [0], [0], [1], [0, 0, 1, 1], [], []>} : vector<16x16xbf16>, vector<16x128xbf16>, vector<16x128xf32> -> vector<16x128xf32>
    %23 = vector.extract_strided_slice %17 {offsets = [0, 0], sizes = [1, 128], strides = [1, 1]} : vector<11x128xf32> to vector<1x128xf32>
    %24 = vector.broadcast %23 : vector<1x128xf32> to vector<16x128xf32>
    %25 = arith.addf %22, %24 : vector<16x128xf32>
    %cst_8 = arith.constant 0.000000e+00 : f32
    %26 = vector.broadcast %cst_8 : f32 to vector<16x128xf32>
    %27 = arith.cmpf oge, %25, %26 : vector<16x128xf32>
    %28 = vector.broadcast %0 : f32 to vector<16x128xf32>
    %29 = arith.mulf %28, %25 : vector<16x128xf32>
    %30 = arith.select %27, %25, %29 : vector<16x128xi1>, vector<16x128xf32>
    %31 = arith.truncf %30 : vector<16x128xf32> to vector<16x128xbf16>
    %c0_9 = arith.constant 0 : index
    %c0_10 = arith.constant 0 : index
    %32 = vector.load %arg8[%c0_9, %c0_10] : memref<128x128xbf16, #tpu.memory_space<vmem>>, vector<128x128xbf16>
    %cst_11 = arith.constant dense<0.000000e+00> : vector<16x128xf32>
    %33 = tpu.matmul %31, %32, %cst_11 {dimension_numbers = #tpu.dot_dimension_numbers<[1], [0], [0], [1], [0, 0, 1, 1], [], []>} : vector<16x128xbf16>, vector<128x128xbf16>, vector<16x128xf32> -> vector<16x128xf32>
    %34 = vector.extract_strided_slice %17 {offsets = [1, 0], sizes = [1, 128], strides = [1, 1]} : vector<11x128xf32> to vector<1x128xf32>
    %35 = vector.broadcast %34 : vector<1x128xf32> to vector<16x128xf32>
    %36 = arith.addf %33, %35 : vector<16x128xf32>
    %37 = vector.extract_strided_slice %17 {offsets = [2, 0], sizes = [1, 128], strides = [1, 1]} : vector<11x128xf32> to vector<1x128xf32>
    %38 = vector.extract_strided_slice %17 {offsets = [3, 0], sizes = [1, 128], strides = [1, 1]} : vector<11x128xf32> to vector<1x128xf32>
    %cst_12 = arith.constant dense<0.000000e+00> : vector<128xf32>
    %39 = vector.multi_reduction <add>, %36, %cst_12 [0] : vector<16x128xf32> to vector<128xf32>
    %40 = vector.shape_cast %39 : vector<128xf32> to vector<1x128xf32>
    %cst_13 = arith.constant 1.600000e+01 : f32
    %41 = vector.broadcast %cst_13 : f32 to vector<1x128xf32>
    %42 = arith.divf %40, %41 : vector<1x128xf32>
    %43 = vector.broadcast %42 : vector<1x128xf32> to vector<16x128xf32>
    %44 = arith.subf %36, %43 : vector<16x128xf32>
    %45 = arith.mulf %44, %44 : vector<16x128xf32>
    %cst_14 = arith.constant dense<0.000000e+00> : vector<128xf32>
    %46 = vector.multi_reduction <add>, %45, %cst_14 [0] : vector<16x128xf32> to vector<128xf32>
    %47 = vector.shape_cast %46 : vector<128xf32> to vector<1x128xf32>
    %cst_15 = arith.constant 1.600000e+01 : f32
    %48 = vector.broadcast %cst_15 : f32 to vector<1x128xf32>
    %49 = arith.divf %47, %48 : vector<1x128xf32>
    %cst_16 = arith.constant 9.99999974E-6 : f32
    %50 = vector.broadcast %cst_16 : f32 to vector<1x128xf32>
    %51 = arith.addf %49, %50 : vector<1x128xf32>
    %52 = math.rsqrt %51 : vector<1x128xf32>
    %53 = arith.mulf %37, %52 : vector<1x128xf32>
    %54 = vector.broadcast %53 : vector<1x128xf32> to vector<16x128xf32>
    %55 = arith.mulf %36, %54 : vector<16x128xf32>
    %56 = arith.mulf %42, %53 : vector<1x128xf32>
    %57 = arith.subf %38, %56 : vector<1x128xf32>
    %58 = vector.broadcast %57 : vector<1x128xf32> to vector<16x128xf32>
    %59 = arith.addf %55, %58 : vector<16x128xf32>
    %cst_17 = arith.constant 0.000000e+00 : f32
    %60 = vector.broadcast %cst_17 : f32 to vector<16x128xf32>
    %61 = arith.cmpf oge, %59, %60 : vector<16x128xf32>
    %62 = vector.broadcast %1 : f32 to vector<16x128xf32>
    %63 = arith.mulf %62, %59 : vector<16x128xf32>
    %64 = arith.select %61, %59, %63 : vector<16x128xi1>, vector<16x128xf32>
    %65 = arith.truncf %64 : vector<16x128xf32> to vector<16x128xbf16>
    %c0_18 = arith.constant 0 : index
    %c0_19 = arith.constant 0 : index
    %66 = vector.load %arg9[%c0_18, %c0_19] : memref<128x128xbf16, #tpu.memory_space<vmem>>, vector<128x128xbf16>
    %cst_20 = arith.constant dense<0.000000e+00> : vector<16x128xf32>
    %67 = tpu.matmul %65, %66, %cst_20 {dimension_numbers = #tpu.dot_dimension_numbers<[1], [0], [0], [1], [0, 0, 1, 1], [], []>} : vector<16x128xbf16>, vector<128x128xbf16>, vector<16x128xf32> -> vector<16x128xf32>
    %68 = vector.extract_strided_slice %17 {offsets = [4, 0], sizes = [1, 128], strides = [1, 1]} : vector<11x128xf32> to vector<1x128xf32>
    %69 = vector.broadcast %68 : vector<1x128xf32> to vector<16x128xf32>
    %70 = arith.addf %67, %69 : vector<16x128xf32>
    %71 = vector.extract_strided_slice %17 {offsets = [5, 0], sizes = [1, 128], strides = [1, 1]} : vector<11x128xf32> to vector<1x128xf32>
    %72 = vector.extract_strided_slice %17 {offsets = [6, 0], sizes = [1, 128], strides = [1, 1]} : vector<11x128xf32> to vector<1x128xf32>
    %cst_21 = arith.constant dense<0.000000e+00> : vector<128xf32>
    %73 = vector.multi_reduction <add>, %70, %cst_21 [0] : vector<16x128xf32> to vector<128xf32>
    %74 = vector.shape_cast %73 : vector<128xf32> to vector<1x128xf32>
    %cst_22 = arith.constant 1.600000e+01 : f32
    %75 = vector.broadcast %cst_22 : f32 to vector<1x128xf32>
    %76 = arith.divf %74, %75 : vector<1x128xf32>
    %77 = vector.broadcast %76 : vector<1x128xf32> to vector<16x128xf32>
    %78 = arith.subf %70, %77 : vector<16x128xf32>
    %79 = arith.mulf %78, %78 : vector<16x128xf32>
    %cst_23 = arith.constant dense<0.000000e+00> : vector<128xf32>
    %80 = vector.multi_reduction <add>, %79, %cst_23 [0] : vector<16x128xf32> to vector<128xf32>
    %81 = vector.shape_cast %80 : vector<128xf32> to vector<1x128xf32>
    %cst_24 = arith.constant 1.600000e+01 : f32
    %82 = vector.broadcast %cst_24 : f32 to vector<1x128xf32>
    %83 = arith.divf %81, %82 : vector<1x128xf32>
    %cst_25 = arith.constant 9.99999974E-6 : f32
    %84 = vector.broadcast %cst_25 : f32 to vector<1x128xf32>
    %85 = arith.addf %83, %84 : vector<1x128xf32>
    %86 = math.rsqrt %85 : vector<1x128xf32>
    %87 = arith.mulf %71, %86 : vector<1x128xf32>
    %88 = vector.broadcast %87 : vector<1x128xf32> to vector<16x128xf32>
    %89 = arith.mulf %70, %88 : vector<16x128xf32>
    %90 = arith.mulf %76, %87 : vector<1x128xf32>
    %91 = arith.subf %72, %90 : vector<1x128xf32>
    %92 = vector.broadcast %91 : vector<1x128xf32> to vector<16x128xf32>
    %93 = arith.addf %89, %92 : vector<16x128xf32>
    %94 = arith.truncf %93 : vector<16x128xf32> to vector<16x128xbf16>
    %c0_26 = arith.constant 0 : index
    %c0_27 = arith.constant 0 : index
    %95 = vector.load %arg10[%c0_26, %c0_27] : memref<128x128xbf16, #tpu.memory_space<vmem>>, vector<128x128xbf16>
    %cst_28 = arith.constant dense<0.000000e+00> : vector<16x128xf32>
    %96 = tpu.matmul %94, %95, %cst_28 {dimension_numbers = #tpu.dot_dimension_numbers<[1], [0], [0], [1], [0, 0, 1, 1], [], []>} : vector<16x128xbf16>, vector<128x128xbf16>, vector<16x128xf32> -> vector<16x128xf32>
    %c0_29 = arith.constant 0 : index
    %c0_30 = arith.constant 0 : index
    %97 = vector.load %arg11[%c0_29, %c0_30] : memref<128x128xbf16, #tpu.memory_space<vmem>>, vector<128x128xbf16>
    %cst_31 = arith.constant dense<0.000000e+00> : vector<16x128xf32>
    %98 = tpu.matmul %94, %97, %cst_31 {dimension_numbers = #tpu.dot_dimension_numbers<[1], [0], [0], [1], [0, 0, 1, 1], [], []>} : vector<16x128xbf16>, vector<128x128xbf16>, vector<16x128xf32> -> vector<16x128xf32>
    %c0_32 = arith.constant 0 : index
    %c0_33 = arith.constant 0 : index
    %99 = vector.load %arg1[%c0_32, %c0_33] : memref<32x8xf32, #tpu.memory_space<vmem>>, vector<32x8xf32>
    %100 = arith.truncf %99 : vector<32x8xf32> to vector<32x8xbf16>
    %c0_34 = arith.constant 0 : index
    %c0_35 = arith.constant 0 : index
    %101 = vector.load %arg12[%c0_34, %c0_35] : memref<8x128xbf16, #tpu.memory_space<vmem>>, vector<8x128xbf16>
    %cst_36 = arith.constant dense<0.000000e+00> : vector<32x128xf32>
    %102 = tpu.matmul %100, %101, %cst_36 {dimension_numbers = #tpu.dot_dimension_numbers<[1], [0], [0], [1], [0, 0, 1, 1], [], []>} : vector<32x8xbf16>, vector<8x128xbf16>, vector<32x128xf32> -> vector<32x128xf32>
    %c0_37 = arith.constant 0 : index
    %c0_38 = arith.constant 0 : index
    %103 = vector.load %arg2[%c0_37, %c0_38] : memref<32x16xbf16, #tpu.memory_space<vmem>>, vector<32x16xbf16>
    %104 = arith.truncf %96 : vector<16x128xf32> to vector<16x128xbf16>
    %cst_39 = arith.constant dense<0.000000e+00> : vector<32x128xf32>
    %105 = tpu.matmul %103, %104, %cst_39 {dimension_numbers = #tpu.dot_dimension_numbers<[1], [0], [0], [1], [0, 0, 1, 1], [], []>} : vector<32x16xbf16>, vector<16x128xbf16>, vector<32x128xf32> -> vector<32x128xf32>
    %c0_40 = arith.constant 0 : index
    %c0_41 = arith.constant 0 : index
    %106 = vector.load %arg3[%c0_40, %c0_41] : memref<32x16xbf16, #tpu.memory_space<vmem>>, vector<32x16xbf16>
    %107 = arith.truncf %98 : vector<16x128xf32> to vector<16x128xbf16>
    %cst_42 = arith.constant dense<0.000000e+00> : vector<32x128xf32>
    %108 = tpu.matmul %106, %107, %cst_42 {dimension_numbers = #tpu.dot_dimension_numbers<[1], [0], [0], [1], [0, 0, 1, 1], [], []>} : vector<32x16xbf16>, vector<16x128xbf16>, vector<32x128xf32> -> vector<32x128xf32>
    %109 = arith.addf %105, %108 : vector<32x128xf32>
    %110 = arith.addf %109, %102 : vector<32x128xf32>
    %cst_43 = arith.constant 3.000000e+00 : f32
    %111 = vector.broadcast %cst_43 : f32 to vector<32x128xf32>
    %112 = arith.divf %110, %111 : vector<32x128xf32>
    %c0_44 = arith.constant 0 : index
    %c0_45 = arith.constant 0 : index
    %113 = vector.load %arg5[%c0_44, %c0_45] : memref<32x32xbf16, #tpu.memory_space<vmem>>, vector<32x32xbf16>
    %c0_46 = arith.constant 0 : index
    %c0_47 = arith.constant 0 : index
    %114 = vector.load %arg13[%c0_46, %c0_47] : memref<128x2xbf16, #tpu.memory_space<vmem>>, vector<128x2xbf16>
    %c0_48 = arith.constant 0 : index
    %c0_49 = arith.constant 0 : index
    %115 = vector.load %arg14[%c0_48, %c0_49] : memref<128x128xbf16, #tpu.memory_space<vmem>>, vector<128x128xbf16>
    %116 = vector.extract_strided_slice %17 {offsets = [7, 0], sizes = [1, 128], strides = [1, 1]} : vector<11x128xf32> to vector<1x128xf32>
    %c0_50 = arith.constant 0 : index
    %c0_51 = arith.constant 0 : index
    %117 = vector.load %arg6[%c0_50, %c0_51] : memref<32x2xf32, #tpu.memory_space<vmem>>, vector<32x2xf32>
    %118 = arith.truncf %112 : vector<32x128xf32> to vector<32x128xbf16>
    %cst_52 = arith.constant dense<0.000000e+00> : vector<32x128xf32>
    %119 = tpu.matmul %113, %118, %cst_52 {dimension_numbers = #tpu.dot_dimension_numbers<[1], [0], [0], [1], [0, 0, 1, 1], [], []>} : vector<32x32xbf16>, vector<32x128xbf16>, vector<32x128xf32> -> vector<32x128xf32>
    %120 = arith.addf %112, %119 : vector<32x128xf32>
    %121 = arith.truncf %120 : vector<32x128xf32> to vector<32x128xbf16>
    %cst_53 = arith.constant dense<0.000000e+00> : vector<32x2xf32>
    %122 = tpu.matmul %121, %114, %cst_53 {dimension_numbers = #tpu.dot_dimension_numbers<[1], [0], [0], [1], [0, 0, 1, 1], [], []>} : vector<32x128xbf16>, vector<128x2xbf16>, vector<32x2xf32> -> vector<32x2xf32>
    %123 = arith.truncf %122 : vector<32x2xf32> to vector<32x2xbf16>
    %cst_54 = arith.constant dense<0.000000e+00> : vector<32x2xf32>
    %124 = tpu.matmul %113, %123, %cst_54 {dimension_numbers = #tpu.dot_dimension_numbers<[1], [0], [0], [1], [0, 0, 1, 1], [], []>} : vector<32x32xbf16>, vector<32x2xbf16>, vector<32x2xf32> -> vector<32x2xf32>
    %125 = vector.extract_strided_slice %124 {offsets = [0, 0], sizes = [32, 1], strides = [1, 1]} : vector<32x2xf32> to vector<32x1xf32>
    %126 = vector.extract_strided_slice %122 {offsets = [0, 1], sizes = [32, 1], strides = [1, 1]} : vector<32x2xf32> to vector<32x1xf32>
    %127 = arith.addf %125, %126 : vector<32x1xf32>
    %128 = vector.broadcast %2 : f32 to vector<32x1xf32>
    %129 = arith.addf %127, %128 : vector<32x1xf32>
    %cst_55 = arith.constant 0.000000e+00 : f32
    %130 = vector.broadcast %cst_55 : f32 to vector<32x2xf32>
    %131 = arith.cmpf ogt, %117, %130 : vector<32x2xf32>
    %cst_56 = arith.constant -1.000000e+30 : f32
    %132 = vector.shape_cast %129 : vector<32x1xf32> to vector<32x1xf32>
    %133 = vector.broadcast %132 : vector<32x1xf32> to vector<32x2xf32>
    %134 = vector.broadcast %cst_56 : f32 to vector<32x2xf32>
    %135 = arith.select %131, %133, %134 : vector<32x2xi1>, vector<32x2xf32>
    %cst_57 = arith.constant dense<0xFF800000> : vector<2xf32>
    %136 = vector.multi_reduction <maximumf>, %135, %cst_57 [0] : vector<32x2xf32> to vector<2xf32>
    %137 = vector.shape_cast %136 : vector<2xf32> to vector<1x2xf32>
    %138 = vector.broadcast %137 : vector<1x2xf32> to vector<32x2xf32>
    %139 = arith.mulf %117, %138 : vector<32x2xf32>
    %cst_58 = arith.constant dense<0.000000e+00> : vector<32xf32>
    %140 = vector.multi_reduction <add>, %139, %cst_58 [1] : vector<32x2xf32> to vector<32xf32>
    %141 = vector.shape_cast %140 : vector<32xf32> to vector<32x1xf32>
    %142 = arith.subf %129, %141 : vector<32x1xf32>
    %143 = math.exp %142 : vector<32x1xf32>
    %144 = vector.broadcast %143 : vector<32x1xf32> to vector<32x2xf32>
    %145 = arith.mulf %117, %144 : vector<32x2xf32>
    %cst_59 = arith.constant dense<0.000000e+00> : vector<2xf32>
    %146 = vector.multi_reduction <add>, %145, %cst_59 [0] : vector<32x2xf32> to vector<2xf32>
    %147 = vector.shape_cast %146 : vector<2xf32> to vector<1x2xf32>
    %148 = vector.broadcast %147 : vector<1x2xf32> to vector<32x2xf32>
    %149 = arith.mulf %117, %148 : vector<32x2xf32>
    %cst_60 = arith.constant dense<0.000000e+00> : vector<32xf32>
    %150 = vector.multi_reduction <add>, %149, %cst_60 [1] : vector<32x2xf32> to vector<32xf32>
    %151 = vector.shape_cast %150 : vector<32xf32> to vector<32x1xf32>
    %cst_61 = arith.constant 1.000000e-16 : f32
    %152 = vector.broadcast %cst_61 : f32 to vector<32x1xf32>
    %153 = arith.addf %151, %152 : vector<32x1xf32>
    %154 = arith.divf %143, %153 : vector<32x1xf32>
    %155 = vector.broadcast %154 : vector<32x1xf32> to vector<32x128xf32>
    %156 = arith.mulf %155, %120 : vector<32x128xf32>
    %157 = vector.extract_strided_slice %117 {offsets = [0, 0], sizes = [32, 1], strides = [1, 1]} : vector<32x2xf32> to vector<32x1xf32>
    %158 = vector.broadcast %157 : vector<32x1xf32> to vector<32x128xf32>
    %159 = arith.mulf %158, %156 : vector<32x128xf32>
    %cst_62 = arith.constant dense<0.000000e+00> : vector<128xf32>
    %160 = vector.multi_reduction <add>, %159, %cst_62 [0] : vector<32x128xf32> to vector<128xf32>
    %161 = vector.shape_cast %160 : vector<128xf32> to vector<1x128xf32>
    %162 = vector.extract_strided_slice %117 {offsets = [0, 1], sizes = [32, 1], strides = [1, 1]} : vector<32x2xf32> to vector<32x1xf32>
    %163 = vector.broadcast %162 : vector<32x1xf32> to vector<32x128xf32>
    %164 = arith.mulf %163, %156 : vector<32x128xf32>
    %cst_63 = arith.constant dense<0.000000e+00> : vector<128xf32>
    %165 = vector.multi_reduction <add>, %164, %cst_63 [0] : vector<32x128xf32> to vector<128xf32>
    %166 = vector.shape_cast %165 : vector<128xf32> to vector<1x128xf32>
    %167 = tpu.concatenate %161, %166 in 0 : vector<1x128xf32>, vector<1x128xf32> -> vector<2x128xf32>
    %168 = arith.truncf %167 : vector<2x128xf32> to vector<2x128xbf16>
    %cst_64 = arith.constant dense<0.000000e+00> : vector<2x128xf32>
    %169 = tpu.matmul %168, %115, %cst_64 {dimension_numbers = #tpu.dot_dimension_numbers<[1], [0], [0], [1], [0, 0, 1, 1], [], []>} : vector<2x128xbf16>, vector<128x128xbf16>, vector<2x128xf32> -> vector<2x128xf32>
    %170 = vector.broadcast %116 : vector<1x128xf32> to vector<2x128xf32>
    %171 = arith.addf %169, %170 : vector<2x128xf32>
    %172 = math.tanh %171 : vector<2x128xf32>
    %cst_65 = arith.constant dense<0.000000e+00> : vector<32x128xf32>
    %173 = tpu.matmul %113, %121, %cst_65 {dimension_numbers = #tpu.dot_dimension_numbers<[1], [0], [0], [1], [0, 0, 1, 1], [], []>} : vector<32x32xbf16>, vector<32x128xbf16>, vector<32x128xf32> -> vector<32x128xf32>
    %174 = arith.addf %112, %173 : vector<32x128xf32>
    %175 = arith.truncf %174 : vector<32x128xf32> to vector<32x128xbf16>
    %cst_66 = arith.constant dense<0.000000e+00> : vector<32x2xf32>
    %176 = tpu.matmul %175, %114, %cst_66 {dimension_numbers = #tpu.dot_dimension_numbers<[1], [0], [0], [1], [0, 0, 1, 1], [], []>} : vector<32x128xbf16>, vector<128x2xbf16>, vector<32x2xf32> -> vector<32x2xf32>
    %177 = arith.truncf %176 : vector<32x2xf32> to vector<32x2xbf16>
    %cst_67 = arith.constant dense<0.000000e+00> : vector<32x2xf32>
    %178 = tpu.matmul %113, %177, %cst_67 {dimension_numbers = #tpu.dot_dimension_numbers<[1], [0], [0], [1], [0, 0, 1, 1], [], []>} : vector<32x32xbf16>, vector<32x2xbf16>, vector<32x2xf32> -> vector<32x2xf32>
    %179 = vector.extract_strided_slice %178 {offsets = [0, 0], sizes = [32, 1], strides = [1, 1]} : vector<32x2xf32> to vector<32x1xf32>
    %180 = vector.extract_strided_slice %176 {offsets = [0, 1], sizes = [32, 1], strides = [1, 1]} : vector<32x2xf32> to vector<32x1xf32>
    %181 = arith.addf %179, %180 : vector<32x1xf32>
    %182 = vector.broadcast %2 : f32 to vector<32x1xf32>
    %183 = arith.addf %181, %182 : vector<32x1xf32>
    %cst_68 = arith.constant 0.000000e+00 : f32
    %184 = vector.broadcast %cst_68 : f32 to vector<32x2xf32>
    %185 = arith.cmpf ogt, %117, %184 : vector<32x2xf32>
    %cst_69 = arith.constant -1.000000e+30 : f32
    %186 = vector.shape_cast %183 : vector<32x1xf32> to vector<32x1xf32>
    %187 = vector.broadcast %186 : vector<32x1xf32> to vector<32x2xf32>
    %188 = vector.broadcast %cst_69 : f32 to vector<32x2xf32>
    %189 = arith.select %185, %187, %188 : vector<32x2xi1>, vector<32x2xf32>
    %cst_70 = arith.constant dense<0xFF800000> : vector<2xf32>
    %190 = vector.multi_reduction <maximumf>, %189, %cst_70 [0] : vector<32x2xf32> to vector<2xf32>
    %191 = vector.shape_cast %190 : vector<2xf32> to vector<1x2xf32>
    %192 = vector.broadcast %191 : vector<1x2xf32> to vector<32x2xf32>
    %193 = arith.mulf %117, %192 : vector<32x2xf32>
    %cst_71 = arith.constant dense<0.000000e+00> : vector<32xf32>
    %194 = vector.multi_reduction <add>, %193, %cst_71 [1] : vector<32x2xf32> to vector<32xf32>
    %195 = vector.shape_cast %194 : vector<32xf32> to vector<32x1xf32>
    %196 = arith.subf %183, %195 : vector<32x1xf32>
    %197 = math.exp %196 : vector<32x1xf32>
    %198 = vector.broadcast %197 : vector<32x1xf32> to vector<32x2xf32>
    %199 = arith.mulf %117, %198 : vector<32x2xf32>
    %cst_72 = arith.constant dense<0.000000e+00> : vector<2xf32>
    %200 = vector.multi_reduction <add>, %199, %cst_72 [0] : vector<32x2xf32> to vector<2xf32>
    %201 = vector.shape_cast %200 : vector<2xf32> to vector<1x2xf32>
    %202 = vector.broadcast %201 : vector<1x2xf32> to vector<32x2xf32>
    %203 = arith.mulf %117, %202 : vector<32x2xf32>
    %cst_73 = arith.constant dense<0.000000e+00> : vector<32xf32>
    %204 = vector.multi_reduction <add>, %203, %cst_73 [1] : vector<32x2xf32> to vector<32xf32>
    %205 = vector.shape_cast %204 : vector<32xf32> to vector<32x1xf32>
    %cst_74 = arith.constant 1.000000e-16 : f32
    %206 = vector.broadcast %cst_74 : f32 to vector<32x1xf32>
    %207 = arith.addf %205, %206 : vector<32x1xf32>
    %208 = arith.divf %197, %207 : vector<32x1xf32>
    %209 = vector.broadcast %208 : vector<32x1xf32> to vector<32x128xf32>
    %210 = arith.mulf %209, %174 : vector<32x128xf32>
    %211 = vector.extract_strided_slice %117 {offsets = [0, 0], sizes = [32, 1], strides = [1, 1]} : vector<32x2xf32> to vector<32x1xf32>
    %212 = vector.broadcast %211 : vector<32x1xf32> to vector<32x128xf32>
    %213 = arith.mulf %212, %210 : vector<32x128xf32>
    %cst_75 = arith.constant dense<0.000000e+00> : vector<128xf32>
    %214 = vector.multi_reduction <add>, %213, %cst_75 [0] : vector<32x128xf32> to vector<128xf32>
    %215 = vector.shape_cast %214 : vector<128xf32> to vector<1x128xf32>
    %216 = vector.extract_strided_slice %117 {offsets = [0, 1], sizes = [32, 1], strides = [1, 1]} : vector<32x2xf32> to vector<32x1xf32>
    %217 = vector.broadcast %216 : vector<32x1xf32> to vector<32x128xf32>
    %218 = arith.mulf %217, %210 : vector<32x128xf32>
    %cst_76 = arith.constant dense<0.000000e+00> : vector<128xf32>
    %219 = vector.multi_reduction <add>, %218, %cst_76 [0] : vector<32x128xf32> to vector<128xf32>
    %220 = vector.shape_cast %219 : vector<128xf32> to vector<1x128xf32>
    %221 = tpu.concatenate %215, %220 in 0 : vector<1x128xf32>, vector<1x128xf32> -> vector<2x128xf32>
    %222 = arith.truncf %221 : vector<2x128xf32> to vector<2x128xbf16>
    %cst_77 = arith.constant dense<0.000000e+00> : vector<2x128xf32>
    %223 = tpu.matmul %222, %115, %cst_77 {dimension_numbers = #tpu.dot_dimension_numbers<[1], [0], [0], [1], [0, 0, 1, 1], [], []>} : vector<2x128xbf16>, vector<128x128xbf16>, vector<2x128xf32> -> vector<2x128xf32>
    %224 = vector.broadcast %116 : vector<1x128xf32> to vector<2x128xf32>
    %225 = arith.addf %223, %224 : vector<2x128xf32>
    %226 = math.tanh %225 : vector<2x128xf32>
    %cst_78 = arith.constant dense<0.000000e+00> : vector<32x128xf32>
    %227 = tpu.matmul %113, %175, %cst_78 {dimension_numbers = #tpu.dot_dimension_numbers<[1], [0], [0], [1], [0, 0, 1, 1], [], []>} : vector<32x32xbf16>, vector<32x128xbf16>, vector<32x128xf32> -> vector<32x128xf32>
    %228 = arith.addf %112, %227 : vector<32x128xf32>
    %229 = arith.truncf %228 : vector<32x128xf32> to vector<32x128xbf16>
    %cst_79 = arith.constant dense<0.000000e+00> : vector<32x2xf32>
    %230 = tpu.matmul %229, %114, %cst_79 {dimension_numbers = #tpu.dot_dimension_numbers<[1], [0], [0], [1], [0, 0, 1, 1], [], []>} : vector<32x128xbf16>, vector<128x2xbf16>, vector<32x2xf32> -> vector<32x2xf32>
    %231 = arith.truncf %230 : vector<32x2xf32> to vector<32x2xbf16>
    %cst_80 = arith.constant dense<0.000000e+00> : vector<32x2xf32>
    %232 = tpu.matmul %113, %231, %cst_80 {dimension_numbers = #tpu.dot_dimension_numbers<[1], [0], [0], [1], [0, 0, 1, 1], [], []>} : vector<32x32xbf16>, vector<32x2xbf16>, vector<32x2xf32> -> vector<32x2xf32>
    %233 = vector.extract_strided_slice %232 {offsets = [0, 0], sizes = [32, 1], strides = [1, 1]} : vector<32x2xf32> to vector<32x1xf32>
    %234 = vector.extract_strided_slice %230 {offsets = [0, 1], sizes = [32, 1], strides = [1, 1]} : vector<32x2xf32> to vector<32x1xf32>
    %235 = arith.addf %233, %234 : vector<32x1xf32>
    %236 = vector.broadcast %2 : f32 to vector<32x1xf32>
    %237 = arith.addf %235, %236 : vector<32x1xf32>
    %cst_81 = arith.constant 0.000000e+00 : f32
    %238 = vector.broadcast %cst_81 : f32 to vector<32x2xf32>
    %239 = arith.cmpf ogt, %117, %238 : vector<32x2xf32>
    %cst_82 = arith.constant -1.000000e+30 : f32
    %240 = vector.shape_cast %237 : vector<32x1xf32> to vector<32x1xf32>
    %241 = vector.broadcast %240 : vector<32x1xf32> to vector<32x2xf32>
    %242 = vector.broadcast %cst_82 : f32 to vector<32x2xf32>
    %243 = arith.select %239, %241, %242 : vector<32x2xi1>, vector<32x2xf32>
    %cst_83 = arith.constant dense<0xFF800000> : vector<2xf32>
    %244 = vector.multi_reduction <maximumf>, %243, %cst_83 [0] : vector<32x2xf32> to vector<2xf32>
    %245 = vector.shape_cast %244 : vector<2xf32> to vector<1x2xf32>
    %246 = vector.broadcast %245 : vector<1x2xf32> to vector<32x2xf32>
    %247 = arith.mulf %117, %246 : vector<32x2xf32>
    %cst_84 = arith.constant dense<0.000000e+00> : vector<32xf32>
    %248 = vector.multi_reduction <add>, %247, %cst_84 [1] : vector<32x2xf32> to vector<32xf32>
    %249 = vector.shape_cast %248 : vector<32xf32> to vector<32x1xf32>
    %250 = arith.subf %237, %249 : vector<32x1xf32>
    %251 = math.exp %250 : vector<32x1xf32>
    %252 = vector.broadcast %251 : vector<32x1xf32> to vector<32x2xf32>
    %253 = arith.mulf %117, %252 : vector<32x2xf32>
    %cst_85 = arith.constant dense<0.000000e+00> : vector<2xf32>
    %254 = vector.multi_reduction <add>, %253, %cst_85 [0] : vector<32x2xf32> to vector<2xf32>
    %255 = vector.shape_cast %254 : vector<2xf32> to vector<1x2xf32>
    %256 = vector.broadcast %255 : vector<1x2xf32> to vector<32x2xf32>
    %257 = arith.mulf %117, %256 : vector<32x2xf32>
    %cst_86 = arith.constant dense<0.000000e+00> : vector<32xf32>
    %258 = vector.multi_reduction <add>, %257, %cst_86 [1] : vector<32x2xf32> to vector<32xf32>
    %259 = vector.shape_cast %258 : vector<32xf32> to vector<32x1xf32>
    %cst_87 = arith.constant 1.000000e-16 : f32
    %260 = vector.broadcast %cst_87 : f32 to vector<32x1xf32>
    %261 = arith.addf %259, %260 : vector<32x1xf32>
    %262 = arith.divf %251, %261 : vector<32x1xf32>
    %263 = vector.broadcast %262 : vector<32x1xf32> to vector<32x128xf32>
    %264 = arith.mulf %263, %228 : vector<32x128xf32>
    %265 = vector.extract_strided_slice %117 {offsets = [0, 0], sizes = [32, 1], strides = [1, 1]} : vector<32x2xf32> to vector<32x1xf32>
    %266 = vector.broadcast %265 : vector<32x1xf32> to vector<32x128xf32>
    %267 = arith.mulf %266, %264 : vector<32x128xf32>
    %cst_88 = arith.constant dense<0.000000e+00> : vector<128xf32>
    %268 = vector.multi_reduction <add>, %267, %cst_88 [0] : vector<32x128xf32> to vector<128xf32>
    %269 = vector.shape_cast %268 : vector<128xf32> to vector<1x128xf32>
    %270 = vector.extract_strided_slice %117 {offsets = [0, 1], sizes = [32, 1], strides = [1, 1]} : vector<32x2xf32> to vector<32x1xf32>
    %271 = vector.broadcast %270 : vector<32x1xf32> to vector<32x128xf32>
    %272 = arith.mulf %271, %264 : vector<32x128xf32>
    %cst_89 = arith.constant dense<0.000000e+00> : vector<128xf32>
    %273 = vector.multi_reduction <add>, %272, %cst_89 [0] : vector<32x128xf32> to vector<128xf32>
    %274 = vector.shape_cast %273 : vector<128xf32> to vector<1x128xf32>
    %275 = tpu.concatenate %269, %274 in 0 : vector<1x128xf32>, vector<1x128xf32> -> vector<2x128xf32>
    %276 = arith.truncf %275 : vector<2x128xf32> to vector<2x128xbf16>
    %cst_90 = arith.constant dense<0.000000e+00> : vector<2x128xf32>
    %277 = tpu.matmul %276, %115, %cst_90 {dimension_numbers = #tpu.dot_dimension_numbers<[1], [0], [0], [1], [0, 0, 1, 1], [], []>} : vector<2x128xbf16>, vector<128x128xbf16>, vector<2x128xf32> -> vector<2x128xf32>
    %278 = vector.broadcast %116 : vector<1x128xf32> to vector<2x128xf32>
    %279 = arith.addf %277, %278 : vector<2x128xf32>
    %280 = math.tanh %279 : vector<2x128xf32>
    %cst_91 = arith.constant dense<0.000000e+00> : vector<32x128xf32>
    %281 = tpu.matmul %113, %229, %cst_91 {dimension_numbers = #tpu.dot_dimension_numbers<[1], [0], [0], [1], [0, 0, 1, 1], [], []>} : vector<32x32xbf16>, vector<32x128xbf16>, vector<32x128xf32> -> vector<32x128xf32>
    %282 = arith.addf %112, %281 : vector<32x128xf32>
    %283 = arith.truncf %282 : vector<32x128xf32> to vector<32x128xbf16>
    %cst_92 = arith.constant dense<0.000000e+00> : vector<32x2xf32>
    %284 = tpu.matmul %283, %114, %cst_92 {dimension_numbers = #tpu.dot_dimension_numbers<[1], [0], [0], [1], [0, 0, 1, 1], [], []>} : vector<32x128xbf16>, vector<128x2xbf16>, vector<32x2xf32> -> vector<32x2xf32>
    %285 = arith.truncf %284 : vector<32x2xf32> to vector<32x2xbf16>
    %cst_93 = arith.constant dense<0.000000e+00> : vector<32x2xf32>
    %286 = tpu.matmul %113, %285, %cst_93 {dimension_numbers = #tpu.dot_dimension_numbers<[1], [0], [0], [1], [0, 0, 1, 1], [], []>} : vector<32x32xbf16>, vector<32x2xbf16>, vector<32x2xf32> -> vector<32x2xf32>
    %287 = vector.extract_strided_slice %286 {offsets = [0, 0], sizes = [32, 1], strides = [1, 1]} : vector<32x2xf32> to vector<32x1xf32>
    %288 = vector.extract_strided_slice %284 {offsets = [0, 1], sizes = [32, 1], strides = [1, 1]} : vector<32x2xf32> to vector<32x1xf32>
    %289 = arith.addf %287, %288 : vector<32x1xf32>
    %290 = vector.broadcast %2 : f32 to vector<32x1xf32>
    %291 = arith.addf %289, %290 : vector<32x1xf32>
    %cst_94 = arith.constant 0.000000e+00 : f32
    %292 = vector.broadcast %cst_94 : f32 to vector<32x2xf32>
    %293 = arith.cmpf ogt, %117, %292 : vector<32x2xf32>
    %cst_95 = arith.constant -1.000000e+30 : f32
    %294 = vector.shape_cast %291 : vector<32x1xf32> to vector<32x1xf32>
    %295 = vector.broadcast %294 : vector<32x1xf32> to vector<32x2xf32>
    %296 = vector.broadcast %cst_95 : f32 to vector<32x2xf32>
    %297 = arith.select %293, %295, %296 : vector<32x2xi1>, vector<32x2xf32>
    %cst_96 = arith.constant dense<0xFF800000> : vector<2xf32>
    %298 = vector.multi_reduction <maximumf>, %297, %cst_96 [0] : vector<32x2xf32> to vector<2xf32>
    %299 = vector.shape_cast %298 : vector<2xf32> to vector<1x2xf32>
    %300 = vector.broadcast %299 : vector<1x2xf32> to vector<32x2xf32>
    %301 = arith.mulf %117, %300 : vector<32x2xf32>
    %cst_97 = arith.constant dense<0.000000e+00> : vector<32xf32>
    %302 = vector.multi_reduction <add>, %301, %cst_97 [1] : vector<32x2xf32> to vector<32xf32>
    %303 = vector.shape_cast %302 : vector<32xf32> to vector<32x1xf32>
    %304 = arith.subf %291, %303 : vector<32x1xf32>
    %305 = math.exp %304 : vector<32x1xf32>
    %306 = vector.broadcast %305 : vector<32x1xf32> to vector<32x2xf32>
    %307 = arith.mulf %117, %306 : vector<32x2xf32>
    %cst_98 = arith.constant dense<0.000000e+00> : vector<2xf32>
    %308 = vector.multi_reduction <add>, %307, %cst_98 [0] : vector<32x2xf32> to vector<2xf32>
    %309 = vector.shape_cast %308 : vector<2xf32> to vector<1x2xf32>
    %310 = vector.broadcast %309 : vector<1x2xf32> to vector<32x2xf32>
    %311 = arith.mulf %117, %310 : vector<32x2xf32>
    %cst_99 = arith.constant dense<0.000000e+00> : vector<32xf32>
    %312 = vector.multi_reduction <add>, %311, %cst_99 [1] : vector<32x2xf32> to vector<32xf32>
    %313 = vector.shape_cast %312 : vector<32xf32> to vector<32x1xf32>
    %cst_100 = arith.constant 1.000000e-16 : f32
    %314 = vector.broadcast %cst_100 : f32 to vector<32x1xf32>
    %315 = arith.addf %313, %314 : vector<32x1xf32>
    %316 = arith.divf %305, %315 : vector<32x1xf32>
    %317 = vector.broadcast %316 : vector<32x1xf32> to vector<32x128xf32>
    %318 = arith.mulf %317, %282 : vector<32x128xf32>
    %319 = vector.extract_strided_slice %117 {offsets = [0, 0], sizes = [32, 1], strides = [1, 1]} : vector<32x2xf32> to vector<32x1xf32>
    %320 = vector.broadcast %319 : vector<32x1xf32> to vector<32x128xf32>
    %321 = arith.mulf %320, %318 : vector<32x128xf32>
    %cst_101 = arith.constant dense<0.000000e+00> : vector<128xf32>
    %322 = vector.multi_reduction <add>, %321, %cst_101 [0] : vector<32x128xf32> to vector<128xf32>
    %323 = vector.shape_cast %322 : vector<128xf32> to vector<1x128xf32>
    %324 = vector.extract_strided_slice %117 {offsets = [0, 1], sizes = [32, 1], strides = [1, 1]} : vector<32x2xf32> to vector<32x1xf32>
    %325 = vector.broadcast %324 : vector<32x1xf32> to vector<32x128xf32>
    %326 = arith.mulf %325, %318 : vector<32x128xf32>
    %cst_102 = arith.constant dense<0.000000e+00> : vector<128xf32>
    %327 = vector.multi_reduction <add>, %326, %cst_102 [0] : vector<32x128xf32> to vector<128xf32>
    %328 = vector.shape_cast %327 : vector<128xf32> to vector<1x128xf32>
    %329 = tpu.concatenate %323, %328 in 0 : vector<1x128xf32>, vector<1x128xf32> -> vector<2x128xf32>
    %330 = arith.truncf %329 : vector<2x128xf32> to vector<2x128xbf16>
    %cst_103 = arith.constant dense<0.000000e+00> : vector<2x128xf32>
    %331 = tpu.matmul %330, %115, %cst_103 {dimension_numbers = #tpu.dot_dimension_numbers<[1], [0], [0], [1], [0, 0, 1, 1], [], []>} : vector<2x128xbf16>, vector<128x128xbf16>, vector<2x128xf32> -> vector<2x128xf32>
    %332 = vector.broadcast %116 : vector<1x128xf32> to vector<2x128xf32>
    %333 = arith.addf %331, %332 : vector<2x128xf32>
    %334 = math.tanh %333 : vector<2x128xf32>
    %335 = tpu.concatenate %172, %226, %280, %334 in 1 : vector<2x128xf32>, vector<2x128xf32>, vector<2x128xf32>, vector<2x128xf32> -> vector<2x512xf32>
    %336 = arith.truncf %335 : vector<2x512xf32> to vector<2x512xbf16>
    %c0_104 = arith.constant 0 : index
    %c0_105 = arith.constant 0 : index
    %337 = vector.load %arg15[%c0_104, %c0_105] : memref<512x4xbf16, #tpu.memory_space<vmem>>, vector<512x4xbf16>
    %cst_106 = arith.constant dense<0.000000e+00> : vector<2x4xf32>
    %338 = tpu.matmul %336, %337, %cst_106 {dimension_numbers = #tpu.dot_dimension_numbers<[1], [0], [0], [1], [0, 0, 1, 1], [], []>} : vector<2x512xbf16>, vector<512x4xbf16>, vector<2x4xf32> -> vector<2x4xf32>
    %339 = tpu.iota {dimensions = array<i32: 1>} : vector<1x4xi32>
    %cst_107 = arith.constant 0.000000e+00 : f32
    %340 = vector.broadcast %cst_107 : f32 to vector<1x4xf32>
    %c0_i32_108 = arith.constant 0 : i32
    %341 = vector.broadcast %c0_i32_108 : i32 to vector<1x4xi32>
    %342 = arith.cmpi eq, %339, %341 : vector<1x4xi32>
    %c7 = arith.constant 7 : index
    %343 = memref.load %arg18[%c7] : memref<11xf32, #tpu.memory_space<smem>>
    %cst_109 = arith.constant 0.000000e+00 : f32
    %344 = vector.broadcast %343 : f32 to vector<1x4xf32>
    %345 = vector.broadcast %cst_109 : f32 to vector<1x4xf32>
    %346 = arith.select %342, %344, %345 : vector<1x4xi1>, vector<1x4xf32>
    %347 = arith.addf %340, %346 : vector<1x4xf32>
    %c1_i32_110 = arith.constant 1 : i32
    %348 = vector.broadcast %c1_i32_110 : i32 to vector<1x4xi32>
    %349 = arith.cmpi eq, %339, %348 : vector<1x4xi32>
    %c8 = arith.constant 8 : index
    %350 = memref.load %arg18[%c8] : memref<11xf32, #tpu.memory_space<smem>>
    %cst_111 = arith.constant 0.000000e+00 : f32
    %351 = vector.broadcast %350 : f32 to vector<1x4xf32>
    %352 = vector.broadcast %cst_111 : f32 to vector<1x4xf32>
    %353 = arith.select %349, %351, %352 : vector<1x4xi1>, vector<1x4xf32>
    %354 = arith.addf %347, %353 : vector<1x4xf32>
    %c2_i32_112 = arith.constant 2 : i32
    %355 = vector.broadcast %c2_i32_112 : i32 to vector<1x4xi32>
    %356 = arith.cmpi eq, %339, %355 : vector<1x4xi32>
    %c9 = arith.constant 9 : index
    %357 = memref.load %arg18[%c9] : memref<11xf32, #tpu.memory_space<smem>>
    %cst_113 = arith.constant 0.000000e+00 : f32
    %358 = vector.broadcast %357 : f32 to vector<1x4xf32>
    %359 = vector.broadcast %cst_113 : f32 to vector<1x4xf32>
    %360 = arith.select %356, %358, %359 : vector<1x4xi1>, vector<1x4xf32>
    %361 = arith.addf %354, %360 : vector<1x4xf32>
    %c3_i32_114 = arith.constant 3 : i32
    %362 = vector.broadcast %c3_i32_114 : i32 to vector<1x4xi32>
    %363 = arith.cmpi eq, %339, %362 : vector<1x4xi32>
    %c10 = arith.constant 10 : index
    %364 = memref.load %arg18[%c10] : memref<11xf32, #tpu.memory_space<smem>>
    %cst_115 = arith.constant 0.000000e+00 : f32
    %365 = vector.broadcast %364 : f32 to vector<1x4xf32>
    %366 = vector.broadcast %cst_115 : f32 to vector<1x4xf32>
    %367 = arith.select %363, %365, %366 : vector<1x4xi1>, vector<1x4xf32>
    %368 = arith.addf %361, %367 : vector<1x4xf32>
    %369 = vector.broadcast %368 : vector<1x4xf32> to vector<2x4xf32>
    %370 = arith.addf %338, %369 : vector<2x4xf32>
    %cst_116 = arith.constant dense<0xFF800000> : vector<2xf32>
    %371 = vector.multi_reduction <maximumf>, %370, %cst_116 [1] : vector<2x4xf32> to vector<2xf32>
    %372 = vector.shape_cast %371 : vector<2xf32> to vector<2x1xf32>
    %373 = vector.broadcast %372 : vector<2x1xf32> to vector<2x4xf32>
    %374 = arith.subf %370, %373 : vector<2x4xf32>
    %375 = math.exp %374 : vector<2x4xf32>
    %cst_117 = arith.constant dense<0.000000e+00> : vector<2xf32>
    %376 = vector.multi_reduction <add>, %375, %cst_117 [1] : vector<2x4xf32> to vector<2xf32>
    %377 = vector.shape_cast %376 : vector<2xf32> to vector<2x1xf32>
    %378 = vector.broadcast %377 : vector<2x1xf32> to vector<2x4xf32>
    %379 = arith.divf %375, %378 : vector<2x4xf32>
    %380 = vector.extract_strided_slice %117 {offsets = [0, 0], sizes = [32, 1], strides = [1, 1]} : vector<32x2xf32> to vector<32x1xf32>
    %381 = vector.extract_strided_slice %379 {offsets = [0, 0], sizes = [1, 4], strides = [1, 1]} : vector<2x4xf32> to vector<1x4xf32>
    %382 = vector.broadcast %380 : vector<32x1xf32> to vector<32x4xf32>
    %383 = vector.broadcast %381 : vector<1x4xf32> to vector<32x4xf32>
    %384 = arith.mulf %382, %383 : vector<32x4xf32>
    %385 = vector.extract_strided_slice %117 {offsets = [0, 1], sizes = [32, 1], strides = [1, 1]} : vector<32x2xf32> to vector<32x1xf32>
    %386 = vector.extract_strided_slice %379 {offsets = [1, 0], sizes = [1, 4], strides = [1, 1]} : vector<2x4xf32> to vector<1x4xf32>
    %387 = vector.broadcast %385 : vector<32x1xf32> to vector<32x4xf32>
    %388 = vector.broadcast %386 : vector<1x4xf32> to vector<32x4xf32>
    %389 = arith.mulf %387, %388 : vector<32x4xf32>
    %390 = arith.addf %384, %389 : vector<32x4xf32>
    %391 = vector.extract_strided_slice %390 {offsets = [0, 0], sizes = [32, 1], strides = [1, 1]} : vector<32x4xf32> to vector<32x1xf32>
    %392 = vector.broadcast %391 : vector<32x1xf32> to vector<32x128xf32>
    %393 = arith.mulf %120, %392 : vector<32x128xf32>
    %394 = vector.extract_strided_slice %390 {offsets = [0, 1], sizes = [32, 1], strides = [1, 1]} : vector<32x4xf32> to vector<32x1xf32>
    %395 = vector.broadcast %394 : vector<32x1xf32> to vector<32x128xf32>
    %396 = arith.mulf %174, %395 : vector<32x128xf32>
    %397 = arith.addf %393, %396 : vector<32x128xf32>
    %398 = vector.extract_strided_slice %390 {offsets = [0, 2], sizes = [32, 1], strides = [1, 1]} : vector<32x4xf32> to vector<32x1xf32>
    %399 = vector.broadcast %398 : vector<32x1xf32> to vector<32x128xf32>
    %400 = arith.mulf %228, %399 : vector<32x128xf32>
    %401 = arith.addf %397, %400 : vector<32x128xf32>
    %402 = vector.extract_strided_slice %390 {offsets = [0, 3], sizes = [32, 1], strides = [1, 1]} : vector<32x4xf32> to vector<32x1xf32>
    %403 = vector.broadcast %402 : vector<32x1xf32> to vector<32x128xf32>
    %404 = arith.mulf %282, %403 : vector<32x128xf32>
    %405 = arith.addf %401, %404 : vector<32x128xf32>
    %c0_118 = arith.constant 0 : index
    %c0_119 = arith.constant 0 : index
    %406 = vector.load %arg4[%c0_118, %c0_119] : memref<16x32xbf16, #tpu.memory_space<vmem>>, vector<16x32xbf16>
    %407 = arith.truncf %405 : vector<32x128xf32> to vector<32x128xbf16>
    %cst_120 = arith.constant dense<0.000000e+00> : vector<16x128xf32>
    %408 = tpu.matmul %406, %407, %cst_120 {dimension_numbers = #tpu.dot_dimension_numbers<[1], [0], [0], [1], [0, 0, 1, 1], [], []>} : vector<16x32xbf16>, vector<32x128xbf16>, vector<16x128xf32> -> vector<16x128xf32>
    %409 = arith.addf %93, %408 : vector<16x128xf32>
    %c0_i32_121 = arith.constant 0 : i32
    %410 = tpu.memref_slice %arg30[%c0_i32_121] : memref<5x!tpu.dma_semaphore, #tpu.memory_space<semaphore_mem>> -> memref<1x!tpu.dma_semaphore, #tpu.memory_space<semaphore_mem>>
    %411 = tpu.memref_squeeze %410 : memref<1x!tpu.dma_semaphore, #tpu.memory_space<semaphore_mem>> -> memref<!tpu.dma_semaphore, #tpu.memory_space<semaphore_mem>>
    tpu.wait_dma2 semaphore(%411 : memref<!tpu.dma_semaphore, #tpu.memory_space<semaphore_mem>>) src(%arg19 : memref<128x384xbf16, #tpu.memory_space<any>>) dst(%arg25 : memref<128x384xbf16, #tpu.memory_space<vmem>>)
    %c1_i32_122 = arith.constant 1 : i32
    %412 = tpu.memref_slice %arg30[%c1_i32_122] : memref<5x!tpu.dma_semaphore, #tpu.memory_space<semaphore_mem>> -> memref<1x!tpu.dma_semaphore, #tpu.memory_space<semaphore_mem>>
    %413 = tpu.memref_squeeze %412 : memref<1x!tpu.dma_semaphore, #tpu.memory_space<semaphore_mem>> -> memref<!tpu.dma_semaphore, #tpu.memory_space<semaphore_mem>>
    tpu.wait_dma2 semaphore(%413 : memref<!tpu.dma_semaphore, #tpu.memory_space<semaphore_mem>>) src(%arg20 : memref<384x384xbf16, #tpu.memory_space<any>>) dst(%arg26 : memref<384x384xbf16, #tpu.memory_space<vmem>>)
    %c2_i32_123 = arith.constant 2 : i32
    %414 = tpu.memref_slice %arg30[%c2_i32_123] : memref<5x!tpu.dma_semaphore, #tpu.memory_space<semaphore_mem>> -> memref<1x!tpu.dma_semaphore, #tpu.memory_space<semaphore_mem>>
    %415 = tpu.memref_squeeze %414 : memref<1x!tpu.dma_semaphore, #tpu.memory_space<semaphore_mem>> -> memref<!tpu.dma_semaphore, #tpu.memory_space<semaphore_mem>>
    tpu.wait_dma2 semaphore(%415 : memref<!tpu.dma_semaphore, #tpu.memory_space<semaphore_mem>>) src(%arg21 : memref<384x384xbf16, #tpu.memory_space<any>>) dst(%arg27 : memref<384x384xbf16, #tpu.memory_space<vmem>>)
    %c3_i32_124 = arith.constant 3 : i32
    %416 = tpu.memref_slice %arg30[%c3_i32_124] : memref<5x!tpu.dma_semaphore, #tpu.memory_space<semaphore_mem>> -> memref<1x!tpu.dma_semaphore, #tpu.memory_space<semaphore_mem>>
    %417 = tpu.memref_squeeze %416 : memref<1x!tpu.dma_semaphore, #tpu.memory_space<semaphore_mem>> -> memref<!tpu.dma_semaphore, #tpu.memory_space<semaphore_mem>>
    tpu.wait_dma2 semaphore(%417 : memref<!tpu.dma_semaphore, #tpu.memory_space<semaphore_mem>>) src(%arg22 : memref<384x384xbf16, #tpu.memory_space<any>>) dst(%arg28 : memref<384x384xbf16, #tpu.memory_space<vmem>>)
    %c4_i32_125 = arith.constant 4 : i32
    %418 = tpu.memref_slice %arg30[%c4_i32_125] : memref<5x!tpu.dma_semaphore, #tpu.memory_space<semaphore_mem>> -> memref<1x!tpu.dma_semaphore, #tpu.memory_space<semaphore_mem>>
    %419 = tpu.memref_squeeze %418 : memref<1x!tpu.dma_semaphore, #tpu.memory_space<semaphore_mem>> -> memref<!tpu.dma_semaphore, #tpu.memory_space<semaphore_mem>>
    tpu.wait_dma2 semaphore(%419 : memref<!tpu.dma_semaphore, #tpu.memory_space<semaphore_mem>>) src(%arg23 : memref<384x128xbf16, #tpu.memory_space<any>>) dst(%arg29 : memref<384x128xbf16, #tpu.memory_space<vmem>>)
    %420 = vector.extract_strided_slice %17 {offsets = [8, 0], sizes = [1, 128], strides = [1, 1]} : vector<11x128xf32> to vector<1x128xf32>
    %421 = vector.extract_strided_slice %17 {offsets = [9, 0], sizes = [1, 128], strides = [1, 1]} : vector<11x128xf32> to vector<1x128xf32>
    %cst_126 = arith.constant dense<0.000000e+00> : vector<128xf32>
    %422 = vector.multi_reduction <add>, %409, %cst_126 [0] : vector<16x128xf32> to vector<128xf32>
    %423 = vector.shape_cast %422 : vector<128xf32> to vector<1x128xf32>
    %cst_127 = arith.constant 1.600000e+01 : f32
    %424 = vector.broadcast %cst_127 : f32 to vector<1x128xf32>
    %425 = arith.divf %423, %424 : vector<1x128xf32>
    %426 = vector.broadcast %425 : vector<1x128xf32> to vector<16x128xf32>
    %427 = arith.subf %409, %426 : vector<16x128xf32>
    %428 = arith.mulf %427, %427 : vector<16x128xf32>
    %cst_128 = arith.constant dense<0.000000e+00> : vector<128xf32>
    %429 = vector.multi_reduction <add>, %428, %cst_128 [0] : vector<16x128xf32> to vector<128xf32>
    %430 = vector.shape_cast %429 : vector<128xf32> to vector<1x128xf32>
    %cst_129 = arith.constant 1.600000e+01 : f32
    %431 = vector.broadcast %cst_129 : f32 to vector<1x128xf32>
    %432 = arith.divf %430, %431 : vector<1x128xf32>
    %cst_130 = arith.constant 9.99999974E-6 : f32
    %433 = vector.broadcast %cst_130 : f32 to vector<1x128xf32>
    %434 = arith.addf %432, %433 : vector<1x128xf32>
    %435 = math.rsqrt %434 : vector<1x128xf32>
    %436 = arith.mulf %420, %435 : vector<1x128xf32>
    %437 = vector.broadcast %436 : vector<1x128xf32> to vector<16x128xf32>
    %438 = arith.mulf %409, %437 : vector<16x128xf32>
    %439 = arith.mulf %425, %436 : vector<1x128xf32>
    %440 = arith.subf %421, %439 : vector<1x128xf32>
    %441 = vector.broadcast %440 : vector<1x128xf32> to vector<16x128xf32>
    %442 = arith.addf %438, %441 : vector<16x128xf32>
    %443 = arith.truncf %442 : vector<16x128xf32> to vector<16x128xbf16>
    %c0_131 = arith.constant 0 : index
    %c0_132 = arith.constant 0 : index
    %444 = vector.load %arg25[%c0_131, %c0_132] : memref<128x384xbf16, #tpu.memory_space<vmem>>, vector<128x384xbf16>
    %cst_133 = arith.constant dense<0.000000e+00> : vector<16x384xf32>
    %445 = tpu.matmul %443, %444, %cst_133 {dimension_numbers = #tpu.dot_dimension_numbers<[1], [0], [0], [1], [0, 0, 1, 1], [], []>} : vector<16x128xbf16>, vector<128x384xbf16>, vector<16x384xf32> -> vector<16x384xf32>
    %446 = vector.extract_strided_slice %18 {offsets = [0, 0], sizes = [1, 384], strides = [1, 1]} : vector<12x384xf32> to vector<1x384xf32>
    %447 = vector.broadcast %446 : vector<1x384xf32> to vector<16x384xf32>
    %448 = arith.addf %445, %447 : vector<16x384xf32>
    %449 = vector.extract_strided_slice %18 {offsets = [1, 0], sizes = [1, 384], strides = [1, 1]} : vector<12x384xf32> to vector<1x384xf32>
    %450 = vector.extract_strided_slice %18 {offsets = [2, 0], sizes = [1, 384], strides = [1, 1]} : vector<12x384xf32> to vector<1x384xf32>
    %cst_134 = arith.constant dense<0.000000e+00> : vector<384xf32>
    %451 = vector.multi_reduction <add>, %448, %cst_134 [0] : vector<16x384xf32> to vector<384xf32>
    %452 = vector.shape_cast %451 : vector<384xf32> to vector<1x384xf32>
    %cst_135 = arith.constant 1.600000e+01 : f32
    %453 = vector.broadcast %cst_135 : f32 to vector<1x384xf32>
    %454 = arith.divf %452, %453 : vector<1x384xf32>
    %455 = vector.broadcast %454 : vector<1x384xf32> to vector<16x384xf32>
    %456 = arith.subf %448, %455 : vector<16x384xf32>
    %457 = arith.mulf %456, %456 : vector<16x384xf32>
    %cst_136 = arith.constant dense<0.000000e+00> : vector<384xf32>
    %458 = vector.multi_reduction <add>, %457, %cst_136 [0] : vector<16x384xf32> to vector<384xf32>
    %459 = vector.shape_cast %458 : vector<384xf32> to vector<1x384xf32>
    %cst_137 = arith.constant 1.600000e+01 : f32
    %460 = vector.broadcast %cst_137 : f32 to vector<1x384xf32>
    %461 = arith.divf %459, %460 : vector<1x384xf32>
    %cst_138 = arith.constant 9.99999974E-6 : f32
    %462 = vector.broadcast %cst_138 : f32 to vector<1x384xf32>
    %463 = arith.addf %461, %462 : vector<1x384xf32>
    %464 = math.rsqrt %463 : vector<1x384xf32>
    %465 = arith.mulf %449, %464 : vector<1x384xf32>
    %466 = vector.broadcast %465 : vector<1x384xf32> to vector<16x384xf32>
    %467 = arith.mulf %448, %466 : vector<16x384xf32>
    %468 = arith.mulf %454, %465 : vector<1x384xf32>
    %469 = arith.subf %450, %468 : vector<1x384xf32>
    %470 = vector.broadcast %469 : vector<1x384xf32> to vector<16x384xf32>
    %471 = arith.addf %467, %470 : vector<16x384xf32>
    %cst_139 = arith.constant 0.000000e+00 : f32
    %472 = vector.broadcast %cst_139 : f32 to vector<16x384xf32>
    %473 = arith.cmpf oge, %471, %472 : vector<16x384xf32>
    %474 = vector.broadcast %3 : f32 to vector<16x384xf32>
    %475 = arith.mulf %474, %471 : vector<16x384xf32>
    %476 = arith.select %473, %471, %475 : vector<16x384xi1>, vector<16x384xf32>
    %477 = arith.truncf %476 : vector<16x384xf32> to vector<16x384xbf16>
    %c0_140 = arith.constant 0 : index
    %c0_141 = arith.constant 0 : index
    %478 = vector.load %arg26[%c0_140, %c0_141] : memref<384x384xbf16, #tpu.memory_space<vmem>>, vector<384x384xbf16>
    %cst_142 = arith.constant dense<0.000000e+00> : vector<16x384xf32>
    %479 = tpu.matmul %477, %478, %cst_142 {dimension_numbers = #tpu.dot_dimension_numbers<[1], [0], [0], [1], [0, 0, 1, 1], [], []>} : vector<16x384xbf16>, vector<384x384xbf16>, vector<16x384xf32> -> vector<16x384xf32>
    %480 = vector.extract_strided_slice %18 {offsets = [3, 0], sizes = [1, 384], strides = [1, 1]} : vector<12x384xf32> to vector<1x384xf32>
    %481 = vector.broadcast %480 : vector<1x384xf32> to vector<16x384xf32>
    %482 = arith.addf %479, %481 : vector<16x384xf32>
    %483 = vector.extract_strided_slice %18 {offsets = [4, 0], sizes = [1, 384], strides = [1, 1]} : vector<12x384xf32> to vector<1x384xf32>
    %484 = vector.extract_strided_slice %18 {offsets = [5, 0], sizes = [1, 384], strides = [1, 1]} : vector<12x384xf32> to vector<1x384xf32>
    %cst_143 = arith.constant dense<0.000000e+00> : vector<384xf32>
    %485 = vector.multi_reduction <add>, %482, %cst_143 [0] : vector<16x384xf32> to vector<384xf32>
    %486 = vector.shape_cast %485 : vector<384xf32> to vector<1x384xf32>
    %cst_144 = arith.constant 1.600000e+01 : f32
    %487 = vector.broadcast %cst_144 : f32 to vector<1x384xf32>
    %488 = arith.divf %486, %487 : vector<1x384xf32>
    %489 = vector.broadcast %488 : vector<1x384xf32> to vector<16x384xf32>
    %490 = arith.subf %482, %489 : vector<16x384xf32>
    %491 = arith.mulf %490, %490 : vector<16x384xf32>
    %cst_145 = arith.constant dense<0.000000e+00> : vector<384xf32>
    %492 = vector.multi_reduction <add>, %491, %cst_145 [0] : vector<16x384xf32> to vector<384xf32>
    %493 = vector.shape_cast %492 : vector<384xf32> to vector<1x384xf32>
    %cst_146 = arith.constant 1.600000e+01 : f32
    %494 = vector.broadcast %cst_146 : f32 to vector<1x384xf32>
    %495 = arith.divf %493, %494 : vector<1x384xf32>
    %cst_147 = arith.constant 9.99999974E-6 : f32
    %496 = vector.broadcast %cst_147 : f32 to vector<1x384xf32>
    %497 = arith.addf %495, %496 : vector<1x384xf32>
    %498 = math.rsqrt %497 : vector<1x384xf32>
    %499 = arith.mulf %483, %498 : vector<1x384xf32>
    %500 = vector.broadcast %499 : vector<1x384xf32> to vector<16x384xf32>
    %501 = arith.mulf %482, %500 : vector<16x384xf32>
    %502 = arith.mulf %488, %499 : vector<1x384xf32>
    %503 = arith.subf %484, %502 : vector<1x384xf32>
    %504 = vector.broadcast %503 : vector<1x384xf32> to vector<16x384xf32>
    %505 = arith.addf %501, %504 : vector<16x384xf32>
    %cst_148 = arith.constant 0.000000e+00 : f32
    %506 = vector.broadcast %cst_148 : f32 to vector<16x384xf32>
    %507 = arith.cmpf oge, %505, %506 : vector<16x384xf32>
    %508 = vector.broadcast %4 : f32 to vector<16x384xf32>
    %509 = arith.mulf %508, %505 : vector<16x384xf32>
    %510 = arith.select %507, %505, %509 : vector<16x384xi1>, vector<16x384xf32>
    %511 = arith.truncf %510 : vector<16x384xf32> to vector<16x384xbf16>
    %c0_149 = arith.constant 0 : index
    %c0_150 = arith.constant 0 : index
    %512 = vector.load %arg27[%c0_149, %c0_150] : memref<384x384xbf16, #tpu.memory_space<vmem>>, vector<384x384xbf16>
    %cst_151 = arith.constant dense<0.000000e+00> : vector<16x384xf32>
    %513 = tpu.matmul %511, %512, %cst_151 {dimension_numbers = #tpu.dot_dimension_numbers<[1], [0], [0], [1], [0, 0, 1, 1], [], []>} : vector<16x384xbf16>, vector<384x384xbf16>, vector<16x384xf32> -> vector<16x384xf32>
    %514 = vector.extract_strided_slice %18 {offsets = [6, 0], sizes = [1, 384], strides = [1, 1]} : vector<12x384xf32> to vector<1x384xf32>
    %515 = vector.broadcast %514 : vector<1x384xf32> to vector<16x384xf32>
    %516 = arith.addf %513, %515 : vector<16x384xf32>
    %517 = arith.addf %516, %448 : vector<16x384xf32>
    %cst_152 = arith.constant 5.000000e-01 : f32
    %518 = vector.broadcast %cst_152 : f32 to vector<16x384xf32>
    %519 = arith.mulf %517, %518 : vector<16x384xf32>
    %520 = vector.extract_strided_slice %18 {offsets = [7, 0], sizes = [1, 384], strides = [1, 1]} : vector<12x384xf32> to vector<1x384xf32>
    %521 = vector.extract_strided_slice %18 {offsets = [8, 0], sizes = [1, 384], strides = [1, 1]} : vector<12x384xf32> to vector<1x384xf32>
    %cst_153 = arith.constant dense<0.000000e+00> : vector<384xf32>
    %522 = vector.multi_reduction <add>, %519, %cst_153 [0] : vector<16x384xf32> to vector<384xf32>
    %523 = vector.shape_cast %522 : vector<384xf32> to vector<1x384xf32>
    %cst_154 = arith.constant 1.600000e+01 : f32
    %524 = vector.broadcast %cst_154 : f32 to vector<1x384xf32>
    %525 = arith.divf %523, %524 : vector<1x384xf32>
    %526 = vector.broadcast %525 : vector<1x384xf32> to vector<16x384xf32>
    %527 = arith.subf %519, %526 : vector<16x384xf32>
    %528 = arith.mulf %527, %527 : vector<16x384xf32>
    %cst_155 = arith.constant dense<0.000000e+00> : vector<384xf32>
    %529 = vector.multi_reduction <add>, %528, %cst_155 [0] : vector<16x384xf32> to vector<384xf32>
    %530 = vector.shape_cast %529 : vector<384xf32> to vector<1x384xf32>
    %cst_156 = arith.constant 1.600000e+01 : f32
    %531 = vector.broadcast %cst_156 : f32 to vector<1x384xf32>
    %532 = arith.divf %530, %531 : vector<1x384xf32>
    %cst_157 = arith.constant 9.99999974E-6 : f32
    %533 = vector.broadcast %cst_157 : f32 to vector<1x384xf32>
    %534 = arith.addf %532, %533 : vector<1x384xf32>
    %535 = math.rsqrt %534 : vector<1x384xf32>
    %536 = arith.mulf %520, %535 : vector<1x384xf32>
    %537 = vector.broadcast %536 : vector<1x384xf32> to vector<16x384xf32>
    %538 = arith.mulf %519, %537 : vector<16x384xf32>
    %539 = arith.mulf %525, %536 : vector<1x384xf32>
    %540 = arith.subf %521, %539 : vector<1x384xf32>
    %541 = vector.broadcast %540 : vector<1x384xf32> to vector<16x384xf32>
    %542 = arith.addf %538, %541 : vector<16x384xf32>
    %cst_158 = arith.constant 0.000000e+00 : f32
    %543 = vector.broadcast %cst_158 : f32 to vector<16x384xf32>
    %544 = arith.cmpf oge, %542, %543 : vector<16x384xf32>
    %545 = vector.broadcast %5 : f32 to vector<16x384xf32>
    %546 = arith.mulf %545, %542 : vector<16x384xf32>
    %547 = arith.select %544, %542, %546 : vector<16x384xi1>, vector<16x384xf32>
    %548 = arith.truncf %547 : vector<16x384xf32> to vector<16x384xbf16>
    %c0_159 = arith.constant 0 : index
    %c0_160 = arith.constant 0 : index
    %549 = vector.load %arg28[%c0_159, %c0_160] : memref<384x384xbf16, #tpu.memory_space<vmem>>, vector<384x384xbf16>
    %cst_161 = arith.constant dense<0.000000e+00> : vector<16x384xf32>
    %550 = tpu.matmul %548, %549, %cst_161 {dimension_numbers = #tpu.dot_dimension_numbers<[1], [0], [0], [1], [0, 0, 1, 1], [], []>} : vector<16x384xbf16>, vector<384x384xbf16>, vector<16x384xf32> -> vector<16x384xf32>
    %551 = vector.extract_strided_slice %18 {offsets = [9, 0], sizes = [1, 384], strides = [1, 1]} : vector<12x384xf32> to vector<1x384xf32>
    %552 = vector.broadcast %551 : vector<1x384xf32> to vector<16x384xf32>
    %553 = arith.addf %550, %552 : vector<16x384xf32>
    %554 = arith.addf %553, %519 : vector<16x384xf32>
    %cst_162 = arith.constant 5.000000e-01 : f32
    %555 = vector.broadcast %cst_162 : f32 to vector<16x384xf32>
    %556 = arith.mulf %554, %555 : vector<16x384xf32>
    %557 = vector.extract_strided_slice %18 {offsets = [10, 0], sizes = [1, 384], strides = [1, 1]} : vector<12x384xf32> to vector<1x384xf32>
    %558 = vector.extract_strided_slice %18 {offsets = [11, 0], sizes = [1, 384], strides = [1, 1]} : vector<12x384xf32> to vector<1x384xf32>
    %cst_163 = arith.constant dense<0.000000e+00> : vector<384xf32>
    %559 = vector.multi_reduction <add>, %556, %cst_163 [0] : vector<16x384xf32> to vector<384xf32>
    %560 = vector.shape_cast %559 : vector<384xf32> to vector<1x384xf32>
    %cst_164 = arith.constant 1.600000e+01 : f32
    %561 = vector.broadcast %cst_164 : f32 to vector<1x384xf32>
    %562 = arith.divf %560, %561 : vector<1x384xf32>
    %563 = vector.broadcast %562 : vector<1x384xf32> to vector<16x384xf32>
    %564 = arith.subf %556, %563 : vector<16x384xf32>
    %565 = arith.mulf %564, %564 : vector<16x384xf32>
    %cst_165 = arith.constant dense<0.000000e+00> : vector<384xf32>
    %566 = vector.multi_reduction <add>, %565, %cst_165 [0] : vector<16x384xf32> to vector<384xf32>
    %567 = vector.shape_cast %566 : vector<384xf32> to vector<1x384xf32>
    %cst_166 = arith.constant 1.600000e+01 : f32
    %568 = vector.broadcast %cst_166 : f32 to vector<1x384xf32>
    %569 = arith.divf %567, %568 : vector<1x384xf32>
    %cst_167 = arith.constant 9.99999974E-6 : f32
    %570 = vector.broadcast %cst_167 : f32 to vector<1x384xf32>
    %571 = arith.addf %569, %570 : vector<1x384xf32>
    %572 = math.rsqrt %571 : vector<1x384xf32>
    %573 = arith.mulf %557, %572 : vector<1x384xf32>
    %574 = vector.broadcast %573 : vector<1x384xf32> to vector<16x384xf32>
    %575 = arith.mulf %556, %574 : vector<16x384xf32>
    %576 = arith.mulf %562, %573 : vector<1x384xf32>
    %577 = arith.subf %558, %576 : vector<1x384xf32>
    %578 = vector.broadcast %577 : vector<1x384xf32> to vector<16x384xf32>
    %579 = arith.addf %575, %578 : vector<16x384xf32>
    %cst_168 = arith.constant 0.000000e+00 : f32
    %580 = vector.broadcast %cst_168 : f32 to vector<16x384xf32>
    %581 = arith.cmpf oge, %579, %580 : vector<16x384xf32>
    %582 = vector.broadcast %6 : f32 to vector<16x384xf32>
    %583 = arith.mulf %582, %579 : vector<16x384xf32>
    %584 = arith.select %581, %579, %583 : vector<16x384xi1>, vector<16x384xf32>
    %585 = arith.truncf %584 : vector<16x384xf32> to vector<16x384xbf16>
    %c0_169 = arith.constant 0 : index
    %c0_170 = arith.constant 0 : index
    %586 = vector.load %arg29[%c0_169, %c0_170] : memref<384x128xbf16, #tpu.memory_space<vmem>>, vector<384x128xbf16>
    %cst_171 = arith.constant dense<0.000000e+00> : vector<16x128xf32>
    %587 = tpu.matmul %585, %586, %cst_171 {dimension_numbers = #tpu.dot_dimension_numbers<[1], [0], [0], [1], [0, 0, 1, 1], [], []>} : vector<16x384xbf16>, vector<384x128xbf16>, vector<16x128xf32> -> vector<16x128xf32>
    %588 = vector.extract_strided_slice %17 {offsets = [10, 0], sizes = [1, 128], strides = [1, 1]} : vector<11x128xf32> to vector<1x128xf32>
    %589 = vector.broadcast %588 : vector<1x128xf32> to vector<16x128xf32>
    %590 = arith.addf %587, %589 : vector<16x128xf32>
    %c0_172 = arith.constant 0 : index
    %c0_173 = arith.constant 0 : index
    %591 = vector.load %arg24[%c0_172, %c0_173] : memref<16x128xf32, #tpu.memory_space<vmem>>, vector<16x128xf32>
    tpu.vector_store %arg24[%c0_172, %c0_173], %590 {strides = array<i32>} : memref<16x128xf32, #tpu.memory_space<vmem>>, vector<16x128xf32>,
    return
  }
}

</mosaic_0001>

<bundles_post_ra>
// kernel: drug_encoder_forward.1
= control target key start
LH: loop header
LB: loop body
LE: loop exit
PB: predicated region body
PF: predicated region fallthrough
CT: control target
= control target key end

     0   :  { %s11479_s0 = inlined_call_operand.vmem [shape: f32[16,16], index: 0, kind: input, shape index: {}]   ;;  %s11480_s1 = inlined_call_operand.vmem [shape: f32[32,8], index: 1, kind: input, shape index: {}]   ;;  %s11481_s2 = inlined_call_operand.vmem [shape: bf16[32,16], index: 2, kind: input, shape index: {}]   ;;  %s11482_s3 = inlined_call_operand.vmem [shape: bf16[32,16], index: 3, kind: input, shape index: {}]   ;;  %s11483_s4 = inlined_call_operand.vmem [shape: bf16[16,32], index: 4, kind: input, shape index: {}]   ;;  %s11484_s5 = inlined_call_operand.vmem [shape: bf16[32,32], index: 5, kind: input, shape index: {}]   ;;  %s11485_s6 = inlined_call_operand.vmem [shape: f32[32,2], index: 6, kind: input, shape index: {}]   ;;  %s11486_s7 = inlined_call_operand.vmem [shape: bf16[16,128], index: 7, kind: input, shape index: {}]   ;;  %s11487_s8 = inlined_call_operand.vmem [shape: bf16[128,128], index: 8, kind: input, shape index: {}]   ;;  %s11488_s9 = inlined_call_operand.vmem [shape: bf16[128,128], index: 9, kind: input, shape index: {}]   ;;  %s11489_s10 = inlined_call_operand.vmem [shape: bf16[128,128], index: 10, kind: input, shape index: {}]   ;;  %s11490_s11 = inlined_call_operand.vmem [shape: bf16[128,128], index: 11, kind: input, shape index: {}]   ;;  %s11491_s12 = inlined_call_operand.vmem [shape: bf16[8,128], index: 12, kind: input, shape index: {}]   ;;  %s11492_s13 = inlined_call_operand.vmem [shape: bf16[128,2], index: 13, kind: input, shape index: {}]   ;;  %s11493_s14 = inlined_call_operand.vmem [shape: bf16[128,128], index: 14, kind: input, shape index: {}]   ;;  %s11494_s15 = inlined_call_operand.vmem [shape: bf16[512,4], index: 15, kind: input, shape index: {}]   ;;  %s11495_s16 = inlined_call_operand.vmem [shape: f32[11,128], index: 16, kind: input, shape index: {}]   ;;  %s11496_s17 = inlined_call_operand.vmem [shape: f32[12,384], index: 17, kind: input, shape index: {}]   ;;  %s11497_s18 = inlined_call_operand.vmem [shape: f32[11], index: 18, kind: input, shape index: {}]   ;;  %s11498_s19 = inlined_call_operand.vmem [shape: bf16[128,384], index: 19, kind: input, shape index: {}]   ;;  %s11499_s20 = inlined_call_operand.vmem [shape: bf16[384,384], index: 20, kind: input, shape index: {}]   ;;  %s11500_s21 = inlined_call_operand.vmem [shape: bf16[384,384], index: 21, kind: input, shape index: {}]   ;;  %s11501_s22 = inlined_call_operand.vmem [shape: bf16[384,384], index: 22, kind: input, shape index: {}]   ;;  %s11502_s23 = inlined_call_operand.vmem [shape: bf16[384,128], index: 23, kind: input, shape index: {}]   ;;  %s11503_s24 = inlined_call_operand.hbm [shape: f32[16,128], index: 24, kind: output, shape index: {}]  }
   0x1   :  { %11566 = sst [smem:[#allocation78_spill]] %s11479_s0 }
   0x2   :  { %11567 = sst [smem:[#allocation79_spill]] %s11480_s1 }
   0x3   :  { %11568 = sst [smem:[#allocation80_spill]] %s11481_s2 }
   0x4   :  { %11569 = sst [smem:[#allocation81_spill]] %s11482_s3 }
   0x5   :  { %11570 = sst [smem:[#allocation82_spill]] %s11483_s4 }
   0x6   :  { %11571 = sst [smem:[#allocation83_spill]] %s11484_s5 }
   0x7   :  { %11572 = sst [smem:[#allocation84_spill]] %s11485_s6 }
   0x8   :  { %11573 = sst [smem:[#allocation85_spill]] %s11486_s7 }
   0x9   :  { %11574 = sst [smem:[#allocation86_spill]] %s11487_s8 }
   0xa   :  { %11575 = sst [smem:[#allocation87_spill]] %s11503_s24 }
   0xb   :  { %29 = vsyncpa [#allocation10], 0 }
   0xc   :  { %30 = vsyncpa [#allocation9], 0  ;;  %s73_s27 = sshll.u32 %s11497_s18, 4  ;;  %s74_s27 = int_to_ptr.vmem [resolvable:$true] %s73_s27 }
   0xd   :  { %s8380_s28 = scalar_lea.vmem %s74_s27, 16  ;;  %p8385_p1 = scmp.lt.s32.totalorder %s74_s27, %s74_s27 }
   0xe   :  { %p8381_p0 = scmp.ne.s32.totalorder %s74_s27, %s8380_s28  ;;  %p8386_p2 = scmp.lt.s32.totalorder %s8380_s28, %s8380_s28 }
  0x10   :  { %p8387_p3 = por %p8386_p2, %p8385_p1 }
  0x12   :  { %p8388_p4 = pnand %p8387_p3, %p8381_p0 }
  0x14   :  { %8391 = shalt.err (!%p8388_p4)
}
  0x15   :  { %s8428_s6 = smov [#allocation8]  }
  0x16   :  { %76 = dma.vmem_to_smem %s74_s27, 16, %s8428_s6, [#allocation10]  }
  0x17   :  { %8414 = dma.done.wait [#allocation10], 16  }
  0x18   :  { %8415 = vsyncadd [#allocation10], 4294967280 }
  0x19   :  { %80 = sfence }
  0x1a   :  { %s8567_s2 = sld [smem:[#allocation8]]  ;;  %s8569_s29 = sld [smem:[#allocation8 + $0x1]]  ;;  %v106_v0 = vld [vmem:[%s11498_s19] sm:$0xf]  ;;  %v108_v1 = vld [vmem:[%s11498_s19 + $0xc] sm:$0xf] }
  0x1b   :  { %s8574_s18 = sld [smem:[#allocation8 + $0x2]]  ;;  %s8576_s30 = sld [smem:[#allocation8 + $0x3]]  ;;  %107 = vst [vmem:[#allocation2] sm:$0xf] %v106_v0  ;;  %109 = vst [vmem:[#allocation2 + $0x4] sm:$0xf] %v108_v1 }
  0x1c   :  { %s8581_s8 = sld [smem:[#allocation8 + $0x4]]  ;;  %s8583_s4 = sld [smem:[#allocation8 + $0x5]]  ;;  %v110_v2 = vld [vmem:[%s11498_s19 + $0x4] sm:$0xf]  ;;  %v112_v3 = vld [vmem:[%s11498_s19 + $0x10] sm:$0xf] }
  0x1d   :  { %s8588_s26 = sld [smem:[#allocation8 + $0x6]]  ;;  %111 = vst [vmem:[#allocation2 + $0x8] sm:$0xf] %v110_v2  ;;  %v114_v4 = vld [vmem:[%s11498_s19 + $0x8] sm:$0xf]  ;;  %v116_v5 = vld [vmem:[%s11498_s19 + $0x14] sm:$0xff]  }
  0x1e   :  { %113 = vst [vmem:[#allocation2 + $0xc] sm:$0xf] %v112_v3  ;;  %115 = vst [vmem:[#allocation2 + $0x10] sm:$0xf] %v114_v4  ;;  %v120_v6 = vld [vmem:[%s11498_s19 + $0x24] sm:$0xf] }
  0x1f   :  { %v122_v7 = vld [vmem:[%s11498_s19 + $0x1c] sm:$0xf]  ;;  %117 = vst [vmem:[#allocation2 + $0x14] sm:$0xff] %v116_v5   ;;  %121 = vst [vmem:[#allocation2 + $0x1c] sm:$0xf] %v120_v6  ;;  %v128_v10 = vld [vmem:[%s11498_s19 + $0x2c] sm:$0xff]  }
  0x20   :  { %123 = vst [vmem:[#allocation2 + $0x20] sm:$0xf] %v122_v7  ;;  %v124_v8 = vld [vmem:[%s11498_s19 + $0x28] sm:$0xf]  ;;  %v126_v9 = vld [vmem:[%s11498_s19 + $0x20] sm:$0xf] }
  0x21   :  { %125 = vst [vmem:[#allocation2 + $0x24] sm:$0xf] %v124_v8  ;;  %127 = vst [vmem:[#allocation2 + $0x28] sm:$0xf] %v126_v9  ;;  %v132_v11 = vld [vmem:[%s11498_s19 + $0x3c] sm:$0xf] }
  0x22   :  { %129 = vst [vmem:[#allocation2 + $0x2c] sm:$0xff] %v128_v10   ;;  %v134_v12 = vld [vmem:[%s11498_s19 + $0x34] sm:$0xf]  ;;  %v136_v13 = vld [vmem:[%s11498_s19 + $0x40] sm:$0xf]  ;;  %v140_v15 = vld [vmem:[%s11498_s19 + $0x44] sm:$0xff]  }
  0x23   :  { %133 = vst [vmem:[#allocation2 + $0x34] sm:$0xf] %v132_v11  ;;  %135 = vst [vmem:[#allocation2 + $0x38] sm:$0xf] %v134_v12  ;;  %v138_v14 = vld [vmem:[%s11498_s19 + $0x38] sm:$0xf] }
  0x24   :  { %137 = vst [vmem:[#allocation2 + $0x3c] sm:$0xf] %v136_v13  ;;  %v144_v16 = vld [vmem:[%s11498_s19 + $0x54] sm:$0xf]  ;;  %139 = vst [vmem:[#allocation2 + $0x40] sm:$0xf] %v138_v14 }
  0x25   :  { %141 = vst [vmem:[#allocation2 + $0x44] sm:$0xff] %v140_v15   ;;  %145 = vst [vmem:[#allocation2 + $0x4c] sm:$0xf] %v144_v16  ;;  %v146_v17 = vld [vmem:[%s11498_s19 + $0x4c] sm:$0xf]  ;;  %v152_v20 = vld [vmem:[%s11498_s19 + $0x5c] sm:$0xff]  }
  0x26   :  { %v148_v18 = vld [vmem:[%s11498_s19 + $0x58] sm:$0xf]  ;;  %v150_v19 = vld [vmem:[%s11498_s19 + $0x50] sm:$0xf]  ;;  %147 = vst [vmem:[#allocation2 + $0x50] sm:$0xf] %v146_v17 }
  0x27   :  { %149 = vst [vmem:[#allocation2 + $0x54] sm:$0xf] %v148_v18  ;;  %151 = vst [vmem:[#allocation2 + $0x58] sm:$0xf] %v150_v19  ;;  %v156_v21 = vld [vmem:[%s11498_s19 + $0x6c] sm:$0xf] }
  0x28   :  { %v158_v22 = vld [vmem:[%s11498_s19 + $0x64] sm:$0xf]  ;;  %153 = vst [vmem:[#allocation2 + $0x5c] sm:$0xff] %v152_v20   ;;  %157 = vst [vmem:[#allocation2 + $0x64] sm:$0xf] %v156_v21  ;;  %v164_v25 = vld [vmem:[%s11498_s19 + $0x74] sm:$0xff]  }
  0x29   :  { %159 = vst [vmem:[#allocation2 + $0x68] sm:$0xf] %v158_v22  ;;  %v160_v23 = vld [vmem:[%s11498_s19 + $0x70] sm:$0xf]  ;;  %v162_v24 = vld [vmem:[%s11498_s19 + $0x68] sm:$0xf] }
  0x2a   :  { %161 = vst [vmem:[#allocation2 + $0x6c] sm:$0xf] %v160_v23  ;;  %163 = vst [vmem:[#allocation2 + $0x70] sm:$0xf] %v162_v24  ;;  %v168_v26 = vld [vmem:[%s11498_s19 + $0x84] sm:$0xf] }
  0x2b   :  { %165 = vst [vmem:[#allocation2 + $0x74] sm:$0xff] %v164_v25   ;;  %v170_v27 = vld [vmem:[%s11498_s19 + $0x7c] sm:$0xf]  ;;  %v172_v28 = vld [vmem:[%s11498_s19 + $0x88] sm:$0xf]  ;;  %v176_v30 = vld [vmem:[%s11498_s19 + $0x8c] sm:$0xff]  }
  0x2c   :  { %169 = vst [vmem:[#allocation2 + $0x7c] sm:$0xf] %v168_v26  ;;  %171 = vst [vmem:[#allocation2 + $0x80] sm:$0xf] %v170_v27  ;;  %v174_v29 = vld [vmem:[%s11498_s19 + $0x80] sm:$0xf] }
  0x2d   :  { %173 = vst [vmem:[#allocation2 + $0x84] sm:$0xf] %v172_v28  ;;  %v180_v31 = vld [vmem:[%s11498_s19 + $0x9c] sm:$0xf]  ;;  %175 = vst [vmem:[#allocation2 + $0x88] sm:$0xf] %v174_v29 }
  0x2e   :  { %177 = vst [vmem:[#allocation2 + $0x8c] sm:$0xff] %v176_v30   ;;  %181 = vst [vmem:[#allocation2 + $0x94] sm:$0xf] %v180_v31  ;;  %v182_v32 = vld [vmem:[%s11498_s19 + $0x94] sm:$0xf]  ;;  %v188_v35 = vld [vmem:[%s11498_s19 + $0xa4] sm:$0xff]  }
  0x2f   :  { %v184_v33 = vld [vmem:[%s11498_s19 + $0xa0] sm:$0xf]  ;;  %v186_v34 = vld [vmem:[%s11498_s19 + $0x98] sm:$0xf]  ;;  %183 = vst [vmem:[#allocation2 + $0x98] sm:$0xf] %v182_v32 }
  0x30   :  { %185 = vst [vmem:[#allocation2 + $0x9c] sm:$0xf] %v184_v33  ;;  %187 = vst [vmem:[#allocation2 + $0xa0] sm:$0xf] %v186_v34  ;;  %v192_v36 = vld [vmem:[%s11498_s19 + $0xb4] sm:$0xf] }
  0x31   :  { %v194_v37 = vld [vmem:[%s11498_s19 + $0xac] sm:$0xf]  ;;  %189 = vst [vmem:[#allocation2 + $0xa4] sm:$0xff] %v188_v35   ;;  %193 = vst [vmem:[#allocation2 + $0xac] sm:$0xf] %v192_v36 }
  0x32   :  { %195 = vst [vmem:[#allocation2 + $0xb0] sm:$0xf] %v194_v37  ;;  %v196_v38 = vld [vmem:[%s11498_s19 + $0xb8] sm:$0xf]  ;;  %v198_v39 = vld [vmem:[%s11498_s19 + $0xb0] sm:$0xf] }
  0x33   :  { %v200_v40 = vld [vmem:[%s11498_s19 + $0xbc] sm:$0xf]  ;;  %197 = vst [vmem:[#allocation2 + $0xb4] sm:$0xf] %v196_v38  ;;  %199 = vst [vmem:[#allocation2 + $0xb8] sm:$0xf] %v198_v39 }
  0x34   :  { %201 = vst [vmem:[#allocation2 + $0xbc] sm:$0xf] %v200_v40 }
  0x35   :  { %328 = vsyncadd [#allocation7], 3072  ;;  %v347_v41 = vld [vmem:[%s11499_s20] sm:$0xf]  ;;  %v349_v42 = vld [vmem:[%s11499_s20 + $0xc] sm:$0xf] }
  0x36   :  { %348 = vst [vmem:[#allocation3] sm:$0xf] %v347_v41  ;;  %350 = vst [vmem:[#allocation3 + $0x4] sm:$0xf] %v349_v42  ;;  %v351_v43 = vld [vmem:[%s11499_s20 + $0x4] sm:$0xf] }
  0x37   :  { %v353_v44 = vld [vmem:[%s11499_s20 + $0x10] sm:$0xf]  ;;  %v355_v45 = vld [vmem:[%s11499_s20 + $0x8] sm:$0xf]  ;;  %352 = vst [vmem:[#allocation3 + $0x8] sm:$0xf] %v351_v43 }
  0x38   :  { %354 = vst [vmem:[#allocation3 + $0xc] sm:$0xf] %v353_v44  ;;  %356 = vst [vmem:[#allocation3 + $0x10] sm:$0xf] %v355_v45  ;;  %v357_v46 = vld [vmem:[%s11499_s20 + $0x14] sm:$0xff]   ;;  %v369_v51 = vld [vmem:[%s11499_s20 + $0x2c] sm:$0xff]  }
  0x39   :  { %v361_v47 = vld [vmem:[%s11499_s20 + $0x24] sm:$0xf]  ;;  %v363_v48 = vld [vmem:[%s11499_s20 + $0x1c] sm:$0xf]  ;;  %358 = vst [vmem:[#allocation3 + $0x14] sm:$0xff] %v357_v46   ;;  %370 = vst [vmem:[#allocation3 + $0x2c] sm:$0xff] %v369_v51  }
  0x3a   :  { %362 = vst [vmem:[#allocation3 + $0x1c] sm:$0xf] %v361_v47  ;;  %364 = vst [vmem:[#allocation3 + $0x20] sm:$0xf] %v363_v48  ;;  %v365_v49 = vld [vmem:[%s11499_s20 + $0x28] sm:$0xf] }
  0x3b   :  { %v367_v50 = vld [vmem:[%s11499_s20 + $0x20] sm:$0xf]  ;;  %366 = vst [vmem:[#allocation3 + $0x24] sm:$0xf] %v365_v49  ;;  %v373_v52 = vld [vmem:[%s11499_s20 + $0x3c] sm:$0xf] }
  0x3c   :  { %368 = vst [vmem:[#allocation3 + $0x28] sm:$0xf] %v367_v50  ;;  %v375_v53 = vld [vmem:[%s11499_s20 + $0x34] sm:$0xf]  ;;  %v377_v54 = vld [vmem:[%s11499_s20 + $0x40] sm:$0xf] }
  0x3d   :  { %374 = vst [vmem:[#allocation3 + $0x34] sm:$0xf] %v373_v52  ;;  %376 = vst [vmem:[#allocation3 + $0x38] sm:$0xf] %v375_v53  ;;  %v379_v55 = vld [vmem:[%s11499_s20 + $0x38] sm:$0xf] }
  0x3e   :  { %378 = vst [vmem:[#allocation3 + $0x3c] sm:$0xf] %v377_v54  ;;  %v381_v56 = vld [vmem:[%s11499_s20 + $0x44] sm:$0xff]   ;;  %v385_v57 = vld [vmem:[%s11499_s20 + $0x54] sm:$0xf]  ;;  %v393_v61 = vld [vmem:[%s11499_s20 + $0x5c] sm:$0xff]  }
  0x3f   :  { %380 = vst [vmem:[#allocation3 + $0x40] sm:$0xf] %v379_v55  ;;  %382 = vst [vmem:[#allocation3 + $0x44] sm:$0xff] %v381_v56   ;;  %v387_v58 = vld [vmem:[%s11499_s20 + $0x4c] sm:$0xf]  ;;  %v405_v2 = vld [vmem:[%s11499_s20 + $0x74] sm:$0xff]  }
  0x40   :  { %386 = vst [vmem:[#allocation3 + $0x4c] sm:$0xf] %v385_v57  ;;  %v389_v59 = vld [vmem:[%s11499_s20 + $0x58] sm:$0xf]  ;;  %v391_v60 = vld [vmem:[%s11499_s20 + $0x50] sm:$0xf] }
  0x41   :  { %388 = vst [vmem:[#allocation3 + $0x50] sm:$0xf] %v387_v58  ;;  %390 = vst [vmem:[#allocation3 + $0x54] sm:$0xf] %v389_v59  ;;  %v397_v62 = vld [vmem:[%s11499_s20 + $0x6c] sm:$0xf] }
  0x42   :  { %392 = vst [vmem:[#allocation3 + $0x58] sm:$0xf] %v391_v60  ;;  %v399_v63 = vld [vmem:[%s11499_s20 + $0x64] sm:$0xf]  ;;  %394 = vst [vmem:[#allocation3 + $0x5c] sm:$0xff] %v393_v61   ;;  %v417_v7 = vld [vmem:[%s11499_s20 + $0x8c] sm:$0xff]  }
  0x43   :  { %398 = vst [vmem:[#allocation3 + $0x64] sm:$0xf] %v397_v62  ;;  %400 = vst [vmem:[#allocation3 + $0x68] sm:$0xf] %v399_v63  ;;  %v401_v0 = vld [vmem:[%s11499_s20 + $0x70] sm:$0xf] }
  0x44   :  { %v403_v1 = vld [vmem:[%s11499_s20 + $0x68] sm:$0xf]  ;;  %402 = vst [vmem:[#allocation3 + $0x6c] sm:$0xf] %v401_v0  ;;  %406 = vst [vmem:[#allocation3 + $0x74] sm:$0xff] %v405_v2   ;;  %v441_v17 = vld [vmem:[%s11499_s20 + $0xbc] sm:$0xff]  }
  0x45   :  { %404 = vst [vmem:[#allocation3 + $0x70] sm:$0xf] %v403_v1  ;;  %v409_v3 = vld [vmem:[%s11499_s20 + $0x84] sm:$0xf]  ;;  %v411_v4 = vld [vmem:[%s11499_s20 + $0x7c] sm:$0xf] }
  0x46   :  { %v413_v5 = vld [vmem:[%s11499_s20 + $0x88] sm:$0xf]  ;;  %410 = vst [vmem:[#allocation3 + $0x7c] sm:$0xf] %v409_v3  ;;  %412 = vst [vmem:[#allocation3 + $0x80] sm:$0xf] %v411_v4 }
  0x47   :  { %414 = vst [vmem:[#allocation3 + $0x84] sm:$0xf] %v413_v5  ;;  %v415_v6 = vld [vmem:[%s11499_s20 + $0x80] sm:$0xf]  ;;  %v421_v8 = vld [vmem:[%s11499_s20 + $0x9c] sm:$0xf] }
  0x48   :  { %416 = vst [vmem:[#allocation3 + $0x88] sm:$0xf] %v415_v6  ;;  %418 = vst [vmem:[#allocation3 + $0x8c] sm:$0xff] %v417_v7   ;;  %v423_v9 = vld [vmem:[%s11499_s20 + $0x94] sm:$0xf]  ;;  %v429_v12 = vld [vmem:[%s11499_s20 + $0xa4] sm:$0xff]  }
  0x49   :  { %422 = vst [vmem:[#allocation3 + $0x94] sm:$0xf] %v421_v8  ;;  %v425_v10 = vld [vmem:[%s11499_s20 + $0xa0] sm:$0xf]  ;;  %v427_v11 = vld [vmem:[%s11499_s20 + $0x98] sm:$0xf] }
  0x4a   :  { %424 = vst [vmem:[#allocation3 + $0x98] sm:$0xf] %v423_v9  ;;  %426 = vst [vmem:[#allocation3 + $0x9c] sm:$0xf] %v425_v10  ;;  %v433_v13 = vld [vmem:[%s11499_s20 + $0xb4] sm:$0xf] }
  0x4b   :  { %428 = vst [vmem:[#allocation3 + $0xa0] sm:$0xf] %v427_v11  ;;  %v435_v14 = vld [vmem:[%s11499_s20 + $0xac] sm:$0xf]  ;;  %430 = vst [vmem:[#allocation3 + $0xa4] sm:$0xff] %v429_v12   ;;  %v453_v22 = vld [vmem:[%s11499_s20 + $0xd4] sm:$0xff]  }
  0x4c   :  { %434 = vst [vmem:[#allocation3 + $0xac] sm:$0xf] %v433_v13  ;;  %436 = vst [vmem:[#allocation3 + $0xb0] sm:$0xf] %v435_v14  ;;  %v437_v15 = vld [vmem:[%s11499_s20 + $0xb8] sm:$0xf] }
  0x4d   :  { %v439_v16 = vld [vmem:[%s11499_s20 + $0xb0] sm:$0xf]  ;;  %438 = vst [vmem:[#allocation3 + $0xb4] sm:$0xf] %v437_v15  ;;  %442 = vst [vmem:[#allocation3 + $0xbc] sm:$0xff] %v441_v17   ;;  %v477_v32 = vld [vmem:[%s11499_s20 + $0x104] sm:$0xff]  }
  0x4e   :  { %440 = vst [vmem:[#allocation3 + $0xb8] sm:$0xf] %v439_v16  ;;  %v445_v18 = vld [vmem:[%s11499_s20 + $0xcc] sm:$0xf]  ;;  %v447_v19 = vld [vmem:[%s11499_s20 + $0xc4] sm:$0xf] }
  0x4f   :  { %v449_v20 = vld [vmem:[%s11499_s20 + $0xd0] sm:$0xf]  ;;  %446 = vst [vmem:[#allocation3 + $0xc4] sm:$0xf] %v445_v18  ;;  %448 = vst [vmem:[#allocation3 + $0xc8] sm:$0xf] %v447_v19 }
  0x50   :  { %450 = vst [vmem:[#allocation3 + $0xcc] sm:$0xf] %v449_v20  ;;  %v451_v21 = vld [vmem:[%s11499_s20 + $0xc8] sm:$0xf]  ;;  %v457_v23 = vld [vmem:[%s11499_s20 + $0xe4] sm:$0xf] }
  0x51   :  { %452 = vst [vmem:[#allocation3 + $0xd0] sm:$0xf] %v451_v21  ;;  %454 = vst [vmem:[#allocation3 + $0xd4] sm:$0xff] %v453_v22   ;;  %v459_v24 = vld [vmem:[%s11499_s20 + $0xdc] sm:$0xf]  ;;  %v465_v27 = vld [vmem:[%s11499_s20 + $0xec] sm:$0xff]  }
  0x52   :  { %458 = vst [vmem:[#allocation3 + $0xdc] sm:$0xf] %v457_v23  ;;  %v461_v25 = vld [vmem:[%s11499_s20 + $0xe8] sm:$0xf]  ;;  %v463_v26 = vld [vmem:[%s11499_s20 + $0xe0] sm:$0xf] }
  0x53   :  { %460 = vst [vmem:[#allocation3 + $0xe0] sm:$0xf] %v459_v24  ;;  %462 = vst [vmem:[#allocation3 + $0xe4] sm:$0xf] %v461_v25  ;;  %v469_v28 = vld [vmem:[%s11499_s20 + $0xfc] sm:$0xf] }
  0x54   :  { %464 = vst [vmem:[#allocation3 + $0xe8] sm:$0xf] %v463_v26  ;;  %v471_v29 = vld [vmem:[%s11499_s20 + $0xf4] sm:$0xf]  ;;  %466 = vst [vmem:[#allocation3 + $0xec] sm:$0xff] %v465_v27   ;;  %v489_v37 = vld [vmem:[%s11499_s20 + $0x11c] sm:$0xff]  }
  0x55   :  { %470 = vst [vmem:[#allocation3 + $0xf4] sm:$0xf] %v469_v28  ;;  %472 = vst [vmem:[#allocation3 + $0xf8] sm:$0xf] %v471_v29  ;;  %v473_v30 = vld [vmem:[%s11499_s20 + $0x100] sm:$0xf] }
  0x56   :  { %v475_v31 = vld [vmem:[%s11499_s20 + $0xf8] sm:$0xf]  ;;  %474 = vst [vmem:[#allocation3 + $0xfc] sm:$0xf] %v473_v30  ;;  %478 = vst [vmem:[#allocation3 + $0x104] sm:$0xff] %v477_v32   ;;  %v513_v47 = vld [vmem:[%s11499_s20 + $0x14c] sm:$0xff]  }
  0x57   :  { %476 = vst [vmem:[#allocation3 + $0x100] sm:$0xf] %v475_v31  ;;  %v481_v33 = vld [vmem:[%s11499_s20 + $0x114] sm:$0xf]  ;;  %v483_v34 = vld [vmem:[%s11499_s20 + $0x10c] sm:$0xf] }
  0x58   :  { %v485_v35 = vld [vmem:[%s11499_s20 + $0x118] sm:$0xf]  ;;  %482 = vst [vmem:[#allocation3 + $0x10c] sm:$0xf] %v481_v33  ;;  %484 = vst [vmem:[#allocation3 + $0x110] sm:$0xf] %v483_v34 }
  0x59   :  { %486 = vst [vmem:[#allocation3 + $0x114] sm:$0xf] %v485_v35  ;;  %v487_v36 = vld [vmem:[%s11499_s20 + $0x110] sm:$0xf]  ;;  %v493_v38 = vld [vmem:[%s11499_s20 + $0x12c] sm:$0xf] }
  0x5a   :  { %488 = vst [vmem:[#allocation3 + $0x118] sm:$0xf] %v487_v36  ;;  %490 = vst [vmem:[#allocation3 + $0x11c] sm:$0xff] %v489_v37   ;;  %v495_v39 = vld [vmem:[%s11499_s20 + $0x124] sm:$0xf]  ;;  %v501_v42 = vld [vmem:[%s11499_s20 + $0x134] sm:$0xff]  }
  0x5b   :  { %494 = vst [vmem:[#allocation3 + $0x124] sm:$0xf] %v493_v38  ;;  %v497_v40 = vld [vmem:[%s11499_s20 + $0x130] sm:$0xf]  ;;  %v499_v41 = vld [vmem:[%s11499_s20 + $0x128] sm:$0xf] }
  0x5c   :  { %496 = vst [vmem:[#allocation3 + $0x128] sm:$0xf] %v495_v39  ;;  %498 = vst [vmem:[#allocation3 + $0x12c] sm:$0xf] %v497_v40  ;;  %v505_v43 = vld [vmem:[%s11499_s20 + $0x144] sm:$0xf] }
  0x5d   :  { %500 = vst [vmem:[#allocation3 + $0x130] sm:$0xf] %v499_v41  ;;  %v507_v44 = vld [vmem:[%s11499_s20 + $0x13c] sm:$0xf]  ;;  %502 = vst [vmem:[#allocation3 + $0x134] sm:$0xff] %v501_v42   ;;  %v525_v52 = vld [vmem:[%s11499_s20 + $0x164] sm:$0xff]  }
  0x5e   :  { %506 = vst [vmem:[#allocation3 + $0x13c] sm:$0xf] %v505_v43  ;;  %508 = vst [vmem:[#allocation3 + $0x140] sm:$0xf] %v507_v44  ;;  %v509_v45 = vld [vmem:[%s11499_s20 + $0x148] sm:$0xf] }
  0x5f   :  { %v511_v46 = vld [vmem:[%s11499_s20 + $0x140] sm:$0xf]  ;;  %510 = vst [vmem:[#allocation3 + $0x144] sm:$0xf] %v509_v45  ;;  %514 = vst [vmem:[#allocation3 + $0x14c] sm:$0xff] %v513_v47   ;;  %v549_v62 = vld [vmem:[%s11499_s20 + $0x194] sm:$0xff]  }
  0x60   :  { %512 = vst [vmem:[#allocation3 + $0x148] sm:$0xf] %v511_v46  ;;  %v517_v48 = vld [vmem:[%s11499_s20 + $0x15c] sm:$0xf]  ;;  %v519_v49 = vld [vmem:[%s11499_s20 + $0x154] sm:$0xf] }
  0x61   :  { %v521_v50 = vld [vmem:[%s11499_s20 + $0x160] sm:$0xf]  ;;  %518 = vst [vmem:[#allocation3 + $0x154] sm:$0xf] %v517_v48  ;;  %520 = vst [vmem:[#allocation3 + $0x158] sm:$0xf] %v519_v49 }
  0x62   :  { %522 = vst [vmem:[#allocation3 + $0x15c] sm:$0xf] %v521_v50  ;;  %v523_v51 = vld [vmem:[%s11499_s20 + $0x158] sm:$0xf]  ;;  %v529_v53 = vld [vmem:[%s11499_s20 + $0x174] sm:$0xf] }
  0x63   :  { %524 = vst [vmem:[#allocation3 + $0x160] sm:$0xf] %v523_v51  ;;  %526 = vst [vmem:[#allocation3 + $0x164] sm:$0xff] %v525_v52   ;;  %v531_v54 = vld [vmem:[%s11499_s20 + $0x16c] sm:$0xf]  ;;  %v537_v57 = vld [vmem:[%s11499_s20 + $0x17c] sm:$0xff]  }
  0x64   :  { %530 = vst [vmem:[#allocation3 + $0x16c] sm:$0xf] %v529_v53  ;;  %v533_v55 = vld [vmem:[%s11499_s20 + $0x178] sm:$0xf]  ;;  %v535_v56 = vld [vmem:[%s11499_s20 + $0x170] sm:$0xf] }
  0x65   :  { %532 = vst [vmem:[#allocation3 + $0x170] sm:$0xf] %v531_v54  ;;  %534 = vst [vmem:[#allocation3 + $0x174] sm:$0xf] %v533_v55  ;;  %v541_v58 = vld [vmem:[%s11499_s20 + $0x18c] sm:$0xf] }
  0x66   :  { %536 = vst [vmem:[#allocation3 + $0x178] sm:$0xf] %v535_v56  ;;  %v543_v59 = vld [vmem:[%s11499_s20 + $0x184] sm:$0xf]  ;;  %538 = vst [vmem:[#allocation3 + $0x17c] sm:$0xff] %v537_v57   ;;  %v561_v3 = vld [vmem:[%s11499_s20 + $0x1ac] sm:$0xff]  }
  0x67   :  { %542 = vst [vmem:[#allocation3 + $0x184] sm:$0xf] %v541_v58  ;;  %544 = vst [vmem:[#allocation3 + $0x188] sm:$0xf] %v543_v59  ;;  %v545_v60 = vld [vmem:[%s11499_s20 + $0x190] sm:$0xf] }
  0x68   :  { %v547_v61 = vld [vmem:[%s11499_s20 + $0x188] sm:$0xf]  ;;  %546 = vst [vmem:[#allocation3 + $0x18c] sm:$0xf] %v545_v60  ;;  %550 = vst [vmem:[#allocation3 + $0x194] sm:$0xff] %v549_v62   ;;  %v585_v13 = vld [vmem:[%s11499_s20 + $0x1dc] sm:$0xff]  }
  0x69   :  { %548 = vst [vmem:[#allocation3 + $0x190] sm:$0xf] %v547_v61  ;;  %v553_v63 = vld [vmem:[%s11499_s20 + $0x1a4] sm:$0xf]  ;;  %v555_v0 = vld [vmem:[%s11499_s20 + $0x19c] sm:$0xf] }
  0x6a   :  { %v557_v1 = vld [vmem:[%s11499_s20 + $0x1a8] sm:$0xf]  ;;  %554 = vst [vmem:[#allocation3 + $0x19c] sm:$0xf] %v553_v63  ;;  %556 = vst [vmem:[#allocation3 + $0x1a0] sm:$0xf] %v555_v0 }
  0x6b   :  { %558 = vst [vmem:[#allocation3 + $0x1a4] sm:$0xf] %v557_v1  ;;  %v559_v2 = vld [vmem:[%s11499_s20 + $0x1a0] sm:$0xf]  ;;  %v565_v4 = vld [vmem:[%s11499_s20 + $0x1bc] sm:$0xf] }
  0x6c   :  { %560 = vst [vmem:[#allocation3 + $0x1a8] sm:$0xf] %v559_v2  ;;  %562 = vst [vmem:[#allocation3 + $0x1ac] sm:$0xff] %v561_v3   ;;  %v567_v5 = vld [vmem:[%s11499_s20 + $0x1b4] sm:$0xf]  ;;  %v573_v8 = vld [vmem:[%s11499_s20 + $0x1c4] sm:$0xff]  }
  0x6d   :  { %566 = vst [vmem:[#allocation3 + $0x1b4] sm:$0xf] %v565_v4  ;;  %v569_v6 = vld [vmem:[%s11499_s20 + $0x1c0] sm:$0xf]  ;;  %v571_v7 = vld [vmem:[%s11499_s20 + $0x1b8] sm:$0xf] }
  0x6e   :  { %568 = vst [vmem:[#allocation3 + $0x1b8] sm:$0xf] %v567_v5  ;;  %570 = vst [vmem:[#allocation3 + $0x1bc] sm:$0xf] %v569_v6  ;;  %v577_v9 = vld [vmem:[%s11499_s20 + $0x1d4] sm:$0xf] }
  0x6f   :  { %572 = vst [vmem:[#allocation3 + $0x1c0] sm:$0xf] %v571_v7  ;;  %v579_v10 = vld [vmem:[%s11499_s20 + $0x1cc] sm:$0xf]  ;;  %574 = vst [vmem:[#allocation3 + $0x1c4] sm:$0xff] %v573_v8   ;;  %v597_v18 = vld [vmem:[%s11499_s20 + $0x1f4] sm:$0xff]  }
  0x70   :  { %578 = vst [vmem:[#allocation3 + $0x1cc] sm:$0xf] %v577_v9  ;;  %580 = vst [vmem:[#allocation3 + $0x1d0] sm:$0xf] %v579_v10  ;;  %v581_v11 = vld [vmem:[%s11499_s20 + $0x1d8] sm:$0xf] }
  0x71   :  { %v583_v12 = vld [vmem:[%s11499_s20 + $0x1d0] sm:$0xf]  ;;  %582 = vst [vmem:[#allocation3 + $0x1d4] sm:$0xf] %v581_v11  ;;  %586 = vst [vmem:[#allocation3 + $0x1dc] sm:$0xff] %v585_v13   ;;  %v621_v28 = vld [vmem:[%s11499_s20 + $0x224] sm:$0xff]  }
  0x72   :  { %584 = vst [vmem:[#allocation3 + $0x1d8] sm:$0xf] %v583_v12  ;;  %v589_v14 = vld [vmem:[%s11499_s20 + $0x1ec] sm:$0xf]  ;;  %v591_v15 = vld [vmem:[%s11499_s20 + $0x1e4] sm:$0xf] }
  0x73   :  { %v593_v16 = vld [vmem:[%s11499_s20 + $0x1f0] sm:$0xf]  ;;  %590 = vst [vmem:[#allocation3 + $0x1e4] sm:$0xf] %v589_v14  ;;  %592 = vst [vmem:[#allocation3 + $0x1e8] sm:$0xf] %v591_v15 }
  0x74   :  { %594 = vst [vmem:[#allocation3 + $0x1ec] sm:$0xf] %v593_v16  ;;  %v595_v17 = vld [vmem:[%s11499_s20 + $0x1e8] sm:$0xf]  ;;  %v601_v19 = vld [vmem:[%s11499_s20 + $0x204] sm:$0xf] }
  0x75   :  { %596 = vst [vmem:[#allocation3 + $0x1f0] sm:$0xf] %v595_v17  ;;  %598 = vst [vmem:[#allocation3 + $0x1f4] sm:$0xff] %v597_v18   ;;  %v603_v20 = vld [vmem:[%s11499_s20 + $0x1fc] sm:$0xf]  ;;  %v609_v23 = vld [vmem:[%s11499_s20 + $0x20c] sm:$0xff]  }
  0x76   :  { %602 = vst [vmem:[#allocation3 + $0x1fc] sm:$0xf] %v601_v19  ;;  %v605_v21 = vld [vmem:[%s11499_s20 + $0x208] sm:$0xf]  ;;  %v607_v22 = vld [vmem:[%s11499_s20 + $0x200] sm:$0xf] }
  0x77   :  { %604 = vst [vmem:[#allocation3 + $0x200] sm:$0xf] %v603_v20  ;;  %606 = vst [vmem:[#allocation3 + $0x204] sm:$0xf] %v605_v21  ;;  %v613_v24 = vld [vmem:[%s11499_s20 + $0x21c] sm:$0xf] }
  0x78   :  { %608 = vst [vmem:[#allocation3 + $0x208] sm:$0xf] %v607_v22  ;;  %v615_v25 = vld [vmem:[%s11499_s20 + $0x214] sm:$0xf]  ;;  %610 = vst [vmem:[#allocation3 + $0x20c] sm:$0xff] %v609_v23  }
  0x79   :  { %614 = vst [vmem:[#allocation3 + $0x214] sm:$0xf] %v613_v24  ;;  %616 = vst [vmem:[#allocation3 + $0x218] sm:$0xf] %v615_v25  ;;  %v617_v26 = vld [vmem:[%s11499_s20 + $0x220] sm:$0xf] }
  0x7a   :  { %v619_v27 = vld [vmem:[%s11499_s20 + $0x218] sm:$0xf]  ;;  %618 = vst [vmem:[#allocation3 + $0x21c] sm:$0xf] %v617_v26  ;;  %622 = vst [vmem:[#allocation3 + $0x224] sm:$0xff] %v621_v28  }
  0x7b   :  { %620 = vst [vmem:[#allocation3 + $0x220] sm:$0xf] %v619_v27  ;;  %v625_v29 = vld [vmem:[%s11499_s20 + $0x234] sm:$0xf]  ;;  %v627_v30 = vld [vmem:[%s11499_s20 + $0x22c] sm:$0xf] }
  0x7c   :  { %v629_v31 = vld [vmem:[%s11499_s20 + $0x238] sm:$0xf]  ;;  %626 = vst [vmem:[#allocation3 + $0x22c] sm:$0xf] %v625_v29  ;;  %628 = vst [vmem:[#allocation3 + $0x230] sm:$0xf] %v627_v30 }
  0x7d   :  { %630 = vst [vmem:[#allocation3 + $0x234] sm:$0xf] %v629_v31  ;;  %v631_v32 = vld [vmem:[%s11499_s20 + $0x230] sm:$0xf]  ;;  %v633_v33 = vld [vmem:[%s11499_s20 + $0x23c] sm:$0xf] }
  0x7e   :  { %632 = vst [vmem:[#allocation3 + $0x238] sm:$0xf] %v631_v32  ;;  %634 = vst [vmem:[#allocation3 + $0x23c] sm:$0xf] %v633_v33 }
  0x7f   :  { %953 = vsyncadd [#allocation7 + $0x1], 9216  ;;  %v972_v34 = vld [vmem:[%s11500_s21] sm:$0xf]  ;;  %v974_v35 = vld [vmem:[%s11500_s21 + $0xc] sm:$0xf] }
  0x80   :  { %973 = vst [vmem:[#allocation4] sm:$0xf] %v972_v34  ;;  %975 = vst [vmem:[#allocation4 + $0x4] sm:$0xf] %v974_v35  ;;  %v976_v36 = vld [vmem:[%s11500_s21 + $0x4] sm:$0xf] }
  0x81   :  { %v978_v37 = vld [vmem:[%s11500_s21 + $0x10] sm:$0xf]  ;;  %v980_v38 = vld [vmem:[%s11500_s21 + $0x8] sm:$0xf]  ;;  %977 = vst [vmem:[#allocation4 + $0x8] sm:$0xf] %v976_v36 }
  0x82   :  { %979 = vst [vmem:[#allocation4 + $0xc] sm:$0xf] %v978_v37  ;;  %981 = vst [vmem:[#allocation4 + $0x10] sm:$0xf] %v980_v38  ;;  %v982_v39 = vld [vmem:[%s11500_s21 + $0x14] sm:$0xff]   ;;  %v994_v44 = vld [vmem:[%s11500_s21 + $0x2c] sm:$0xff]  }
  0x83   :  { %v986_v40 = vld [vmem:[%s11500_s21 + $0x24] sm:$0xf]  ;;  %v988_v41 = vld [vmem:[%s11500_s21 + $0x1c] sm:$0xf]  ;;  %983 = vst [vmem:[#allocation4 + $0x14] sm:$0xff] %v982_v39   ;;  %995 = vst [vmem:[#allocation4 + $0x2c] sm:$0xff] %v994_v44  }
  0x84   :  { %987 = vst [vmem:[#allocation4 + $0x1c] sm:$0xf] %v986_v40  ;;  %989 = vst [vmem:[#allocation4 + $0x20] sm:$0xf] %v988_v41  ;;  %v990_v42 = vld [vmem:[%s11500_s21 + $0x28] sm:$0xf] }
  0x85   :  { %v992_v43 = vld [vmem:[%s11500_s21 + $0x20] sm:$0xf]  ;;  %991 = vst [vmem:[#allocation4 + $0x24] sm:$0xf] %v990_v42  ;;  %v998_v45 = vld [vmem:[%s11500_s21 + $0x3c] sm:$0xf] }
  0x86   :  { %993 = vst [vmem:[#allocation4 + $0x28] sm:$0xf] %v992_v43  ;;  %v1000_v46 = vld [vmem:[%s11500_s21 + $0x34] sm:$0xf]  ;;  %v1002_v47 = vld [vmem:[%s11500_s21 + $0x40] sm:$0xf] }
  0x87   :  { %999 = vst [vmem:[#allocation4 + $0x34] sm:$0xf] %v998_v45  ;;  %1001 = vst [vmem:[#allocation4 + $0x38] sm:$0xf] %v1000_v46  ;;  %v1004_v48 = vld [vmem:[%s11500_s21 + $0x38] sm:$0xf] }
  0x88   :  { %1003 = vst [vmem:[#allocation4 + $0x3c] sm:$0xf] %v1002_v47  ;;  %v1006_v49 = vld [vmem:[%s11500_s21 + $0x44] sm:$0xff]   ;;  %v1010_v50 = vld [vmem:[%s11500_s21 + $0x54] sm:$0xf]  ;;  %v1018_v54 = vld [vmem:[%s11500_s21 + $0x5c] sm:$0xff]  }
  0x89   :  { %1005 = vst [vmem:[#allocation4 + $0x40] sm:$0xf] %v1004_v48  ;;  %1007 = vst [vmem:[#allocation4 + $0x44] sm:$0xff] %v1006_v49   ;;  %v1012_v51 = vld [vmem:[%s11500_s21 + $0x4c] sm:$0xf]  ;;  %v1030_v59 = vld [vmem:[%s11500_s21 + $0x74] sm:$0xff]  }
  0x8a   :  { %1011 = vst [vmem:[#allocation4 + $0x4c] sm:$0xf] %v1010_v50  ;;  %v1014_v52 = vld [vmem:[%s11500_s21 + $0x58] sm:$0xf]  ;;  %v1016_v53 = vld [vmem:[%s11500_s21 + $0x50] sm:$0xf] }
  0x8b   :  { %1013 = vst [vmem:[#allocation4 + $0x50] sm:$0xf] %v1012_v51  ;;  %1015 = vst [vmem:[#allocation4 + $0x54] sm:$0xf] %v1014_v52  ;;  %v1022_v55 = vld [vmem:[%s11500_s21 + $0x6c] sm:$0xf] }
  0x8c   :  { %1017 = vst [vmem:[#allocation4 + $0x58] sm:$0xf] %v1016_v53  ;;  %v1024_v56 = vld [vmem:[%s11500_s21 + $0x64] sm:$0xf]  ;;  %1019 = vst [vmem:[#allocation4 + $0x5c] sm:$0xff] %v1018_v54   ;;  %v1042_v0 = vld [vmem:[%s11500_s21 + $0x8c] sm:$0xff]  }
  0x8d   :  { %1023 = vst [vmem:[#allocation4 + $0x64] sm:$0xf] %v1022_v55  ;;  %1025 = vst [vmem:[#allocation4 + $0x68] sm:$0xf] %v1024_v56  ;;  %v1026_v57 = vld [vmem:[%s11500_s21 + $0x70] sm:$0xf] }
  0x8e   :  { %v1028_v58 = vld [vmem:[%s11500_s21 + $0x68] sm:$0xf]  ;;  %1027 = vst [vmem:[#allocation4 + $0x6c] sm:$0xf] %v1026_v57  ;;  %1031 = vst [vmem:[#allocation4 + $0x74] sm:$0xff] %v1030_v59   ;;  %v1066_v10 = vld [vmem:[%s11500_s21 + $0xbc] sm:$0xff]  }
  0x8f   :  { %1029 = vst [vmem:[#allocation4 + $0x70] sm:$0xf] %v1028_v58  ;;  %v1034_v60 = vld [vmem:[%s11500_s21 + $0x84] sm:$0xf]  ;;  %v1036_v61 = vld [vmem:[%s11500_s21 + $0x7c] sm:$0xf] }
  0x90   :  { %v1038_v62 = vld [vmem:[%s11500_s21 + $0x88] sm:$0xf]  ;;  %1035 = vst [vmem:[#allocation4 + $0x7c] sm:$0xf] %v1034_v60  ;;  %1037 = vst [vmem:[#allocation4 + $0x80] sm:$0xf] %v1036_v61 }
  0x91   :  { %1039 = vst [vmem:[#allocation4 + $0x84] sm:$0xf] %v1038_v62  ;;  %v1040_v63 = vld [vmem:[%s11500_s21 + $0x80] sm:$0xf]  ;;  %v1046_v1 = vld [vmem:[%s11500_s21 + $0x9c] sm:$0xf] }
  0x92   :  { %1041 = vst [vmem:[#allocation4 + $0x88] sm:$0xf] %v1040_v63  ;;  %1043 = vst [vmem:[#allocation4 + $0x8c] sm:$0xff] %v1042_v0   ;;  %v1048_v2 = vld [vmem:[%s11500_s21 + $0x94] sm:$0xf]  ;;  %v1054_v5 = vld [vmem:[%s11500_s21 + $0xa4] sm:$0xff]  }
  0x93   :  { %1047 = vst [vmem:[#allocation4 + $0x94] sm:$0xf] %v1046_v1  ;;  %v1050_v3 = vld [vmem:[%s11500_s21 + $0xa0] sm:$0xf]  ;;  %v1052_v4 = vld [vmem:[%s11500_s21 + $0x98] sm:$0xf] }
  0x94   :  { %1049 = vst [vmem:[#allocation4 + $0x98] sm:$0xf] %v1048_v2  ;;  %1051 = vst [vmem:[#allocation4 + $0x9c] sm:$0xf] %v1050_v3  ;;  %v1058_v6 = vld [vmem:[%s11500_s21 + $0xb4] sm:$0xf] }
  0x95   :  { %1053 = vst [vmem:[#allocation4 + $0xa0] sm:$0xf] %v1052_v4  ;;  %v1060_v7 = vld [vmem:[%s11500_s21 + $0xac] sm:$0xf]  ;;  %1055 = vst [vmem:[#allocation4 + $0xa4] sm:$0xff] %v1054_v5   ;;  %v1078_v15 = vld [vmem:[%s11500_s21 + $0xd4] sm:$0xff]  }
  0x96   :  { %1059 = vst [vmem:[#allocation4 + $0xac] sm:$0xf] %v1058_v6  ;;  %1061 = vst [vmem:[#allocation4 + $0xb0] sm:$0xf] %v1060_v7  ;;  %v1062_v8 = vld [vmem:[%s11500_s21 + $0xb8] sm:$0xf] }
  0x97   :  { %v1064_v9 = vld [vmem:[%s11500_s21 + $0xb0] sm:$0xf]  ;;  %1063 = vst [vmem:[#allocation4 + $0xb4] sm:$0xf] %v1062_v8  ;;  %1067 = vst [vmem:[#allocation4 + $0xbc] sm:$0xff] %v1066_v10   ;;  %v1102_v25 = vld [vmem:[%s11500_s21 + $0x104] sm:$0xff]  }
  0x98   :  { %1065 = vst [vmem:[#allocation4 + $0xb8] sm:$0xf] %v1064_v9  ;;  %v1070_v11 = vld [vmem:[%s11500_s21 + $0xcc] sm:$0xf]  ;;  %v1072_v12 = vld [vmem:[%s11500_s21 + $0xc4] sm:$0xf] }
  0x99   :  { %v1074_v13 = vld [vmem:[%s11500_s21 + $0xd0] sm:$0xf]  ;;  %1071 = vst [vmem:[#allocation4 + $0xc4] sm:$0xf] %v1070_v11  ;;  %1073 = vst [vmem:[#allocation4 + $0xc8] sm:$0xf] %v1072_v12 }
  0x9a   :  { %1075 = vst [vmem:[#allocation4 + $0xcc] sm:$0xf] %v1074_v13  ;;  %v1076_v14 = vld [vmem:[%s11500_s21 + $0xc8] sm:$0xf]  ;;  %v1082_v16 = vld [vmem:[%s11500_s21 + $0xe4] sm:$0xf] }
  0x9b   :  { %1077 = vst [vmem:[#allocation4 + $0xd0] sm:$0xf] %v1076_v14  ;;  %1079 = vst [vmem:[#allocation4 + $0xd4] sm:$0xff] %v1078_v15   ;;  %v1084_v17 = vld [vmem:[%s11500_s21 + $0xdc] sm:$0xf]  ;;  %v1090_v20 = vld [vmem:[%s11500_s21 + $0xec] sm:$0xff]  }
  0x9c   :  { %1083 = vst [vmem:[#allocation4 + $0xdc] sm:$0xf] %v1082_v16  ;;  %v1086_v18 = vld [vmem:[%s11500_s21 + $0xe8] sm:$0xf]  ;;  %v1088_v19 = vld [vmem:[%s11500_s21 + $0xe0] sm:$0xf] }
  0x9d   :  { %1085 = vst [vmem:[#allocation4 + $0xe0] sm:$0xf] %v1084_v17  ;;  %1087 = vst [vmem:[#allocation4 + $0xe4] sm:$0xf] %v1086_v18  ;;  %v1094_v21 = vld [vmem:[%s11500_s21 + $0xfc] sm:$0xf] }
  0x9e   :  { %1089 = vst [vmem:[#allocation4 + $0xe8] sm:$0xf] %v1088_v19  ;;  %v1096_v22 = vld [vmem:[%s11500_s21 + $0xf4] sm:$0xf]  ;;  %1091 = vst [vmem:[#allocation4 + $0xec] sm:$0xff] %v1090_v20   ;;  %v1114_v30 = vld [vmem:[%s11500_s21 + $0x11c] sm:$0xff]  }
  0x9f   :  { %1095 = vst [vmem:[#allocation4 + $0xf4] sm:$0xf] %v1094_v21  ;;  %1097 = vst [vmem:[#allocation4 + $0xf8] sm:$0xf] %v1096_v22  ;;  %v1098_v23 = vld [vmem:[%s11500_s21 + $0x100] sm:$0xf] }
  0xa0   :  { %v1100_v24 = vld [vmem:[%s11500_s21 + $0xf8] sm:$0xf]  ;;  %1099 = vst [vmem:[#allocation4 + $0xfc] sm:$0xf] %v1098_v23  ;;  %1103 = vst [vmem:[#allocation4 + $0x104] sm:$0xff] %v1102_v25   ;;  %v1138_v40 = vld [vmem:[%s11500_s21 + $0x14c] sm:$0xff]  }
  0xa1   :  { %1101 = vst [vmem:[#allocation4 + $0x100] sm:$0xf] %v1100_v24  ;;  %v1106_v26 = vld [vmem:[%s11500_s21 + $0x114] sm:$0xf]  ;;  %v1108_v27 = vld [vmem:[%s11500_s21 + $0x10c] sm:$0xf] }
  0xa2   :  { %v1110_v28 = vld [vmem:[%s11500_s21 + $0x118] sm:$0xf]  ;;  %1107 = vst [vmem:[#allocation4 + $0x10c] sm:$0xf] %v1106_v26  ;;  %1109 = vst [vmem:[#allocation4 + $0x110] sm:$0xf] %v1108_v27 }
  0xa3   :  { %1111 = vst [vmem:[#allocation4 + $0x114] sm:$0xf] %v1110_v28  ;;  %v1112_v29 = vld [vmem:[%s11500_s21 + $0x110] sm:$0xf]  ;;  %v1118_v31 = vld [vmem:[%s11500_s21 + $0x12c] sm:$0xf] }
  0xa4   :  { %1113 = vst [vmem:[#allocation4 + $0x118] sm:$0xf] %v1112_v29  ;;  %1115 = vst [vmem:[#allocation4 + $0x11c] sm:$0xff] %v1114_v30   ;;  %v1120_v32 = vld [vmem:[%s11500_s21 + $0x124] sm:$0xf]  ;;  %v1126_v35 = vld [vmem:[%s11500_s21 + $0x134] sm:$0xff]  }
  0xa5   :  { %1119 = vst [vmem:[#allocation4 + $0x124] sm:$0xf] %v1118_v31  ;;  %v1122_v33 = vld [vmem:[%s11500_s21 + $0x130] sm:$0xf]  ;;  %v1124_v34 = vld [vmem:[%s11500_s21 + $0x128] sm:$0xf] }
  0xa6   :  { %1121 = vst [vmem:[#allocation4 + $0x128] sm:$0xf] %v1120_v32  ;;  %1123 = vst [vmem:[#allocation4 + $0x12c] sm:$0xf] %v1122_v33  ;;  %v1130_v36 = vld [vmem:[%s11500_s21 + $0x144] sm:$0xf] }
  0xa7   :  { %1125 = vst [vmem:[#allocation4 + $0x130] sm:$0xf] %v1124_v34  ;;  %v1132_v37 = vld [vmem:[%s11500_s21 + $0x13c] sm:$0xf]  ;;  %1127 = vst [vmem:[#allocation4 + $0x134] sm:$0xff] %v1126_v35   ;;  %v1150_v45 = vld [vmem:[%s11500_s21 + $0x164] sm:$0xff]  }
  0xa8   :  { %1131 = vst [vmem:[#allocation4 + $0x13c] sm:$0xf] %v1130_v36  ;;  %1133 = vst [vmem:[#allocation4 + $0x140] sm:$0xf] %v1132_v37  ;;  %v1134_v38 = vld [vmem:[%s11500_s21 + $0x148] sm:$0xf] }
  0xa9   :  { %v1136_v39 = vld [vmem:[%s11500_s21 + $0x140] sm:$0xf]  ;;  %1135 = vst [vmem:[#allocation4 + $0x144] sm:$0xf] %v1134_v38  ;;  %1139 = vst [vmem:[#allocation4 + $0x14c] sm:$0xff] %v1138_v40   ;;  %v1174_v55 = vld [vmem:[%s11500_s21 + $0x194] sm:$0xff]  }
  0xaa   :  { %1137 = vst [vmem:[#allocation4 + $0x148] sm:$0xf] %v1136_v39  ;;  %v1142_v41 = vld [vmem:[%s11500_s21 + $0x15c] sm:$0xf]  ;;  %v1144_v42 = vld [vmem:[%s11500_s21 + $0x154] sm:$0xf] }
  0xab   :  { %v1146_v43 = vld [vmem:[%s11500_s21 + $0x160] sm:$0xf]  ;;  %1143 = vst [vmem:[#allocation4 + $0x154] sm:$0xf] %v1142_v41  ;;  %1145 = vst [vmem:[#allocation4 + $0x158] sm:$0xf] %v1144_v42 }
  0xac   :  { %1147 = vst [vmem:[#allocation4 + $0x15c] sm:$0xf] %v1146_v43  ;;  %v1148_v44 = vld [vmem:[%s11500_s21 + $0x158] sm:$0xf]  ;;  %v1154_v46 = vld [vmem:[%s11500_s21 + $0x174] sm:$0xf] }
  0xad   :  { %1149 = vst [vmem:[#allocation4 + $0x160] sm:$0xf] %v1148_v44  ;;  %1151 = vst [vmem:[#allocation4 + $0x164] sm:$0xff] %v1150_v45   ;;  %v1156_v47 = vld [vmem:[%s11500_s21 + $0x16c] sm:$0xf]  ;;  %v1162_v50 = vld [vmem:[%s11500_s21 + $0x17c] sm:$0xff]  }
  0xae   :  { %1155 = vst [vmem:[#allocation4 + $0x16c] sm:$0xf] %v1154_v46  ;;  %v1158_v48 = vld [vmem:[%s11500_s21 + $0x178] sm:$0xf]  ;;  %v1160_v49 = vld [vmem:[%s11500_s21 + $0x170] sm:$0xf] }
  0xaf   :  { %1157 = vst [vmem:[#allocation4 + $0x170] sm:$0xf] %v1156_v47  ;;  %1159 = vst [vmem:[#allocation4 + $0x174] sm:$0xf] %v1158_v48  ;;  %v1166_v51 = vld [vmem:[%s11500_s21 + $0x18c] sm:$0xf] }
  0xb0   :  { %1161 = vst [vmem:[#allocation4 + $0x178] sm:$0xf] %v1160_v49  ;;  %v1168_v52 = vld [vmem:[%s11500_s21 + $0x184] sm:$0xf]  ;;  %1163 = vst [vmem:[#allocation4 + $0x17c] sm:$0xff] %v1162_v50   ;;  %v1186_v60 = vld [vmem:[%s11500_s21 + $0x1ac] sm:$0xff]  }
  0xb1   :  { %1167 = vst [vmem:[#allocation4 + $0x184] sm:$0xf] %v1166_v51  ;;  %1169 = vst [vmem:[#allocation4 + $0x188] sm:$0xf] %v1168_v52  ;;  %v1170_v53 = vld [vmem:[%s11500_s21 + $0x190] sm:$0xf] }
  0xb2   :  { %v1172_v54 = vld [vmem:[%s11500_s21 + $0x188] sm:$0xf]  ;;  %1171 = vst [vmem:[#allocation4 + $0x18c] sm:$0xf] %v1170_v53  ;;  %1175 = vst [vmem:[#allocation4 + $0x194] sm:$0xff] %v1174_v55   ;;  %v1210_v6 = vld [vmem:[%s11500_s21 + $0x1dc] sm:$0xff]  }
  0xb3   :  { %1173 = vst [vmem:[#allocation4 + $0x190] sm:$0xf] %v1172_v54  ;;  %v1178_v56 = vld [vmem:[%s11500_s21 + $0x1a4] sm:$0xf]  ;;  %v1180_v57 = vld [vmem:[%s11500_s21 + $0x19c] sm:$0xf] }
  0xb4   :  { %v1182_v58 = vld [vmem:[%s11500_s21 + $0x1a8] sm:$0xf]  ;;  %1179 = vst [vmem:[#allocation4 + $0x19c] sm:$0xf] %v1178_v56  ;;  %1181 = vst [vmem:[#allocation4 + $0x1a0] sm:$0xf] %v1180_v57 }
  0xb5   :  { %1183 = vst [vmem:[#allocation4 + $0x1a4] sm:$0xf] %v1182_v58  ;;  %v1184_v59 = vld [vmem:[%s11500_s21 + $0x1a0] sm:$0xf]  ;;  %v1190_v61 = vld [vmem:[%s11500_s21 + $0x1bc] sm:$0xf] }
  0xb6   :  { %1185 = vst [vmem:[#allocation4 + $0x1a8] sm:$0xf] %v1184_v59  ;;  %1187 = vst [vmem:[#allocation4 + $0x1ac] sm:$0xff] %v1186_v60   ;;  %v1192_v62 = vld [vmem:[%s11500_s21 + $0x1b4] sm:$0xf]  ;;  %v1198_v1 = vld [vmem:[%s11500_s21 + $0x1c4] sm:$0xff]  }
  0xb7   :  { %1191 = vst [vmem:[#allocation4 + $0x1b4] sm:$0xf] %v1190_v61  ;;  %v1194_v63 = vld [vmem:[%s11500_s21 + $0x1c0] sm:$0xf]  ;;  %v1196_v0 = vld [vmem:[%s11500_s21 + $0x1b8] sm:$0xf] }
  0xb8   :  { %1193 = vst [vmem:[#allocation4 + $0x1b8] sm:$0xf] %v1192_v62  ;;  %1195 = vst [vmem:[#allocation4 + $0x1bc] sm:$0xf] %v1194_v63  ;;  %v1202_v2 = vld [vmem:[%s11500_s21 + $0x1d4] sm:$0xf] }
  0xb9   :  { %1197 = vst [vmem:[#allocation4 + $0x1c0] sm:$0xf] %v1196_v0  ;;  %v1204_v3 = vld [vmem:[%s11500_s21 + $0x1cc] sm:$0xf]  ;;  %1199 = vst [vmem:[#allocation4 + $0x1c4] sm:$0xff] %v1198_v1   ;;  %v1222_v11 = vld [vmem:[%s11500_s21 + $0x1f4] sm:$0xff]  }
  0xba   :  { %1203 = vst [vmem:[#allocation4 + $0x1cc] sm:$0xf] %v1202_v2  ;;  %1205 = vst [vmem:[#allocation4 + $0x1d0] sm:$0xf] %v1204_v3  ;;  %v1206_v4 = vld [vmem:[%s11500_s21 + $0x1d8] sm:$0xf] }
  0xbb   :  { %v1208_v5 = vld [vmem:[%s11500_s21 + $0x1d0] sm:$0xf]  ;;  %1207 = vst [vmem:[#allocation4 + $0x1d4] sm:$0xf] %v1206_v4  ;;  %1211 = vst [vmem:[#allocation4 + $0x1dc] sm:$0xff] %v1210_v6   ;;  %v1246_v21 = vld [vmem:[%s11500_s21 + $0x224] sm:$0xff]  }
  0xbc   :  { %1209 = vst [vmem:[#allocation4 + $0x1d8] sm:$0xf] %v1208_v5  ;;  %v1214_v7 = vld [vmem:[%s11500_s21 + $0x1ec] sm:$0xf]  ;;  %v1216_v8 = vld [vmem:[%s11500_s21 + $0x1e4] sm:$0xf] }
  0xbd   :  { %v1218_v9 = vld [vmem:[%s11500_s21 + $0x1f0] sm:$0xf]  ;;  %1215 = vst [vmem:[#allocation4 + $0x1e4] sm:$0xf] %v1214_v7  ;;  %1217 = vst [vmem:[#allocation4 + $0x1e8] sm:$0xf] %v1216_v8 }
  0xbe   :  { %1219 = vst [vmem:[#allocation4 + $0x1ec] sm:$0xf] %v1218_v9  ;;  %v1220_v10 = vld [vmem:[%s11500_s21 + $0x1e8] sm:$0xf]  ;;  %v1226_v12 = vld [vmem:[%s11500_s21 + $0x204] sm:$0xf] }
  0xbf   :  { %1221 = vst [vmem:[#allocation4 + $0x1f0] sm:$0xf] %v1220_v10  ;;  %1223 = vst [vmem:[#allocation4 + $0x1f4] sm:$0xff] %v1222_v11   ;;  %v1228_v13 = vld [vmem:[%s11500_s21 + $0x1fc] sm:$0xf]  ;;  %v1234_v16 = vld [vmem:[%s11500_s21 + $0x20c] sm:$0xff]  }
  0xc0   :  { %1227 = vst [vmem:[#allocation4 + $0x1fc] sm:$0xf] %v1226_v12  ;;  %v1230_v14 = vld [vmem:[%s11500_s21 + $0x208] sm:$0xf]  ;;  %v1232_v15 = vld [vmem:[%s11500_s21 + $0x200] sm:$0xf] }
  0xc1   :  { %1229 = vst [vmem:[#allocation4 + $0x200] sm:$0xf] %v1228_v13  ;;  %1231 = vst [vmem:[#allocation4 + $0x204] sm:$0xf] %v1230_v14  ;;  %v1238_v17 = vld [vmem:[%s11500_s21 + $0x21c] sm:$0xf] }
  0xc2   :  { %1233 = vst [vmem:[#allocation4 + $0x208] sm:$0xf] %v1232_v15  ;;  %v1240_v18 = vld [vmem:[%s11500_s21 + $0x214] sm:$0xf]  ;;  %1235 = vst [vmem:[#allocation4 + $0x20c] sm:$0xff] %v1234_v16  }
  0xc3   :  { %1239 = vst [vmem:[#allocation4 + $0x214] sm:$0xf] %v1238_v17  ;;  %1241 = vst [vmem:[#allocation4 + $0x218] sm:$0xf] %v1240_v18  ;;  %v1242_v19 = vld [vmem:[%s11500_s21 + $0x220] sm:$0xf] }
  0xc4   :  { %v1244_v20 = vld [vmem:[%s11500_s21 + $0x218] sm:$0xf]  ;;  %1243 = vst [vmem:[#allocation4 + $0x21c] sm:$0xf] %v1242_v19  ;;  %1247 = vst [vmem:[#allocation4 + $0x224] sm:$0xff] %v1246_v21  }
  0xc5   :  { %1245 = vst [vmem:[#allocation4 + $0x220] sm:$0xf] %v1244_v20  ;;  %v1250_v22 = vld [vmem:[%s11500_s21 + $0x234] sm:$0xf]  ;;  %v1252_v23 = vld [vmem:[%s11500_s21 + $0x22c] sm:$0xf] }
  0xc6   :  { %v1254_v24 = vld [vmem:[%s11500_s21 + $0x238] sm:$0xf]  ;;  %1251 = vst [vmem:[#allocation4 + $0x22c] sm:$0xf] %v1250_v22  ;;  %1253 = vst [vmem:[#allocation4 + $0x230] sm:$0xf] %v1252_v23 }
  0xc7   :  { %1255 = vst [vmem:[#allocation4 + $0x234] sm:$0xf] %v1254_v24  ;;  %v1256_v25 = vld [vmem:[%s11500_s21 + $0x230] sm:$0xf]  ;;  %v1258_v26 = vld [vmem:[%s11500_s21 + $0x23c] sm:$0xf] }
  0xc8   :  { %1257 = vst [vmem:[#allocation4 + $0x238] sm:$0xf] %v1256_v25  ;;  %1259 = vst [vmem:[#allocation4 + $0x23c] sm:$0xf] %v1258_v26 }
  0xc9   :  { %1578 = vsyncadd [#allocation7 + $0x2], 9216  ;;  %v1597_v27 = vld [vmem:[%s11501_s22] sm:$0xf]  ;;  %v1599_v28 = vld [vmem:[%s11501_s22 + $0xc] sm:$0xf] }
  0xca   :  { %1598 = vst [vmem:[#allocation5] sm:$0xf] %v1597_v27  ;;  %1600 = vst [vmem:[#allocation5 + $0x4] sm:$0xf] %v1599_v28  ;;  %v1601_v29 = vld [vmem:[%s11501_s22 + $0x4] sm:$0xf] }
  0xcb   :  { %v1603_v30 = vld [vmem:[%s11501_s22 + $0x10] sm:$0xf]  ;;  %v1605_v31 = vld [vmem:[%s11501_s22 + $0x8] sm:$0xf]  ;;  %1602 = vst [vmem:[#allocation5 + $0x8] sm:$0xf] %v1601_v29 }
  0xcc   :  { %1604 = vst [vmem:[#allocation5 + $0xc] sm:$0xf] %v1603_v30  ;;  %1606 = vst [vmem:[#allocation5 + $0x10] sm:$0xf] %v1605_v31  ;;  %v1607_v32 = vld [vmem:[%s11501_s22 + $0x14] sm:$0xff]   ;;  %v1619_v37 = vld [vmem:[%s11501_s22 + $0x2c] sm:$0xff]  }
  0xcd   :  { %v1611_v33 = vld [vmem:[%s11501_s22 + $0x24] sm:$0xf]  ;;  %v1613_v34 = vld [vmem:[%s11501_s22 + $0x1c] sm:$0xf]  ;;  %1608 = vst [vmem:[#allocation5 + $0x14] sm:$0xff] %v1607_v32   ;;  %1620 = vst [vmem:[#allocation5 + $0x2c] sm:$0xff] %v1619_v37  }
  0xce   :  { %1612 = vst [vmem:[#allocation5 + $0x1c] sm:$0xf] %v1611_v33  ;;  %1614 = vst [vmem:[#allocation5 + $0x20] sm:$0xf] %v1613_v34  ;;  %v1615_v35 = vld [vmem:[%s11501_s22 + $0x28] sm:$0xf] }
  0xcf   :  { %v1617_v36 = vld [vmem:[%s11501_s22 + $0x20] sm:$0xf]  ;;  %1616 = vst [vmem:[#allocation5 + $0x24] sm:$0xf] %v1615_v35  ;;  %v1623_v38 = vld [vmem:[%s11501_s22 + $0x3c] sm:$0xf] }
  0xd0   :  { %1618 = vst [vmem:[#allocation5 + $0x28] sm:$0xf] %v1617_v36  ;;  %v1625_v39 = vld [vmem:[%s11501_s22 + $0x34] sm:$0xf]  ;;  %v1627_v40 = vld [vmem:[%s11501_s22 + $0x40] sm:$0xf] }
  0xd1   :  { %1624 = vst [vmem:[#allocation5 + $0x34] sm:$0xf] %v1623_v38  ;;  %1626 = vst [vmem:[#allocation5 + $0x38] sm:$0xf] %v1625_v39  ;;  %v1629_v41 = vld [vmem:[%s11501_s22 + $0x38] sm:$0xf] }
  0xd2   :  { %1628 = vst [vmem:[#allocation5 + $0x3c] sm:$0xf] %v1627_v40  ;;  %v1631_v42 = vld [vmem:[%s11501_s22 + $0x44] sm:$0xff]   ;;  %v1635_v43 = vld [vmem:[%s11501_s22 + $0x54] sm:$0xf]  ;;  %v1643_v47 = vld [vmem:[%s11501_s22 + $0x5c] sm:$0xff]  }
  0xd3   :  { %1630 = vst [vmem:[#allocation5 + $0x40] sm:$0xf] %v1629_v41  ;;  %1632 = vst [vmem:[#allocation5 + $0x44] sm:$0xff] %v1631_v42   ;;  %v1637_v44 = vld [vmem:[%s11501_s22 + $0x4c] sm:$0xf]  ;;  %v1655_v52 = vld [vmem:[%s11501_s22 + $0x74] sm:$0xff]  }
  0xd4   :  { %1636 = vst [vmem:[#allocation5 + $0x4c] sm:$0xf] %v1635_v43  ;;  %v1639_v45 = vld [vmem:[%s11501_s22 + $0x58] sm:$0xf]  ;;  %v1641_v46 = vld [vmem:[%s11501_s22 + $0x50] sm:$0xf] }
  0xd5   :  { %1638 = vst [vmem:[#allocation5 + $0x50] sm:$0xf] %v1637_v44  ;;  %1640 = vst [vmem:[#allocation5 + $0x54] sm:$0xf] %v1639_v45  ;;  %v1647_v48 = vld [vmem:[%s11501_s22 + $0x6c] sm:$0xf] }
  0xd6   :  { %1642 = vst [vmem:[#allocation5 + $0x58] sm:$0xf] %v1641_v46  ;;  %v1649_v49 = vld [vmem:[%s11501_s22 + $0x64] sm:$0xf]  ;;  %1644 = vst [vmem:[#allocation5 + $0x5c] sm:$0xff] %v1643_v47   ;;  %v1667_v57 = vld [vmem:[%s11501_s22 + $0x8c] sm:$0xff]  }
  0xd7   :  { %1648 = vst [vmem:[#allocation5 + $0x64] sm:$0xf] %v1647_v48  ;;  %1650 = vst [vmem:[#allocation5 + $0x68] sm:$0xf] %v1649_v49  ;;  %v1651_v50 = vld [vmem:[%s11501_s22 + $0x70] sm:$0xf] }
  0xd8   :  { %v1653_v51 = vld [vmem:[%s11501_s22 + $0x68] sm:$0xf]  ;;  %1652 = vst [vmem:[#allocation5 + $0x6c] sm:$0xf] %v1651_v50  ;;  %1656 = vst [vmem:[#allocation5 + $0x74] sm:$0xff] %v1655_v52   ;;  %v1691_v3 = vld [vmem:[%s11501_s22 + $0xbc] sm:$0xff]  }
  0xd9   :  { %1654 = vst [vmem:[#allocation5 + $0x70] sm:$0xf] %v1653_v51  ;;  %v1659_v53 = vld [vmem:[%s11501_s22 + $0x84] sm:$0xf]  ;;  %v1661_v54 = vld [vmem:[%s11501_s22 + $0x7c] sm:$0xf] }
  0xda   :  { %v1663_v55 = vld [vmem:[%s11501_s22 + $0x88] sm:$0xf]  ;;  %1660 = vst [vmem:[#allocation5 + $0x7c] sm:$0xf] %v1659_v53  ;;  %1662 = vst [vmem:[#allocation5 + $0x80] sm:$0xf] %v1661_v54 }
  0xdb   :  { %1664 = vst [vmem:[#allocation5 + $0x84] sm:$0xf] %v1663_v55  ;;  %v1665_v56 = vld [vmem:[%s11501_s22 + $0x80] sm:$0xf]  ;;  %v1671_v58 = vld [vmem:[%s11501_s22 + $0x9c] sm:$0xf] }
  0xdc   :  { %1666 = vst [vmem:[#allocation5 + $0x88] sm:$0xf] %v1665_v56  ;;  %1668 = vst [vmem:[#allocation5 + $0x8c] sm:$0xff] %v1667_v57   ;;  %v1673_v59 = vld [vmem:[%s11501_s22 + $0x94] sm:$0xf]  ;;  %v1679_v62 = vld [vmem:[%s11501_s22 + $0xa4] sm:$0xff]  }
  0xdd   :  { %1672 = vst [vmem:[#allocation5 + $0x94] sm:$0xf] %v1671_v58  ;;  %v1675_v60 = vld [vmem:[%s11501_s22 + $0xa0] sm:$0xf]  ;;  %v1677_v61 = vld [vmem:[%s11501_s22 + $0x98] sm:$0xf] }
  0xde   :  { %1674 = vst [vmem:[#allocation5 + $0x98] sm:$0xf] %v1673_v59  ;;  %1676 = vst [vmem:[#allocation5 + $0x9c] sm:$0xf] %v1675_v60  ;;  %v1683_v63 = vld [vmem:[%s11501_s22 + $0xb4] sm:$0xf] }
  0xdf   :  { %1678 = vst [vmem:[#allocation5 + $0xa0] sm:$0xf] %v1677_v61  ;;  %v1685_v0 = vld [vmem:[%s11501_s22 + $0xac] sm:$0xf]  ;;  %1680 = vst [vmem:[#allocation5 + $0xa4] sm:$0xff] %v1679_v62   ;;  %v1703_v8 = vld [vmem:[%s11501_s22 + $0xd4] sm:$0xff]  }
  0xe0   :  { %1684 = vst [vmem:[#allocation5 + $0xac] sm:$0xf] %v1683_v63  ;;  %1686 = vst [vmem:[#allocation5 + $0xb0] sm:$0xf] %v1685_v0  ;;  %v1687_v1 = vld [vmem:[%s11501_s22 + $0xb8] sm:$0xf] }
  0xe1   :  { %v1689_v2 = vld [vmem:[%s11501_s22 + $0xb0] sm:$0xf]  ;;  %1688 = vst [vmem:[#allocation5 + $0xb4] sm:$0xf] %v1687_v1  ;;  %1692 = vst [vmem:[#allocation5 + $0xbc] sm:$0xff] %v1691_v3   ;;  %v1727_v18 = vld [vmem:[%s11501_s22 + $0x104] sm:$0xff]  }
  0xe2   :  { %1690 = vst [vmem:[#allocation5 + $0xb8] sm:$0xf] %v1689_v2  ;;  %v1695_v4 = vld [vmem:[%s11501_s22 + $0xcc] sm:$0xf]  ;;  %v1697_v5 = vld [vmem:[%s11501_s22 + $0xc4] sm:$0xf] }
  0xe3   :  { %v1699_v6 = vld [vmem:[%s11501_s22 + $0xd0] sm:$0xf]  ;;  %1696 = vst [vmem:[#allocation5 + $0xc4] sm:$0xf] %v1695_v4  ;;  %1698 = vst [vmem:[#allocation5 + $0xc8] sm:$0xf] %v1697_v5 }
  0xe4   :  { %1700 = vst [vmem:[#allocation5 + $0xcc] sm:$0xf] %v1699_v6  ;;  %v1701_v7 = vld [vmem:[%s11501_s22 + $0xc8] sm:$0xf]  ;;  %v1707_v9 = vld [vmem:[%s11501_s22 + $0xe4] sm:$0xf] }
  0xe5   :  { %1702 = vst [vmem:[#allocation5 + $0xd0] sm:$0xf] %v1701_v7  ;;  %1704 = vst [vmem:[#allocation5 + $0xd4] sm:$0xff] %v1703_v8   ;;  %v1709_v10 = vld [vmem:[%s11501_s22 + $0xdc] sm:$0xf]  ;;  %v1715_v13 = vld [vmem:[%s11501_s22 + $0xec] sm:$0xff]  }
  0xe6   :  { %1708 = vst [vmem:[#allocation5 + $0xdc] sm:$0xf] %v1707_v9  ;;  %v1711_v11 = vld [vmem:[%s11501_s22 + $0xe8] sm:$0xf]  ;;  %v1713_v12 = vld [vmem:[%s11501_s22 + $0xe0] sm:$0xf] }
  0xe7   :  { %1710 = vst [vmem:[#allocation5 + $0xe0] sm:$0xf] %v1709_v10  ;;  %1712 = vst [vmem:[#allocation5 + $0xe4] sm:$0xf] %v1711_v11  ;;  %v1719_v14 = vld [vmem:[%s11501_s22 + $0xfc] sm:$0xf] }
  0xe8   :  { %1714 = vst [vmem:[#allocation5 + $0xe8] sm:$0xf] %v1713_v12  ;;  %v1721_v15 = vld [vmem:[%s11501_s22 + $0xf4] sm:$0xf]  ;;  %1716 = vst [vmem:[#allocation5 + $0xec] sm:$0xff] %v1715_v13   ;;  %v1739_v23 = vld [vmem:[%s11501_s22 + $0x11c] sm:$0xff]  }
  0xe9   :  { %1720 = vst [vmem:[#allocation5 + $0xf4] sm:$0xf] %v1719_v14  ;;  %1722 = vst [vmem:[#allocation5 + $0xf8] sm:$0xf] %v1721_v15  ;;  %v1723_v16 = vld [vmem:[%s11501_s22 + $0x100] sm:$0xf] }
  0xea   :  { %v1725_v17 = vld [vmem:[%s11501_s22 + $0xf8] sm:$0xf]  ;;  %1724 = vst [vmem:[#allocation5 + $0xfc] sm:$0xf] %v1723_v16  ;;  %1728 = vst [vmem:[#allocation5 + $0x104] sm:$0xff] %v1727_v18   ;;  %v1763_v33 = vld [vmem:[%s11501_s22 + $0x14c] sm:$0xff]  }
  0xeb   :  { %1726 = vst [vmem:[#allocation5 + $0x100] sm:$0xf] %v1725_v17  ;;  %v1731_v19 = vld [vmem:[%s11501_s22 + $0x114] sm:$0xf]  ;;  %v1733_v20 = vld [vmem:[%s11501_s22 + $0x10c] sm:$0xf] }
  0xec   :  { %v1735_v21 = vld [vmem:[%s11501_s22 + $0x118] sm:$0xf]  ;;  %1732 = vst [vmem:[#allocation5 + $0x10c] sm:$0xf] %v1731_v19  ;;  %1734 = vst [vmem:[#allocation5 + $0x110] sm:$0xf] %v1733_v20 }
  0xed   :  { %1736 = vst [vmem:[#allocation5 + $0x114] sm:$0xf] %v1735_v21  ;;  %v1737_v22 = vld [vmem:[%s11501_s22 + $0x110] sm:$0xf]  ;;  %v1743_v24 = vld [vmem:[%s11501_s22 + $0x12c] sm:$0xf] }
  0xee   :  { %1738 = vst [vmem:[#allocation5 + $0x118] sm:$0xf] %v1737_v22  ;;  %1740 = vst [vmem:[#allocation5 + $0x11c] sm:$0xff] %v1739_v23   ;;  %v1745_v25 = vld [vmem:[%s11501_s22 + $0x124] sm:$0xf]  ;;  %v1751_v28 = vld [vmem:[%s11501_s22 + $0x134] sm:$0xff]  }
  0xef   :  { %1744 = vst [vmem:[#allocation5 + $0x124] sm:$0xf] %v1743_v24  ;;  %v1747_v26 = vld [vmem:[%s11501_s22 + $0x130] sm:$0xf]  ;;  %v1749_v27 = vld [vmem:[%s11501_s22 + $0x128] sm:$0xf] }
  0xf0   :  { %1746 = vst [vmem:[#allocation5 + $0x128] sm:$0xf] %v1745_v25  ;;  %1748 = vst [vmem:[#allocation5 + $0x12c] sm:$0xf] %v1747_v26  ;;  %v1755_v29 = vld [vmem:[%s11501_s22 + $0x144] sm:$0xf] }
  0xf1   :  { %1750 = vst [vmem:[#allocation5 + $0x130] sm:$0xf] %v1749_v27  ;;  %v1757_v30 = vld [vmem:[%s11501_s22 + $0x13c] sm:$0xf]  ;;  %1752 = vst [vmem:[#allocation5 + $0x134] sm:$0xff] %v1751_v28   ;;  %v1775_v38 = vld [vmem:[%s11501_s22 + $0x164] sm:$0xff]  }
  0xf2   :  { %1756 = vst [vmem:[#allocation5 + $0x13c] sm:$0xf] %v1755_v29  ;;  %1758 = vst [vmem:[#allocation5 + $0x140] sm:$0xf] %v1757_v30  ;;  %v1759_v31 = vld [vmem:[%s11501_s22 + $0x148] sm:$0xf] }
  0xf3   :  { %v1761_v32 = vld [vmem:[%s11501_s22 + $0x140] sm:$0xf]  ;;  %1760 = vst [vmem:[#allocation5 + $0x144] sm:$0xf] %v1759_v31  ;;  %1764 = vst [vmem:[#allocation5 + $0x14c] sm:$0xff] %v1763_v33   ;;  %v1799_v48 = vld [vmem:[%s11501_s22 + $0x194] sm:$0xff]  }
  0xf4   :  { %1762 = vst [vmem:[#allocation5 + $0x148] sm:$0xf] %v1761_v32  ;;  %v1767_v34 = vld [vmem:[%s11501_s22 + $0x15c] sm:$0xf]  ;;  %v1769_v35 = vld [vmem:[%s11501_s22 + $0x154] sm:$0xf] }
  0xf5   :  { %v1771_v36 = vld [vmem:[%s11501_s22 + $0x160] sm:$0xf]  ;;  %1768 = vst [vmem:[#allocation5 + $0x154] sm:$0xf] %v1767_v34  ;;  %1770 = vst [vmem:[#allocation5 + $0x158] sm:$0xf] %v1769_v35 }
  0xf6   :  { %1772 = vst [vmem:[#allocation5 + $0x15c] sm:$0xf] %v1771_v36  ;;  %v1773_v37 = vld [vmem:[%s11501_s22 + $0x158] sm:$0xf]  ;;  %v1779_v39 = vld [vmem:[%s11501_s22 + $0x174] sm:$0xf] }
  0xf7   :  { %1774 = vst [vmem:[#allocation5 + $0x160] sm:$0xf] %v1773_v37  ;;  %1776 = vst [vmem:[#allocation5 + $0x164] sm:$0xff] %v1775_v38   ;;  %v1781_v40 = vld [vmem:[%s11501_s22 + $0x16c] sm:$0xf]  ;;  %v1787_v43 = vld [vmem:[%s11501_s22 + $0x17c] sm:$0xff]  }
  0xf8   :  { %1780 = vst [vmem:[#allocation5 + $0x16c] sm:$0xf] %v1779_v39  ;;  %v1783_v41 = vld [vmem:[%s11501_s22 + $0x178] sm:$0xf]  ;;  %v1785_v42 = vld [vmem:[%s11501_s22 + $0x170] sm:$0xf] }
  0xf9   :  { %1782 = vst [vmem:[#allocation5 + $0x170] sm:$0xf] %v1781_v40  ;;  %1784 = vst [vmem:[#allocation5 + $0x174] sm:$0xf] %v1783_v41  ;;  %v1791_v44 = vld [vmem:[%s11501_s22 + $0x18c] sm:$0xf] }
  0xfa   :  { %1786 = vst [vmem:[#allocation5 + $0x178] sm:$0xf] %v1785_v42  ;;  %v1793_v45 = vld [vmem:[%s11501_s22 + $0x184] sm:$0xf]  ;;  %1788 = vst [vmem:[#allocation5 + $0x17c] sm:$0xff] %v1787_v43   ;;  %v1811_v53 = vld [vmem:[%s11501_s22 + $0x1ac] sm:$0xff]  }
  0xfb   :  { %1792 = vst [vmem:[#allocation5 + $0x184] sm:$0xf] %v1791_v44  ;;  %1794 = vst [vmem:[#allocation5 + $0x188] sm:$0xf] %v1793_v45  ;;  %v1795_v46 = vld [vmem:[%s11501_s22 + $0x190] sm:$0xf] }
  0xfc   :  { %v1797_v47 = vld [vmem:[%s11501_s22 + $0x188] sm:$0xf]  ;;  %1796 = vst [vmem:[#allocation5 + $0x18c] sm:$0xf] %v1795_v46  ;;  %1800 = vst [vmem:[#allocation5 + $0x194] sm:$0xff] %v1799_v48   ;;  %v1835_v63 = vld [vmem:[%s11501_s22 + $0x1dc] sm:$0xff]  }
  0xfd   :  { %1798 = vst [vmem:[#allocation5 + $0x190] sm:$0xf] %v1797_v47  ;;  %v1803_v49 = vld [vmem:[%s11501_s22 + $0x1a4] sm:$0xf]  ;;  %v1805_v50 = vld [vmem:[%s11501_s22 + $0x19c] sm:$0xf] }
  0xfe   :  { %v1807_v51 = vld [vmem:[%s11501_s22 + $0x1a8] sm:$0xf]  ;;  %1804 = vst [vmem:[#allocation5 + $0x19c] sm:$0xf] %v1803_v49  ;;  %1806 = vst [vmem:[#allocation5 + $0x1a0] sm:$0xf] %v1805_v50 }
  0xff   :  { %1808 = vst [vmem:[#allocation5 + $0x1a4] sm:$0xf] %v1807_v51  ;;  %v1809_v52 = vld [vmem:[%s11501_s22 + $0x1a0] sm:$0xf]  ;;  %v1815_v54 = vld [vmem:[%s11501_s22 + $0x1bc] sm:$0xf] }
 0x100   :  { %1810 = vst [vmem:[#allocation5 + $0x1a8] sm:$0xf] %v1809_v52  ;;  %1812 = vst [vmem:[#allocation5 + $0x1ac] sm:$0xff] %v1811_v53   ;;  %v1817_v55 = vld [vmem:[%s11501_s22 + $0x1b4] sm:$0xf]  ;;  %v1823_v58 = vld [vmem:[%s11501_s22 + $0x1c4] sm:$0xff]  }
 0x101   :  { %1816 = vst [vmem:[#allocation5 + $0x1b4] sm:$0xf] %v1815_v54  ;;  %v1819_v56 = vld [vmem:[%s11501_s22 + $0x1c0] sm:$0xf]  ;;  %v1821_v57 = vld [vmem:[%s11501_s22 + $0x1b8] sm:$0xf] }
 0x102   :  { %1818 = vst [vmem:[#allocation5 + $0x1b8] sm:$0xf] %v1817_v55  ;;  %1820 = vst [vmem:[#allocation5 + $0x1bc] sm:$0xf] %v1819_v56  ;;  %v1827_v59 = vld [vmem:[%s11501_s22 + $0x1d4] sm:$0xf] }
 0x103   :  { %1822 = vst [vmem:[#allocation5 + $0x1c0] sm:$0xf] %v1821_v57  ;;  %v1829_v60 = vld [vmem:[%s11501_s22 + $0x1cc] sm:$0xf]  ;;  %1824 = vst [vmem:[#allocation5 + $0x1c4] sm:$0xff] %v1823_v58   ;;  %v1847_v4 = vld [vmem:[%s11501_s22 + $0x1f4] sm:$0xff]  }
 0x104   :  { %1828 = vst [vmem:[#allocation5 + $0x1cc] sm:$0xf] %v1827_v59  ;;  %1830 = vst [vmem:[#allocation5 + $0x1d0] sm:$0xf] %v1829_v60  ;;  %v1831_v61 = vld [vmem:[%s11501_s22 + $0x1d8] sm:$0xf] }
 0x105   :  { %v1833_v62 = vld [vmem:[%s11501_s22 + $0x1d0] sm:$0xf]  ;;  %1832 = vst [vmem:[#allocation5 + $0x1d4] sm:$0xf] %v1831_v61  ;;  %1836 = vst [vmem:[#allocation5 + $0x1dc] sm:$0xff] %v1835_v63   ;;  %v1871_v14 = vld [vmem:[%s11501_s22 + $0x224] sm:$0xff]  }
 0x106   :  { %1834 = vst [vmem:[#allocation5 + $0x1d8] sm:$0xf] %v1833_v62  ;;  %v1839_v0 = vld [vmem:[%s11501_s22 + $0x1ec] sm:$0xf]  ;;  %v1841_v1 = vld [vmem:[%s11501_s22 + $0x1e4] sm:$0xf] }
 0x107   :  { %v1843_v2 = vld [vmem:[%s11501_s22 + $0x1f0] sm:$0xf]  ;;  %1840 = vst [vmem:[#allocation5 + $0x1e4] sm:$0xf] %v1839_v0  ;;  %1842 = vst [vmem:[#allocation5 + $0x1e8] sm:$0xf] %v1841_v1 }
 0x108   :  { %1844 = vst [vmem:[#allocation5 + $0x1ec] sm:$0xf] %v1843_v2  ;;  %v1845_v3 = vld [vmem:[%s11501_s22 + $0x1e8] sm:$0xf]  ;;  %v1851_v5 = vld [vmem:[%s11501_s22 + $0x204] sm:$0xf] }
 0x109   :  { %1846 = vst [vmem:[#allocation5 + $0x1f0] sm:$0xf] %v1845_v3  ;;  %1848 = vst [vmem:[#allocation5 + $0x1f4] sm:$0xff] %v1847_v4   ;;  %v1853_v6 = vld [vmem:[%s11501_s22 + $0x1fc] sm:$0xf]  ;;  %v1859_v9 = vld [vmem:[%s11501_s22 + $0x20c] sm:$0xff]  }
 0x10a   :  { %1852 = vst [vmem:[#allocation5 + $0x1fc] sm:$0xf] %v1851_v5  ;;  %v1855_v7 = vld [vmem:[%s11501_s22 + $0x208] sm:$0xf]  ;;  %v1857_v8 = vld [vmem:[%s11501_s22 + $0x200] sm:$0xf] }
 0x10b   :  { %1854 = vst [vmem:[#allocation5 + $0x200] sm:$0xf] %v1853_v6  ;;  %1856 = vst [vmem:[#allocation5 + $0x204] sm:$0xf] %v1855_v7  ;;  %v1863_v10 = vld [vmem:[%s11501_s22 + $0x21c] sm:$0xf] }
 0x10c   :  { %1858 = vst [vmem:[#allocation5 + $0x208] sm:$0xf] %v1857_v8  ;;  %v1865_v11 = vld [vmem:[%s11501_s22 + $0x214] sm:$0xf]  ;;  %1860 = vst [vmem:[#allocation5 + $0x20c] sm:$0xff] %v1859_v9  }
 0x10d   :  { %1864 = vst [vmem:[#allocation5 + $0x214] sm:$0xf] %v1863_v10  ;;  %1866 = vst [vmem:[#allocation5 + $0x218] sm:$0xf] %v1865_v11  ;;  %v1867_v12 = vld [vmem:[%s11501_s22 + $0x220] sm:$0xf] }
 0x10e   :  { %v1869_v13 = vld [vmem:[%s11501_s22 + $0x218] sm:$0xf]  ;;  %1868 = vst [vmem:[#allocation5 + $0x21c] sm:$0xf] %v1867_v12  ;;  %1872 = vst [vmem:[#allocation5 + $0x224] sm:$0xff] %v1871_v14  }
 0x10f   :  { %1870 = vst [vmem:[#allocation5 + $0x220] sm:$0xf] %v1869_v13  ;;  %v1875_v15 = vld [vmem:[%s11501_s22 + $0x234] sm:$0xf]  ;;  %v1877_v16 = vld [vmem:[%s11501_s22 + $0x22c] sm:$0xf] }
 0x110   :  { %v1879_v17 = vld [vmem:[%s11501_s22 + $0x238] sm:$0xf]  ;;  %1876 = vst [vmem:[#allocation5 + $0x22c] sm:$0xf] %v1875_v15  ;;  %1878 = vst [vmem:[#allocation5 + $0x230] sm:$0xf] %v1877_v16 }
 0x111   :  { %1880 = vst [vmem:[#allocation5 + $0x234] sm:$0xf] %v1879_v17  ;;  %v1881_v18 = vld [vmem:[%s11501_s22 + $0x230] sm:$0xf]  ;;  %v1883_v19 = vld [vmem:[%s11501_s22 + $0x23c] sm:$0xf] }
 0x112   :  { %1882 = vst [vmem:[#allocation5 + $0x238] sm:$0xf] %v1881_v18  ;;  %1884 = vst [vmem:[#allocation5 + $0x23c] sm:$0xf] %v1883_v19 }
 0x113   :  { %2203 = vsyncadd [#allocation7 + $0x3], 9216  ;;  %v9796_v20 = vld [vmem:[%s11502_s23] sm:$0xff]  ;;  %v9801_v21 = vld [vmem:[%s11502_s23 + $0x8] sm:$0xff] }
 0x114   :  { %11576 = vst [vmem:[#allocation24_spill] sm:$0xff] %v9796_v20  ;;  %11577 = vst [vmem:[#allocation25_spill] sm:$0xff] %v9801_v21  ;;  %v9806_v22 = vld [vmem:[%s11502_s23 + $0x10] sm:$0xff]  ;;  %v9811_v23 = vld [vmem:[%s11502_s23 + $0x18] sm:$0xff] }
 0x115   :  { %11578 = vst [vmem:[#allocation26_spill] sm:$0xff] %v9806_v22  ;;  %11579 = vst [vmem:[#allocation27_spill] sm:$0xff] %v9811_v23  ;;  %v9816_v24 = vld [vmem:[%s11502_s23 + $0x20] sm:$0xff]  ;;  %v9821_v25 = vld [vmem:[%s11502_s23 + $0x28] sm:$0xff] }
 0x116   :  { %11580 = vst [vmem:[#allocation28_spill] sm:$0xff] %v9816_v24  ;;  %11581 = vst [vmem:[#allocation29_spill] sm:$0xff] %v9821_v25  ;;  %v9826_v26 = vld [vmem:[%s11502_s23 + $0x30] sm:$0xff]  ;;  %v9831_v27 = vld [vmem:[%s11502_s23 + $0x38] sm:$0xff] }
 0x117   :  { %11582 = vst [vmem:[#allocation30_spill] sm:$0xff] %v9826_v26  ;;  %11583 = vst [vmem:[#allocation31_spill] sm:$0xff] %v9831_v27  ;;  %v9836_v28 = vld [vmem:[%s11502_s23 + $0x40] sm:$0xff]  ;;  %v9841_v29 = vld [vmem:[%s11502_s23 + $0x48] sm:$0xff] }
 0x118   :  { %11584 = vst [vmem:[#allocation32_spill] sm:$0xff] %v9836_v28  ;;  %11585 = vst [vmem:[#allocation33_spill] sm:$0xff] %v9841_v29  ;;  %v9846_v30 = vld [vmem:[%s11502_s23 + $0x50] sm:$0xff]  ;;  %v9851_v31 = vld [vmem:[%s11502_s23 + $0x58] sm:$0xff] }
 0x119   :  { %11586 = vst [vmem:[#allocation34_spill] sm:$0xff] %v9846_v30  ;;  %11587 = vst [vmem:[#allocation35_spill] sm:$0xff] %v9851_v31  ;;  %v9856_v32 = vld [vmem:[%s11502_s23 + $0x60] sm:$0xff]  ;;  %v9861_v33 = vld [vmem:[%s11502_s23 + $0x68] sm:$0xff] }
 0x11a   :  { %11588 = vst [vmem:[#allocation36_spill] sm:$0xff] %v9856_v32  ;;  %11589 = vst [vmem:[#allocation37_spill] sm:$0xff] %v9861_v33  ;;  %v9866_v34 = vld [vmem:[%s11502_s23 + $0x70] sm:$0xff]  ;;  %v9871_v35 = vld [vmem:[%s11502_s23 + $0x78] sm:$0xff] }
 0x11b   :  { %11590 = vst [vmem:[#allocation38_spill] sm:$0xff] %v9866_v34  ;;  %11591 = vst [vmem:[#allocation39_spill] sm:$0xff] %v9871_v35  ;;  %v9876_v36 = vld [vmem:[%s11502_s23 + $0x80] sm:$0xff]  ;;  %v9881_v37 = vld [vmem:[%s11502_s23 + $0x88] sm:$0xff] }
 0x11c   :  { %11592 = vst [vmem:[#allocation40_spill] sm:$0xff] %v9876_v36  ;;  %11593 = vst [vmem:[#allocation41_spill] sm:$0xff] %v9881_v37  ;;  %v9886_v38 = vld [vmem:[%s11502_s23 + $0x90] sm:$0xff]  ;;  %v9891_v39 = vld [vmem:[%s11502_s23 + $0x98] sm:$0xff] }
 0x11d   :  { %11594 = vst [vmem:[#allocation42_spill] sm:$0xff] %v9886_v38  ;;  %11595 = vst [vmem:[#allocation43_spill] sm:$0xff] %v9891_v39  ;;  %v9896_v40 = vld [vmem:[%s11502_s23 + $0xa0] sm:$0xff]  ;;  %v9901_v41 = vld [vmem:[%s11502_s23 + $0xa8] sm:$0xff] }
 0x11e   :  { %11596 = vst [vmem:[#allocation44_spill] sm:$0xff] %v9896_v40  ;;  %11597 = vst [vmem:[#allocation45_spill] sm:$0xff] %v9901_v41  ;;  %v9906_v42 = vld [vmem:[%s11502_s23 + $0xb0] sm:$0xff]  ;;  %v9911_v43 = vld [vmem:[%s11502_s23 + $0xb8] sm:$0xff] }
 0x11f   :  { %11598 = vst [vmem:[#allocation46_spill] sm:$0xff] %v9906_v42  ;;  %11599 = vst [vmem:[#allocation47_spill] sm:$0xff] %v9911_v43 }
 0x120   :  { %2292 = vsyncadd [#allocation7 + $0x4], 3072  ;;  %v9916_v44 = vld [vmem:[%s11495_s16 + $0x8] sm:$0x7]  ;;  %v9921_v45 = vld [vmem:[%s11496_s17] sm:$0xff]  ;;  %v11513_v49 = vmov 0.0   ;;  %v11512_v0 = vlaneseq  ;;  %v2363_v6 = vstv %s8567_s2  ;;  %v10402_v39 = vstv %s8574_s18 }
 0x121   :  { %11600 = vst [vmem:[#allocation48_spill] sm:$0xff] %v9916_v44  ;;  %11601 = vst [vmem:[#allocation49_spill] sm:$0xff] %v9921_v45  ;;  %v9926_v46 = vld [vmem:[%s11496_s17 + $0x8] sm:$0xff]  ;;  %v9931_v47 = vld [vmem:[%s11496_s17 + $0x10] sm:$0xff]  ;;  %7671 = vmatprep.subr.bf16.mxu0 %v11513_v49  ;;  %7677 = vmatprep.subr.bf16.mxu1 %v11513_v49  ;;  %vm8430_vm0 = vmmov 0   ;;  %s11607_s22 = sld [smem:[#allocation85_spill]] }
 0x122   :  { %11602 = vst [vmem:[#allocation50_spill] sm:$0xff] %v9926_v46  ;;  %11603 = vst [vmem:[#allocation51_spill] sm:$0xff] %v9931_v47  ;;  %v9936_v48 = vld [vmem:[%s11496_s17 + $0x18] sm:$0xf]  ;;  %v9943_v50 = vld [vmem:[%s11496_s17 + $0x20] sm:$0xf]  ;;  %7673 = vmatprep.mubr.msk.bf16.mxu0 %vm8430_vm0, %v11513_v49  ;;  %7693 = vmatprep.mubr.msk.bf16.mxu1 %vm8430_vm0, %v11513_v49 }
 0x123   :  { %11604 = vst [vmem:[#allocation52_spill] sm:$0xff] %v9936_v48  ;;  %11605 = vst [vmem:[#allocation53_spill] sm:$0xff] %v9943_v50  ;;  %v9948_v51 = vld [vmem:[%s11496_s17 + $0x28] sm:$0xf]  ;;  %s11608_s6 = sld [smem:[#allocation78_spill]]  ;;  %vm2316_vm1 = vcmask 130048  }
 0x124   :  { %11606 = vst [vmem:[#allocation54_spill] sm:$0xff] %v9948_v51  ;;  %s11609_s23 = sld [smem:[#allocation86_spill]]  ;;  %v10000_v1 = vshrl.u32 %v11512_v0, 7  ;;  %v10008_v3 = vld [vmem:[%s11495_s16] sm:$0xff]  ;;  %v8181_v18 = vld [vmem:[%s11488_s9 + $0x8] sm:$0xff]   ;;  %v8182_v19 = vld [vmem:[%s11488_s9 + $0x10] sm:$0xff]  }
 0x125   :  { %v8180_v17 = vld [vmem:[%s11488_s9] sm:$0xff]   ;;  %vm2901_vm6 = vcmask 1043456   ;;  %vm2894_vm7 = vcmask 64512   ;;  %s11621_s1 = sld [smem:[#allocation80_spill]]  ;;  %vm3155_vm8 = vcmask 261120   ;;  %v10389_v25 = vld [vmem:[%s11493_s14 + $0x30] sm:$0xff]  }
 0x126   :  { %v10003_v2 = vsub.s32 0, %v10000_v1  ;;  %v11515_v41 = vmov 0   ;;  %v10398_v33 = vld [vmem:[%s11493_s14 + $0x38] sm:$0xff]   ;;  %s11632_s24 = sld [smem:[#allocation84_spill]]  ;;  %vm3418_vm13 = vcmask 15360   ;;  %vm3611_vm14 = vcmask 1040384  }
 0x127   :  { %v8171_v52 = vld [vmem:[%s11607_s22] sm:$0xff]   ;;  %8151 = vset.pattern.permute.xlu0 %v11515_v41  ;;  %8152 = vset.pattern.permute.xlu1 %v11515_v41  ;;  %s7295_s28 = sld [smem:[#allocation8 + $0x9]] }
 0x128   :  { %7672 = vmatpush3.bf16.msra.mxu0 %v8171_v52  ;;  %11610 = vst [vmem:[#allocation55_spill] sm:$0xff] %v10003_v2  ;;  %v2309_v4 = vrot.slane %v10008_v3, %v10003_v2  ;;  %v8183_v52 = vld [vmem:[%s11488_s9 + $0x18] sm:$0xff]  }
 0x129   :  { %v2301_v53 = vld [vmem:[%s11608_s6] sm:$0xff]  ;;  %v2302_v54 = vld [vmem:[%s11608_s6 + $0x8] sm:$0xff]  ;;  %7697 = vmatprep.subr.bf16.mxu0 %v11513_v49  ;;  %s11622_s6 = sld [smem:[#allocation83_spill]] }
 0x12a   :  { %v2303_v55 = vpack.c.bf16 %v2302_v54, %v2301_v53  ;;  %v8172_v56 = vld [vmem:[%s11609_s23] sm:$0xff]   ;;  %v8173_v57 = vld [vmem:[%s11609_s23 + $0x8] sm:$0xff]   ;;  %v8174_v58 = vld [vmem:[%s11609_s23 + $0x10] sm:$0xff]  }
 0x12b   :  { %7678 = vmatpush3.bf16.msra.mxu1 %v8172_v56  ;;  %v8175_v59 = vld [vmem:[%s11609_s23 + $0x18] sm:$0xff]   ;;  %v8176_v60 = vld [vmem:[%s11609_s23 + $0x20] sm:$0xff]   ;;  %v8177_v61 = vld [vmem:[%s11609_s23 + $0x28] sm:$0xff]  }
 0x12c   :  { %7674 = vmatmul.mubr.msk.bf16.vlgmr.msra.gmra.mrb[0].mxu0 %vm2316_vm1, %v2303_v55  ;;  %7679 = vmatprep.subr.bf16.mxu1 %v11513_v49  ;;  %v8178_v62 = vld [vmem:[%s11609_s23 + $0x30] sm:$0xff]   ;;  %v8179_v63 = vld [vmem:[%s11609_s23 + $0x38] sm:$0xff]   ;;  %v8184_v53 = vld [vmem:[%s11488_s9 + $0x20] sm:$0xff]  }
 0x12d   :  { %7713 = vmatprep.mubr.msk.bf16.mxu0 %vm8430_vm0, %v11513_v49  ;;  %7698 = vmatpush3.bf16.msra.mxu0 %v8180_v17  ;;  %v8185_v54 = vld [vmem:[%s11488_s9 + $0x28] sm:$0xff]   ;;  %v8186_v55 = vld [vmem:[%s11488_s9 + $0x30] sm:$0xff]   ;;  %v8187_v56 = vld [vmem:[%s11488_s9 + $0x38] sm:$0xff]  }
 0x12e   :  { %7699 = vmatprep.subr.bf16.mxu0 %v11513_v49 }
 0x12f   :  { %7680 = vmatpush3.bf16.msra.mxu1 %v8173_v57  ;;  %v10048_v57 = vsub.s32 1, %v10000_v1 }
 0x130   :  { %7681 = vmatprep.subr.bf16.mxu1 %v11513_v49 }
 0x131   :  { %7700 = vmatpush3.bf16.msra.mxu0 %v8181_v18  ;;  %11611 = vst [vmem:[#allocation56_spill] sm:$0xff] %v10048_v57 }
 0x132   :  { %7701 = vmatprep.subr.bf16.mxu0 %v11513_v49 }
 0x133   :  { %7682 = vmatpush3.bf16.msra.mxu1 %v8174_v58  ;;  %v2388_v58 = vrot.slane %v10008_v3, %v10048_v57 }
 0x134   :  { %7683 = vmatprep.subr.bf16.mxu1 %v11513_v49 }
 0x135   :  { %7702 = vmatpush3.bf16.msra.mxu0 %v8182_v19 }
 0x136   :  { %7703 = vmatprep.subr.bf16.mxu0 %v11513_v49 }
 0x137   :  { %7684 = vmatpush3.bf16.msra.mxu1 %v8175_v59 }
 0x138   :  { %7685 = vmatprep.subr.bf16.mxu1 %v11513_v49 }
 0x139   :  { %7704 = vmatpush3.bf16.msra.mxu0 %v8183_v52 }
 0x13a   :  { %7705 = vmatprep.subr.bf16.mxu0 %v11513_v49 }
 0x13b   :  { %7686 = vmatpush3.bf16.msra.mxu1 %v8176_v60 }
 0x13c   :  { %7687 = vmatprep.subr.bf16.mxu1 %v11513_v49 }
 0x13d   :  { %7706 = vmatpush3.bf16.msra.mxu0 %v8184_v53 }
 0x13e   :  { %7707 = vmatprep.subr.bf16.mxu0 %v11513_v49 }
 0x13f   :  { %7688 = vmatpush3.bf16.msra.mxu1 %v8177_v61 }
 0x140   :  { %7689 = vmatprep.subr.bf16.mxu1 %v11513_v49 }
 0x141   :  { %7708 = vmatpush3.bf16.msra.mxu0 %v8185_v54 }
 0x142   :  { %7709 = vmatprep.subr.bf16.mxu0 %v11513_v49 }
 0x143   :  { %7690 = vmatpush3.bf16.msra.mxu1 %v8178_v62 }
 0x144   :  { %7691 = vmatprep.subr.bf16.mxu1 %v11513_v49 }
 0x145   :  { %7710 = vmatpush3.bf16.msra.mxu0 %v8186_v55 }
 0x146   :  { %7711 = vmatprep.subr.bf16.mxu0 %v11513_v49 }
 0x147   :  { %7692 = vmatpush3.bf16.msra.mxu1 %v8179_v63 }
 0x148   :  { %7717 = vmatprep.subr.bf16.mxu1 %v11513_v49 }
 0x149   :  { %7712 = vmatpush3.bf16.msra.mxu0 %v8187_v56 }
 0x14a   :  { %7737 = vmatprep.subr.bf16.mxu0 %v11513_v49 }
 0x1ff   :  { %v2354_v5 = vpop.f32.mrb[0].mxu0 }
 0x200   :  { %v2355_v7 = vadd.f32 %v2354_v5, %v2309_v4  ;;  %v7675_v8 = vpop.f32.mrb[1].mxu0 }
 0x201   :  { %v2357_v9 = vpop.f32.mrb[2].mxu0 }
 0x202   :  { %v2364_v10 = vmul.f32 %v2363_v6, %v2355_v7  ;;  %v2358_v11 = vadd.f32 %v2357_v9, %v2309_v4  ;;  %v7676_v12 = vpop.f32.mrb[3].mxu0  ;;  %vm2361_vm2 = vcmp.ge.f32.partialorder %v2355_v7, 0.0 }
 0x204   :  { %vm2362_vm3 = vcmp.ge.f32.partialorder %v2358_v11, 0.0  ;;  %v2365_v13 = vmul.f32 %v2363_v6, %v2358_v11  ;;  %v2366_v14 = vsel %vm2361_vm2, %v2355_v7, %v2364_v10 }
 0x206   :  { %v2367_v15 = vsel %vm2362_vm3, %v2358_v11, %v2365_v13 }
 0x207   :  { %v2368_v16 = vpack.c.bf16 %v2367_v15, %v2366_v14 }
 0x209   :  { %7694 = vmatmul.mubr.bf16.vlgmr.msra.gmra.mrb[0].mxu1 %v2368_v16 }
 0x20a   :  { %7733 = vmatprep.mubr.msk.bf16.mxu1 %vm8430_vm0, %v11513_v49 }
 0x2dc   :  { %v2471_v59 = vpop.f32.mrb[0].mxu1 }
 0x2dd   :  { %v7695_v60 = vpop.f32.mrb[1].mxu1  ;;  %v2472_v62 = vadd.f32 %v2471_v59, %v2388_v58  ;;  %v10053_v59 = vsub.s32 2, %v10000_v1 }
 0x2de   :  { %v2474_v61 = vpop.f32.mrb[2].mxu1 }
 0x2df   :  { %v2475_v63 = vadd.f32 %v2474_v61, %v2388_v58  ;;  %v7696_v4 = vpop.f32.mrb[3].mxu1  ;;  %11612 = vst [vmem:[#allocation57_spill] sm:$0xff] %v10053_v59 }
 0x2e1   :  { %v2478_v5 = vadd.f32 %v2475_v63, %v2472_v62 }
 0x2e3   :  { %v2479_v6 = vrot.slane %v2478_v5, 4 }
 0x2e5   :  { %v2480_v7 = vadd.f32 %v2479_v6, %v2478_v5 }
 0x2e7   :  { %v2481_v8 = vrot.slane %v2480_v7, 2 }
 0x2e9   :  { %v2482_v9 = vadd.f32 %v2481_v8, %v2480_v7 }
 0x2eb   :  { %v2483_v10 = vrot.slane %v2482_v9, 1 }
 0x2ed   :  { %v2484_v11 = vadd.f32 %v2483_v10, %v2482_v9  ;;  %v10058_v9 = vsub.s32 3, %v10000_v1 }
 0x2ef   :  { %v2486_v12 = vmul.f32 0.0625, %v2484_v11  ;;  %11613 = vst [vmem:[#allocation58_spill] sm:$0xff] %v10058_v9 }
 0x2f1   :  { %v2487_v13 = vsub.f32 %v2472_v62, %v2486_v12  ;;  %v2488_v14 = vsub.f32 %v2475_v63, %v2486_v12 }
 0x2f3   :  { %v2489_v15 = vmul.f32 %v2487_v13, %v2487_v13  ;;  %v2490_v16 = vmul.f32 %v2488_v14, %v2488_v14  ;;  %v2521_v13 = vstv %s8569_s29  ;;  %s11620_s29 = sld [smem:[#allocation81_spill]] }
 0x2f5   :  { %v2491_v17 = vadd.f32 %v2490_v16, %v2489_v15 }
 0x2f7   :  { %v2492_v18 = vrot.slane %v2491_v17, 4 }
 0x2f9   :  { %v2493_v19 = vadd.f32 %v2492_v18, %v2491_v17 }
 0x2fb   :  { %v2494_v52 = vrot.slane %v2493_v19, 2 }
 0x2fd   :  { %v2495_v53 = vadd.f32 %v2494_v52, %v2493_v19  ;;  %v8190_v52 = vld [vmem:[%s11489_s10 + $0x8] sm:$0xff]  }
 0x2ff   :  { %v2496_v54 = vrot.slane %v2495_v53, 1 }
 0x301   :  { %v2497_v55 = vadd.f32 %v2496_v54, %v2495_v53  ;;  %v8191_v53 = vld [vmem:[%s11490_s11 + $0x8] sm:$0xff]   ;;  %v8192_v54 = vld [vmem:[%s11489_s10 + $0x10] sm:$0xff]  }
 0x303   :  { %v2498_v56 = vmul.f32 0.0625, %v2497_v55  ;;  %v8193_v55 = vld [vmem:[%s11490_s11 + $0x10] sm:$0xff]  }
 0x305   :  { %v2499_v58 = vadd.f32 1e-05, %v2498_v56  ;;  %v8194_v56 = vld [vmem:[%s11489_s10 + $0x18] sm:$0xff]  }
 0x307   :  { %8259 = vrsqrt.f32 %v2499_v58  ;;  %v8195_v58 = vld [vmem:[%s11490_s11 + $0x18] sm:$0xff]  }
 0x311   :  { %v8260_v60 = vpop.eup %8259 }
 0x312   :  { %v2501_v61 = vmul.f32 %v8260_v60, %v10008_v3  ;;  %v8196_v60 = vld [vmem:[%s11489_s10 + $0x20] sm:$0xff]  }
 0x314   :  { %v2505_v4 = vrot.slane %v2501_v61, %v10053_v59  ;;  %v2508_v5 = vmul.f32 %v2501_v61, %v2486_v12  ;;  %v8197_v61 = vld [vmem:[%s11490_s11 + $0x20] sm:$0xff]  }
 0x316   :  { %v2506_v6 = vmul.f32 %v2505_v4, %v2472_v62  ;;  %v2507_v7 = vmul.f32 %v2505_v4, %v2475_v63  ;;  %v2510_v8 = vrot.slane %v2508_v5, 7  ;;  %v8188_v62 = vld [vmem:[%s11489_s10] sm:$0xff]   ;;  %v8198_v4 = vld [vmem:[%s11489_s10 + $0x28] sm:$0xff]  }
 0x317   :  { %v8189_v63 = vld [vmem:[%s11490_s11] sm:$0xff]   ;;  %7718 = vmatpush3.bf16.msra.mxu1 %v8188_v62  ;;  %v8199_v5 = vld [vmem:[%s11490_s11 + $0x28] sm:$0xff]  }
 0x318   :  { %v2512_v10 = vsub.f32 %v10008_v3, %v2510_v8  ;;  %7719 = vmatprep.subr.bf16.mxu1 %v11513_v49  ;;  %v8202_v8 = vld [vmem:[%s11489_s10 + $0x38] sm:$0xff]  }
 0x31a   :  { %v2516_v11 = vrot.slane %v2512_v10, %v10058_v9  ;;  %v8203_v10 = vld [vmem:[%s11490_s11 + $0x38] sm:$0xff]  }
 0x31b   :  { %7720 = vmatpush3.bf16.msra.mxu1 %v8190_v52 }
 0x31c   :  { %v2517_v14 = vadd.f32 %v2516_v11, %v2506_v6  ;;  %v2518_v15 = vadd.f32 %v2516_v11, %v2507_v7  ;;  %7721 = vmatprep.subr.bf16.mxu1 %v11513_v49  ;;  %v8200_v6 = vld [vmem:[%s11489_s10 + $0x30] sm:$0xff]   ;;  %v2893_v11 = vld [vmem:[%s11491_s12] sm:$0xf]  ;;  %s11617_s12 = sld [smem:[#allocation79_spill]]  ;;  %s7296_s10 = sld [smem:[#allocation8 + $0xa]] }
 0x31d   :  { %v8201_v7 = vld [vmem:[%s11490_s11 + $0x30] sm:$0xff]  }
 0x31e   :  { %v2523_v16 = vmul.f32 %v2521_v13, %v2518_v15  ;;  %vm2519_vm4 = vcmp.ge.f32.partialorder %v2517_v14, 0.0  ;;  %vm2520_vm5 = vcmp.ge.f32.partialorder %v2518_v15, 0.0  ;;  %v2522_v17 = vmul.f32 %v2521_v13, %v2517_v14 }
 0x31f   :  { %7722 = vmatpush3.bf16.msra.mxu1 %v8192_v54  ;;  %v2903_v13 = vsel %vm2901_vm6, %v2893_v11, 0 }
 0x320   :  { %v2524_v18 = vsel %vm2519_vm4, %v2517_v14, %v2522_v17  ;;  %v2525_v19 = vsel %vm2520_vm5, %v2518_v15, %v2523_v16  ;;  %7723 = vmatprep.subr.bf16.mxu1 %v11513_v49  ;;  %v10131_v14 = vsub.s32 4, %v10000_v1  ;;  %vm5275_vm4 = vcmask 25600  }
 0x321   :  { %v2526_v12 = vpack.c.bf16 %v2525_v19, %v2524_v18 }
 0x322   :  { %11614 = vst [vmem:[#allocation59_spill] sm:$0xff] %v10131_v14  ;;  %v2546_v15 = vrot.slane %v10008_v3, %v10131_v14 }
 0x323   :  { %7714 = vmatmul.mubr.bf16.vlgmr.msra.gmra.mrb[4].mxu0 %v2526_v12  ;;  %7724 = vmatpush3.bf16.msra.mxu1 %v8194_v56 }
 0x324   :  { %7753 = vmatprep.mubr.msk.bf16.mxu0 %vm8430_vm0, %v11513_v49  ;;  %7738 = vmatpush3.bf16.msra.mxu0 %v8189_v63 }
 0x325   :  { %7739 = vmatprep.subr.bf16.mxu0 %v11513_v49  ;;  %7725 = vmatprep.subr.bf16.mxu1 %v11513_v49 }
 0x327   :  { %7726 = vmatpush3.bf16.msra.mxu1 %v8196_v60 }
 0x328   :  { %7740 = vmatpush3.bf16.msra.mxu0 %v8191_v53  ;;  %7727 = vmatprep.subr.bf16.mxu1 %v11513_v49 }
 0x329   :  { %7741 = vmatprep.subr.bf16.mxu0 %v11513_v49 }
 0x32b   :  { %7728 = vmatpush3.bf16.msra.mxu1 %v8198_v4 }
 0x32c   :  { %7742 = vmatpush3.bf16.msra.mxu0 %v8193_v55  ;;  %7729 = vmatprep.subr.bf16.mxu1 %v11513_v49 }
 0x32d   :  { %7743 = vmatprep.subr.bf16.mxu0 %v11513_v49 }
 0x32f   :  { %7730 = vmatpush3.bf16.msra.mxu1 %v8200_v6 }
 0x330   :  { %7744 = vmatpush3.bf16.msra.mxu0 %v8195_v58  ;;  %7731 = vmatprep.subr.bf16.mxu1 %v11513_v49 }
 0x331   :  { %7745 = vmatprep.subr.bf16.mxu0 %v11513_v49 }
 0x333   :  { %7732 = vmatpush3.bf16.msra.mxu1 %v8202_v8 }
 0x334   :  { %7746 = vmatpush3.bf16.msra.mxu0 %v8197_v61  ;;  %8139 = vmatprep.subr.msk.bf16.mxu1 %vm2901_vm6, %v2893_v11 }
 0x335   :  { %7747 = vmatprep.subr.bf16.mxu0 %v11513_v49 }
 0x338   :  { %7748 = vmatpush3.bf16.msra.mxu0 %v8199_v5 }
 0x339   :  { %7749 = vmatprep.subr.bf16.mxu0 %v11513_v49 }
 0x33c   :  { %7750 = vmatpush3.bf16.msra.mxu0 %v8201_v7 }
 0x33d   :  { %7751 = vmatprep.subr.bf16.mxu0 %v11513_v49 }
 0x340   :  { %7752 = vmatpush3.bf16.msra.mxu0 %v8203_v10 }
 0x3f6   :  { %v2629_v16 = vpop.f32.mrb[4].mxu0 }
 0x3f7   :  { %v7715_v17 = vpop.f32.mrb[5].mxu0  ;;  %v2630_v19 = vadd.f32 %v2629_v16, %v2546_v15 }
 0x3f8   :  { %v2632_v18 = vpop.f32.mrb[6].mxu0 }
 0x3f9   :  { %v2633_v12 = vadd.f32 %v2632_v18, %v2546_v15  ;;  %v7716_v62 = vpop.f32.mrb[7].mxu0 }
 0x3fb   :  { %v2636_v63 = vadd.f32 %v2633_v12, %v2630_v19 }
 0x3fd   :  { %v2637_v52 = vrot.slane %v2636_v63, 4 }
 0x3ff   :  { %v2638_v53 = vadd.f32 %v2637_v52, %v2636_v63  ;;  %v10136_v63 = vsub.s32 5, %v10000_v1 }
 0x401   :  { %v2639_v54 = vrot.slane %v2638_v53, 2  ;;  %11615 = vst [vmem:[#allocation60_spill] sm:$0xff] %v10136_v63 }
 0x403   :  { %v2640_v55 = vadd.f32 %v2639_v54, %v2638_v53 }
 0x405   :  { %v2641_v56 = vrot.slane %v2640_v55, 1 }
 0x407   :  { %v2642_v58 = vadd.f32 %v2641_v56, %v2640_v55 }
 0x409   :  { %v2643_v60 = vmul.f32 0.0625, %v2642_v58 }
 0x40b   :  { %v2644_v61 = vsub.f32 %v2630_v19, %v2643_v60  ;;  %v2645_v4 = vsub.f32 %v2633_v12, %v2643_v60 }
 0x40d   :  { %v2646_v5 = vmul.f32 %v2644_v61, %v2644_v61  ;;  %v2647_v6 = vmul.f32 %v2645_v4, %v2645_v4  ;;  %v10141_v4 = vsub.s32 6, %v10000_v1 }
 0x40f   :  { %v2648_v7 = vadd.f32 %v2647_v6, %v2646_v5  ;;  %11616 = vst [vmem:[#allocation61_spill] sm:$0xff] %v10141_v4 }
 0x411   :  { %v2649_v8 = vrot.slane %v2648_v7, 4 }
 0x413   :  { %v2650_v10 = vadd.f32 %v2649_v8, %v2648_v7  ;;  %v2887_v7 = vld [vmem:[%s11617_s12] sm:$0xff]  ;;  %v2888_v8 = vld [vmem:[%s11617_s12 + $0x8] sm:$0xff] }
 0x415   :  { %v2651_v11 = vrot.slane %v2650_v10, 2 }
 0x417   :  { %v2652_v17 = vadd.f32 %v2651_v11, %v2650_v10  ;;  %v2890_v11 = vld [vmem:[%s11617_s12 + $0x18] sm:$0xff] }
 0x419   :  { %v2653_v16 = vrot.slane %v2652_v17, 1 }
 0x41b   :  { %v2654_v15 = vadd.f32 %v2653_v16, %v2652_v17  ;;  %v8204_v16 = vld [vmem:[%s11620_s29] sm:$0xff]  }
 0x41d   :  { %v2655_v18 = vmul.f32 0.0625, %v2654_v15 }
 0x41f   :  { %v2656_v62 = vadd.f32 1e-05, %v2655_v18 }
 0x421   :  { %8261 = vrsqrt.f32 %v2656_v62 }
 0x42b   :  { %v8262_v52 = vpop.eup %8261 }
 0x42c   :  { %v2658_v53 = vmul.f32 %v8262_v52, %v10008_v3 }
 0x42e   :  { %v2662_v54 = vrot.slane %v2658_v53, %v10136_v63  ;;  %v2665_v55 = vmul.f32 %v2658_v53, %v2643_v60 }
 0x430   :  { %v2663_v56 = vmul.f32 %v2662_v54, %v2630_v19  ;;  %v2664_v58 = vmul.f32 %v2662_v54, %v2633_v12  ;;  %v2667_v61 = vrot.slane %v2665_v55, 7  ;;  %v2891_v12 = vpack.c.bf16 %v2888_v8, %v2887_v7  ;;  %v10182_v7 = vld [vmem:[%s11622_s6] sm:$0xff]  }
 0x431   :  { %v10189_v8 = vld [vmem:[%s11492_s13] sm:$0xff]  }
 0x432   :  { %v2669_v5 = vsub.f32 %v10008_v3, %v2667_v61  ;;  %v2889_v3 = vld [vmem:[%s11617_s12 + $0x10] sm:$0xff]  ;;  %v8205_v61 = vld [vmem:[%s11620_s29 + $0x8] sm:$0xff]   ;;  %7783 = vmatprep.subr.bf16.mxu0 %v10189_v8 }
 0x433   :  { %v2892_v17 = vpack.c.bf16 %v2890_v11, %v2889_v3  ;;  %v10209_v3 = vld [vmem:[%s11492_s13 + $0x18] sm:$0xff]   ;;  %v10216_v11 = vld [vmem:[%s11492_s13 + $0x20] sm:$0xff]  }
 0x434   :  { %v2673_v6 = vrot.slane %v2669_v5, %v10141_v4  ;;  %v8206_v5 = vld [vmem:[%s11621_s1] sm:$0xff]  }
 0x436   :  { %v10151_v10 = vadd.f32 %v2673_v6, %v2664_v58  ;;  %v10153_v19 = vadd.f32 %v2673_v6, %v2663_v56  ;;  %v8207_v6 = vld [vmem:[%s11621_s1 + $0x8] sm:$0xff]  }
 0x438   :  { %11618 = vst [vmem:[#allocation62_spill] sm:$0xff] %v10151_v10  ;;  %11619 = vst [vmem:[#allocation63_spill] sm:$0xff] %v10153_v19  ;;  %v2676_v60 = vpack.c.bf16 %v10151_v10, %v10153_v19 }
 0x43a   :  { %7734 = vmatmul.mubr.bf16.vlgmr.msra.gmra.mrb[4].mxu1 %v2676_v60  ;;  %7754 = vmatmul.mubr.bf16.vlgmr.msra.gmra.mrb[8].mxu0 %v2676_v60  ;;  %v10202_v60 = vld [vmem:[%s11492_s13 + $0x10] sm:$0xff]  }
 0x43b   :  { %7758 = vmatpush3.bf16.msra.mxu1 %v2903_v13  ;;  %7759 = vmatprep.mubr.msk.bf16.mxu1 %vm2894_vm7, %v2891_v12  ;;  %v10194_v12 = vld [vmem:[%s11492_s13 + $0x8] sm:$0xff]  }
 0x43c   :  { %7784 = vmatpush3.bf16.msra.mxu0 %v10189_v8 }
 0x43d   :  { %7785 = vmatprep.subr.bf16.mxu0 %v10194_v12 }
 0x440   :  { %7786 = vmatpush3.bf16.msra.mxu0 %v10194_v12 }
 0x441   :  { %7787 = vmatprep.subr.bf16.mxu0 %v10202_v60 }
 0x442   :  { %7760 = vmatmul.mubr.msk.bf16.vlgmr.msra.gmra.mrb[8].mxu1 %vm2894_vm7, %v2892_v17  ;;  %v10223_v17 = vld [vmem:[%s11492_s13 + $0x28] sm:$0xff]  }
 0x443   :  { %7765 = vmatprep.mubr.msk.bf16.mxu1 %vm2316_vm1, %v8204_v16 }
 0x444   :  { %7788 = vmatpush3.bf16.msra.mxu0 %v10202_v60 }
 0x445   :  { %7789 = vmatprep.subr.bf16.mxu0 %v10209_v3 }
 0x448   :  { %7790 = vmatpush3.bf16.msra.mxu0 %v10209_v3 }
 0x449   :  { %7791 = vmatprep.subr.bf16.mxu0 %v10216_v11 }
 0x44c   :  { %7792 = vmatpush3.bf16.msra.mxu0 %v10216_v11 }
 0x44d   :  { %7793 = vmatprep.subr.bf16.mxu0 %v10223_v17 }
 0x450   :  { %7794 = vmatpush3.bf16.msra.mxu0 %v10223_v17 }
 0x50d   :  { %v2775_v15 = vpop.f32.mrb[4].mxu1  ;;  %v2880_v18 = vpop.f32.mrb[8].mxu0 }
 0x50e   :  { %v7735_v13 = vpop.f32.mrb[5].mxu1  ;;  %v7755_v62 = vpop.f32.mrb[9].mxu0 }
 0x50f   :  { %v2778_v52 = vpop.f32.mrb[6].mxu1  ;;  %v2883_v53 = vpop.f32.mrb[10].mxu0 }
 0x510   :  { %v2958_v54 = vpack.c.bf16 %v2778_v52, %v2775_v15  ;;  %v2963_v55 = vpack.c.bf16 %v2883_v53, %v2880_v18  ;;  %v7736_v56 = vpop.f32.mrb[7].mxu1  ;;  %v7756_v58 = vpop.f32.mrb[11].mxu0 }
 0x511   :  { %v10243_v58 = vld [vmem:[%s11622_s6 + $0x8] sm:$0xff]  }
 0x512   :  { %7763 = vmatprep.subr.bf16.mxu1 %v2963_v55 }
 0x513   :  { %7764 = vmatpush3.bf16.msra.mxu1 %v2963_v55 }
 0x514   :  { %7769 = vmatprep.subr.bf16.mxu1 %v2958_v54 }
 0x516   :  { %7766 = vmatmul.mubr.msk.bf16.vlgmr.msra.gmra.mrb[8].mxu1 %vm2316_vm1, %v8205_v61  ;;  %v10252_v61 = vld [vmem:[%s11492_s13 + $0x30] sm:$0xff]  }
 0x517   :  { %7770 = vmatpush3.bf16.msra.mxu1 %v2958_v54  ;;  %7771 = vmatprep.mubr.msk.bf16.mxu1 %vm2316_vm1, %v8206_v5  ;;  %v10259_v5 = vld [vmem:[%s11492_s13 + $0x38] sm:$0xff]   ;;  %s8431_s13 = smov 127  }
 0x518   :  { %7795 = vmatprep.subr.bf16.mxu0 %v10252_v61 }
 0x519   :  { %7796 = vmatpush3.bf16.msra.mxu0 %v10252_v61 }
 0x51a   :  { %7797 = vmatprep.subr.bf16.mxu0 %v10259_v5 }
 0x51d   :  { %7798 = vmatpush3.bf16.msra.mxu0 %v10259_v5 }
 0x522   :  { %7772 = vmatmul.mubr.msk.bf16.vlgmr.msra.gmra.mrb[8].mxu1 %vm2316_vm1, %v8207_v6 }
 0x523   :  { %7779 = vmatprep.mubr.msk.bf16.mxu1 %vm3155_vm8, %v10182_v7 }
 0x5f5   :  { %v7773_v16 = vpop.f32.mrb[8].mxu1 }
 0x5f6   :  { %v3079_v15 = vpop.f32.mrb[9].mxu1  ;;  %v10234_v54 = vmul.f32 0.33333334, %v7773_v16 }
 0x5f7   :  { %v7774_v18 = vpop.f32.mrb[10].mxu1  ;;  %v10228_v62 = vmul.f32 0.33333334, %v3079_v15 }
 0x5f8   :  { %v3082_v13 = vpop.f32.mrb[11].mxu1  ;;  %v10230_v52 = vmul.f32 0.33333334, %v7774_v18 }
 0x5f9   :  { %v10232_v53 = vmul.f32 0.33333334, %v3082_v13 }
 0x5fa   :  { %v3144_v56 = vpack.c.bf16 %v10230_v52, %v10234_v54 }
 0x5fb   :  { %v3143_v55 = vpack.c.bf16 %v10232_v53, %v10228_v62 }
 0x5fd   :  { %7775 = vmatprep.subr.bf16.mxu1 %v3143_v55 }
 0x5fe   :  { %7776 = vmatpush3.bf16.msra.mxu1 %v3143_v55 }
 0x5ff   :  { %7777 = vmatprep.subr.bf16.mxu1 %v3144_v56 }
 0x602   :  { %7778 = vmatpush3.bf16.msra.mxu1 %v3144_v56 }
 0x605   :  { %7780 = vmatmul.mubr.msk.bf16.vlgmr.msra.gmra.mrb[12].mxu1 %vm3155_vm8, %v10243_v58 }
 0x606   :  { %7807 = vmatprep.mubr.msk.bf16.mxu1 %vm3155_vm8, %v10182_v7 }
 0x6d8   :  { %v7781_v6 = vpop.f32.mrb[12].mxu1 }
 0x6d9   :  { %v3196_v16 = vpop.f32.mrb[13].mxu1  ;;  %v10273_v0 = vadd.f32 %v7781_v6, %v10234_v54 }
 0x6da   :  { %v7782_v15 = vpop.f32.mrb[14].mxu1  ;;  %v10267_v55 = vadd.f32 %v3196_v16, %v10228_v62 }
 0x6db   :  { %v10264_v18 = vadd.f32 %v7782_v15, %v10230_v52  ;;  %v3199_v13 = vpop.f32.mrb[15].mxu1  ;;  %11626 = vst [vmem:[#allocation67_spill] sm:$0xff] %v10273_v0 }
 0x6dc   :  { %11624 = vst [vmem:[#allocation65_spill] sm:$0xff] %v10267_v55  ;;  %v10270_v56 = vadd.f32 %v3199_v13, %v10232_v53 }
 0x6dd   :  { %11623 = vst [vmem:[#allocation64_spill] sm:$0xff] %v10264_v18  ;;  %v3216_v27 = vpack.c.bf16 %v10264_v18, %v10273_v0 }
 0x6de   :  { %11625 = vst [vmem:[#allocation66_spill] sm:$0xff] %v10270_v56  ;;  %v3215_v49 = vpack.c.bf16 %v10270_v56, %v10267_v55 }
 0x6e0   :  { %7799 = vmatprep.mubr.bf16.mxu0 %v3215_v49  ;;  %7831 = vmatprep.subr.bf16.mxu0 %v3215_v49 }
 0x6e1   :  { %7800 = vmatmul.mubr.bf16.vlgmr.msra.gmra.mrb[12].mxu0 %v3216_v27 }
 0x6e2   :  { %7832 = vmatpush3.bf16.msra.mxu0 %v3215_v49  ;;  %7835 = vmatprep.mubr.msk.bf16.mxu0 %vm3155_vm8, %v10182_v7 }
 0x6e3   :  { %7833 = vmatprep.subr.bf16.mxu0 %v3216_v27 }
 0x6e6   :  { %7834 = vmatpush3.bf16.msra.mxu0 %v3216_v27 }
 0x6e7   :  { %7839 = vmatprep.subr.bf16.mxu0 %v10189_v8 }
 0x6e9   :  { %7836 = vmatmul.mubr.msk.bf16.vlgmr.msra.gmra.mrb[16].mxu0 %vm3155_vm8, %v10243_v58 }
 0x6ea   :  { %7840 = vmatpush3.bf16.msra.mxu0 %v10189_v8 }
 0x6eb   :  { %7841 = vmatprep.subr.bf16.mxu0 %v10194_v12 }
 0x6ee   :  { %7842 = vmatpush3.bf16.msra.mxu0 %v10194_v12 }
 0x6ef   :  { %7843 = vmatprep.subr.bf16.mxu0 %v10202_v60 }
 0x6f2   :  { %7844 = vmatpush3.bf16.msra.mxu0 %v10202_v60 }
 0x6f3   :  { %7845 = vmatprep.subr.bf16.mxu0 %v10209_v3 }
 0x6f6   :  { %7846 = vmatpush3.bf16.msra.mxu0 %v10209_v3 }
 0x6f7   :  { %7847 = vmatprep.subr.bf16.mxu0 %v10216_v11 }
 0x6fa   :  { %7848 = vmatpush3.bf16.msra.mxu0 %v10216_v11 }
 0x6fb   :  { %7849 = vmatprep.subr.bf16.mxu0 %v10223_v17 }
 0x6fe   :  { %7850 = vmatpush3.bf16.msra.mxu0 %v10223_v17 }
 0x6ff   :  { %7851 = vmatprep.subr.bf16.mxu0 %v10252_v61 }
 0x702   :  { %7852 = vmatpush3.bf16.msra.mxu0 %v10252_v61 }
 0x703   :  { %7853 = vmatprep.subr.bf16.mxu0 %v10259_v5 }
 0x706   :  { %7854 = vmatpush3.bf16.msra.mxu0 %v10259_v5 }
 0x7b4   :  { %v7801_v27 = vpop.f32.mrb[12].mxu0 }
 0x7b5   :  { %3373 = vrot.lane.b32.xlu1 %v7801_v27, %s8431_s13  ;;  %v3299_v49 = vpop.f32.mrb[13].mxu0 }
 0x7b6   :  { %3369 = vrot.lane.b32.xlu0 %v3299_v49, %s8431_s13  ;;  %v7802_v6 = vpop.f32.mrb[14].mxu0 }
 0x7b7   :  { %v3315_v16 = vpack.c.bf16 %v7802_v6, %v7801_v27  ;;  %v3302_v15 = vpop.f32.mrb[15].mxu0  ;;  %v10309_v27 = vld [vmem:[%s11493_s14] sm:$0xff]  }
 0x7b8   :  { %v3314_v13 = vpack.c.bf16 %v3302_v15, %v3299_v49 }
 0x7b9   :  { %3375 = vrot.lane.b32.xlu1 %v7802_v6, %s8431_s13 }
 0x7ba   :  { %3371 = vrot.lane.b32.xlu0 %v3302_v15, %s8431_s13  ;;  %7803 = vmatprep.subr.bf16.mxu1 %v3314_v13  ;;  %v11627_v15 = vmov 0.0  }
 0x7bb   :  { %7804 = vmatpush3.bf16.msra.mxu1 %v3314_v13 }
 0x7bc   :  { %7805 = vmatprep.subr.bf16.mxu1 %v3315_v16  ;;  %v7837_v43 = vpop.f32.mrb[16].mxu0 }
 0x7bd   :  { %v3741_v35 = vpop.f32.mrb[17].mxu0  ;;  %v10319_v13 = vadd.f32 %v7837_v43, %v10234_v54  ;;  %v10350_v43 = vld [vmem:[%s11493_s14 + $0x18] sm:$0xff]  }
 0x7be   :  { %v7838_v26 = vpop.f32.mrb[18].mxu0  ;;  %v10312_v49 = vadd.f32 %v3741_v35, %v10228_v62  ;;  %v10342_v35 = vld [vmem:[%s11493_s14 + $0x10] sm:$0xff]  }
 0x7bf   :  { %v10304_v42 = vadd.f32 %v7838_v26, %v10230_v52  ;;  %7806 = vmatpush3.bf16.msra.mxu1 %v3315_v16  ;;  %v3744_v34 = vpop.f32.mrb[19].mxu0 }
 0x7c0   :  { %v10315_v6 = vadd.f32 %v3744_v34, %v10232_v53  ;;  %7811 = vmatprep.subr.bf16.mxu1 %v11627_v15  ;;  %v10331_v34 = vld [vmem:[%s11493_s14 + $0x8] sm:$0xff]  }
 0x7c1   :  { %v3761_v16 = vpack.c.bf16 %v10304_v42, %v10319_v13 }
 0x7c2   :  { %7808 = vmatmul.mubr.msk.bf16.vlgmr.msra.gmra.mrb[16].mxu1 %vm3155_vm8, %v10243_v58  ;;  %v3760_v26 = vpack.c.bf16 %v10315_v6, %v10312_v49 }
 0x7c3   :  { %7812 = vmatpush3.bf16.msra.mxu1 %v10309_v27  ;;  %7827 = vmatprep.mubr.msk.bf16.mxu1 %vm8430_vm0, %v11627_v15 }
 0x7c4   :  { %7855 = vmatprep.mubr.bf16.mxu0 %v3760_v26  ;;  %7887 = vmatprep.subr.bf16.mxu0 %v3760_v26 }
 0x7c5   :  { %7856 = vmatmul.mubr.bf16.vlgmr.msra.gmra.mrb[20].mxu0 %v3761_v16  ;;  %7813 = vmatprep.subr.bf16.mxu1 %v11627_v15 }
 0x7c6   :  { %7888 = vmatpush3.bf16.msra.mxu0 %v3760_v26  ;;  %7891 = vmatprep.mubr.msk.bf16.mxu0 %vm3155_vm8, %v10182_v7  ;;  %v10361_v26 = vld [vmem:[%s11493_s14 + $0x20] sm:$0xff]  }
 0x7c7   :  { %7889 = vmatprep.subr.bf16.mxu0 %v3761_v16  ;;  %7814 = vmatpush3.bf16.msra.mxu1 %v10331_v34 }
 0x7c8   :  { %7815 = vmatprep.subr.bf16.mxu1 %v11627_v15 }
 0x7ca   :  { %7890 = vmatpush3.bf16.msra.mxu0 %v3761_v16  ;;  %v10382_v16 = vld [vmem:[%s11493_s14 + $0x28] sm:$0xff]  }
 0x7cb   :  { %7895 = vmatprep.subr.bf16.mxu0 %v10189_v8  ;;  %7816 = vmatpush3.bf16.msra.mxu1 %v10342_v35 }
 0x7cc   :  { %7817 = vmatprep.subr.bf16.mxu1 %v11627_v15 }
 0x7cd   :  { %7892 = vmatmul.mubr.msk.bf16.vlgmr.msra.gmra.mrb[24].mxu0 %vm3155_vm8, %v10243_v58 }
 0x7ce   :  { %7896 = vmatpush3.bf16.msra.mxu0 %v10189_v8 }
 0x7cf   :  { %7897 = vmatprep.subr.bf16.mxu0 %v10194_v12  ;;  %7818 = vmatpush3.bf16.msra.mxu1 %v10350_v43 }
 0x7d0   :  { %7819 = vmatprep.subr.bf16.mxu1 %v11627_v15 }
 0x7d2   :  { %7898 = vmatpush3.bf16.msra.mxu0 %v10194_v12 }
 0x7d3   :  { %7899 = vmatprep.subr.bf16.mxu0 %v10202_v60  ;;  %7820 = vmatpush3.bf16.msra.mxu1 %v10361_v26 }
 0x7d4   :  { %7821 = vmatprep.subr.bf16.mxu1 %v11627_v15 }
 0x7d6   :  { %7900 = vmatpush3.bf16.msra.mxu0 %v10202_v60 }
 0x7d7   :  { %7901 = vmatprep.subr.bf16.mxu0 %v10209_v3  ;;  %7822 = vmatpush3.bf16.msra.mxu1 %v10382_v16 }
 0x7d8   :  { %7823 = vmatprep.subr.bf16.mxu1 %v11627_v15 }
 0x7da   :  { %7902 = vmatpush3.bf16.msra.mxu0 %v10209_v3 }
 0x7db   :  { %7903 = vmatprep.subr.bf16.mxu0 %v10216_v11  ;;  %7824 = vmatpush3.bf16.msra.mxu1 %v10389_v25 }
 0x7dc   :  { %7825 = vmatprep.subr.bf16.mxu1 %v11627_v15 }
 0x7de   :  { %7904 = vmatpush3.bf16.msra.mxu0 %v10216_v11 }
 0x7df   :  { %7905 = vmatprep.subr.bf16.mxu0 %v10223_v17  ;;  %7826 = vmatpush3.bf16.msra.mxu1 %v10398_v33 }
 0x7e2   :  { %7906 = vmatpush3.bf16.msra.mxu0 %v10223_v17 }
 0x7e3   :  { %7907 = vmatprep.subr.bf16.mxu0 %v10252_v61 }
 0x7e6   :  { %7908 = vmatpush3.bf16.msra.mxu0 %v10252_v61 }
 0x7e7   :  { %7909 = vmatprep.subr.bf16.mxu0 %v10259_v5 }
 0x7ea   :  { %7910 = vmatpush3.bf16.msra.mxu0 %v10259_v5 }
 0x827   :  { %v3374_v24 = vpop.permute.xlu1 %3373 }
 0x828   :  { %v3370_v40 = vpop.permute.xlu0 %3369 }
 0x82b   :  { %v3376_v23 = vpop.permute.xlu1 %3375 }
 0x82c   :  { %v3372_v22 = vpop.permute.xlu0 %3371 }
 0x895   :  { %v7809_v32 = vpop.f32.mrb[16].mxu1 }
 0x896   :  { %v3350_v31 = vpop.f32.mrb[17].mxu1  ;;  %v3383_v51 = vadd.f32 %v7809_v32, %v3374_v24 }
 0x897   :  { %v3381_v38 = vadd.f32 %v3370_v40, %v3350_v31  ;;  %v7810_v30 = vpop.f32.mrb[18].mxu1 }
 0x898   :  { %v3353_v41 = vpop.f32.mrb[19].mxu1  ;;  %v10404_v21 = vpop.f32.mrb[20].mxu0  ;;  %v3384_v29 = vadd.f32 %v7810_v30, %v3376_v23 }
 0x899   :  { %v10407_v37 = vadd.f32 %v10402_v39, %v3381_v38  ;;  %v3382_v20 = vadd.f32 %v3372_v22, %v3353_v41  ;;  %v10409_v36 = vpop.f32.mrb[21].mxu0 }
 0x89a   :  { %v10411_v28 = vpop.f32.mrb[22].mxu0  ;;  %v10428_v22 = vadd.f32 %v10402_v39, %v3384_v29 }
 0x89b   :  { %v10414_v50 = vadd.f32 %v10402_v39, %v3382_v20  ;;  %v10418_v31 = vpack.c.bf16 %v10411_v28, %v10404_v21  ;;  %v10420_v40 = vpop.f32.mrb[23].mxu0  ;;  %3396 = vperm.xlu0 %8151, %v10407_v37   ;;  %v10433_v20 = vadd.f32 %v10402_v39, %v3383_v51 }
 0x89c   :  { %v10425_v23 = vpack.c.bf16 %v10420_v40, %v10409_v36 }
 0x89d   :  { %3401 = vperm.xlu1 %8152, %v10414_v50  }
 0x89e   :  { %7859 = vmatprep.subr.bf16.mxu1 %v10425_v23 }
 0x89f   :  { %3411 = vperm.xlu0 %8151, %v10428_v22  }
 0x8a0   :  { %v7893_v24 = vpop.f32.mrb[24].mxu0 }
 0x8a1   :  { %v4143_v30 = vpop.f32.mrb[25].mxu0  ;;  %3406 = vperm.xlu1 %8152, %v10433_v20   ;;  %v10447_v51 = vadd.f32 %v7893_v24, %v10234_v54 }
 0x8a2   :  { %v7894_v32 = vpop.f32.mrb[26].mxu0  ;;  %v10441_v29 = vadd.f32 %v4143_v30, %v10228_v62 }
 0x8a3   :  { %v10438_v38 = vadd.f32 %v7894_v32, %v10230_v52  ;;  %v4146_v41 = vpop.f32.mrb[27].mxu0  ;;  %11631 = vst [vmem:[#allocation71_spill] sm:$0xff] %v10447_v51 }
 0x8a4   :  { %11629 = vst [vmem:[#allocation69_spill] sm:$0xff] %v10441_v29  ;;  %v10444_v48 = vadd.f32 %v4146_v41, %v10232_v53 }
 0x8a5   :  { %11628 = vst [vmem:[#allocation68_spill] sm:$0xff] %v10438_v38  ;;  %v4163_v63 = vpack.c.bf16 %v10438_v38, %v10447_v51 }
 0x8a6   :  { %11630 = vst [vmem:[#allocation70_spill] sm:$0xff] %v10444_v48  ;;  %v4162_v4 = vpack.c.bf16 %v10444_v48, %v10441_v29 }
 0x8a8   :  { %7911 = vmatprep.mubr.bf16.mxu0 %v4162_v4  ;;  %7943 = vmatprep.subr.bf16.mxu0 %v4162_v4 }
 0x8a9   :  { %7912 = vmatmul.mubr.bf16.vlgmr.msra.gmra.mrb[28].mxu0 %v4163_v63 }
 0x8aa   :  { %7944 = vmatpush3.bf16.msra.mxu0 %v4162_v4  ;;  %7947 = vmatprep.mubr.msk.bf16.mxu0 %vm3155_vm8, %v10182_v7  ;;  %v10481_v4 = vld [vmem:[%s11632_s24] sm:$0xff] }
 0x8ab   :  { %7945 = vmatprep.subr.bf16.mxu0 %v4163_v63  ;;  %vm3390_vm10 = vcmp.gt.f32.partialorder %v10481_v4, 0.0 }
 0x8ae   :  { %7946 = vmatpush3.bf16.msra.mxu0 %v4163_v63  ;;  %v10476_v63 = vld [vmem:[%s11632_s24 + $0x8] sm:$0xff] }
 0x8af   :  { %7951 = vmatprep.subr.bf16.mxu0 %v10189_v8  ;;  %vm3391_vm9 = vcmp.gt.f32.partialorder %v10476_v63, 0.0 }
 0x8b1   :  { %7948 = vmatmul.mubr.msk.bf16.vlgmr.msra.gmra.mrb[32].mxu0 %vm3155_vm8, %v10243_v58 }
 0x8b2   :  { %7952 = vmatpush3.bf16.msra.mxu0 %v10189_v8  ;;  %v10486_v8 = vld [vmem:[%s11632_s24 + $0x18] sm:$0xff] }
 0x8b3   :  { %7953 = vmatprep.subr.bf16.mxu0 %v10194_v12  ;;  %vm3393_vm11 = vcmp.gt.f32.partialorder %v10486_v8, 0.0 }
 0x8b6   :  { %7954 = vmatpush3.bf16.msra.mxu0 %v10194_v12 }
 0x8b7   :  { %7955 = vmatprep.subr.bf16.mxu0 %v10202_v60 }
 0x8ba   :  { %7956 = vmatpush3.bf16.msra.mxu0 %v10202_v60  ;;  %v10492_v60 = vld [vmem:[%s11632_s24 + $0x10] sm:$0xff] }
 0x8bb   :  { %7957 = vmatprep.subr.bf16.mxu0 %v10209_v3  ;;  %vm3392_vm12 = vcmp.gt.f32.partialorder %v10492_v60, 0.0 }
 0x8be   :  { %7958 = vmatpush3.bf16.msra.mxu0 %v10209_v3 }
 0x8bf   :  { %7959 = vmatprep.subr.bf16.mxu0 %v10216_v11 }
 0x8c2   :  { %7960 = vmatpush3.bf16.msra.mxu0 %v10216_v11 }
 0x8c3   :  { %7961 = vmatprep.subr.bf16.mxu0 %v10223_v17 }
 0x8c6   :  { %7962 = vmatpush3.bf16.msra.mxu0 %v10223_v17 }
 0x8c7   :  { %7963 = vmatprep.subr.bf16.mxu0 %v10252_v61 }
 0x8ca   :  { %7964 = vmatpush3.bf16.msra.mxu0 %v10252_v61 }
 0x8cb   :  { %7965 = vmatprep.subr.bf16.mxu0 %v10259_v5 }
 0x8ce   :  { %7966 = vmatpush3.bf16.msra.mxu0 %v10259_v5 }
 0x91a   :  { %v3397_v12 = vpop.permute.xlu0 %3396 }
 0x91b   :  { %v3414_v61 = vsel %vm3390_vm10, %v3397_v12, -1e+30 }
 0x91c   :  { %v3402_v3 = vpop.permute.xlu1 %3401  ;;  %v3419_v41 = vsel %vm3418_vm13, %v3414_v61, -inf }
 0x91d   :  { %v3415_v11 = vsel %vm3391_vm9, %v3402_v3, -1e+30 }
 0x91e   :  { %v3412_v17 = vpop.permute.xlu0 %3411  ;;  %v3420_v24 = vsel %vm3418_vm13, %v3415_v11, -inf }
 0x91f   :  { %v3417_v5 = vsel %vm3393_vm11, %v3412_v17, -1e+30  ;;  %v3423_v9 = vmax.f32 %v3419_v41, %v3420_v24 }
 0x920   :  { %v3407_v30 = vpop.permute.xlu1 %3406  ;;  %v3422_v3 = vsel %vm3418_vm13, %v3417_v5, -inf }
 0x921   :  { %v3416_v32 = vsel %vm3392_vm12, %v3407_v30, -1e+30 }
 0x922   :  { %v3421_v14 = vsel %vm3418_vm13, %v3416_v32, -inf }
 0x923   :  { %v3424_v59 = vmax.f32 %v3421_v14, %v3422_v3 }
 0x925   :  { %v3425_v46 = vmax.f32 %v3423_v9, %v3424_v59 }
 0x927   :  { %v3426_v45 = vrot.slane %v3425_v46, 4 }
 0x929   :  { %v3427_v12 = vmax.f32 %v3425_v46, %v3426_v45 }
 0x92b   :  { %v3428_v47 = vrot.slane %v3427_v12, 2 }
 0x92d   :  { %v3429_v44 = vmax.f32 %v3427_v12, %v3428_v47 }
 0x92f   :  { %v3430_v17 = vrot.slane %v3429_v44, 1 }
 0x931   :  { %v3431_v10 = vmax.f32 %v3429_v44, %v3430_v17 }
 0x933   :  { %v3433_v11 = vmul.f32 %v3431_v10, %v10476_v63  ;;  %v3432_v19 = vmul.f32 %v3431_v10, %v10481_v4  ;;  %v3434_v5 = vmul.f32 %v3431_v10, %v10492_v60  ;;  %v3435_v24 = vmul.f32 %v3431_v10, %v10486_v8 }
 0x935   :  { %v3439_v30 = vsel %vm3418_vm13, %v3433_v11, 0.0  ;;  %v3436_v61 = vsel %vm3418_vm13, %v3432_v19, 0.0  ;;  %v3442_v45 = vsel %vm3418_vm13, %v3434_v5, 0.0  ;;  %v3445_v46 = vsel %vm3418_vm13, %v3435_v24, 0.0 }
 0x936   :  { %3440 = vadd.xlane.f32.xlu0 %v3439_v30  ;;  %3437 = vadd.xlane.f32.xlu1 %v3436_v61 }
 0x93a   :  { %3443 = vadd.xlane.f32.xlu0 %v3442_v45  ;;  %3446 = vadd.xlane.f32.xlu1 %v3445_v46 }
 0x97c   :  { %v10517_v44 = vpop.f32.mrb[28].mxu0 }
 0x97d   :  { %v10519_v47 = vpop.f32.mrb[29].mxu0 }
 0x97e   :  { %v10521_v59 = vpop.f32.mrb[30].mxu0 }
 0x97f   :  { %v10525_v9 = vpack.c.bf16 %v10521_v59, %v10517_v44  ;;  %v10527_v14 = vpop.f32.mrb[31].mxu0 }
 0x980   :  { %v10531_v10 = vpack.c.bf16 %v10527_v14, %v10519_v47 }
 0x984   :  { %v7949_v19 = vpop.f32.mrb[32].mxu0 }
 0x985   :  { %v4545_v32 = vpop.f32.mrb[33].mxu0  ;;  %v10543_v30 = vadd.f32 %v7949_v19, %v10234_v54 }
 0x986   :  { %v7950_v41 = vpop.f32.mrb[34].mxu0  ;;  %v10537_v17 = vadd.f32 %v4545_v32, %v10228_v62 }
 0x987   :  { %v10534_v3 = vadd.f32 %v7950_v41, %v10230_v52  ;;  %v4548_v12 = vpop.f32.mrb[35].mxu0  ;;  %11636 = vst [vmem:[#allocation75_spill] sm:$0xff] %v10543_v30 }
 0x988   :  { %11634 = vst [vmem:[#allocation73_spill] sm:$0xff] %v10537_v17  ;;  %v10540_v11 = vadd.f32 %v4548_v12, %v10232_v53 }
 0x989   :  { %11633 = vst [vmem:[#allocation72_spill] sm:$0xff] %v10534_v3  ;;  %v4565_v5 = vpack.c.bf16 %v10534_v3, %v10543_v30 }
 0x98a   :  { %11635 = vst [vmem:[#allocation74_spill] sm:$0xff] %v10540_v11  ;;  %v4564_v61 = vpack.c.bf16 %v10540_v11, %v10537_v17 }
 0x98c   :  { %7967 = vmatprep.mubr.bf16.mxu0 %v4564_v61 }
 0x98d   :  { %7968 = vmatmul.mubr.bf16.vlgmr.msra.gmra.mrb[36].mxu0 %v4565_v5 }
 0x9c3   :  { %v3441_v52 = vpop.xlane.xlu0 %3440  ;;  %v3438_v24 = vpop.xlane.xlu1 %3437 }
 0x9c4   :  { %v3449_v45 = vsub.f32 %v10414_v50, %v3441_v52  ;;  %v3448_v62 = vsub.f32 %v10407_v37, %v3438_v24 }
 0x9c6   :  { %v3454_v46 = vmul.f32 1.442695, %v3449_v45  ;;  %v3452_v53 = vmul.f32 1.442695, %v3448_v62 }
 0x9c7   :  { %v3444_v32 = vpop.xlane.xlu0 %3443  ;;  %v3447_v41 = vpop.xlane.xlu1 %3446 }
 0x9c8   :  { %8263 = vpow2.f32 %v3454_v46  ;;  %v3450_v54 = vsub.f32 %v10433_v20, %v3444_v32  ;;  %v3451_v19 = vsub.f32 %v10428_v22, %v3447_v41 }
 0x9c9   :  { %8265 = vpow2.f32 %v3452_v53 }
 0x9ca   :  { %v3456_v12 = vmul.f32 1.442695, %v3450_v54  ;;  %v3458_v57 = vmul.f32 1.442695, %v3451_v19 }
 0x9cc   :  { %8267 = vpow2.f32 %v3456_v12 }
 0x9cd   :  { %8269 = vpow2.f32 %v3458_v57 }
 0x9d2   :  { %v10553_v61 = vpop.eup %8263 }
 0x9d3   :  { %v10555_v5 = vpop.eup %8265  ;;  %3467 = vperm.xlu1 %8152, %v10553_v61  }
 0x9d4   :  { %3462 = vperm.xlu0 %8151, %v10555_v5  }
 0x9d6   :  { %v10559_v37 = vpop.eup %8267 }
 0x9d7   :  { %v10561_v50 = vpop.eup %8269  ;;  %3472 = vperm.xlu1 %8152, %v10559_v37  }
 0x9d8   :  { %3477 = vperm.xlu0 %8151, %v10561_v50  }
 0xa52   :  { %v3468_v22 = vpop.permute.xlu1 %3467 }
 0xa53   :  { %v3463_v20 = vpop.permute.xlu0 %3462  ;;  %v3481_v57 = vmul.f32 %v3468_v22, %v10476_v63 }
 0xa54   :  { %v3480_v52 = vmul.f32 %v3463_v20, %v10481_v4 }
 0xa55   :  { %v3485_v24 = vsel %vm3418_vm13, %v3481_v57, 0.0 }
 0xa56   :  { %v3484_v45 = vsel %vm3418_vm13, %v3480_v52, 0.0  ;;  %v3473_v62 = vpop.permute.xlu1 %3472 }
 0xa57   :  { %v3478_v46 = vpop.permute.xlu0 %3477  ;;  %v3482_v53 = vmul.f32 %v3473_v62, %v10492_v60  ;;  %v3486_v32 = vadd.f32 %v3485_v24, %v3484_v45 }
 0xa58   :  { %v3483_v41 = vmul.f32 %v3478_v46, %v10486_v8 }
 0xa59   :  { %v3487_v54 = vsel %vm3418_vm13, %v3482_v53, 0.0 }
 0xa5a   :  { %v3488_v19 = vadd.f32 %v3487_v54, %v3486_v32  ;;  %v3489_v12 = vsel %vm3418_vm13, %v3483_v41, 0.0 }
 0xa5c   :  { %v3490_v2 = vadd.f32 %v3489_v12, %v3488_v19 }
 0xa5e   :  { %v3491_v22 = vrot.slane %v3490_v2, 4 }
 0xa60   :  { %v3492_v3 = vadd.f32 %v3491_v22, %v3490_v2  ;;  %v10573_v20 = vpop.f32.mrb[36].mxu0 }
 0xa61   :  { %v10575_v57 = vpop.f32.mrb[37].mxu0 }
 0xa62   :  { %v3493_v52 = vrot.slane %v3492_v3, 2  ;;  %v10577_v30 = vpop.f32.mrb[38].mxu0 }
 0xa63   :  { %v10581_v24 = vpack.c.bf16 %v10577_v30, %v10573_v20  ;;  %v10583_v45 = vpop.f32.mrb[39].mxu0 }
 0xa64   :  { %v3494_v62 = vadd.f32 %v3493_v52, %v3492_v3  ;;  %v10587_v46 = vpack.c.bf16 %v10583_v45, %v10575_v57 }
 0xa65   :  { %11637 = vst [vmem:[#allocation76_spill] sm:$0xff] %v10581_v24 }
 0xa66   :  { %v3495_v53 = vrot.slane %v3494_v62, 1 }
 0xa68   :  { %v3496_v2 = vadd.f32 %v3495_v53, %v3494_v62  ;;  %v11544_v62 = vmov 1   ;;  %v11638_v53 = vmov 0  }
 0xa69   :  { %8153 = vset.pattern.permute.xlu0 %v11544_v62 }
 0xa6a   :  { %v3498_v32 = vmul.f32 %v3496_v2, %v10476_v63  ;;  %v3497_v41 = vmul.f32 %v3496_v2, %v10481_v4  ;;  %v3499_v12 = vmul.f32 %v3496_v2, %v10492_v60  ;;  %v3500_v22 = vmul.f32 %v3496_v2, %v10486_v8 }
 0xa6c   :  { %v3504_v54 = vsel %vm3418_vm13, %v3498_v32, 0.0  ;;  %v3501_v19 = vsel %vm3418_vm13, %v3497_v41, 0.0  ;;  %v3507_v3 = vsel %vm3418_vm13, %v3499_v12, 0.0  ;;  %v3510_v52 = vsel %vm3418_vm13, %v3500_v22, 0.0 }
 0xa6d   :  { %3505 = vadd.xlane.f32.xlu0 %v3504_v54  ;;  %3502 = vadd.xlane.f32.xlu1 %v3501_v19 }
 0xa71   :  { %3508 = vadd.xlane.f32.xlu0 %v3507_v3  ;;  %3511 = vadd.xlane.f32.xlu1 %v3510_v52 }
 0xa82   :  { %3556 = vperm.xlu1 %8152, %v10476_v63  }
 0xa86   :  { %8155 = vset.pattern.permute.xlu1 %v11544_v62 }
 0xa87   :  { %3583 = vperm.xlu0 %8153, %v10481_v4   ;;  %3587 = vperm.xlu1 %8155, %v10476_v63  }
 0xa8b   :  { %8154 = vset.pattern.permute.xlu0 %v11638_v53  ;;  %3591 = vperm.xlu1 %8155, %v10492_v60  }
 0xa8c   :  { %3551 = vperm.xlu0 %8154, %v10481_v4  }
 0xa8f   :  { %8156 = vset.pattern.permute.xlu1 %v11638_v53 }
 0xa90   :  { %3561 = vperm.xlu0 %8154, %v10492_v60  }
 0xafa   :  { %v3506_v2 = vpop.xlane.xlu0 %3505  ;;  %v3503_v32 = vpop.xlane.xlu1 %3502 }
 0xafb   :  { %v3514_v41 = vadd.f32 1e-16, %v3506_v2  ;;  %v3513_v54 = vadd.f32 1e-16, %v3503_v32 }
 0xafd   :  { %8271 = vrcp.f32 %v3514_v41  ;;  %v11639_v41 = vmov 1  }
 0xafe   :  { %8273 = vrcp.f32 %v3513_v54  ;;  %v3509_v19 = vpop.xlane.xlu0 %3508  ;;  %v3512_v12 = vpop.xlane.xlu1 %3511 }
 0xaff   :  { %v3515_v22 = vadd.f32 1e-16, %v3509_v19  ;;  %v3516_v3 = vadd.f32 1e-16, %v3512_v12 }
 0xb01   :  { %8275 = vrcp.f32 %v3515_v22 }
 0xb02   :  { %8277 = vrcp.f32 %v3516_v3 }
 0xb07   :  { %v8272_v52 = vpop.eup %8271 }
 0xb08   :  { %v8274_v62 = vpop.eup %8273  ;;  %v3520_v17 = vmul.f32 %v8272_v52, %v10553_v61 }
 0xb09   :  { %v3518_v11 = vmul.f32 %v8274_v62, %v10555_v5 }
 0xb0a   :  { %3532 = vperm.xlu1 %8156, %v3520_v17   ;;  %v10623_v17 = vpop.permute.xlu0 %3583 }
 0xb0b   :  { %v8276_v24 = vpop.eup %8275  ;;  %3527 = vperm.xlu0 %8154, %v3518_v11   ;;  %v10625_v11 = vpop.permute.xlu1 %3556 }
 0xb0c   :  { %v3522_v2 = vmul.f32 %v8276_v24, %v10559_v37  ;;  %v8278_v32 = vpop.eup %8277 }
 0xb0d   :  { %v3524_v54 = vmul.f32 %v8278_v32, %v10561_v50 }
 0xb0e   :  { %3537 = vperm.xlu1 %8156, %v3522_v2   ;;  %v10627_v61 = vpop.permute.xlu0 %3551 }
 0xb0f   :  { %8157 = vset.pattern.permute.xlu0 %v11639_v41 }
 0xb10   :  { %3595 = vperm.xlu0 %8157, %v10486_v8  }
 0xb12   :  { %3542 = vperm.xlu1 %8156, %v3524_v54   ;;  %v10631_v5 = vpop.permute.xlu0 %3561 }
 0xb14   :  { %3870 = vrot.lane.b32.xlu0 %v10404_v21, %s8431_s13  ;;  %v10629_v21 = vpop.permute.xlu1 %3587 }
 0xb15   :  { %8158 = vset.pattern.permute.xlu0 %v11638_v53 }
 0xb16   :  { %3566 = vperm.xlu1 %8156, %v10486_v8  }
 0xb18   :  { %v10633_v37 = vpop.permute.xlu1 %3591 }
 0xb1a   :  { %3866 = vrot.lane.b32.xlu1 %v10409_v36, %s8431_s13 }
 0xb1e   :  { %3868 = vrot.lane.b32.xlu1 %v10420_v40, %s8431_s13 }
 0xb22   :  { %3872 = vrot.lane.b32.xlu1 %v10411_v28, %s8431_s13 }
 0xb89   :  { %v3533_v50 = vpop.permute.xlu1 %3532 }
 0xb8a   :  { %v3528_v36 = vpop.permute.xlu0 %3527  ;;  %v3546_v24 = vmul.f32 %v3533_v50, %v10270_v56 }
 0xb8b   :  { %v3545_v40 = vmul.f32 %v3528_v36, %v10267_v55 }
 0xb8c   :  { %v3599_v19 = vmul.f32 %v10629_v21, %v3546_v24  ;;  %v3570_v3 = vmul.f32 %v10625_v11, %v3546_v24 }
 0xb8d   :  { %v3538_v62 = vpop.permute.xlu1 %3537  ;;  %v3598_v28 = vmul.f32 %v10623_v17, %v3545_v40  ;;  %v3569_v22 = vmul.f32 %v10627_v61, %v3545_v40 }
 0xb8e   :  { %v3547_v12 = vmul.f32 %v3538_v62, %v10273_v0 }
 0xb8f   :  { %v3602_v32 = vadd.f32 %v3599_v19, %v3598_v28  ;;  %v10645_v36 = vpop.permute.xlu0 %3595  ;;  %v3573_v55 = vadd.f32 %v3570_v3, %v3569_v22 }
 0xb90   :  { %v3600_v52 = vmul.f32 %v10633_v37, %v3547_v12  ;;  %v3571_v54 = vmul.f32 %v10631_v5, %v3547_v12 }
 0xb91   :  { %v3543_v2 = vpop.permute.xlu1 %3542 }
 0xb92   :  { %v3548_v50 = vmul.f32 %v3543_v2, %v10264_v18  ;;  %v3603_v56 = vadd.f32 %v3602_v32, %v3600_v52  ;;  %v3574_v62 = vadd.f32 %v3573_v55, %v3571_v54 }
 0xb94   :  { %v3601_v53 = vmul.f32 %v10645_v36, %v3548_v50 }
 0xb95   :  { %v10648_v41 = vpop.permute.xlu1 %3566 }
 0xb96   :  { %v3604_v40 = vadd.f32 %v3603_v56, %v3601_v53  ;;  %v3572_v24 = vmul.f32 %v10648_v41, %v3548_v50 }
 0xb98   :  { %v3605_v0 = vrot.slane %v3604_v40, 4  ;;  %v3575_v38 = vadd.f32 %v3574_v62, %v3572_v24 }
 0xb9a   :  { %v3606_v51 = vadd.f32 %v3605_v0, %v3604_v40  ;;  %v3576_v28 = vrot.slane %v3575_v38, 4 }
 0xb9c   :  { %v3607_v19 = vrot.slane %v3606_v51, 2  ;;  %v3577_v12 = vadd.f32 %v3576_v28, %v3575_v38 }
 0xb9e   :  { %v3608_v29 = vadd.f32 %v3607_v19, %v3606_v51  ;;  %v3578_v2 = vrot.slane %v3577_v12, 2 }
 0xba0   :  { %v3609_v18 = vrot.slane %v3608_v29, 1  ;;  %v3579_v48 = vadd.f32 %v3578_v2, %v3577_v12 }
 0xba2   :  { %v3580_v22 = vrot.slane %v3579_v48, 1  ;;  %v3610_v3 = vadd.f32 %v3609_v18, %v3608_v29 }
 0xba4   :  { %v3581_v52 = vadd.f32 %v3580_v22, %v3579_v48  ;;  %v3867_v48 = vpop.permute.xlu1 %3866 }
 0xba6   :  { %v3612_v32 = vsel %vm3611_vm14, %v3581_v52, %v3610_v3 }
 0xba7   :  { %v3613_v55 = vpack.c.bf16 %v3612_v32, %v3612_v32 }
 0xba8   :  { %v3869_v56 = vpop.permute.xlu1 %3868 }
 0xba9   :  { %7828 = vmatmul.mubr.bf16.vlgmr.msra.gmra.mrb[20].mxu1 %v3613_v55 }
 0xbaa   :  { %7860 = vmatpush3.bf16.msra.mxu1 %v10425_v23  ;;  %7863 = vmatprep.mubr.msk.bf16.mxu1 %vm3155_vm8, %v10182_v7 }
 0xbab   :  { %7861 = vmatprep.subr.bf16.mxu1 %v10418_v31 }
 0xbae   :  { %7862 = vmatpush3.bf16.msra.mxu1 %v10418_v31 }
 0xbaf   :  { %7867 = vmatprep.subr.bf16.mxu1 %v11627_v15 }
 0xbb1   :  { %7864 = vmatmul.mubr.msk.bf16.vlgmr.msra.gmra.mrb[24].mxu1 %vm3155_vm8, %v10243_v58 }
 0xbb2   :  { %7868 = vmatpush3.bf16.msra.mxu1 %v10309_v27  ;;  %7883 = vmatprep.mubr.msk.bf16.mxu1 %vm8430_vm0, %v11627_v15 }
 0xbb3   :  { %7869 = vmatprep.subr.bf16.mxu1 %v11627_v15 }
 0xbb6   :  { %7870 = vmatpush3.bf16.msra.mxu1 %v10331_v34 }
 0xbb7   :  { %7871 = vmatprep.subr.bf16.mxu1 %v11627_v15 }
 0xbba   :  { %7872 = vmatpush3.bf16.msra.mxu1 %v10342_v35 }
 0xbbb   :  { %7873 = vmatprep.subr.bf16.mxu1 %v11627_v15 }
 0xbbe   :  { %7874 = vmatpush3.bf16.msra.mxu1 %v10350_v43 }
 0xbbf   :  { %7875 = vmatprep.subr.bf16.mxu1 %v11627_v15 }
 0xbc2   :  { %7876 = vmatpush3.bf16.msra.mxu1 %v10361_v26  ;;  %v3873_v26 = vpop.permute.xlu1 %3872 }
 0xbc3   :  { %7877 = vmatprep.subr.bf16.mxu1 %v11627_v15 }
 0xbc6   :  { %7878 = vmatpush3.bf16.msra.mxu1 %v10382_v16 }
 0xbc7   :  { %7879 = vmatprep.subr.bf16.mxu1 %v11627_v15 }
 0xbca   :  { %7880 = vmatpush3.bf16.msra.mxu1 %v10389_v25 }
 0xbcb   :  { %7881 = vmatprep.subr.bf16.mxu1 %v11627_v15 }
 0xbce   :  { %7882 = vmatpush3.bf16.msra.mxu1 %v10398_v33  ;;  %v3871_v33 = vpop.permute.xlu0 %3870 }
 0xbcf   :  { %7915 = vmatprep.subr.bf16.mxu1 %v10531_v10 }
 0xc7c   :  { %v10678_v0 = vpop.f32.mrb[20].mxu1 }
 0xc7d   :  { %v7829_v7 = vpop.f32.mrb[21].mxu1 }
 0xc7e   :  { %v3703_v58 = vpop.f32.mrb[22].mxu1 }
 0xc7f   :  { %v7830_v18 = vpop.f32.mrb[23].mxu1 }
 0xc84   :  { %v7865_v27 = vpop.f32.mrb[24].mxu1 }
 0xc85   :  { %v3847_v34 = vpop.f32.mrb[25].mxu1  ;;  %v3880_v38 = vadd.f32 %v7865_v27, %v3871_v33 }
 0xc86   :  { %v3878_v35 = vadd.f32 %v3867_v48, %v3847_v34  ;;  %v7866_v43 = vpop.f32.mrb[26].mxu1 }
 0xc87   :  { %v3850_v16 = vpop.f32.mrb[27].mxu1  ;;  %v3881_v31 = vadd.f32 %v7866_v43, %v3873_v26  ;;  %v3884_v53 = vadd.f32 %v3880_v38, %v10402_v39 }
 0xc88   :  { %v3882_v25 = vadd.f32 %v3878_v35, %v10402_v39  ;;  %v3879_v23 = vadd.f32 %v3869_v56, %v3850_v16 }
 0xc89   :  { %v3885_v51 = vadd.f32 %v3881_v31, %v10402_v39 }
 0xc8a   :  { %v3883_v29 = vadd.f32 %v3879_v23, %v10402_v39  ;;  %3888 = vperm.xlu0 %8158, %v3882_v25  }
 0xc8c   :  { %3893 = vperm.xlu1 %8156, %v3883_v29  }
 0xc8e   :  { %3903 = vperm.xlu0 %8158, %v3885_v51  }
 0xc90   :  { %3898 = vperm.xlu1 %8156, %v3884_v53  }
 0xd09   :  { %v3889_v54 = vpop.permute.xlu0 %3888 }
 0xd0a   :  { %v3906_v24 = vsel %vm3390_vm10, %v3889_v54, -1e+30 }
 0xd0b   :  { %v3894_v50 = vpop.permute.xlu1 %3893  ;;  %v3910_v22 = vsel %vm3418_vm13, %v3906_v24, -inf }
 0xd0c   :  { %v3907_v62 = vsel %vm3391_vm9, %v3894_v50, -1e+30 }
 0xd0d   :  { %v3904_v40 = vpop.permute.xlu0 %3903  ;;  %v3911_v19 = vsel %vm3418_vm13, %v3907_v62, -inf }
 0xd0e   :  { %v3909_v28 = vsel %vm3393_vm11, %v3904_v40, -1e+30  ;;  %v3914_v32 = vmax.f32 %v3910_v22, %v3911_v19 }
 0xd0f   :  { %v3899_v12 = vpop.permute.xlu1 %3898  ;;  %v3913_v3 = vsel %vm3418_vm13, %v3909_v28, -inf }
 0xd10   :  { %v3908_v2 = vsel %vm3392_vm12, %v3899_v12, -1e+30 }
 0xd11   :  { %v3912_v52 = vsel %vm3418_vm13, %v3908_v2, -inf }
 0xd12   :  { %v3915_v55 = vmax.f32 %v3912_v52, %v3913_v3 }
 0xd14   :  { %v3916_v48 = vmax.f32 %v3914_v32, %v3915_v55 }
 0xd16   :  { %v3917_v7 = vrot.slane %v3916_v48, 4 }
 0xd18   :  { %v3918_v58 = vmax.f32 %v3916_v48, %v3917_v7 }
 0xd1a   :  { %v3919_v18 = vrot.slane %v3918_v58, 2 }
 0xd1c   :  { %v3920_v56 = vmax.f32 %v3918_v58, %v3919_v18 }
 0xd1e   :  { %v3921_v27 = vrot.slane %v3920_v56, 1 }
 0xd20   :  { %v3922_v34 = vmax.f32 %v3920_v56, %v3921_v27 }
 0xd22   :  { %v3924_v35 = vmul.f32 %v3922_v34, %v10476_v63  ;;  %v3923_v43 = vmul.f32 %v3922_v34, %v10481_v4  ;;  %v3925_v31 = vmul.f32 %v3922_v34, %v10492_v60  ;;  %v3926_v23 = vmul.f32 %v3922_v34, %v10486_v8 }
 0xd24   :  { %v3930_v26 = vsel %vm3418_vm13, %v3924_v35, 0.0  ;;  %v3927_v16 = vsel %vm3418_vm13, %v3923_v43, 0.0  ;;  %v3933_v33 = vsel %vm3418_vm13, %v3925_v31, 0.0  ;;  %v3936_v38 = vsel %vm3418_vm13, %v3926_v23, 0.0 }
 0xd25   :  { %3931 = vadd.xlane.f32.xlu0 %v3930_v26  ;;  %3928 = vadd.xlane.f32.xlu1 %v3927_v16 }
 0xd29   :  { %3934 = vadd.xlane.f32.xlu0 %v3933_v33  ;;  %3937 = vadd.xlane.f32.xlu1 %v3936_v38 }
 0xdb2   :  { %v3932_v54 = vpop.xlane.xlu0 %3931  ;;  %v3929_v50 = vpop.xlane.xlu1 %3928 }
 0xdb3   :  { %v3940_v62 = vsub.f32 %v3883_v29, %v3932_v54  ;;  %v3939_v40 = vsub.f32 %v3882_v25, %v3929_v50 }
 0xdb5   :  { %v3945_v24 = vmul.f32 1.442695, %v3940_v62  ;;  %v3943_v28 = vmul.f32 1.442695, %v3939_v40 }
 0xdb6   :  { %v3935_v19 = vpop.xlane.xlu0 %3934  ;;  %v3938_v12 = vpop.xlane.xlu1 %3937 }
 0xdb7   :  { %8279 = vpow2.f32 %v3945_v24  ;;  %v3941_v2 = vsub.f32 %v3884_v53, %v3935_v19  ;;  %v3942_v22 = vsub.f32 %v3885_v51, %v3938_v12 }
 0xdb8   :  { %8281 = vpow2.f32 %v3943_v28 }
 0xdb9   :  { %v3947_v3 = vmul.f32 1.442695, %v3941_v2  ;;  %v3949_v52 = vmul.f32 1.442695, %v3942_v22 }
 0xdbb   :  { %8283 = vpow2.f32 %v3947_v3 }
 0xdbc   :  { %8285 = vpow2.f32 %v3949_v52 }
 0xdc1   :  { %v8280_v32 = vpop.eup %8279 }
 0xdc2   :  { %v8282_v55 = vpop.eup %8281  ;;  %3958 = vperm.xlu1 %8156, %v8280_v32  }
 0xdc3   :  { %3953 = vperm.xlu0 %8158, %v8282_v55  }
 0xdc5   :  { %v8284_v48 = vpop.eup %8283 }
 0xdc6   :  { %v8286_v7 = vpop.eup %8285  ;;  %3963 = vperm.xlu1 %8156, %v8284_v48  }
 0xdc7   :  { %3968 = vperm.xlu0 %8158, %v8286_v7  }
 0xe41   :  { %v3959_v25 = vpop.permute.xlu1 %3958 }
 0xe42   :  { %v3954_v29 = vpop.permute.xlu0 %3953  ;;  %v3972_v58 = vmul.f32 %v3959_v25, %v10476_v63 }
 0xe43   :  { %v3971_v53 = vmul.f32 %v3954_v29, %v10481_v4 }
 0xe44   :  { %v3976_v51 = vsel %vm3418_vm13, %v3972_v58, 0.0 }
 0xe45   :  { %v3975_v18 = vsel %vm3418_vm13, %v3971_v53, 0.0  ;;  %v3964_v56 = vpop.permute.xlu1 %3963 }
 0xe46   :  { %v3969_v27 = vpop.permute.xlu0 %3968  ;;  %v3973_v34 = vmul.f32 %v3964_v56, %v10492_v60  ;;  %v3977_v35 = vadd.f32 %v3976_v51, %v3975_v18 }
 0xe47   :  { %v3974_v43 = vmul.f32 %v3969_v27, %v10486_v8 }
 0xe48   :  { %v3978_v26 = vsel %vm3418_vm13, %v3973_v34, 0.0 }
 0xe49   :  { %v3979_v16 = vadd.f32 %v3978_v26, %v3977_v35  ;;  %v3980_v31 = vsel %vm3418_vm13, %v3974_v43, 0.0 }
 0xe4b   :  { %v3981_v23 = vadd.f32 %v3980_v31, %v3979_v16 }
 0xe4d   :  { %v3982_v33 = vrot.slane %v3981_v23, 4 }
 0xe4f   :  { %v3983_v38 = vadd.f32 %v3982_v33, %v3981_v23 }
 0xe51   :  { %v3984_v54 = vrot.slane %v3983_v38, 2 }
 0xe53   :  { %v3985_v50 = vadd.f32 %v3984_v54, %v3983_v38 }
 0xe55   :  { %v3986_v62 = vrot.slane %v3985_v50, 1 }
 0xe57   :  { %v3987_v40 = vadd.f32 %v3986_v62, %v3985_v50 }
 0xe59   :  { %v3989_v24 = vmul.f32 %v3987_v40, %v10476_v63  ;;  %v3988_v28 = vmul.f32 %v3987_v40, %v10481_v4  ;;  %v3990_v2 = vmul.f32 %v3987_v40, %v10492_v60  ;;  %v3991_v22 = vmul.f32 %v3987_v40, %v10486_v8 }
 0xe5b   :  { %v3995_v19 = vsel %vm3418_vm13, %v3989_v24, 0.0  ;;  %v3992_v12 = vsel %vm3418_vm13, %v3988_v28, 0.0  ;;  %v3998_v3 = vsel %vm3418_vm13, %v3990_v2, 0.0  ;;  %v4001_v52 = vsel %vm3418_vm13, %v3991_v22, 0.0 }
 0xe5c   :  { %3996 = vadd.xlane.f32.xlu0 %v3995_v19  ;;  %3993 = vadd.xlane.f32.xlu1 %v3992_v12 }
 0xe60   :  { %3999 = vadd.xlane.f32.xlu0 %v3998_v3  ;;  %4002 = vadd.xlane.f32.xlu1 %v4001_v52 }
 0xee9   :  { %v3997_v25 = vpop.xlane.xlu0 %3996  ;;  %v3994_v29 = vpop.xlane.xlu1 %3993 }
 0xeea   :  { %v4005_v58 = vadd.f32 1e-16, %v3997_v25  ;;  %v4004_v53 = vadd.f32 1e-16, %v3994_v29 }
 0xeec   :  { %8287 = vrcp.f32 %v4005_v58 }
 0xeed   :  { %8289 = vrcp.f32 %v4004_v53  ;;  %v4000_v51 = vpop.xlane.xlu0 %3999  ;;  %v4003_v18 = vpop.xlane.xlu1 %4002 }
 0xeee   :  { %v4006_v56 = vadd.f32 1e-16, %v4000_v51  ;;  %v4007_v27 = vadd.f32 1e-16, %v4003_v18 }
 0xef0   :  { %8291 = vrcp.f32 %v4006_v56 }
 0xef1   :  { %8293 = vrcp.f32 %v4007_v27 }
 0xef6   :  { %v8288_v34 = vpop.eup %8287 }
 0xef7   :  { %v8290_v35 = vpop.eup %8289  ;;  %v4011_v43 = vmul.f32 %v8288_v34, %v8280_v32  ;;  %v8226_v32 = vld [vmem:[%s11494_s15 + $0x40] sm:$0xff]  }
 0xef8   :  { %v4009_v26 = vmul.f32 %v8290_v35, %v8282_v55  ;;  %v8227_v55 = vld [vmem:[%s11494_s15] sm:$0xff]   ;;  %7491 = vmatprep.subr.bf16.mxu0 %v8226_v32 }
 0xef9   :  { %4023 = vperm.xlu1 %8156, %v4011_v43   ;;  %7492 = vmatpush3.bf16.msra.mxu0 %v8227_v55 }
 0xefa   :  { %v8292_v16 = vpop.eup %8291  ;;  %4018 = vperm.xlu0 %8158, %v4009_v26  }
 0xefb   :  { %v8294_v31 = vpop.eup %8293  ;;  %v4013_v23 = vmul.f32 %v8292_v16, %v8284_v48  ;;  %v8232_v48 = vld [vmem:[%s11494_s15 + $0x58] sm:$0xff]  }
 0xefc   :  { %v4015_v33 = vmul.f32 %v8294_v31, %v8286_v7  ;;  %v8233_v7 = vld [vmem:[%s11494_s15 + $0x18] sm:$0xff]  }
 0xefd   :  { %4028 = vperm.xlu1 %8156, %v4013_v23  }
 0xefe   :  { %4033 = vperm.xlu0 %8158, %v4015_v33  }
 0xf01   :  { %4268 = vrot.lane.b32.xlu1 %v10519_v47, %s8431_s13  ;;  %v8228_v47 = vld [vmem:[%s11494_s15 + $0x48] sm:$0xff]  }
 0xf02   :  { %4270 = vrot.lane.b32.xlu0 %v10527_v14, %s8431_s13  ;;  %7493 = vmatprep.subr.bf16.mxu0 %v8228_v47  ;;  %v8231_v14 = vld [vmem:[%s11494_s15 + $0x10] sm:$0xff]  }
 0xf05   :  { %4272 = vrot.lane.b32.xlu1 %v10517_v44, %s8431_s13  ;;  %v8229_v44 = vld [vmem:[%s11494_s15 + $0x8] sm:$0xff]  }
 0xf06   :  { %4274 = vrot.lane.b32.xlu0 %v10521_v59, %s8431_s13  ;;  %v8230_v59 = vld [vmem:[%s11494_s15 + $0x50] sm:$0xff]   ;;  %7494 = vmatpush3.bf16.msra.mxu0 %v8229_v44 }
 0xf07   :  { %7495 = vmatprep.subr.bf16.mxu0 %v8230_v59 }
 0xf0a   :  { %7496 = vmatpush3.bf16.msra.mxu0 %v8231_v14 }
 0xf0b   :  { %7497 = vmatprep.subr.bf16.mxu0 %v8232_v48 }
 0xf0e   :  { %7498 = vmatpush3.bf16.msra.mxu0 %v8233_v7  ;;  %v10769_v7 = vld [vmem:[%s11622_s6] sm:$0xff]  }
 0xf78   :  { %v4024_v38 = vpop.permute.xlu1 %4023 }
 0xf79   :  { %v4019_v54 = vpop.permute.xlu0 %4018  ;;  %v4037_v50 = vmul.f32 %v4024_v38, %v10315_v6  ;;  %v10779_v38 = vld [vmem:[%s11622_s6 + $0x8] sm:$0xff]   ;;  %s11659_s6 = sld [smem:[#allocation82_spill]] }
 0xf7a   :  { %v4036_v62 = vmul.f32 %v4019_v54, %v10312_v49  ;;  %v10802_v54 = vld [vmem:[%s11493_s14 + $0x10] sm:$0xff]  }
 0xf7b   :  { %v4041_v40 = vmul.f32 %v4037_v50, %v10625_v11  ;;  %v4054_v24 = vmul.f32 %v4037_v50, %v10629_v21  ;;  %v10809_v50 = vld [vmem:[%s11493_s14 + $0x18] sm:$0xff]  }
 0xf7c   :  { %v4040_v28 = vmul.f32 %v4036_v62, %v10627_v61  ;;  %v4053_v19 = vmul.f32 %v4036_v62, %v10623_v17  ;;  %v4029_v12 = vpop.permute.xlu1 %4028  ;;  %v10816_v62 = vld [vmem:[%s11493_s14 + $0x20] sm:$0xff]  }
 0xf7d   :  { %v4034_v2 = vpop.permute.xlu0 %4033  ;;  %v4038_v22 = vmul.f32 %v4029_v12, %v10319_v13  ;;  %v8235_v12 = vld [vmem:[%s11494_s15 + $0x20] sm:$0xff]  }
 0xf7e   :  { %v4039_v3 = vmul.f32 %v4034_v2, %v10304_v42  ;;  %v4044_v52 = vadd.f32 %v4041_v40, %v4040_v28  ;;  %v4057_v25 = vadd.f32 %v4054_v24, %v4053_v19  ;;  %v10823_v40 = vld [vmem:[%s11493_s14 + $0x28] sm:$0xff]   ;;  %v10830_v24 = vld [vmem:[%s11493_s14 + $0x30] sm:$0xff]   ;;  %v10837_v28 = vld [vmem:[%s11493_s14 + $0x38] sm:$0xff]  }
 0xf7f   :  { %v4042_v29 = vmul.f32 %v4038_v22, %v10631_v5  ;;  %v4055_v58 = vmul.f32 %v4038_v22, %v10633_v37  ;;  %v8234_v19 = vld [vmem:[%s11494_s15 + $0x60] sm:$0xff]   ;;  %v8236_v2 = vld [vmem:[%s11494_s15 + $0x68] sm:$0xff]  }
 0xf80   :  { %v4043_v53 = vmul.f32 %v4039_v3, %v10648_v41  ;;  %v4056_v51 = vmul.f32 %v4039_v3, %v10645_v36  ;;  %7499 = vmatprep.subr.bf16.mxu0 %v8234_v19  ;;  %v8237_v22 = vld [vmem:[%s11494_s15 + $0x28] sm:$0xff]   ;;  %v8238_v3 = vld [vmem:[%s11494_s15 + $0x70] sm:$0xff]  }
 0xf81   :  { %v4045_v18 = vadd.f32 %v4044_v52, %v4042_v29  ;;  %v4058_v56 = vadd.f32 %v4057_v25, %v4055_v58  ;;  %7500 = vmatpush3.bf16.msra.mxu0 %v8235_v12  ;;  %v8239_v52 = vld [vmem:[%s11494_s15 + $0x30] sm:$0xff]   ;;  %v8240_v25 = vld [vmem:[%s11494_s15 + $0x78] sm:$0xff]   ;;  %v10867_v58 = vsub.s32 7, %v10000_v1  ;;  %v4269_v1 = vpop.permute.xlu1 %4268 }
 0xf82   :  { %7501 = vmatprep.subr.bf16.mxu0 %v8236_v2  ;;  %v8241_v29 = vld [vmem:[%s11494_s15 + $0x38] sm:$0xff]  }
 0xf83   :  { %v4046_v27 = vadd.f32 %v4045_v18, %v4043_v53  ;;  %v4059_v34 = vadd.f32 %v4058_v56, %v4056_v51  ;;  %11640 = vst [vmem:[#allocation77_spill] sm:$0xff] %v10867_v58  ;;  %v8349_v53 = vld [vmem:[%s11495_s16] sm:$0xff] }
 0xf84   :  { %v10873_v51 = vrot.slane %v8349_v53, %v10867_v58 }
 0xf85   :  { %v4047_v35 = vrot.slane %v4046_v27, 4  ;;  %v4060_v43 = vrot.slane %v4059_v34, 4  ;;  %7502 = vmatpush3.bf16.msra.mxu0 %v8237_v22 }
 0xf86   :  { %7503 = vmatprep.subr.bf16.mxu0 %v8238_v3  ;;  %v3701_v18 = vadd.f32 %v10678_v0, %v10873_v51 }
 0xf87   :  { %v4048_v26 = vadd.f32 %v4047_v35, %v4046_v27  ;;  %v4061_v16 = vadd.f32 %v4060_v43, %v4059_v34 }
 0xf88   :  { %8295 = vtanh.f32 %v3701_v18 }
 0xf89   :  { %v4049_v31 = vrot.slane %v4048_v26, 2  ;;  %v4062_v23 = vrot.slane %v4061_v16, 2  ;;  %7504 = vmatpush3.bf16.msra.mxu0 %v8239_v52 }
 0xf8a   :  { %7505 = vmatprep.subr.bf16.mxu0 %v8240_v25 }
 0xf8b   :  { %v4050_v33 = vadd.f32 %v4049_v31, %v4048_v26  ;;  %v4063_v32 = vadd.f32 %v4062_v23, %v4061_v16  ;;  %v4271_v26 = vpop.permute.xlu0 %4270 }
 0xf8d   :  { %v4051_v55 = vrot.slane %v4050_v33, 1  ;;  %v4064_v47 = vrot.slane %v4063_v32, 1  ;;  %7506 = vmatpush3.bf16.msra.mxu0 %v8241_v29 }
 0xf8e   :  { %7999 = vmatprep.subr.bf16.mxu0 %v11627_v15 }
 0xf8f   :  { %v4052_v44 = vadd.f32 %v4051_v55, %v4050_v33  ;;  %v4065_v59 = vadd.f32 %v4064_v47, %v4063_v32  ;;  %v4273_v32 = vpop.permute.xlu1 %4272 }
 0xf91   :  { %v4066_v14 = vsel %vm3611_vm14, %v4052_v44, %v4065_v59 }
 0xf92   :  { %v4067_v48 = vpack.c.bf16 %v4066_v14, %v4066_v14  ;;  %v8296_v47 = vpop.eup %8295 }
 0xf93   :  { %v4913_v22 = vpack.c.bf16 %v8296_v47, %v8296_v47 }
 0xf94   :  { %7884 = vmatmul.mubr.bf16.vlgmr.msra.gmra.mrb[28].mxu1 %v4067_v48  ;;  %v4275_v48 = vpop.permute.xlu0 %4274 }
 0xf95   :  { %7916 = vmatpush3.bf16.msra.mxu1 %v10531_v10  ;;  %7919 = vmatprep.mubr.msk.bf16.mxu1 %vm3155_vm8, %v10769_v7  ;;  %v10786_v10 = vld [vmem:[%s11493_s14] sm:$0xff]  }
 0xf96   :  { %7917 = vmatprep.subr.bf16.mxu1 %v10525_v9 }
 0xf99   :  { %7918 = vmatpush3.bf16.msra.mxu1 %v10525_v9  ;;  %v10795_v9 = vld [vmem:[%s11493_s14 + $0x8] sm:$0xff]   ;;  %s7294_s14 = sld [smem:[#allocation8 + $0x8]] }
 0xf9a   :  { %7923 = vmatprep.subr.bf16.mxu1 %v11627_v15 }
 0xf9c   :  { %7920 = vmatmul.mubr.msk.bf16.vlgmr.msra.gmra.mrb[32].mxu1 %vm3155_vm8, %v10779_v38 }
 0xf9d   :  { %7924 = vmatpush3.bf16.msra.mxu1 %v10786_v10  ;;  %7939 = vmatprep.mubr.msk.bf16.mxu1 %vm8430_vm0, %v11627_v15 }
 0xf9e   :  { %7925 = vmatprep.subr.bf16.mxu1 %v11627_v15 }
 0xfa1   :  { %7926 = vmatpush3.bf16.msra.mxu1 %v10795_v9 }
 0xfa2   :  { %7927 = vmatprep.subr.bf16.mxu1 %v11627_v15 }
 0xfa5   :  { %7928 = vmatpush3.bf16.msra.mxu1 %v10802_v54 }
 0xfa6   :  { %7929 = vmatprep.subr.bf16.mxu1 %v11627_v15 }
 0xfa9   :  { %7930 = vmatpush3.bf16.msra.mxu1 %v10809_v50 }
 0xfaa   :  { %7931 = vmatprep.subr.bf16.mxu1 %v11627_v15 }
 0xfad   :  { %7932 = vmatpush3.bf16.msra.mxu1 %v10816_v62 }
 0xfae   :  { %7933 = vmatprep.subr.bf16.mxu1 %v11627_v15 }
 0xfb1   :  { %7934 = vmatpush3.bf16.msra.mxu1 %v10823_v40 }
 0xfb2   :  { %7935 = vmatprep.subr.bf16.mxu1 %v11627_v15 }
 0xfb5   :  { %7936 = vmatpush3.bf16.msra.mxu1 %v10830_v24 }
 0xfb6   :  { %7937 = vmatprep.subr.bf16.mxu1 %v11627_v15 }
 0xfb9   :  { %7938 = vmatpush3.bf16.msra.mxu1 %v10837_v28 }
 0xfba   :  { %7971 = vmatprep.subr.bf16.mxu1 %v10587_v46 }
0x1067   :  { %v4102_v56 = vpop.f32.mrb[28].mxu1 }
0x1068   :  { %v4103_v27 = vadd.f32 %v4102_v56, %v10873_v51  ;;  %v7885_v34 = vpop.f32.mrb[29].mxu1 }
0x1069   :  { %v4105_v35 = vpop.f32.mrb[30].mxu1 }
0x106a   :  { %8297 = vtanh.f32 %v4103_v27  ;;  %v7886_v43 = vpop.f32.mrb[31].mxu1 }
0x106f   :  { %v7921_v16 = vpop.f32.mrb[32].mxu1 }
0x1070   :  { %v4249_v31 = vpop.f32.mrb[33].mxu1  ;;  %v4282_v44 = vadd.f32 %v7921_v16, %v4273_v32 }
0x1071   :  { %v4280_v23 = vadd.f32 %v4269_v1, %v4249_v31  ;;  %v7922_v33 = vpop.f32.mrb[34].mxu1 }
0x1072   :  { %v4252_v55 = vpop.f32.mrb[35].mxu1  ;;  %v4283_v12 = vadd.f32 %v7922_v33, %v4275_v48  ;;  %v4286_v3 = vadd.f32 %v4282_v44, %v10402_v39  ;;  %v10902_v48 = vld [vmem:[%s11632_s24 + $0x8] sm:$0xff] }
0x1073   :  { %v10879_v0 = vadd.f32 %v4280_v23, %v10402_v39  ;;  %v4281_v59 = vadd.f32 %v4271_v26, %v4252_v55 }
0x1074   :  { %v8298_v14 = vpop.eup %8297  ;;  %v4287_v52 = vadd.f32 %v4283_v12, %v10402_v39  ;;  %v10908_v12 = vld [vmem:[%s11632_s24] sm:$0xff] }
0x1075   :  { %v4914_v19 = vpack.c.bf16 %v8298_v14, %v8298_v14  ;;  %v4285_v2 = vadd.f32 %v4281_v59, %v10402_v39  ;;  %4290 = vperm.xlu1 %8156, %v10879_v0  }
0x1077   :  { %5227 = vmatprep.mubr.bf16.mxu0 %v4914_v19  ;;  %4295 = vperm.xlu0 %8158, %v4285_v2  }
0x1078   :  { %5228 = vmatmul.mubr.bf16.vlgmr.msra.gmra.mrb[40].mxu0 %v4913_v22 }
0x1079   :  { %4300 = vperm.xlu1 %8156, %v4286_v3   ;;  %8003 = vmatprep.mubr.msk.bf16.mxu0 %vm8430_vm0, %v11627_v15 }
0x107b   :  { %4305 = vperm.xlu0 %8158, %v4287_v52  }
0x10f4   :  { %v4291_v25 = vpop.permute.xlu1 %4290 }
0x10f5   :  { %v4308_v56 = vsel %vm3390_vm10, %v4291_v25, -1e+30 }
0x10f6   :  { %v4296_v29 = vpop.permute.xlu0 %4295  ;;  %v4312_v1 = vsel %vm3418_vm13, %v4308_v56, -inf  ;;  %v10922_v56 = vld [vmem:[%s11632_s24 + $0x18] sm:$0xff] }
0x10f7   :  { %v4309_v53 = vsel %vm3391_vm9, %v4296_v29, -1e+30 }
0x10f8   :  { %v4301_v18 = vpop.permute.xlu1 %4300  ;;  %v4313_v34 = vsel %vm3418_vm13, %v4309_v53, -inf  ;;  %v10916_v53 = vld [vmem:[%s11632_s24 + $0x10] sm:$0xff] }
0x10f9   :  { %v4310_v27 = vsel %vm3392_vm12, %v4301_v18, -1e+30  ;;  %v4316_v31 = vmax.f32 %v4312_v1, %v4313_v34 }
0x10fa   :  { %v4306_v35 = vpop.permute.xlu0 %4305  ;;  %v4314_v26 = vsel %vm3418_vm13, %v4310_v27, -inf }
0x10fb   :  { %v4311_v43 = vsel %vm3393_vm11, %v4306_v35, -1e+30 }
0x10fc   :  { %v4315_v16 = vsel %vm3418_vm13, %v4311_v43, -inf }
0x10fd   :  { %v4317_v23 = vmax.f32 %v4314_v26, %v4315_v16 }
0x10ff   :  { %v4318_v33 = vmax.f32 %v4316_v31, %v4317_v23 }
0x1101   :  { %v4319_v32 = vrot.slane %v4318_v33, 4 }
0x1103   :  { %v4320_v55 = vmax.f32 %v4318_v33, %v4319_v32 }
0x1105   :  { %v4321_v47 = vrot.slane %v4320_v55, 2 }
0x1107   :  { %v4322_v44 = vmax.f32 %v4320_v55, %v4321_v47 }
0x1109   :  { %v4323_v59 = vrot.slane %v4322_v44, 1 }
0x110b   :  { %v4324_v14 = vmax.f32 %v4322_v44, %v4323_v59 }
0x110d   :  { %v4326_v19 = vmul.f32 %v10902_v48, %v4324_v14  ;;  %v4325_v22 = vmul.f32 %v10908_v12, %v4324_v14  ;;  %v4327_v18 = vmul.f32 %v10916_v53, %v4324_v14  ;;  %v4328_v27 = vmul.f32 %v10922_v56, %v4324_v14 }
0x110f   :  { %v4332_v25 = vsel %vm3418_vm13, %v4326_v19, 0.0  ;;  %v4329_v29 = vsel %vm3418_vm13, %v4325_v22, 0.0  ;;  %v4335_v34 = vsel %vm3418_vm13, %v4327_v18, 0.0  ;;  %v4338_v35 = vsel %vm3418_vm13, %v4328_v27, 0.0 }
0x1110   :  { %4333 = vadd.xlane.f32.xlu0 %v4332_v25  ;;  %4330 = vadd.xlane.f32.xlu1 %v4329_v29 }
0x1114   :  { %4336 = vadd.xlane.f32.xlu0 %v4335_v34  ;;  %4339 = vadd.xlane.f32.xlu1 %v4338_v35 }
0x114b   :  { %v7507_v43 = vpop.f32.mrb[40].mxu0 }
0x114c   :  { %v7508_v1 = vpop.f32.mrb[41].mxu0 }
0x114d   :  { %v10927_v26 = vadd.f32 %v7508_v1, %v7507_v43  ;;  %v7510_v16 = vpop.f32.mrb[42].mxu0 }
0x114e   :  { %v7511_v31 = vpop.f32.mrb[43].mxu0 }
0x119d   :  { %v4334_v23 = vpop.xlane.xlu0 %4333  ;;  %v4331_v33 = vpop.xlane.xlu1 %4330 }
0x119e   :  { %v4342_v32 = vsub.f32 %v4285_v2, %v4334_v23  ;;  %v4341_v55 = vsub.f32 %v10879_v0, %v4331_v33 }
0x11a0   :  { %v4347_v47 = vmul.f32 1.442695, %v4342_v32  ;;  %v4345_v44 = vmul.f32 1.442695, %v4341_v55 }
0x11a1   :  { %v4337_v59 = vpop.xlane.xlu0 %4336  ;;  %v4340_v14 = vpop.xlane.xlu1 %4339 }
0x11a2   :  { %8299 = vpow2.f32 %v4347_v47  ;;  %v4343_v19 = vsub.f32 %v4286_v3, %v4337_v59  ;;  %v4344_v22 = vsub.f32 %v4287_v52, %v4340_v14 }
0x11a3   :  { %8301 = vpow2.f32 %v4345_v44 }
0x11a4   :  { %v4349_v25 = vmul.f32 1.442695, %v4343_v19  ;;  %v4351_v29 = vmul.f32 1.442695, %v4344_v22 }
0x11a6   :  { %8303 = vpow2.f32 %v4349_v25 }
0x11a7   :  { %8305 = vpow2.f32 %v4351_v29 }
0x11ac   :  { %v8300_v18 = vpop.eup %8299 }
0x11ad   :  { %v8302_v27 = vpop.eup %8301  ;;  %4360 = vperm.xlu1 %8156, %v8300_v18  }
0x11ae   :  { %4355 = vperm.xlu0 %8158, %v8302_v27  }
0x11b0   :  { %v8304_v34 = vpop.eup %8303 }
0x11b1   :  { %v8306_v2 = vpop.eup %8305  ;;  %4365 = vperm.xlu1 %8156, %v8304_v34  }
0x11b2   :  { %4370 = vperm.xlu0 %8158, %v8306_v2  }
0x122c   :  { %v4361_v0 = vpop.permute.xlu1 %4360 }
0x122d   :  { %v4356_v35 = vpop.permute.xlu0 %4355  ;;  %v4374_v43 = vmul.f32 %v10902_v48, %v4361_v0 }
0x122e   :  { %v4373_v3 = vmul.f32 %v10908_v12, %v4356_v35 }
0x122f   :  { %v4378_v52 = vsel %vm3418_vm13, %v4374_v43, 0.0 }
0x1230   :  { %v4377_v1 = vsel %vm3418_vm13, %v4373_v3, 0.0  ;;  %v4366_v16 = vpop.permute.xlu1 %4365 }
0x1231   :  { %v4371_v31 = vpop.permute.xlu0 %4370  ;;  %v4375_v23 = vmul.f32 %v10916_v53, %v4366_v16  ;;  %v4379_v33 = vadd.f32 %v4378_v52, %v4377_v1 }
0x1232   :  { %v4376_v32 = vmul.f32 %v10922_v56, %v4371_v31 }
0x1233   :  { %v4380_v55 = vsel %vm3418_vm13, %v4375_v23, 0.0 }
0x1234   :  { %v4381_v47 = vadd.f32 %v4380_v55, %v4379_v33  ;;  %v4382_v44 = vsel %vm3418_vm13, %v4376_v32, 0.0 }
0x1236   :  { %v4383_v59 = vadd.f32 %v4382_v44, %v4381_v47 }
0x1238   :  { %v4384_v14 = vrot.slane %v4383_v59, 4 }
0x123a   :  { %v4385_v19 = vadd.f32 %v4384_v14, %v4383_v59 }
0x123c   :  { %v4386_v22 = vrot.slane %v4385_v19, 2 }
0x123e   :  { %v4387_v25 = vadd.f32 %v4386_v22, %v4385_v19 }
0x1240   :  { %v4388_v29 = vrot.slane %v4387_v25, 1 }
0x1242   :  { %v4389_v0 = vadd.f32 %v4388_v29, %v4387_v25 }
0x1244   :  { %v4391_v35 = vmul.f32 %v10902_v48, %v4389_v0  ;;  %v4390_v43 = vmul.f32 %v10908_v12, %v4389_v0  ;;  %v4392_v1 = vmul.f32 %v10916_v53, %v4389_v0  ;;  %v4393_v16 = vmul.f32 %v10922_v56, %v4389_v0 }
0x1246   :  { %v4397_v3 = vsel %vm3418_vm13, %v4391_v35, 0.0  ;;  %v4394_v52 = vsel %vm3418_vm13, %v4390_v43, 0.0  ;;  %v4400_v31 = vsel %vm3418_vm13, %v4392_v1, 0.0  ;;  %v4403_v23 = vsel %vm3418_vm13, %v4393_v16, 0.0  ;;  %v11641_v1 = vld [vmem:[#allocation70_spill] sm:$0xff] }
0x1247   :  { %4398 = vadd.xlane.f32.xlu0 %v4397_v3  ;;  %4395 = vadd.xlane.f32.xlu1 %v4394_v52 }
0x124b   :  { %4401 = vadd.xlane.f32.xlu0 %v4400_v31  ;;  %4404 = vadd.xlane.f32.xlu1 %v4403_v23 }
0x12d4   :  { %v4399_v33 = vpop.xlane.xlu0 %4398  ;;  %v4396_v32 = vpop.xlane.xlu1 %4395 }
0x12d5   :  { %v4407_v55 = vadd.f32 1e-16, %v4399_v33  ;;  %v4406_v47 = vadd.f32 1e-16, %v4396_v32 }
0x12d7   :  { %8307 = vrcp.f32 %v4407_v55 }
0x12d8   :  { %8309 = vrcp.f32 %v4406_v47  ;;  %v4402_v44 = vpop.xlane.xlu0 %4401  ;;  %v4405_v59 = vpop.xlane.xlu1 %4404  ;;  %v11644_v47 = vld [vmem:[#allocation68_spill] sm:$0xff] }
0x12d9   :  { %v4408_v14 = vadd.f32 1e-16, %v4402_v44  ;;  %v4409_v19 = vadd.f32 1e-16, %v4405_v59 }
0x12db   :  { %8311 = vrcp.f32 %v4408_v14 }
0x12dc   :  { %8313 = vrcp.f32 %v4409_v19 }
0x12e1   :  { %v8308_v22 = vpop.eup %8307 }
0x12e2   :  { %v8310_v25 = vpop.eup %8309  ;;  %v4413_v29 = vmul.f32 %v8308_v22, %v8300_v18 }
0x12e3   :  { %v4411_v0 = vmul.f32 %v8310_v25, %v8302_v27 }
0x12e4   :  { %4425 = vperm.xlu1 %8156, %v4413_v29  }
0x12e5   :  { %v8312_v35 = vpop.eup %8311  ;;  %4420 = vperm.xlu0 %8158, %v4411_v0  }
0x12e6   :  { %v8314_v43 = vpop.eup %8313  ;;  %v4415_v3 = vmul.f32 %v8312_v35, %v8304_v34  ;;  %v11642_v34 = vld [vmem:[#allocation69_spill] sm:$0xff] }
0x12e7   :  { %v4417_v52 = vmul.f32 %v8314_v43, %v8306_v2 }
0x12e8   :  { %4430 = vperm.xlu1 %8156, %v4415_v3  }
0x12e9   :  { %4435 = vperm.xlu0 %8158, %v4417_v52  }
0x12ec   :  { %4670 = vrot.lane.b32.xlu1 %v10575_v57, %s8431_s13 }
0x12ed   :  { %4672 = vrot.lane.b32.xlu0 %v10583_v45, %s8431_s13 }
0x12f0   :  { %4674 = vrot.lane.b32.xlu1 %v10573_v20, %s8431_s13  ;;  %v11643_v20 = vld [vmem:[#allocation71_spill] sm:$0xff] }
0x12f1   :  { %4676 = vrot.lane.b32.xlu0 %v10577_v30, %s8431_s13 }
0x1363   :  { %v4426_v18 = vpop.permute.xlu1 %4425 }
0x1364   :  { %v4421_v27 = vpop.permute.xlu0 %4420  ;;  %v4439_v16 = vmul.f32 %v4426_v18, %v11641_v1 }
0x1365   :  { %v4438_v2 = vmul.f32 %v4421_v27, %v11642_v34 }
0x1366   :  { %v4443_v31 = vmul.f32 %v4439_v16, %v10625_v11  ;;  %v4456_v23 = vmul.f32 %v4439_v16, %v10629_v21 }
0x1367   :  { %v4442_v57 = vmul.f32 %v4438_v2, %v10627_v61  ;;  %v4455_v45 = vmul.f32 %v4438_v2, %v10623_v17  ;;  %v4431_v33 = vpop.permute.xlu1 %4430 }
0x1368   :  { %v4436_v32 = vpop.permute.xlu0 %4435  ;;  %v4440_v55 = vmul.f32 %v4431_v33, %v11643_v20 }
0x1369   :  { %v4441_v30 = vmul.f32 %v4436_v32, %v11644_v47  ;;  %v4446_v44 = vadd.f32 %v4443_v31, %v4442_v57  ;;  %v4459_v59 = vadd.f32 %v4456_v23, %v4455_v45 }
0x136a   :  { %v4444_v14 = vmul.f32 %v4440_v55, %v10631_v5  ;;  %v4457_v19 = vmul.f32 %v4440_v55, %v10633_v37 }
0x136b   :  { %v4445_v22 = vmul.f32 %v4441_v30, %v10648_v41  ;;  %v4458_v25 = vmul.f32 %v4441_v30, %v10645_v36  ;;  %v11645_v30 = vld [vmem:[#allocation76_spill] sm:$0xff] }
0x136c   :  { %v4447_v29 = vadd.f32 %v4446_v44, %v4444_v14  ;;  %v4460_v0 = vadd.f32 %v4459_v59, %v4457_v19 }
0x136e   :  { %v4448_v35 = vadd.f32 %v4447_v29, %v4445_v22  ;;  %v4461_v43 = vadd.f32 %v4460_v0, %v4458_v25 }
0x1370   :  { %v4449_v3 = vrot.slane %v4448_v35, 4  ;;  %v4462_v52 = vrot.slane %v4461_v43, 4 }
0x1372   :  { %v4450_v18 = vadd.f32 %v4449_v3, %v4448_v35  ;;  %v4463_v27 = vadd.f32 %v4462_v52, %v4461_v43 }
0x1374   :  { %v4451_v16 = vrot.slane %v4450_v18, 2  ;;  %v4464_v2 = vrot.slane %v4463_v27, 2 }
0x1376   :  { %v4452_v31 = vadd.f32 %v4451_v16, %v4450_v18  ;;  %v4465_v23 = vadd.f32 %v4464_v2, %v4463_v27 }
0x1378   :  { %v4453_v57 = vrot.slane %v4452_v31, 1  ;;  %v4466_v45 = vrot.slane %v4465_v23, 1 }
0x137a   :  { %v4454_v33 = vadd.f32 %v4453_v57, %v4452_v31  ;;  %v4467_v32 = vadd.f32 %v4466_v45, %v4465_v23 }
0x137c   :  { %v4468_v55 = vsel %vm3611_vm14, %v4454_v33, %v4467_v32 }
0x137d   :  { %v4469_v58 = vpack.c.bf16 %v4468_v55, %v4468_v55 }
0x137f   :  { %7940 = vmatmul.mubr.bf16.vlgmr.msra.gmra.mrb[36].mxu1 %v4469_v58 }
0x1380   :  { %7972 = vmatpush3.bf16.msra.mxu1 %v10587_v46  ;;  %7975 = vmatprep.mubr.msk.bf16.mxu1 %vm3155_vm8, %v10769_v7 }
0x1381   :  { %7973 = vmatprep.subr.bf16.mxu1 %v11645_v30 }
0x1384   :  { %7974 = vmatpush3.bf16.msra.mxu1 %v11645_v30 }
0x1385   :  { %7979 = vmatprep.subr.bf16.mxu1 %v11627_v15 }
0x1387   :  { %7976 = vmatmul.mubr.msk.bf16.vlgmr.msra.gmra.mrb[40].mxu1 %vm3155_vm8, %v10779_v38 }
0x1388   :  { %7980 = vmatpush3.bf16.msra.mxu1 %v10786_v10  ;;  %7995 = vmatprep.mubr.msk.bf16.mxu1 %vm8430_vm0, %v11627_v15 }
0x1389   :  { %7981 = vmatprep.subr.bf16.mxu1 %v11627_v15 }
0x138c   :  { %7982 = vmatpush3.bf16.msra.mxu1 %v10795_v9  ;;  %v4671_v9 = vpop.permute.xlu1 %4670 }
0x138d   :  { %7983 = vmatprep.subr.bf16.mxu1 %v11627_v15 }
0x1390   :  { %7984 = vmatpush3.bf16.msra.mxu1 %v10802_v54  ;;  %v4673_v54 = vpop.permute.xlu0 %4672 }
0x1391   :  { %7985 = vmatprep.subr.bf16.mxu1 %v11627_v15 }
0x1394   :  { %7986 = vmatpush3.bf16.msra.mxu1 %v10809_v50  ;;  %v4677_v22 = vpop.permute.xlu0 %4676 }
0x1395   :  { %7987 = vmatprep.subr.bf16.mxu1 %v11627_v15 }
0x1398   :  { %7988 = vmatpush3.bf16.msra.mxu1 %v10816_v62 }
0x1399   :  { %7989 = vmatprep.subr.bf16.mxu1 %v11627_v15 }
0x139c   :  { %7990 = vmatpush3.bf16.msra.mxu1 %v10823_v40  ;;  %v4675_v40 = vpop.permute.xlu1 %4674 }
0x139d   :  { %7991 = vmatprep.subr.bf16.mxu1 %v11627_v15 }
0x13a0   :  { %7992 = vmatpush3.bf16.msra.mxu1 %v10830_v24 }
0x13a1   :  { %7993 = vmatprep.subr.bf16.mxu1 %v11627_v15 }
0x13a4   :  { %7994 = vmatpush3.bf16.msra.mxu1 %v10837_v28 }
0x1452   :  { %v10992_v46 = vpop.f32.mrb[36].mxu1 }
0x1453   :  { %v7941_v7 = vpop.f32.mrb[37].mxu1 }
0x1454   :  { %v4507_v38 = vpop.f32.mrb[38].mxu1 }
0x1455   :  { %v7942_v10 = vpop.f32.mrb[39].mxu1 }
0x145a   :  { %v7977_v50 = vpop.f32.mrb[40].mxu1 }
0x145b   :  { %v4651_v62 = vpop.f32.mrb[41].mxu1  ;;  %v4684_v14 = vadd.f32 %v7977_v50, %v4675_v40 }
0x145c   :  { %v4682_v58 = vadd.f32 %v4671_v9, %v4651_v62  ;;  %v7978_v44 = vpop.f32.mrb[42].mxu1 }
0x145d   :  { %v4654_v59 = vpop.f32.mrb[43].mxu1  ;;  %v4685_v25 = vadd.f32 %v7978_v44, %v4677_v22  ;;  %v4688_v29 = vadd.f32 %v4684_v14, %v10402_v39 }
0x145e   :  { %v4686_v24 = vadd.f32 %v4682_v58, %v10402_v39  ;;  %v4683_v19 = vadd.f32 %v4673_v54, %v4654_v59 }
0x145f   :  { %v4689_v0 = vadd.f32 %v4685_v25, %v10402_v39 }
0x1460   :  { %v4687_v28 = vadd.f32 %v4683_v19, %v10402_v39  ;;  %4692 = vperm.xlu1 %8156, %v4686_v24  }
0x1462   :  { %4697 = vperm.xlu0 %8158, %v4687_v28  }
0x1464   :  { %4702 = vperm.xlu1 %8156, %v4688_v29  }
0x1466   :  { %4707 = vperm.xlu0 %8158, %v4689_v0  }
0x14df   :  { %v4693_v35 = vpop.permute.xlu1 %4692 }
0x14e0   :  { %v4710_v18 = vsel %vm3390_vm10, %v4693_v35, -1e+30 }
0x14e1   :  { %v4698_v43 = vpop.permute.xlu0 %4697  ;;  %v4714_v31 = vsel %vm3418_vm13, %v4710_v18, -inf }
0x14e2   :  { %v4711_v3 = vsel %vm3391_vm9, %v4698_v43, -1e+30 }
0x14e3   :  { %v4703_v52 = vpop.permute.xlu1 %4702  ;;  %v4715_v16 = vsel %vm3418_vm13, %v4711_v3, -inf }
0x14e4   :  { %v4712_v27 = vsel %vm3392_vm12, %v4703_v52, -1e+30  ;;  %v4718_v57 = vmax.f32 %v4714_v31, %v4715_v16 }
0x14e5   :  { %v4708_v2 = vpop.permute.xlu0 %4707  ;;  %v4716_v23 = vsel %vm3418_vm13, %v4712_v27, -inf }
0x14e6   :  { %v4713_v39 = vsel %vm3393_vm11, %v4708_v2, -1e+30 }
0x14e7   :  { %v4717_v63 = vsel %vm3418_vm13, %v4713_v39, -inf }
0x14e8   :  { %v4719_v45 = vmax.f32 %v4716_v23, %v4717_v63 }
0x14ea   :  { %v4720_v33 = vmax.f32 %v4718_v57, %v4719_v45 }
0x14ec   :  { %v4721_v4 = vrot.slane %v4720_v33, 4 }
0x14ee   :  { %v4722_v32 = vmax.f32 %v4720_v33, %v4721_v4 }
0x14f0   :  { %v4723_v55 = vrot.slane %v4722_v32, 2 }
0x14f2   :  { %v4724_v60 = vmax.f32 %v4722_v32, %v4723_v55 }
0x14f4   :  { %v4725_v30 = vrot.slane %v4724_v60, 1 }
0x14f6   :  { %v4726_v7 = vmax.f32 %v4724_v60, %v4725_v30 }
0x14f8   :  { %v4728_v38 = vmul.f32 %v10902_v48, %v4726_v7  ;;  %v4727_v8 = vmul.f32 %v10908_v12, %v4726_v7  ;;  %v4729_v54 = vmul.f32 %v10916_v53, %v4726_v7  ;;  %v4730_v50 = vmul.f32 %v10922_v56, %v4726_v7 }
0x14fa   :  { %v4734_v10 = vsel %vm3418_vm13, %v4728_v38, 0.0  ;;  %v4731_v9 = vsel %vm3418_vm13, %v4727_v8, 0.0  ;;  %v4737_v62 = vsel %vm3418_vm13, %v4729_v54, 0.0  ;;  %v4740_v58 = vsel %vm3418_vm13, %v4730_v50, 0.0 }
0x14fb   :  { %4735 = vadd.xlane.f32.xlu0 %v4734_v10  ;;  %4732 = vadd.xlane.f32.xlu1 %v4731_v9 }
0x14ff   :  { %4738 = vadd.xlane.f32.xlu0 %v4737_v62  ;;  %4741 = vadd.xlane.f32.xlu1 %v4740_v58 }
0x1588   :  { %v4736_v44 = vpop.xlane.xlu0 %4735  ;;  %v4733_v40 = vpop.xlane.xlu1 %4732 }
0x1589   :  { %v4744_v59 = vsub.f32 %v4687_v28, %v4736_v44  ;;  %v4743_v14 = vsub.f32 %v4686_v24, %v4733_v40 }
0x158b   :  { %v4749_v19 = vmul.f32 1.442695, %v4744_v59  ;;  %v4747_v22 = vmul.f32 1.442695, %v4743_v14 }
0x158c   :  { %v4739_v25 = vpop.xlane.xlu0 %4738  ;;  %v4742_v35 = vpop.xlane.xlu1 %4741 }
0x158d   :  { %8315 = vpow2.f32 %v4749_v19  ;;  %v4745_v43 = vsub.f32 %v4688_v29, %v4739_v25  ;;  %v4746_v3 = vsub.f32 %v4689_v0, %v4742_v35 }
0x158e   :  { %8317 = vpow2.f32 %v4747_v22 }
0x158f   :  { %v4751_v52 = vmul.f32 1.442695, %v4745_v43  ;;  %v4753_v18 = vmul.f32 1.442695, %v4746_v3 }
0x1591   :  { %8319 = vpow2.f32 %v4751_v52 }
0x1592   :  { %8321 = vpow2.f32 %v4753_v18 }
0x1597   :  { %v8316_v27 = vpop.eup %8315 }
0x1598   :  { %v8318_v16 = vpop.eup %8317  ;;  %4762 = vperm.xlu1 %8156, %v8316_v27  }
0x1599   :  { %4757 = vperm.xlu0 %8158, %v8318_v16  }
0x159b   :  { %v8320_v2 = vpop.eup %8319 }
0x159c   :  { %v8322_v39 = vpop.eup %8321  ;;  %4767 = vperm.xlu1 %8156, %v8320_v2  }
0x159d   :  { %4772 = vperm.xlu0 %8158, %v8322_v39  }
0x1617   :  { %v4763_v24 = vpop.permute.xlu1 %4762 }
0x1618   :  { %v4758_v28 = vpop.permute.xlu0 %4757  ;;  %v4776_v31 = vmul.f32 %v10902_v48, %v4763_v24 }
0x1619   :  { %v4775_v29 = vmul.f32 %v10908_v12, %v4758_v28 }
0x161a   :  { %v4780_v0 = vsel %vm3418_vm13, %v4776_v31, 0.0 }
0x161b   :  { %v4779_v23 = vsel %vm3418_vm13, %v4775_v29, 0.0  ;;  %v4768_v63 = vpop.permute.xlu1 %4767 }
0x161c   :  { %v4773_v57 = vpop.permute.xlu0 %4772  ;;  %v4777_v45 = vmul.f32 %v10916_v53, %v4768_v63  ;;  %v4781_v33 = vadd.f32 %v4780_v0, %v4779_v23  ;;  %v8242_v23 = vld [vmem:[%s11494_s15 + $0xc0] sm:$0xff]  }
0x161d   :  { %v4778_v4 = vmul.f32 %v10922_v56, %v4773_v57  ;;  %7513 = vmatprep.subr.bf16.mxu1 %v8242_v23  ;;  %v8246_v23 = vld [vmem:[%s11494_s15 + $0xd0] sm:$0xff]  }
0x161e   :  { %v4782_v32 = vsel %vm3418_vm13, %v4777_v45, 0.0  ;;  %v11646_v45 = vld [vmem:[#allocation74_spill] sm:$0xff] }
0x161f   :  { %v4783_v55 = vadd.f32 %v4782_v32, %v4781_v33  ;;  %v4784_v60 = vsel %vm3418_vm13, %v4778_v4, 0.0  ;;  %v11647_v4 = vld [vmem:[#allocation73_spill] sm:$0xff] }
0x1621   :  { %v4785_v30 = vadd.f32 %v4784_v60, %v4783_v55 }
0x1623   :  { %v4786_v7 = vrot.slane %v4785_v30, 4 }
0x1625   :  { %v4787_v38 = vadd.f32 %v4786_v7, %v4785_v30  ;;  %v11648_v30 = vld [vmem:[#allocation75_spill] sm:$0xff] }
0x1627   :  { %v4788_v8 = vrot.slane %v4787_v38, 2 }
0x1629   :  { %v4789_v10 = vadd.f32 %v4788_v8, %v4787_v38  ;;  %v11649_v38 = vld [vmem:[#allocation72_spill] sm:$0xff] }
0x162b   :  { %v4790_v9 = vrot.slane %v4789_v10, 1 }
0x162d   :  { %v4791_v54 = vadd.f32 %v4790_v9, %v4789_v10 }
0x162f   :  { %v4793_v50 = vmul.f32 %v10902_v48, %v4791_v54  ;;  %v4792_v62 = vmul.f32 %v10908_v12, %v4791_v54  ;;  %v4794_v40 = vmul.f32 %v10916_v53, %v4791_v54  ;;  %v4795_v59 = vmul.f32 %v10922_v56, %v4791_v54 }
0x1631   :  { %v4799_v58 = vsel %vm3418_vm13, %v4793_v50, 0.0  ;;  %v4796_v44 = vsel %vm3418_vm13, %v4792_v62, 0.0  ;;  %v4802_v14 = vsel %vm3418_vm13, %v4794_v40, 0.0  ;;  %v4805_v19 = vsel %vm3418_vm13, %v4795_v59, 0.0 }
0x1632   :  { %4800 = vadd.xlane.f32.xlu0 %v4799_v58  ;;  %4797 = vadd.xlane.f32.xlu1 %v4796_v44 }
0x1636   :  { %4803 = vadd.xlane.f32.xlu0 %v4802_v14  ;;  %4806 = vadd.xlane.f32.xlu1 %v4805_v19 }
0x16bf   :  { %v4801_v22 = vpop.xlane.xlu0 %4800  ;;  %v4798_v48 = vpop.xlane.xlu1 %4797 }
0x16c0   :  { %v4809_v25 = vadd.f32 1e-16, %v4801_v22  ;;  %v4808_v12 = vadd.f32 1e-16, %v4798_v48 }
0x16c2   :  { %8323 = vrcp.f32 %v4809_v25 }
0x16c3   :  { %8325 = vrcp.f32 %v4808_v12  ;;  %v4804_v35 = vpop.xlane.xlu0 %4803  ;;  %v4807_v43 = vpop.xlane.xlu1 %4806 }
0x16c4   :  { %v4810_v3 = vadd.f32 1e-16, %v4804_v35  ;;  %v4811_v53 = vadd.f32 1e-16, %v4807_v43 }
0x16c6   :  { %8327 = vrcp.f32 %v4810_v3 }
0x16c7   :  { %8329 = vrcp.f32 %v4811_v53 }
0x16cc   :  { %v8324_v56 = vpop.eup %8323 }
0x16cd   :  { %v8326_v52 = vpop.eup %8325  ;;  %v4815_v18 = vmul.f32 %v8324_v56, %v8316_v27 }
0x16ce   :  { %v4813_v24 = vmul.f32 %v8326_v52, %v8318_v16 }
0x16cf   :  { %4827 = vperm.xlu1 %8156, %v4815_v18  }
0x16d0   :  { %v8328_v28 = vpop.eup %8327  ;;  %4822 = vperm.xlu0 %8158, %v4813_v24  }
0x16d1   :  { %v8330_v31 = vpop.eup %8329  ;;  %v4817_v29 = vmul.f32 %v8328_v28, %v8320_v2  ;;  %v8243_v28 = vld [vmem:[%s11494_s15 + $0x80] sm:$0xff]  }
0x16d2   :  { %v4819_v0 = vmul.f32 %v8330_v31, %v8322_v39 }
0x16d3   :  { %4832 = vperm.xlu1 %8156, %v4817_v29   ;;  %v8244_v29 = vld [vmem:[%s11494_s15 + $0xc8] sm:$0xff]  }
0x16d4   :  { %4837 = vperm.xlu0 %8158, %v4819_v0   ;;  %v8245_v0 = vld [vmem:[%s11494_s15 + $0x88] sm:$0xff]  }
0x174e   :  { %v4828_v63 = vpop.permute.xlu1 %4827 }
0x174f   :  { %v4823_v57 = vpop.permute.xlu0 %4822  ;;  %v4841_v33 = vmul.f32 %v4828_v63, %v11646_v45  ;;  %v8247_v63 = vld [vmem:[%s11494_s15 + $0x90] sm:$0xff]  }
0x1750   :  { %v4840_v27 = vmul.f32 %v4823_v57, %v11647_v4  ;;  %v8248_v57 = vld [vmem:[%s11494_s15 + $0xd8] sm:$0xff]  }
0x1751   :  { %v4845_v16 = vmul.f32 %v4841_v33, %v10625_v11  ;;  %v4858_v32 = vmul.f32 %v4841_v33, %v10629_v21  ;;  %v8249_v33 = vld [vmem:[%s11494_s15 + $0x98] sm:$0xff]  }
0x1752   :  { %v4844_v2 = vmul.f32 %v4840_v27, %v10627_v61  ;;  %v4857_v39 = vmul.f32 %v4840_v27, %v10623_v17  ;;  %v4833_v55 = vpop.permute.xlu1 %4832  ;;  %v8250_v27 = vld [vmem:[%s11494_s15 + $0xe0] sm:$0xff]  }
0x1753   :  { %v4838_v60 = vpop.permute.xlu0 %4837  ;;  %v4842_v7 = vmul.f32 %v4833_v55, %v11648_v30  ;;  %v8255_v55 = vld [vmem:[%s11494_s15 + $0xb0] sm:$0xff]  }
0x1754   :  { %v4843_v8 = vmul.f32 %v4838_v60, %v11649_v38  ;;  %v4848_v10 = vadd.f32 %v4845_v16, %v4844_v2  ;;  %v4861_v9 = vadd.f32 %v4858_v32, %v4857_v39  ;;  %v8251_v16 = vld [vmem:[%s11494_s15 + $0xa0] sm:$0xff]   ;;  %v8252_v32 = vld [vmem:[%s11494_s15 + $0xe8] sm:$0xff]   ;;  %v8254_v39 = vld [vmem:[%s11494_s15 + $0xf0] sm:$0xff]  }
0x1755   :  { %v4846_v54 = vmul.f32 %v4842_v7, %v10631_v5  ;;  %v4859_v50 = vmul.f32 %v4842_v7, %v10633_v37  ;;  %v8253_v2 = vld [vmem:[%s11494_s15 + $0xa8] sm:$0xff]   ;;  %v8256_v60 = vld [vmem:[%s11494_s15 + $0xf8] sm:$0xff]  }
0x1756   :  { %v4847_v62 = vmul.f32 %v4843_v8, %v10648_v41  ;;  %v4860_v58 = vmul.f32 %v4843_v8, %v10645_v36  ;;  %v8257_v7 = vld [vmem:[%s11494_s15 + $0xb8] sm:$0xff]   ;;  %v4505_v8 = vadd.f32 %v10992_v46, %v10873_v51  ;;  %s7293_s15 = sld [smem:[#allocation8 + $0x7]] }
0x1757   :  { %v4849_v44 = vadd.f32 %v4848_v10, %v4846_v54  ;;  %v4862_v40 = vadd.f32 %v4861_v9, %v4859_v50 }
0x1758   :  { %8331 = vtanh.f32 %v4505_v8 }
0x1759   :  { %v4850_v59 = vadd.f32 %v4849_v44, %v4847_v62  ;;  %v4863_v14 = vadd.f32 %v4862_v40, %v4860_v58 }
0x175b   :  { %v4851_v19 = vrot.slane %v4850_v59, 4  ;;  %v4864_v22 = vrot.slane %v4863_v14, 4 }
0x175c   :  { %v4985_v46 = vstv %s7293_s15 }
0x175d   :  { %v4852_v48 = vadd.f32 %v4851_v19, %v4850_v59  ;;  %v4865_v25 = vadd.f32 %v4864_v22, %v4863_v14  ;;  %v11650_v14 = vlaneseq }
0x175f   :  { %v4853_v12 = vrot.slane %v4852_v48, 2  ;;  %v4866_v35 = vrot.slane %v4865_v25, 2  ;;  %v4982_v19 = vand.u32 127, %v11650_v14 }
0x1761   :  { %v4854_v43 = vadd.f32 %v4853_v12, %v4852_v48  ;;  %v4867_v3 = vadd.f32 %v4866_v35, %v4865_v25  ;;  %vm4983_vm15 = vcmp.eq.s32.totalorder %v4982_v19, 0  ;;  %vm4988_vm1 = vcmp.eq.s32.totalorder %v4982_v19, 1 }
0x1762   :  { %v8332_v58 = vpop.eup %8331  ;;  %v4986_v22 = vsel %vm4983_vm15, %v4985_v46, 0.0  ;;  %vm4993_vm2 = vcmp.eq.s32.totalorder %v4982_v19, 2  ;;  %v4995_v25 = vstv %s7295_s28  ;;  %vm4998_vm3 = vcmp.eq.s32.totalorder %v4982_v19, 3 }
0x1763   :  { %v4855_v53 = vrot.slane %v4854_v43, 1  ;;  %v4868_v56 = vrot.slane %v4867_v3, 1  ;;  %v4915_v59 = vpack.c.bf16 %v8332_v58, %v8332_v58  ;;  %v4996_v35 = vsel %vm4993_vm2, %v4995_v25, 0.0 }
0x1764   :  { %v11653_v58 = vmov 1  }
0x1765   :  { %v4856_v52 = vadd.f32 %v4855_v53, %v4854_v43  ;;  %v4869_v18 = vadd.f32 %v4868_v56, %v4867_v3  ;;  %v5000_v43 = vstv %s7296_s10 }
0x1766   :  { %v5001_v53 = vsel %vm4998_vm3, %v5000_v43, 0.0 }
0x1767   :  { %v4870_v24 = vsel %vm3611_vm14, %v4856_v52, %v4869_v18 }
0x1768   :  { %v4871_v31 = vpack.c.bf16 %v4870_v24, %v4870_v24 }
0x176a   :  { %7996 = vmatmul.mubr.bf16.vlgmr.msra.gmra.mrb[44].mxu1 %v4871_v31 }
0x176b   :  { %7514 = vmatpush3.bf16.msra.mxu1 %v8243_v28 }
0x176c   :  { %7515 = vmatprep.subr.bf16.mxu1 %v8244_v29 }
0x176f   :  { %7516 = vmatpush3.bf16.msra.mxu1 %v8245_v0 }
0x1770   :  { %7517 = vmatprep.subr.bf16.mxu1 %v8246_v23 }
0x1773   :  { %7518 = vmatpush3.bf16.msra.mxu1 %v8247_v63 }
0x1774   :  { %7519 = vmatprep.subr.bf16.mxu1 %v8248_v57 }
0x1777   :  { %7520 = vmatpush3.bf16.msra.mxu1 %v8249_v33 }
0x1778   :  { %7521 = vmatprep.subr.bf16.mxu1 %v8250_v27 }
0x177b   :  { %7522 = vmatpush3.bf16.msra.mxu1 %v8251_v16 }
0x177c   :  { %7523 = vmatprep.subr.bf16.mxu1 %v8252_v32 }
0x177f   :  { %7524 = vmatpush3.bf16.msra.mxu1 %v8253_v2 }
0x1780   :  { %7525 = vmatprep.subr.bf16.mxu1 %v8254_v39 }
0x1783   :  { %7526 = vmatpush3.bf16.msra.mxu1 %v8255_v55  ;;  %v11651_v55 = vld [vmem:[#allocation55_spill] sm:$0xff] }
0x1784   :  { %7527 = vmatprep.subr.bf16.mxu1 %v8256_v60  ;;  %v11652_v60 = vld [vmem:[#allocation56_spill] sm:$0xff] }
0x1787   :  { %7528 = vmatpush3.bf16.msra.mxu1 %v8257_v7 }
0x183d   :  { %v4906_v10 = vpop.f32.mrb[44].mxu1 }
0x183e   :  { %v4907_v9 = vadd.f32 %v4906_v10, %v10873_v51  ;;  %v7997_v54 = vpop.f32.mrb[45].mxu1  ;;  %v4990_v51 = vstv %s7294_s14 }
0x183f   :  { %v4909_v50 = vpop.f32.mrb[46].mxu1  ;;  %v4991_v48 = vsel %vm4988_vm1, %v4990_v51, 0.0 }
0x1840   :  { %8333 = vtanh.f32 %v4907_v9  ;;  %v7998_v62 = vpop.f32.mrb[47].mxu1  ;;  %v4992_v12 = vadd.f32 %v4991_v48, %v4986_v22 }
0x1842   :  { %v4997_v3 = vadd.f32 %v4996_v35, %v4992_v12 }
0x1844   :  { %v5002_v56 = vadd.f32 %v5001_v53, %v4997_v3  ;;  %v11655_v53 = vld [vmem:[#allocation66_spill] sm:$0xff] }
0x1846   :  { %v5230_v24 = vadd.f32 %v10927_v26, %v5002_v56 }
0x184a   :  { %v8334_v44 = vpop.eup %8333 }
0x184b   :  { %v4916_v40 = vpack.c.bf16 %v8334_v44, %v8334_v44 }
0x184d   :  { %5267 = vmatprep.mubr.bf16.mxu1 %v4916_v40 }
0x184e   :  { %5268 = vmatmul.mubr.bf16.vlgmr.msra.gmra.mrb[48].mxu1 %v4915_v59 }
0x1921   :  { %v7529_v52 = vpop.f32.mrb[48].mxu1 }
0x1922   :  { %v7530_v18 = vpop.f32.mrb[49].mxu1 }
0x1923   :  { %v7531_v28 = vadd.f32 %v7530_v18, %v7529_v52  ;;  %v7532_v31 = vpop.f32.mrb[50].mxu1  ;;  %v11656_v52 = vld [vmem:[#allocation65_spill] sm:$0xff] }
0x1924   :  { %v7533_v29 = vpop.f32.mrb[51].mxu1 }
0x1925   :  { %v5270_v0 = vadd.f32 %v7531_v28, %v5230_v24 }
0x1927   :  { %v5276_v23 = vsel %vm5275_vm4, %v5270_v0, -inf }
0x1928   :  { %5277 = vmax.xlane.f32.xlu1 %v5276_v23 }
0x19b5   :  { %v5278_v63 = vpop.xlane.xlu1 %5277 }
0x19b6   :  { %v5279_v57 = vsub.f32 %v5270_v0, %v5278_v63 }
0x19b8   :  { %v5280_v33 = vmul.f32 1.442695, %v5279_v57 }
0x19ba   :  { %8335 = vpow2.f32 %v5280_v33  ;;  %v11657_v33 = vld [vmem:[#allocation64_spill] sm:$0xff] }
0x19c4   :  { %v8336_v27 = vpop.eup %8335 }
0x19c5   :  { %v5282_v16 = vsel %vm5275_vm4, %v8336_v27, 0.0 }
0x19c6   :  { %5283 = vadd.xlane.f32.xlu0 %v5282_v16 }
0x1a53   :  { %v5284_v32 = vpop.xlane.xlu0 %5283 }
0x1a54   :  { %8337 = vrcp.f32 %v5284_v32 }
0x1a5e   :  { %v8338_v2 = vpop.eup %8337 }
0x1a5f   :  { %v5286_v39 = vmul.f32 %v8338_v2, %v8336_v27 }
0x1a61   :  { %v5290_v26 = vrot.slane %v5286_v39, %v11651_v55  ;;  %v5298_v7 = vrot.slane %v5286_v39, %v11652_v60  ;;  %v11658_v39 = vld [vmem:[#allocation67_spill] sm:$0xff] }
0x1a63   :  { %v5292_v8 = vmul.f32 %v5290_v26, %v10625_v11  ;;  %v5300_v10 = vmul.f32 %v5298_v7, %v10629_v21  ;;  %v5291_v9 = vmul.f32 %v5290_v26, %v10627_v61  ;;  %v5299_v54 = vmul.f32 %v5298_v7, %v10623_v17 }
0x1a64   :  { %v5293_v44 = vmul.f32 %v5290_v26, %v10631_v5  ;;  %v5301_v40 = vmul.f32 %v5298_v7, %v10633_v37  ;;  %v8434_v21 = vmov 2   ;;  %v11654_v61 = vmov 0  }
0x1a65   :  { %v5304_v50 = vadd.f32 %v5300_v10, %v5292_v8  ;;  %v5303_v62 = vadd.f32 %v5299_v54, %v5291_v9  ;;  %v5294_v17 = vmul.f32 %v5290_v26, %v10648_v41  ;;  %v5302_v59 = vmul.f32 %v5298_v7, %v10645_v36 }
0x1a66   :  { %v5305_v11 = vadd.f32 %v5301_v40, %v5293_v44  ;;  %v8435_v5 = vmov 3  }
0x1a67   :  { %5314 = vperm.xlu1 %8156, %v5304_v50   ;;  %5309 = vperm.xlu0 %8158, %v5303_v62   ;;  %v5306_v14 = vadd.f32 %v5302_v59, %v5294_v17 }
0x1a6b   :  { %8159 = vset.pattern.permute.xlu1 %v11653_v58  ;;  %8160 = vset.pattern.permute.xlu0 %v11653_v58 }
0x1a6c   :  { %5332 = vperm.xlu1 %8159, %v5303_v62   ;;  %5336 = vperm.xlu0 %8160, %v5304_v50  }
0x1a70   :  { %8161 = vset.pattern.permute.xlu1 %v8434_v21  ;;  %8162 = vset.pattern.permute.xlu0 %v11654_v61 }
0x1a71   :  { %5356 = vperm.xlu1 %8161, %v5303_v62   ;;  %5319 = vperm.xlu0 %8162, %v5305_v11  }
0x1a75   :  { %5360 = vperm.xlu1 %8161, %v5304_v50   ;;  %8165 = vset.pattern.permute.xlu0 %v11653_v58 }
0x1a76   :  { %5344 = vperm.xlu0 %8165, %v5306_v14  }
0x1a79   :  { %8163 = vset.pattern.permute.xlu1 %v11654_v61 }
0x1a7a   :  { %5324 = vperm.xlu1 %8163, %v5306_v14   ;;  %8167 = vset.pattern.permute.xlu0 %v8434_v21 }
0x1a7b   :  { %5364 = vperm.xlu0 %8167, %v5305_v11  }
0x1a7e   :  { %8164 = vset.pattern.permute.xlu1 %v11653_v58 }
0x1a7f   :  { %5340 = vperm.xlu1 %8164, %v5305_v11   ;;  %8170 = vset.pattern.permute.xlu0 %v8435_v5 }
0x1a80   :  { %5392 = vperm.xlu0 %8170, %v5306_v14  }
0x1a83   :  { %8166 = vset.pattern.permute.xlu1 %v8435_v5 }
0x1a84   :  { %5380 = vperm.xlu1 %8166, %v5303_v62  }
0x1a88   :  { %5384 = vperm.xlu1 %8166, %v5304_v50  }
0x1a8c   :  { %8168 = vset.pattern.permute.xlu1 %v8434_v21  ;;  %v11660_v21 = vld [vmem:[#allocation63_spill] sm:$0xff] }
0x1a8d   :  { %5368 = vperm.xlu1 %8168, %v5306_v14  }
0x1a91   :  { %8169 = vset.pattern.permute.xlu1 %v8435_v5 }
0x1a92   :  { %5388 = vperm.xlu1 %8169, %v5305_v11  }
0x1ae6   :  { %v5315_v41 = vpop.permute.xlu1 %5314  ;;  %v5310_v19 = vpop.permute.xlu0 %5309 }
0x1ae7   :  { %v5328_v56 = vmul.f32 %v5315_v41, %v11655_v53  ;;  %v5327_v18 = vmul.f32 %v5310_v19, %v11656_v52 }
0x1aeb   :  { %v5333_v37 = vpop.permute.xlu1 %5332  ;;  %v5337_v51 = vpop.permute.xlu0 %5336 }
0x1aec   :  { %v5347_v12 = vmul.f32 %v5333_v37, %v10312_v49  ;;  %v5348_v35 = vmul.f32 %v5337_v51, %v10315_v6 }
0x1aee   :  { %v5351_v31 = vadd.f32 %v5347_v12, %v5327_v18  ;;  %v5352_v29 = vadd.f32 %v5348_v35, %v5328_v56 }
0x1af0   :  { %v5357_v36 = vpop.permute.xlu1 %5356  ;;  %v5320_v48 = vpop.permute.xlu0 %5319 }
0x1af1   :  { %v5371_v24 = vmul.f32 %v5357_v36, %v11642_v34  ;;  %v5329_v34 = vmul.f32 %v5320_v48, %v11658_v39 }
0x1af3   :  { %v5375_v63 = vadd.f32 %v5371_v24, %v5351_v31 }
0x1af4   :  { %v5361_v46 = vpop.permute.xlu1 %5360 }
0x1af5   :  { %v5345_v43 = vpop.permute.xlu0 %5344  ;;  %v5372_v28 = vmul.f32 %v5361_v46, %v11641_v1 }
0x1af6   :  { %v5350_v1 = vmul.f32 %v5345_v43, %v10304_v42 }
0x1af7   :  { %v5376_v57 = vadd.f32 %v5372_v28, %v5352_v29 }
0x1af9   :  { %v5325_v22 = vpop.permute.xlu1 %5324 }
0x1afa   :  { %v5365_v6 = vpop.permute.xlu0 %5364  ;;  %v5330_v27 = vmul.f32 %v5325_v22, %v11657_v33 }
0x1afc   :  { %v5354_v8 = vadd.f32 %v5350_v1, %v5330_v27 }
0x1afe   :  { %v5341_v25 = vpop.permute.xlu1 %5340 }
0x1aff   :  { %v5349_v16 = vmul.f32 %v5341_v25, %v10319_v13  ;;  %v5393_v9 = vpop.permute.xlu0 %5392 }
0x1b00   :  { %v5398_v50 = vmul.f32 %v5393_v9, %v11649_v38  ;;  %v11661_v38 = vld [vmem:[#allocation62_spill] sm:$0xff] }
0x1b01   :  { %v5353_v10 = vadd.f32 %v5349_v16, %v5329_v34 }
0x1b03   :  { %v5381_v3 = vpop.permute.xlu1 %5380 }
0x1b04   :  { %v5395_v0 = vmul.f32 %v5381_v3, %v11647_v4 }
0x1b06   :  { %v5399_v32 = vadd.f32 %v5395_v0, %v5375_v63 }
0x1b07   :  { %v5385_v23 = vpop.permute.xlu1 %5384 }
0x1b08   :  { %v5396_v49 = vmul.f32 %v5385_v23, %v11646_v45  ;;  %v5373_v45 = vmul.f32 %v5365_v6, %v11643_v20 }
0x1b0a   :  { %v5400_v2 = vadd.f32 %v5396_v49, %v5376_v57  ;;  %v5377_v62 = vadd.f32 %v5373_v45, %v5353_v10 }
0x1b0c   :  { %v5405_v26 = vpack.c.bf16 %v5400_v2, %v5399_v32  ;;  %v5369_v7 = vpop.permute.xlu1 %5368 }
0x1b0d   :  { %v5374_v4 = vmul.f32 %v5369_v7, %v11644_v47  ;;  %v8258_v47 = vld [vmem:[%s11659_s6] sm:$0xff]  }
0x1b0e   :  { %8000 = vmatpush3.bf16.msra.mxu0 %v5405_v26 }
0x1b0f   :  { %8001 = vmatprep.subr.bf16.mxu0 %v11627_v15  ;;  %v5378_v54 = vadd.f32 %v5374_v4, %v5354_v8 }
0x1b11   :  { %v5389_v13 = vpop.permute.xlu1 %5388  ;;  %v5402_v42 = vadd.f32 %v5398_v50, %v5378_v54 }
0x1b12   :  { %v5397_v58 = vmul.f32 %v5389_v13, %v11648_v30 }
0x1b14   :  { %v5401_v44 = vadd.f32 %v5397_v58, %v5377_v62 }
0x1b16   :  { %v5406_v40 = vpack.c.bf16 %v5402_v42, %v5401_v44 }
0x1b18   :  { %8002 = vmatpush3.bf16.msra.mxu0 %v5406_v40 }
0x1b1b   :  { %8004 = vmatmul.mubr.msk.bf16.vlgmr.msra.gmra.mrb[44].mxu0 %vm3155_vm8, %v8258_v47 }
0x1bee   :  { %v5449_v11 = vpop.f32.mrb[44].mxu0 }
0x1bef   :  { %v11138_v20 = vadd.f32 %v5449_v11, %v11660_v21  ;;  %v8005_v17 = vpop.f32.mrb[45].mxu0 }
0x1bf0   :  { %v5452_v59 = vpop.f32.mrb[46].mxu0 }
0x1bf1   :  { %v11141_v14 = vadd.f32 %v5452_v59, %v11661_v38  ;;  %v8006_v30 = vpop.f32.mrb[47].mxu0 }
0x1bf2   :  { %8416 = dma.done.wait [#allocation7], 3072 }
0x1bf3   :  { %8417 = vsyncadd [#allocation7], 4294964224 }
0x1bf4   :  { %8418 = dma.done.wait [#allocation7 + $0x1], 9216 }
0x1bf5   :  { %8419 = vsyncadd [#allocation7 + $0x1], 4294958080 }
0x1bf6   :  { %8420 = dma.done.wait [#allocation7 + $0x2], 9216 }
0x1bf7   :  { %8421 = vsyncadd [#allocation7 + $0x2], 4294958080 }
0x1bf8   :  { %8422 = dma.done.wait [#allocation7 + $0x3], 9216 }
0x1bf9   :  { %8423 = vsyncadd [#allocation7 + $0x3], 4294958080 }
0x1bfa   :  { %8424 = dma.done.wait [#allocation7 + $0x4], 3072 }
0x1bfb   :  { %8425 = vsyncadd [#allocation7 + $0x4], 4294964224  ;;  %8007 = vmatprep.subr.bf16.mxu1 %v11627_v15  ;;  %5582 = vmatprep.mubr.bf16.mxu0 %v11654_v61  ;;  %v5473_v5 = vadd.f32 %v11141_v14, %v11138_v20  ;;  %v5515_v19 = vld [vmem:[#allocation2 + $0x8] sm:$0xff]  ;;  %v5514_v46 = vld [vmem:[#allocation2] sm:$0xff] }
0x1bfc   :  { %8023 = vmatprep.mubr.msk.bf16.mxu1 %vm8430_vm0, %v11627_v15  ;;  %v5516_v51 = vld [vmem:[#allocation2 + $0x10] sm:$0xff]  ;;  %5550 = vmatprep.subr.bf16.mxu0 %v5515_v19  ;;  %v5518_v22 = vld [vmem:[#allocation2 + $0x20] sm:$0xff]  ;;  %v5519_v25 = vld [vmem:[#allocation2 + $0x28] sm:$0xff] }
0x1bfd   :  { %v5474_v41 = vrot.slane %v5473_v5, 4  ;;  %8008 = vmatpush3.bf16.msra.mxu1 %v5516_v51  ;;  %5551 = vmatpush1.bf16.msra.mxu0 %v5514_v46  ;;  %v5517_v12 = vld [vmem:[#allocation2 + $0x18] sm:$0xff]  ;;  %v5522_v53 = vld [vmem:[#allocation2 + $0x40] sm:$0xff]  ;;  %v5520_v56 = vld [vmem:[#allocation2 + $0x30] sm:$0xff] }
0x1bfe   :  { %8009 = vmatprep.subr.bf16.mxu1 %v11627_v15  ;;  %5552 = vmatprep.subr.bf16.mxu0 %v5518_v22  ;;  %v5521_v43 = vld [vmem:[#allocation2 + $0x38] sm:$0xff]  ;;  %v5524_v18 = vld [vmem:[#allocation2 + $0x50] sm:$0xff]  ;;  %v5523_v29 = vld [vmem:[#allocation2 + $0x48] sm:$0xff] }
0x1bff   :  { %v5475_v37 = vadd.f32 %v5474_v41, %v5473_v5  ;;  %v5525_v31 = vld [vmem:[#allocation2 + $0x58] sm:$0xff]  ;;  %v5527_v63 = vld [vmem:[#allocation2 + $0x68] sm:$0xff]  ;;  %v5528_v49 = vld [vmem:[#allocation2 + $0x70] sm:$0xff] }
0x1c00   :  { %v5526_v6 = vld [vmem:[#allocation2 + $0x60] sm:$0xff]  ;;  %v5531_v32 = vld [vmem:[#allocation2 + $0x88] sm:$0xff]  ;;  %v5529_v2 = vld [vmem:[#allocation2 + $0x78] sm:$0xff] }
0x1c01   :  { %v5476_v36 = vrot.slane %v5475_v37, 2  ;;  %8010 = vmatpush3.bf16.msra.mxu1 %v5519_v25  ;;  %5553 = vmatpush1.bf16.msra.mxu0 %v5517_v12  ;;  %v5530_v27 = vld [vmem:[#allocation2 + $0x80] sm:$0xff]  ;;  %v5533_v34 = vld [vmem:[#allocation2 + $0x98] sm:$0xff]  ;;  %v5532_v7 = vld [vmem:[#allocation2 + $0x90] sm:$0xff] }
0x1c02   :  { %8011 = vmatprep.subr.bf16.mxu1 %v11627_v15  ;;  %5554 = vmatprep.subr.bf16.mxu0 %v5521_v43  ;;  %v5534_v26 = vld [vmem:[#allocation2 + $0xa0] sm:$0xff]  ;;  %v5536_v8 = vld [vmem:[#allocation2 + $0xb0] sm:$0xff]  ;;  %v5537_v9 = vld [vmem:[#allocation2 + $0xb8] sm:$0xff] }
0x1c03   :  { %v5477_v48 = vadd.f32 %v5476_v36, %v5475_v37  ;;  %v5535_v45 = vld [vmem:[#allocation2 + $0xa8] sm:$0xff]  ;;  %v11662_v62 = vld [vmem:[#allocation48_spill] sm:$0xff]  ;;  %v5776_v41 = vld [vmem:[#allocation3] sm:$0xff] }
0x1c04   :  { %v5777_v5 = vld [vmem:[#allocation3 + $0x8] sm:$0xff]  ;;  %v5780_v37 = vld [vmem:[#allocation3 + $0x20] sm:$0xff]  ;;  %v5779_v36 = vld [vmem:[#allocation3 + $0x18] sm:$0xff] }
0x1c05   :  { %v5478_v35 = vrot.slane %v5477_v48, 1  ;;  %8012 = vmatpush3.bf16.msra.mxu1 %v5522_v53  ;;  %5555 = vmatpush1.bf16.msra.mxu0 %v5520_v56  ;;  %v5786_v19 = vld [vmem:[#allocation3 + $0x50] sm:$0xff]  ;;  %v5785_v46 = vld [vmem:[#allocation3 + $0x48] sm:$0xff]  ;;  %v5788_v22 = vld [vmem:[#allocation3 + $0x60] sm:$0xff] }
0x1c06   :  { %8013 = vmatprep.subr.bf16.mxu1 %v11627_v15  ;;  %5556 = vmatprep.subr.bf16.mxu0 %v5524_v18  ;;  %v5789_v51 = vld [vmem:[#allocation3 + $0x68] sm:$0xff]  ;;  %v5791_v25 = vld [vmem:[#allocation3 + $0x78] sm:$0xff]  ;;  %v5798_v43 = vld [vmem:[#allocation3 + $0xb0] sm:$0xff] }
0x1c07   :  { %v5479_v3 = vadd.f32 %v5478_v35, %v5477_v48  ;;  %v5792_v48 = vld [vmem:[#allocation3 + $0x80] sm:$0xff]  ;;  %v5795_v12 = vld [vmem:[#allocation3 + $0x98] sm:$0xff]  ;;  %v5794_v35 = vld [vmem:[#allocation3 + $0x90] sm:$0xff] }
0x1c08   :  { %v5801_v53 = vld [vmem:[#allocation3 + $0xc8] sm:$0xff]  ;;  %v5802_v56 = vld [vmem:[#allocation3 + $0xd0] sm:$0xff] }
0x1c09   :  { %v5480_v52 = vmul.f32 0.0625, %v5479_v3  ;;  %8014 = vmatpush3.bf16.msra.mxu1 %v5525_v31  ;;  %5557 = vmatpush1.bf16.msra.mxu0 %v5523_v29  ;;  %v5797_v3 = vld [vmem:[#allocation3 + $0xa8] sm:$0xff]  ;;  %v5778_v18 = vld [vmem:[#allocation3 + $0x10] sm:$0xff]  ;;  %v5803_v31 = vld [vmem:[#allocation3 + $0xd8] sm:$0xff] }
0x1c0a   :  { %8015 = vmatprep.subr.bf16.mxu1 %v11627_v15  ;;  %5558 = vmatprep.subr.bf16.mxu0 %v5527_v63  ;;  %v5781_v29 = vld [vmem:[#allocation3 + $0x28] sm:$0xff]  ;;  %v5806_v63 = vld [vmem:[#allocation3 + $0xf0] sm:$0xff] }
0x1c0b   :  { %v5481_v24 = vsub.f32 %v11138_v20, %v5480_v52  ;;  %v5482_v28 = vsub.f32 %v11141_v14, %v5480_v52 }
0x1c0d   :  { %v5483_v0 = vmul.f32 %v5481_v24, %v5481_v24  ;;  %v5484_v23 = vmul.f32 %v5482_v28, %v5482_v28  ;;  %8016 = vmatpush3.bf16.msra.mxu1 %v5528_v49  ;;  %5559 = vmatpush1.bf16.msra.mxu0 %v5526_v6  ;;  %v5804_v24 = vld [vmem:[#allocation3 + $0xe0] sm:$0xff]  ;;  %v5805_v28 = vld [vmem:[#allocation3 + $0xe8] sm:$0xff]  ;;  %v5810_v49 = vld [vmem:[#allocation3 + $0x110] sm:$0xff] }
0x1c0e   :  { %8017 = vmatprep.subr.bf16.mxu1 %v11627_v15  ;;  %5560 = vmatprep.subr.bf16.mxu0 %v5530_v27  ;;  %v5811_v6 = vld [vmem:[#allocation3 + $0x118] sm:$0xff] }
0x1c0f   :  { %v5485_v57 = vadd.f32 %v5484_v23, %v5483_v0  ;;  %v5807_v0 = vld [vmem:[#allocation3 + $0xf8] sm:$0xff]  ;;  %v5808_v23 = vld [vmem:[#allocation3 + $0x100] sm:$0xff] }
0x1c10   :  { %v5787_v27 = vld [vmem:[#allocation3 + $0x58] sm:$0xff] }
0x1c11   :  { %v5486_v33 = vrot.slane %v5485_v57, 4  ;;  %8018 = vmatpush3.bf16.msra.mxu1 %v5531_v32  ;;  %5561 = vmatpush1.bf16.msra.mxu0 %v5529_v2  ;;  %v5814_v32 = vld [vmem:[#allocation3 + $0x130] sm:$0xff]  ;;  %v5812_v2 = vld [vmem:[#allocation3 + $0x120] sm:$0xff] }
0x1c12   :  { %8019 = vmatprep.subr.bf16.mxu1 %v11627_v15  ;;  %5562 = vmatprep.subr.bf16.mxu0 %v5533_v34  ;;  %v5816_v34 = vld [vmem:[#allocation3 + $0x140] sm:$0xff] }
0x1c13   :  { %v5487_v16 = vadd.f32 %v5486_v33, %v5485_v57  ;;  %v5784_v57 = vld [vmem:[#allocation3 + $0x40] sm:$0xff]  ;;  %v5809_v33 = vld [vmem:[#allocation3 + $0x108] sm:$0xff] }
0x1c15   :  { %v5488_v39 = vrot.slane %v5487_v16, 2  ;;  %8020 = vmatpush3.bf16.msra.mxu1 %v5534_v26  ;;  %5563 = vmatpush1.bf16.msra.mxu0 %v5532_v7  ;;  %v5815_v26 = vld [vmem:[#allocation3 + $0x138] sm:$0xff]  ;;  %v5793_v7 = vld [vmem:[#allocation3 + $0x88] sm:$0xff] }
0x1c16   :  { %8021 = vmatprep.subr.bf16.mxu1 %v11627_v15  ;;  %5564 = vmatprep.subr.bf16.mxu0 %v5536_v8  ;;  %v5820_v8 = vld [vmem:[#allocation3 + $0x160] sm:$0xff] }
0x1c17   :  { %v5489_v1 = vadd.f32 %v5488_v39, %v5487_v16  ;;  %v5813_v16 = vld [vmem:[#allocation3 + $0x128] sm:$0xff]  ;;  %v5790_v39 = vld [vmem:[#allocation3 + $0x70] sm:$0xff] }
0x1c19   :  { %v5490_v4 = vrot.slane %v5489_v1, 1  ;;  %8022 = vmatpush3.bf16.msra.mxu1 %v5537_v9  ;;  %5565 = vmatpush1.bf16.msra.mxu0 %v5535_v45  ;;  %v5796_v9 = vld [vmem:[#allocation3 + $0xa0] sm:$0xff]  ;;  %v5822_v45 = vld [vmem:[#allocation3 + $0x170] sm:$0xff] }
0x1c1a   :  { %5860 = vmatprep.subr.bf16.mxu0 %v5777_v5  ;;  %7547 = vmatprep.subr.bf16.mxu1 %v5802_v56 }
0x1c1b   :  { %v5491_v10 = vadd.f32 %v5490_v4, %v5489_v1  ;;  %v5817_v1 = vld [vmem:[#allocation3 + $0x148] sm:$0xff]  ;;  %v5819_v4 = vld [vmem:[#allocation3 + $0x158] sm:$0xff] }
0x1c1d   :  { %v5492_v54 = vmul.f32 0.0625, %v5491_v10  ;;  %v5818_v10 = vld [vmem:[#allocation3 + $0x150] sm:$0xff] }
0x1c1f   :  { %v5493_v13 = vadd.f32 1e-05, %v5492_v54  ;;  %v5823_v54 = vld [vmem:[#allocation3 + $0x178] sm:$0xff] }
0x1c21   :  { %8354 = vrsqrt.f32 %v5493_v13  ;;  %v5821_v13 = vld [vmem:[#allocation3 + $0x168] sm:$0xff] }
0x1c2b   :  { %v8355_v50 = vpop.eup %8354 }
0x1c2c   :  { %v5495_v58 = vmul.f32 %v8355_v50, %v11662_v62  ;;  %v5799_v50 = vld [vmem:[#allocation3 + $0xb8] sm:$0xff] }
0x1c2e   :  { %v5499_v42 = vrot.slane %v5495_v58, %v11651_v55  ;;  %v5502_v44 = vmul.f32 %v5495_v58, %v5480_v52  ;;  %v5800_v52 = vld [vmem:[#allocation3 + $0xc0] sm:$0xff]  ;;  %v5825_v58 = vld [vmem:[#allocation3 + $0x188] sm:$0xff] }
0x1c30   :  { %v5504_v40 = vrot.slane %v5502_v44, 7  ;;  %v5500_v47 = vmul.f32 %v5499_v42, %v11138_v20  ;;  %v5501_v11 = vmul.f32 %v5499_v42, %v11141_v14  ;;  %v5783_v20 = vld [vmem:[#allocation3 + $0x38] sm:$0xff]  ;;  %v5782_v14 = vld [vmem:[#allocation3 + $0x30] sm:$0xff]  ;;  %v11663_v42 = vld [vmem:[#allocation51_spill] sm:$0xff] }
0x1c31   :  { %v5549_v44 = vrot.slane %v11663_v42, %v11651_v55 }
0x1c32   :  { %v5506_v21 = vsub.f32 %v11662_v62, %v5504_v40  ;;  %v11664_v40 = vld [vmem:[#allocation49_spill] sm:$0xff] }
0x1c34   :  { %v5510_v17 = vrot.slane %v5506_v21, %v11652_v60 }
0x1c36   :  { %v5511_v59 = vadd.f32 %v5510_v17, %v5500_v47  ;;  %v5512_v38 = vadd.f32 %v5510_v17, %v5501_v11  ;;  %v5541_v47 = vrot.slane %v11664_v40, %v11651_v55  ;;  %v11665_v17 = vld [vmem:[#allocation50_spill] sm:$0xff] }
0x1c38   :  { %v5513_v30 = vpack.c.bf16 %v5512_v38, %v5511_v59  ;;  %v5545_v59 = vrot.slane %v11665_v17, %v11651_v55 }
0x1c3a   :  { %5583 = vmatmul.mubr.bf16.vlgmr.msra.gmra.mrb[48].mxu0 %v5513_v30  ;;  %8024 = vmatmul.mubr.bf16.vlgmr.msra.gmra.mrb[52].mxu1 %v5513_v30 }
0x1c3b   :  { %5861 = vmatpush1.bf16.msra.mxu0 %v5776_v41  ;;  %7548 = vmatpush3.bf16.msra.mxu1 %v5778_v18 }
0x1c3c   :  { %5862 = vmatprep.subr.bf16.mxu0 %v5780_v37  ;;  %7549 = vmatprep.subr.bf16.mxu1 %v5805_v28 }
0x1c3f   :  { %5863 = vmatpush1.bf16.msra.mxu0 %v5779_v36  ;;  %7550 = vmatpush3.bf16.msra.mxu1 %v5781_v29 }
0x1c40   :  { %5864 = vmatprep.subr.bf16.mxu0 %v5783_v20  ;;  %7551 = vmatprep.subr.bf16.mxu1 %v5808_v23 }
0x1c43   :  { %5865 = vmatpush1.bf16.msra.mxu0 %v5782_v14  ;;  %7552 = vmatpush3.bf16.msra.mxu1 %v5784_v57 }
0x1c44   :  { %5866 = vmatprep.subr.bf16.mxu0 %v5786_v19  ;;  %7553 = vmatprep.subr.bf16.mxu1 %v5811_v6 }
0x1c47   :  { %5867 = vmatpush1.bf16.msra.mxu0 %v5785_v46  ;;  %7554 = vmatpush3.bf16.msra.mxu1 %v5787_v27 }
0x1c48   :  { %5868 = vmatprep.subr.bf16.mxu0 %v5789_v51  ;;  %7555 = vmatprep.subr.bf16.mxu1 %v5814_v32 }
0x1c4b   :  { %5869 = vmatpush1.bf16.msra.mxu0 %v5788_v22  ;;  %7556 = vmatpush3.bf16.msra.mxu1 %v5790_v39 }
0x1c4c   :  { %5870 = vmatprep.subr.bf16.mxu0 %v5792_v48  ;;  %7557 = vmatprep.subr.bf16.mxu1 %v5817_v1 }
0x1c4f   :  { %5871 = vmatpush1.bf16.msra.mxu0 %v5791_v25  ;;  %7558 = vmatpush3.bf16.msra.mxu1 %v5793_v7 }
0x1c50   :  { %5872 = vmatprep.subr.bf16.mxu0 %v5795_v12  ;;  %7559 = vmatprep.subr.bf16.mxu1 %v5820_v8 }
0x1c53   :  { %5873 = vmatpush1.bf16.msra.mxu0 %v5794_v35  ;;  %7560 = vmatpush3.bf16.msra.mxu1 %v5796_v9 }
0x1c54   :  { %5874 = vmatprep.subr.bf16.mxu0 %v5798_v43  ;;  %7561 = vmatprep.subr.bf16.mxu1 %v5823_v54 }
0x1c57   :  { %5875 = vmatpush1.bf16.msra.mxu0 %v5797_v3  ;;  %7562 = vmatpush3.bf16.msra.mxu1 %v5799_v50 }
0x1c58   :  { %5876 = vmatprep.subr.bf16.mxu0 %v5801_v53  ;;  %8027 = vmatprep.subr.bf16.mxu1 %v11627_v15 }
0x1c5b   :  { %5877 = vmatpush1.bf16.msra.mxu0 %v5800_v52 }
0x1c5c   :  { %5878 = vmatprep.subr.bf16.mxu0 %v5804_v24 }
0x1c5f   :  { %5879 = vmatpush1.bf16.msra.mxu0 %v5803_v31 }
0x1c60   :  { %5880 = vmatprep.subr.bf16.mxu0 %v5807_v0 }
0x1c63   :  { %5881 = vmatpush1.bf16.msra.mxu0 %v5806_v63 }
0x1c64   :  { %5882 = vmatprep.subr.bf16.mxu0 %v5810_v49 }
0x1c67   :  { %5883 = vmatpush1.bf16.msra.mxu0 %v5809_v33 }
0x1c68   :  { %5884 = vmatprep.subr.bf16.mxu0 %v5813_v16 }
0x1c6b   :  { %5885 = vmatpush1.bf16.msra.mxu0 %v5812_v2 }
0x1c6c   :  { %5886 = vmatprep.subr.bf16.mxu0 %v5816_v34 }
0x1c6f   :  { %5887 = vmatpush1.bf16.msra.mxu0 %v5815_v26 }
0x1c70   :  { %5888 = vmatprep.subr.bf16.mxu0 %v5819_v4 }
0x1c73   :  { %5889 = vmatpush1.bf16.msra.mxu0 %v5818_v10 }
0x1c74   :  { %5890 = vmatprep.subr.bf16.mxu0 %v5822_v45 }
0x1c77   :  { %5891 = vmatpush1.bf16.msra.mxu0 %v5821_v13 }
0x1c78   :  { %5903 = vmatprep.subr.bf16.mxu0 %v5825_v58 }
0x1d0d   :  { %v5584_v11 = vpop.f32.mrb[48].mxu0  ;;  %v5627_v21 = vpop.f32.mrb[52].mxu1 }
0x1d0e   :  { %v11171_v38 = vadd.f32 %v5627_v21, %v5549_v44  ;;  %v5586_v30 = vpop.f32.mrb[49].mxu0  ;;  %v8025_v5 = vpop.f32.mrb[53].mxu1  ;;  %v11173_v36 = vadd.f32 %v5584_v11, %v5541_v47 }
0x1d0f   :  { %v5588_v41 = vpop.f32.mrb[50].mxu0  ;;  %v5630_v37 = vpop.f32.mrb[54].mxu1  ;;  %v11179_v51 = vadd.f32 %v5586_v30, %v5545_v59 }
0x1d10   :  { %v11175_v20 = vadd.f32 %v5588_v41, %v5541_v47  ;;  %v11177_v14 = vadd.f32 %v5630_v37, %v5549_v44  ;;  %v5590_v19 = vpop.f32.mrb[51].mxu0  ;;  %v8026_v46 = vpop.f32.mrb[55].mxu1 }
0x1d11   :  { %v11181_v22 = vadd.f32 %v5590_v19, %v5545_v59 }
0x1d12   :  { %v5634_v48 = vadd.f32 %v11175_v20, %v11173_v36  ;;  %v5648_v25 = vadd.f32 %v11177_v14, %v11171_v38 }
0x1d13   :  { %v5641_v12 = vadd.f32 %v11181_v22, %v11179_v51 }
0x1d14   :  { %v5635_v35 = vrot.slane %v5634_v48, 4  ;;  %v5649_v43 = vrot.slane %v5648_v25, 4 }
0x1d15   :  { %v5642_v3 = vrot.slane %v5641_v12, 4 }
0x1d16   :  { %v5636_v53 = vadd.f32 %v5635_v35, %v5634_v48  ;;  %v5650_v56 = vadd.f32 %v5649_v43, %v5648_v25 }
0x1d17   :  { %v5643_v52 = vadd.f32 %v5642_v3, %v5641_v12 }
0x1d18   :  { %v5637_v18 = vrot.slane %v5636_v53, 2  ;;  %v5651_v24 = vrot.slane %v5650_v56, 2 }
0x1d19   :  { %v5644_v28 = vrot.slane %v5643_v52, 2 }
0x1d1a   :  { %v5638_v31 = vadd.f32 %v5637_v18, %v5636_v53  ;;  %v5652_v29 = vadd.f32 %v5651_v24, %v5650_v56 }
0x1d1b   :  { %v5645_v0 = vadd.f32 %v5644_v28, %v5643_v52 }
0x1d1c   :  { %v5639_v23 = vrot.slane %v5638_v31, 1  ;;  %v5653_v63 = vrot.slane %v5652_v29, 1 }
0x1d1d   :  { %v5646_v57 = vrot.slane %v5645_v0, 1 }
0x1d1e   :  { %v5640_v49 = vadd.f32 %v5639_v23, %v5638_v31  ;;  %v5654_v6 = vadd.f32 %v5653_v63, %v5652_v29 }
0x1d1f   :  { %v5647_v33 = vadd.f32 %v5646_v57, %v5645_v0 }
0x1d20   :  { %v5655_v27 = vmul.f32 0.0625, %v5640_v49  ;;  %v11189_v16 = vmul.f32 0.0625, %v5654_v6 }
0x1d21   :  { %v5656_v32 = vmul.f32 0.0625, %v5647_v33 }
0x1d22   :  { %v5658_v2 = vsub.f32 %v11173_v36, %v5655_v27  ;;  %v5661_v39 = vsub.f32 %v11175_v20, %v5655_v27  ;;  %v5660_v34 = vsub.f32 %v11171_v38, %v11189_v16  ;;  %v5663_v1 = vsub.f32 %v11177_v14, %v11189_v16 }
0x1d23   :  { %v5659_v26 = vsub.f32 %v11179_v51, %v5656_v32  ;;  %v5662_v7 = vsub.f32 %v11181_v22, %v5656_v32 }
0x1d24   :  { %v5664_v4 = vmul.f32 %v5658_v2, %v5658_v2  ;;  %v5667_v8 = vmul.f32 %v5661_v39, %v5661_v39  ;;  %v5666_v10 = vmul.f32 %v5660_v34, %v5660_v34  ;;  %v5669_v9 = vmul.f32 %v5663_v1, %v5663_v1 }
0x1d25   :  { %v5665_v45 = vmul.f32 %v5659_v26, %v5659_v26  ;;  %v5668_v54 = vmul.f32 %v5662_v7, %v5662_v7  ;;  %v11666_v7 = vld [vmem:[#allocation57_spill] sm:$0xff] }
0x1d26   :  { %v5670_v13 = vadd.f32 %v5667_v8, %v5664_v4  ;;  %v5684_v50 = vadd.f32 %v5669_v9, %v5666_v10  ;;  %v11209_v8 = vstv %s8576_s30  ;;  %s8436_s30 = smov [#allocation11]  }
0x1d27   :  { %v5677_v58 = vadd.f32 %v5668_v54, %v5665_v45 }
0x1d28   :  { %v5671_v44 = vrot.slane %v5670_v13, 4  ;;  %v5685_v21 = vrot.slane %v5684_v50, 4 }
0x1d29   :  { %v5678_v47 = vrot.slane %v5677_v58, 4 }
0x1d2a   :  { %v5672_v11 = vadd.f32 %v5671_v44, %v5670_v13  ;;  %v5686_v37 = vadd.f32 %v5685_v21, %v5684_v50 }
0x1d2b   :  { %v5679_v59 = vadd.f32 %v5678_v47, %v5677_v58 }
0x1d2c   :  { %v5673_v30 = vrot.slane %v5672_v11, 2  ;;  %v5687_v12 = vrot.slane %v5686_v37, 2 }
0x1d2d   :  { %v5680_v5 = vrot.slane %v5679_v59, 2 }
0x1d2e   :  { %v5674_v41 = vadd.f32 %v5673_v30, %v5672_v11  ;;  %v5688_v56 = vadd.f32 %v5687_v12, %v5686_v37  ;;  %v5828_v12 = vld [vmem:[#allocation3 + $0x1a0] sm:$0xff] }
0x1d2f   :  { %v5681_v19 = vadd.f32 %v5680_v5, %v5679_v59 }
0x1d30   :  { %v5675_v46 = vrot.slane %v5674_v41, 1  ;;  %v5689_v18 = vrot.slane %v5688_v56, 1 }
0x1d31   :  { %v5682_v48 = vrot.slane %v5681_v19, 1 }
0x1d32   :  { %v5676_v25 = vadd.f32 %v5675_v46, %v5674_v41  ;;  %v5690_v24 = vadd.f32 %v5689_v18, %v5688_v56  ;;  %v5824_v46 = vld [vmem:[#allocation3 + $0x180] sm:$0xff]  ;;  %v5830_v56 = vld [vmem:[#allocation3 + $0x1b0] sm:$0xff] }
0x1d33   :  { %v5683_v35 = vadd.f32 %v5682_v48, %v5681_v19  ;;  %v5826_v48 = vld [vmem:[#allocation3 + $0x190] sm:$0xff] }
0x1d34   :  { %v5691_v43 = vmul.f32 0.0625, %v5676_v25  ;;  %v5693_v31 = vmul.f32 0.0625, %v5690_v24  ;;  %v5834_v24 = vld [vmem:[#allocation3 + $0x1d0] sm:$0xff] }
0x1d35   :  { %v5692_v3 = vmul.f32 0.0625, %v5683_v35  ;;  %v5827_v35 = vld [vmem:[#allocation3 + $0x198] sm:$0xff] }
0x1d36   :  { %v5694_v53 = vadd.f32 1e-05, %v5691_v43  ;;  %v5696_v57 = vadd.f32 1e-05, %v5693_v31  ;;  %v5829_v43 = vld [vmem:[#allocation3 + $0x1a8] sm:$0xff] }
0x1d37   :  { %v5695_v52 = vadd.f32 1e-05, %v5692_v3 }
0x1d38   :  { %8356 = vrsqrt.f32 %v5694_v53  ;;  %v5831_v53 = vld [vmem:[#allocation3 + $0x1b8] sm:$0xff] }
0x1d39   :  { %8358 = vrsqrt.f32 %v5695_v52  ;;  %v5832_v52 = vld [vmem:[#allocation3 + $0x1c0] sm:$0xff] }
0x1d3a   :  { %8360 = vrsqrt.f32 %v5696_v57 }
0x1d42   :  { %v8357_v28 = vpop.eup %8356 }
0x1d43   :  { %v5700_v29 = vmul.f32 %v8357_v28, %v11664_v40  ;;  %v8359_v0 = vpop.eup %8358  ;;  %v5835_v28 = vld [vmem:[#allocation3 + $0x1d8] sm:$0xff] }
0x1d44   :  { %v5701_v63 = vmul.f32 %v8359_v0, %v11665_v17  ;;  %v8361_v30 = vpop.eup %8360 }
0x1d45   :  { %v5721_v23 = vmul.f32 %v5700_v29, %v5655_v27  ;;  %v5706_v49 = vrot.slane %v5700_v29, %v11652_v60  ;;  %v5702_v25 = vmul.f32 %v8361_v30, %v11663_v42  ;;  %v5837_v29 = vld [vmem:[#allocation3 + $0x1e8] sm:$0xff]  ;;  %v6180_v30 = vld [vmem:[#allocation4 + $0x50] sm:$0xff] }
0x1d46   :  { %v5722_v33 = vmul.f32 %v5701_v63, %v5656_v32  ;;  %v5710_v39 = vrot.slane %v5701_v63, %v11652_v60  ;;  %v5838_v63 = vld [vmem:[#allocation3 + $0x1f0] sm:$0xff] }
0x1d47   :  { %v5727_v6 = vrot.slane %v5721_v23, 7  ;;  %v5715_v1 = vmul.f32 %v5706_v49, %v11173_v36  ;;  %v5718_v26 = vmul.f32 %v5706_v49, %v11175_v20  ;;  %v5723_v3 = vmul.f32 %v5702_v25, %v11189_v16  ;;  %v5833_v16 = vld [vmem:[#allocation3 + $0x1c8] sm:$0xff]  ;;  %v5836_v23 = vld [vmem:[#allocation3 + $0x1e0] sm:$0xff] }
0x1d48   :  { %v5728_v34 = vrot.slane %v5722_v33, 7  ;;  %v5719_v32 = vmul.f32 %v5710_v39, %v11181_v22  ;;  %v5716_v45 = vmul.f32 %v5710_v39, %v11179_v51  ;;  %v5714_v0 = vrot.slane %v5702_v25, %v11652_v60  ;;  %v5840_v49 = vld [vmem:[#allocation3 + $0x200] sm:$0xff]  ;;  %v5841_v39 = vld [vmem:[#allocation3 + $0x208] sm:$0xff]  ;;  %v6188_v25 = vld [vmem:[#allocation4 + $0x90] sm:$0xff] }
0x1d49   :  { %v5733_v2 = vsub.f32 %v11664_v40, %v5727_v6  ;;  %v5729_v18 = vrot.slane %v5723_v3, 7  ;;  %v6196_v3 = vld [vmem:[#allocation4 + $0xd0] sm:$0xff] }
0x1d4a   :  { %v5734_v27 = vsub.f32 %v11665_v17, %v5728_v34  ;;  %v5717_v6 = vmul.f32 %v5714_v0, %v11171_v38  ;;  %v5720_v33 = vmul.f32 %v5714_v0, %v11177_v14  ;;  %v6178_v0 = vld [vmem:[#allocation4 + $0x40] sm:$0xff] }
0x1d4b   :  { %v5739_v4 = vrot.slane %v5733_v2, %v11666_v7  ;;  %v5735_v31 = vsub.f32 %v11663_v42, %v5729_v18  ;;  %v5839_v2 = vld [vmem:[#allocation3 + $0x1f8] sm:$0xff]  ;;  %v6199_v18 = vld [vmem:[#allocation4 + $0xe8] sm:$0xff] }
0x1d4c   :  { %v5743_v54 = vrot.slane %v5734_v27, %v11666_v7  ;;  %v5844_v27 = vld [vmem:[#allocation3 + $0x220] sm:$0xff] }
0x1d4d   :  { %v5751_v10 = vadd.f32 %v5739_v4, %v5718_v26  ;;  %v5748_v9 = vadd.f32 %v5739_v4, %v5715_v1  ;;  %v5747_v57 = vrot.slane %v5735_v31, %v11666_v7  ;;  %v5843_v1 = vld [vmem:[#allocation3 + $0x218] sm:$0xff]  ;;  %v5842_v4 = vld [vmem:[#allocation3 + $0x210] sm:$0xff]  ;;  %v6202_v31 = vld [vmem:[#allocation4 + $0x100] sm:$0xff] }
0x1d4e   :  { %v5749_v58 = vadd.f32 %v5743_v54, %v5716_v45  ;;  %v5752_v44 = vadd.f32 %v5743_v54, %v5719_v32  ;;  %v5845_v45 = vld [vmem:[#allocation3 + $0x228] sm:$0xff]  ;;  %v5847_v54 = vld [vmem:[#allocation3 + $0x238] sm:$0xff] }
0x1d4f   :  { %v5761_v13 = vmul.f32 %v11209_v8, %v5748_v9  ;;  %v5764_v50 = vmul.f32 %v11209_v8, %v5751_v10  ;;  %vm5754_vm5 = vcmp.ge.f32.partialorder %v5748_v9, 0.0  ;;  %vm5757_vm6 = vcmp.ge.f32.partialorder %v5751_v10, 0.0 }
0x1d50   :  { %vm5755_vm7 = vcmp.ge.f32.partialorder %v5749_v58, 0.0  ;;  %vm5758_vm8 = vcmp.ge.f32.partialorder %v5752_v44, 0.0  ;;  %v5762_v47 = vmul.f32 %v11209_v8, %v5749_v58  ;;  %v5765_v11 = vmul.f32 %v11209_v8, %v5752_v44 }
0x1d51   :  { %v5767_v21 = vsel %vm5754_vm5, %v5748_v9, %v5761_v13  ;;  %v5770_v59 = vsel %vm5757_vm6, %v5751_v10, %v5764_v50  ;;  %v5753_v34 = vadd.f32 %v5747_v57, %v5720_v33  ;;  %v5750_v26 = vadd.f32 %v5747_v57, %v5717_v6  ;;  %v5846_v10 = vld [vmem:[#allocation3 + $0x230] sm:$0xff]  ;;  %v6203_v57 = vld [vmem:[#allocation4 + $0x108] sm:$0xff] }
0x1d52   :  { %v5768_v5 = vsel %vm5755_vm7, %v5749_v58, %v5762_v47  ;;  %v5771_v41 = vsel %vm5758_vm8, %v5752_v44, %v5765_v11  ;;  %v5773_v19 = vpack.c.bf16 %v5770_v59, %v5767_v21  ;;  %v6171_v44 = vld [vmem:[#allocation4 + $0x8] sm:$0xff]  ;;  %v6170_v47 = vld [vmem:[#allocation4] sm:$0xff]  ;;  %v6173_v11 = vld [vmem:[#allocation4 + $0x18] sm:$0xff] }
0x1d53   :  { %v5774_v37 = vpack.c.bf16 %v5771_v41, %v5768_v5  ;;  %v5763_v9 = vmul.f32 %v11209_v8, %v5750_v26  ;;  %v5766_v32 = vmul.f32 %v11209_v8, %v5753_v34  ;;  %vm5756_vm9 = vcmp.ge.f32.partialorder %v5750_v26, 0.0  ;;  %v6174_v8 = vld [vmem:[#allocation4 + $0x20] sm:$0xff]  ;;  %v6177_v21 = vld [vmem:[#allocation4 + $0x38] sm:$0xff]  ;;  %v6176_v59 = vld [vmem:[#allocation4 + $0x30] sm:$0xff] }
0x1d54   :  { %vm5759_vm10 = vcmp.ge.f32.partialorder %v5753_v34, 0.0  ;;  %v6179_v5 = vld [vmem:[#allocation4 + $0x48] sm:$0xff]  ;;  %v6208_v33 = vld [vmem:[#allocation4 + $0x130] sm:$0xff] }
0x1d55   :  { %5892 = vmatprep.mubr.bf16.mxu0 %v5774_v37  ;;  %5978 = vmatprep.mubr.bf16.mxu1 %v5774_v37  ;;  %v5769_v13 = vsel %vm5756_vm9, %v5750_v26, %v5763_v9  ;;  %v5772_v50 = vsel %vm5759_vm10, %v5753_v34, %v5766_v32  ;;  %v6183_v41 = vld [vmem:[#allocation4 + $0x68] sm:$0xff]  ;;  %v6182_v37 = vld [vmem:[#allocation4 + $0x60] sm:$0xff]  ;;  %v6209_v26 = vld [vmem:[#allocation4 + $0x138] sm:$0xff] }
0x1d56   :  { %5893 = vmatmul.mubr.bf16.vlgmr.msra.gmra.mrb[52].mxu0 %v5773_v19  ;;  %5979 = vmatmul.mubr.bf16.vlgmr.msra.gmra.mrb[56].mxu1 %v5773_v19  ;;  %v5775_v58 = vpack.c.bf16 %v5772_v50, %v5769_v13  ;;  %v6186_v19 = vld [vmem:[#allocation4 + $0x80] sm:$0xff]  ;;  %v6207_v6 = vld [vmem:[#allocation4 + $0x128] sm:$0xff]  ;;  %v6212_v9 = vld [vmem:[#allocation4 + $0x150] sm:$0xff] }
0x1d57   :  { %5904 = vmatpush1.bf16.msra.mxu0 %v5824_v46  ;;  %8028 = vmatpush3.bf16.msra.mxu1 %v5826_v48  ;;  %v6185_v46 = vld [vmem:[#allocation4 + $0x78] sm:$0xff]  ;;  %v6210_v34 = vld [vmem:[#allocation4 + $0x140] sm:$0xff]  ;;  %v6215_v13 = vld [vmem:[#allocation4 + $0x168] sm:$0xff] }
0x1d58   :  { %5905 = vmatprep.subr.bf16.mxu0 %v5828_v12  ;;  %8029 = vmatprep.subr.bf16.mxu1 %v11627_v15  ;;  %v6189_v48 = vld [vmem:[#allocation4 + $0x98] sm:$0xff]  ;;  %v6192_v12 = vld [vmem:[#allocation4 + $0xb0] sm:$0xff]  ;;  %v6190_v32 = vld [vmem:[#allocation4 + $0xa0] sm:$0xff] }
0x1d59   :  { %5935 = vmatprep.mubr.bf16.mxu0 %v11654_v61  ;;  %8043 = vmatprep.mubr.msk.bf16.mxu1 %vm8430_vm0, %v11627_v15  ;;  %v6193_v50 = vld [vmem:[#allocation4 + $0xb8] sm:$0xff] }
0x1d5b   :  { %5906 = vmatpush1.bf16.msra.mxu0 %v5827_v35  ;;  %8030 = vmatpush3.bf16.msra.mxu1 %v5829_v43  ;;  %v6191_v35 = vld [vmem:[#allocation4 + $0xa8] sm:$0xff] }
0x1d5c   :  { %5907 = vmatprep.subr.bf16.mxu0 %v5831_v53  ;;  %8031 = vmatprep.subr.bf16.mxu1 %v11627_v15  ;;  %v6195_v43 = vld [vmem:[#allocation4 + $0xc8] sm:$0xff]  ;;  %v6194_v53 = vld [vmem:[#allocation4 + $0xc0] sm:$0xff] }
0x1d5f   :  { %5908 = vmatpush1.bf16.msra.mxu0 %v5830_v56  ;;  %8032 = vmatpush3.bf16.msra.mxu1 %v5832_v52  ;;  %v6172_v56 = vld [vmem:[#allocation4 + $0x10] sm:$0xff]  ;;  %v6198_v52 = vld [vmem:[#allocation4 + $0xe0] sm:$0xff] }
0x1d60   :  { %5909 = vmatprep.subr.bf16.mxu0 %v5834_v24  ;;  %8033 = vmatprep.subr.bf16.mxu1 %v11627_v15  ;;  %v6197_v24 = vld [vmem:[#allocation4 + $0xd8] sm:$0xff] }
0x1d63   :  { %5910 = vmatpush1.bf16.msra.mxu0 %v5833_v16  ;;  %8034 = vmatpush3.bf16.msra.mxu1 %v5835_v28  ;;  %v6175_v16 = vld [vmem:[#allocation4 + $0x28] sm:$0xff]  ;;  %v6201_v28 = vld [vmem:[#allocation4 + $0xf8] sm:$0xff] }
0x1d64   :  { %5911 = vmatprep.subr.bf16.mxu0 %v5837_v29  ;;  %8035 = vmatprep.subr.bf16.mxu1 %v11627_v15  ;;  %v6200_v29 = vld [vmem:[#allocation4 + $0xf0] sm:$0xff] }
0x1d67   :  { %5912 = vmatpush1.bf16.msra.mxu0 %v5836_v23  ;;  %8036 = vmatpush3.bf16.msra.mxu1 %v5838_v63  ;;  %v6204_v23 = vld [vmem:[#allocation4 + $0x110] sm:$0xff]  ;;  %v6205_v63 = vld [vmem:[#allocation4 + $0x118] sm:$0xff] }
0x1d68   :  { %5913 = vmatprep.subr.bf16.mxu0 %v5840_v49  ;;  %8037 = vmatprep.subr.bf16.mxu1 %v11627_v15  ;;  %v6181_v49 = vld [vmem:[#allocation4 + $0x58] sm:$0xff] }
0x1d6b   :  { %5914 = vmatpush1.bf16.msra.mxu0 %v5839_v2  ;;  %8038 = vmatpush3.bf16.msra.mxu1 %v5841_v39  ;;  %v6206_v2 = vld [vmem:[#allocation4 + $0x120] sm:$0xff]  ;;  %v6184_v39 = vld [vmem:[#allocation4 + $0x70] sm:$0xff] }
0x1d6c   :  { %5915 = vmatprep.subr.bf16.mxu0 %v5843_v1  ;;  %8039 = vmatprep.subr.bf16.mxu1 %v11627_v15  ;;  %v6211_v1 = vld [vmem:[#allocation4 + $0x148] sm:$0xff] }
0x1d6f   :  { %5916 = vmatpush1.bf16.msra.mxu0 %v5842_v4  ;;  %8040 = vmatpush3.bf16.msra.mxu1 %v5844_v27  ;;  %v6187_v4 = vld [vmem:[#allocation4 + $0x88] sm:$0xff]  ;;  %v6213_v27 = vld [vmem:[#allocation4 + $0x158] sm:$0xff] }
0x1d70   :  { %5917 = vmatprep.subr.bf16.mxu0 %v5846_v10  ;;  %8041 = vmatprep.subr.bf16.mxu1 %v11627_v15  ;;  %v6214_v10 = vld [vmem:[#allocation4 + $0x160] sm:$0xff] }
0x1d73   :  { %5918 = vmatpush1.bf16.msra.mxu0 %v5845_v45  ;;  %8042 = vmatpush3.bf16.msra.mxu1 %v5847_v54  ;;  %v6216_v45 = vld [vmem:[#allocation4 + $0x170] sm:$0xff]  ;;  %v6217_v54 = vld [vmem:[#allocation4 + $0x178] sm:$0xff] }
0x1d74   :  { %6254 = vmatprep.subr.bf16.mxu1 %v6171_v44  ;;  %7578 = vmatprep.subr.bf16.mxu0 %v6196_v3 }
0x1d76   :  { %5936 = vmatmul.mubr.bf16.vlgmr.msra.gmra.mrb[52].mxu0 %v5775_v58  ;;  %8044 = vmatmul.mubr.bf16.vlgmr.msra.gmra.mrb[60].mxu1 %v5775_v58  ;;  %v6219_v58 = vld [vmem:[#allocation4 + $0x188] sm:$0xff] }
0x1d77   :  { %6255 = vmatpush1.bf16.msra.mxu1 %v6170_v47  ;;  %7579 = vmatpush3.bf16.msra.mxu0 %v6172_v56 }
0x1d78   :  { %6256 = vmatprep.subr.bf16.mxu1 %v6174_v8  ;;  %7580 = vmatprep.subr.bf16.mxu0 %v6199_v18 }
0x1d7b   :  { %6257 = vmatpush1.bf16.msra.mxu1 %v6173_v11  ;;  %7581 = vmatpush3.bf16.msra.mxu0 %v6175_v16 }
0x1d7c   :  { %6258 = vmatprep.subr.bf16.mxu1 %v6177_v21  ;;  %7582 = vmatprep.subr.bf16.mxu0 %v6202_v31 }
0x1d7f   :  { %6259 = vmatpush1.bf16.msra.mxu1 %v6176_v59  ;;  %7583 = vmatpush3.bf16.msra.mxu0 %v6178_v0 }
0x1d80   :  { %6260 = vmatprep.subr.bf16.mxu1 %v6180_v30  ;;  %7584 = vmatprep.subr.bf16.mxu0 %v6205_v63  ;;  %v11667_v30 = vld [vmem:[#allocation58_spill] sm:$0xff] }
0x1d83   :  { %6261 = vmatpush1.bf16.msra.mxu1 %v6179_v5  ;;  %7585 = vmatpush3.bf16.msra.mxu0 %v6181_v49  ;;  %v5859_v5 = vrot.slane %v11663_v42, %v11667_v30 }
0x1d84   :  { %6262 = vmatprep.subr.bf16.mxu1 %v6183_v41  ;;  %7586 = vmatprep.subr.bf16.mxu0 %v6208_v33  ;;  %v5851_v41 = vrot.slane %v11664_v40, %v11667_v30 }
0x1d87   :  { %6263 = vmatpush1.bf16.msra.mxu1 %v6182_v37  ;;  %7587 = vmatpush3.bf16.msra.mxu0 %v6184_v39 }
0x1d88   :  { %6264 = vmatprep.subr.bf16.mxu1 %v6186_v19  ;;  %7588 = vmatprep.subr.bf16.mxu0 %v6211_v1 }
0x1d8b   :  { %6265 = vmatpush1.bf16.msra.mxu1 %v6185_v46  ;;  %7589 = vmatpush3.bf16.msra.mxu0 %v6187_v4 }
0x1d8c   :  { %6266 = vmatprep.subr.bf16.mxu1 %v6189_v48  ;;  %7590 = vmatprep.subr.bf16.mxu0 %v6214_v10  ;;  %v5855_v48 = vrot.slane %v11665_v17, %v11667_v30 }
0x1d8f   :  { %6267 = vmatpush1.bf16.msra.mxu1 %v6188_v25  ;;  %7591 = vmatpush3.bf16.msra.mxu0 %v6190_v32 }
0x1d90   :  { %6268 = vmatprep.subr.bf16.mxu1 %v6192_v12  ;;  %7592 = vmatprep.subr.bf16.mxu0 %v6217_v54 }
0x1d93   :  { %6269 = vmatpush1.bf16.msra.mxu1 %v6191_v35  ;;  %7593 = vmatpush3.bf16.msra.mxu0 %v6193_v50 }
0x1d94   :  { %6270 = vmatprep.subr.bf16.mxu1 %v6195_v43  ;;  %8047 = vmatprep.subr.bf16.mxu0 %v11627_v15 }
0x1d97   :  { %6271 = vmatpush1.bf16.msra.mxu1 %v6194_v53 }
0x1d98   :  { %6272 = vmatprep.subr.bf16.mxu1 %v6198_v52 }
0x1d9b   :  { %6273 = vmatpush1.bf16.msra.mxu1 %v6197_v24 }
0x1d9c   :  { %6274 = vmatprep.subr.bf16.mxu1 %v6201_v28 }
0x1d9f   :  { %6275 = vmatpush1.bf16.msra.mxu1 %v6200_v29 }
0x1da0   :  { %6276 = vmatprep.subr.bf16.mxu1 %v6204_v23 }
0x1da3   :  { %6277 = vmatpush1.bf16.msra.mxu1 %v6203_v57 }
0x1da4   :  { %6278 = vmatprep.subr.bf16.mxu1 %v6207_v6 }
0x1da7   :  { %6279 = vmatpush1.bf16.msra.mxu1 %v6206_v2 }
0x1da8   :  { %6280 = vmatprep.subr.bf16.mxu1 %v6210_v34 }
0x1dab   :  { %6281 = vmatpush1.bf16.msra.mxu1 %v6209_v26 }
0x1dac   :  { %6282 = vmatprep.subr.bf16.mxu1 %v6213_v27 }
0x1daf   :  { %6283 = vmatpush1.bf16.msra.mxu1 %v6212_v9 }
0x1db0   :  { %6284 = vmatprep.subr.bf16.mxu1 %v6216_v45 }
0x1db3   :  { %6285 = vmatpush1.bf16.msra.mxu1 %v6215_v13 }
0x1db4   :  { %6297 = vmatprep.subr.bf16.mxu1 %v6219_v58 }
0x1e29   :  { %v7563_v44 = vpop.f32.mrb[56].mxu1 }
0x1e2a   :  { %v7564_v47 = vpop.f32.mrb[57].mxu1 }
0x1e2b   :  { %v7565_v8 = vadd.f32 %v7564_v47, %v7563_v44  ;;  %v7566_v11 = vpop.f32.mrb[58].mxu1 }
0x1e2c   :  { %v7567_v21 = vpop.f32.mrb[59].mxu1 }
0x1e2d   :  { %v7568_v59 = vadd.f32 %v7567_v21, %v7566_v11  ;;  %v5981_v37 = vadd.f32 %v7565_v8, %v5859_v5 }
0x1e2f   :  { %v5984_v43 = vadd.f32 %v7568_v59, %v5859_v5 }
0x1e49   :  { %v5937_v19 = vpop.f32.mrb[52].mxu0  ;;  %v6021_v46 = vpop.f32.mrb[60].mxu1 }
0x1e4a   :  { %v11244_v25 = vadd.f32 %v6021_v46, %v5981_v37  ;;  %v5939_v12 = vpop.f32.mrb[53].mxu0  ;;  %v8045_v35 = vpop.f32.mrb[61].mxu1  ;;  %v11246_v56 = vadd.f32 %v5937_v19, %v5851_v41 }
0x1e4b   :  { %v5941_v3 = vpop.f32.mrb[54].mxu0  ;;  %v6024_v53 = vpop.f32.mrb[62].mxu1  ;;  %v11252_v28 = vadd.f32 %v5939_v12, %v5855_v48 }
0x1e4c   :  { %v11248_v52 = vadd.f32 %v5941_v3, %v5851_v41  ;;  %v11250_v18 = vadd.f32 %v6024_v53, %v5984_v43  ;;  %v5943_v24 = vpop.f32.mrb[55].mxu0  ;;  %v8046_v16 = vpop.f32.mrb[63].mxu1 }
0x1e4d   :  { %v11254_v31 = vadd.f32 %v5943_v24, %v5855_v48 }
0x1e4e   :  { %v6028_v29 = vadd.f32 %v11248_v52, %v11246_v56  ;;  %v6042_v0 = vadd.f32 %v11250_v18, %v11244_v25 }
0x1e4f   :  { %v6035_v23 = vadd.f32 %v11254_v31, %v11252_v28 }
0x1e50   :  { %v6029_v63 = vrot.slane %v6028_v29, 4  ;;  %v6043_v57 = vrot.slane %v6042_v0, 4 }
0x1e51   :  { %v6036_v49 = vrot.slane %v6035_v23, 4 }
0x1e52   :  { %v6030_v6 = vadd.f32 %v6029_v63, %v6028_v29  ;;  %v6044_v33 = vadd.f32 %v6043_v57, %v6042_v0 }
0x1e53   :  { %v6037_v2 = vadd.f32 %v6036_v49, %v6035_v23 }
0x1e54   :  { %v6031_v39 = vrot.slane %v6030_v6, 2  ;;  %v6045_v34 = vrot.slane %v6044_v33, 2 }
0x1e55   :  { %v6038_v1 = vrot.slane %v6037_v2, 2 }
0x1e56   :  { %v6032_v26 = vadd.f32 %v6031_v39, %v6030_v6  ;;  %v6046_v4 = vadd.f32 %v6045_v34, %v6044_v33 }
0x1e57   :  { %v6039_v27 = vadd.f32 %v6038_v1, %v6037_v2 }
0x1e58   :  { %v6033_v10 = vrot.slane %v6032_v26, 1  ;;  %v6047_v9 = vrot.slane %v6046_v4, 1 }
0x1e59   :  { %v6040_v32 = vrot.slane %v6039_v27, 1 }
0x1e5a   :  { %v6034_v45 = vadd.f32 %v6033_v10, %v6032_v26  ;;  %v6048_v54 = vadd.f32 %v6047_v9, %v6046_v4 }
0x1e5b   :  { %v6041_v13 = vadd.f32 %v6040_v32, %v6039_v27 }
0x1e5c   :  { %v6049_v50 = vmul.f32 0.0625, %v6034_v45  ;;  %v6051_v58 = vmul.f32 0.0625, %v6048_v54 }
0x1e5d   :  { %v6050_v44 = vmul.f32 0.0625, %v6041_v13 }
0x1e5e   :  { %v6052_v47 = vsub.f32 %v11246_v56, %v6049_v50  ;;  %v6055_v8 = vsub.f32 %v11248_v52, %v6049_v50  ;;  %v6054_v11 = vsub.f32 %v11244_v25, %v6051_v58  ;;  %v6057_v21 = vsub.f32 %v11250_v18, %v6051_v58 }
0x1e5f   :  { %v6053_v59 = vsub.f32 %v11252_v28, %v6050_v44  ;;  %v6056_v5 = vsub.f32 %v11254_v31, %v6050_v44 }
0x1e60   :  { %v6058_v41 = vmul.f32 %v6052_v47, %v6052_v47  ;;  %v6061_v37 = vmul.f32 %v6055_v8, %v6055_v8  ;;  %v6060_v19 = vmul.f32 %v6054_v11, %v6054_v11  ;;  %v6063_v46 = vmul.f32 %v6057_v21, %v6057_v21 }
0x1e61   :  { %v6059_v48 = vmul.f32 %v6053_v59, %v6053_v59  ;;  %v6062_v12 = vmul.f32 %v6056_v5, %v6056_v5  ;;  %v11668_v5 = vld [vmem:[#allocation59_spill] sm:$0xff] }
0x1e62   :  { %v6064_v35 = vadd.f32 %v6061_v37, %v6058_v41  ;;  %v6078_v43 = vadd.f32 %v6063_v46, %v6060_v19 }
0x1e63   :  { %v6071_v3 = vadd.f32 %v6062_v12, %v6059_v48 }
0x1e64   :  { %v6065_v53 = vrot.slane %v6064_v35, 4  ;;  %v6079_v24 = vrot.slane %v6078_v43, 4 }
0x1e65   :  { %v6072_v16 = vrot.slane %v6071_v3, 4 }
0x1e66   :  { %v6066_v29 = vadd.f32 %v6065_v53, %v6064_v35  ;;  %v6080_v0 = vadd.f32 %v6079_v24, %v6078_v43 }
0x1e67   :  { %v6073_v23 = vadd.f32 %v6072_v16, %v6071_v3 }
0x1e68   :  { %v6067_v63 = vrot.slane %v6066_v29, 2  ;;  %v6081_v57 = vrot.slane %v6080_v0, 2 }
0x1e69   :  { %v6074_v49 = vrot.slane %v6073_v23, 2 }
0x1e6a   :  { %v6068_v6 = vadd.f32 %v6067_v63, %v6066_v29  ;;  %v6082_v33 = vadd.f32 %v6081_v57, %v6080_v0  ;;  %v11669_v63 = vld [vmem:[#allocation60_spill] sm:$0xff]  ;;  %v6154_v57 = vstv %s8581_s8  ;;  %s7099_s8 = sshll.u32 %s8436_s30, 4  ;;  %s7100_s8 = int_to_ptr.vmem [resolvable:$true] %s7099_s8 }
0x1e6b   :  { %v6075_v2 = vadd.f32 %v6074_v49, %v6073_v23  ;;  %p8397_p6 = scmp.lt.s32.totalorder %s7100_s8, %s7100_s8 }
0x1e6c   :  { %v6069_v39 = vrot.slane %v6068_v6, 1  ;;  %v6083_v34 = vrot.slane %v6082_v33, 1 }
0x1e6d   :  { %v6076_v1 = vrot.slane %v6075_v2, 1 }
0x1e6e   :  { %v6070_v26 = vadd.f32 %v6069_v39, %v6068_v6  ;;  %v6084_v4 = vadd.f32 %v6083_v34, %v6082_v33 }
0x1e6f   :  { %v6077_v27 = vadd.f32 %v6076_v1, %v6075_v2 }
0x1e70   :  { %v6085_v10 = vmul.f32 0.0625, %v6070_v26  ;;  %v6087_v9 = vmul.f32 0.0625, %v6084_v4 }
0x1e71   :  { %v6086_v32 = vmul.f32 0.0625, %v6077_v27 }
0x1e72   :  { %v6088_v45 = vadd.f32 1e-05, %v6085_v10  ;;  %v6090_v54 = vadd.f32 1e-05, %v6087_v9 }
0x1e73   :  { %v6089_v13 = vadd.f32 1e-05, %v6086_v32 }
0x1e74   :  { %8362 = vrsqrt.f32 %v6088_v45 }
0x1e75   :  { %8364 = vrsqrt.f32 %v6090_v54 }
0x1e76   :  { %8366 = vrsqrt.f32 %v6089_v13 }
0x1e7e   :  { %v8363_v47 = vpop.eup %8362 }
0x1e7f   :  { %v8365_v8 = vpop.eup %8364  ;;  %v6094_v11 = vmul.f32 %v8363_v47, %v11664_v40 }
0x1e80   :  { %v8367_v21 = vpop.eup %8366  ;;  %v6096_v59 = vmul.f32 %v8365_v8, %v11663_v42 }
0x1e81   :  { %v6100_v41 = vrot.slane %v6094_v11, %v11668_v5  ;;  %v6115_v37 = vmul.f32 %v6094_v11, %v6049_v50  ;;  %v6095_v19 = vmul.f32 %v8367_v21, %v11665_v17  ;;  %v6218_v21 = vld [vmem:[#allocation4 + $0x180] sm:$0xff] }
0x1e82   :  { %v6108_v46 = vrot.slane %v6096_v59, %v11668_v5  ;;  %v6117_v48 = vmul.f32 %v6096_v59, %v6051_v58  ;;  %v6220_v59 = vld [vmem:[#allocation4 + $0x190] sm:$0xff] }
0x1e83   :  { %v6109_v12 = vmul.f32 %v11246_v56, %v6100_v41  ;;  %v6112_v35 = vmul.f32 %v11248_v52, %v6100_v41  ;;  %v6121_v43 = vrot.slane %v6115_v37, 7  ;;  %v6104_v3 = vrot.slane %v6095_v19, %v11668_v5  ;;  %v6222_v5 = vld [vmem:[#allocation4 + $0x1a0] sm:$0xff]  ;;  %v6221_v41 = vld [vmem:[#allocation4 + $0x198] sm:$0xff]  ;;  %v6223_v37 = vld [vmem:[#allocation4 + $0x1a8] sm:$0xff] }
0x1e84   :  { %v6111_v53 = vmul.f32 %v6108_v46, %v11244_v25  ;;  %v6114_v24 = vmul.f32 %v6108_v46, %v11250_v18  ;;  %v6123_v16 = vrot.slane %v6117_v48, 7  ;;  %v6116_v29 = vmul.f32 %v6095_v19, %v6050_v44  ;;  %v6225_v19 = vld [vmem:[#allocation4 + $0x1b8] sm:$0xff]  ;;  %v6224_v46 = vld [vmem:[#allocation4 + $0x1b0] sm:$0xff]  ;;  %v6226_v48 = vld [vmem:[#allocation4 + $0x1c0] sm:$0xff] }
0x1e85   :  { %v6127_v50 = vsub.f32 %v11664_v40, %v6121_v43  ;;  %v6110_v0 = vmul.f32 %v11252_v28, %v6104_v3  ;;  %v6113_v23 = vmul.f32 %v11254_v31, %v6104_v3  ;;  %v6229_v43 = vld [vmem:[#allocation4 + $0x1d8] sm:$0xff]  ;;  %v6231_v3 = vld [vmem:[#allocation4 + $0x1e8] sm:$0xff] }
0x1e86   :  { %v6129_v58 = vsub.f32 %v11663_v42, %v6123_v16  ;;  %v6122_v56 = vrot.slane %v6116_v29, 7  ;;  %v6234_v16 = vld [vmem:[#allocation4 + $0x200] sm:$0xff]  ;;  %v6233_v29 = vld [vmem:[#allocation4 + $0x1f8] sm:$0xff] }
0x1e87   :  { %v6133_v52 = vrot.slane %v6127_v50, %v11669_v63  ;;  %v6235_v50 = vld [vmem:[#allocation4 + $0x208] sm:$0xff] }
0x1e88   :  { %v6141_v49 = vrot.slane %v6129_v58, %v11669_v63  ;;  %v6128_v25 = vsub.f32 %v11665_v17, %v6122_v56  ;;  %v6238_v58 = vld [vmem:[#allocation4 + $0x220] sm:$0xff]  ;;  %v6240_v56 = vld [vmem:[#allocation4 + $0x230] sm:$0xff] }
0x1e89   :  { %v6142_v6 = vadd.f32 %v6133_v52, %v6109_v12  ;;  %v6145_v18 = vadd.f32 %v6133_v52, %v6112_v35  ;;  %v6228_v12 = vld [vmem:[#allocation4 + $0x1d0] sm:$0xff]  ;;  %v6227_v35 = vld [vmem:[#allocation4 + $0x1c8] sm:$0xff]  ;;  %v6241_v52 = vld [vmem:[#allocation4 + $0x238] sm:$0xff] }
0x1e8a   :  { %v6144_v33 = vadd.f32 %v6141_v49, %v6111_v53  ;;  %v6147_v44 = vadd.f32 %v6141_v49, %v6114_v24  ;;  %v6137_v2 = vrot.slane %v6128_v25, %v11669_v63  ;;  %v6230_v53 = vld [vmem:[#allocation4 + $0x1e0] sm:$0xff]  ;;  %v6232_v24 = vld [vmem:[#allocation4 + $0x1f0] sm:$0xff]  ;;  %v6239_v63 = vld [vmem:[#allocation4 + $0x228] sm:$0xff] }
0x1e8b   :  { %v6158_v39 = vmul.f32 %v6154_v57, %v6145_v18  ;;  %vm6148_vm11 = vcmp.ge.f32.partialorder %v6142_v6, 0.0  ;;  %vm6151_vm12 = vcmp.ge.f32.partialorder %v6145_v18, 0.0  ;;  %v6155_v28 = vmul.f32 %v6154_v57, %v6142_v6  ;;  %v6576_v49 = vld [vmem:[#allocation5] sm:$0xff] }
0x1e8c   :  { %v6160_v31 = vmul.f32 %v6154_v57, %v6147_v44  ;;  %v6146_v34 = vadd.f32 %v6137_v2, %v6113_v23  ;;  %v6143_v1 = vadd.f32 %v6137_v2, %v6110_v0  ;;  %vm6150_vm13 = vcmp.ge.f32.partialorder %v6144_v33, 0.0  ;;  %v6237_v0 = vld [vmem:[#allocation4 + $0x218] sm:$0xff]  ;;  %v6236_v23 = vld [vmem:[#allocation4 + $0x210] sm:$0xff]  ;;  %v6580_v25 = vld [vmem:[#allocation5 + $0x20] sm:$0xff] }
0x1e8d   :  { %v6161_v26 = vsel %vm6148_vm11, %v6142_v6, %v6155_v28  ;;  %v6164_v4 = vsel %vm6151_vm12, %v6145_v18, %v6158_v39  ;;  %vm6153_vm14 = vcmp.ge.f32.partialorder %v6147_v44, 0.0  ;;  %v6157_v27 = vmul.f32 %v6154_v57, %v6144_v33  ;;  %v6579_v6 = vld [vmem:[#allocation5 + $0x18] sm:$0xff]  ;;  %v6585_v2 = vld [vmem:[#allocation5 + $0x48] sm:$0xff]  ;;  %v6588_v28 = vld [vmem:[#allocation5 + $0x60] sm:$0xff] }
0x1e8e   :  { %vm6149_vm15 = vcmp.ge.f32.partialorder %v6143_v1, 0.0  ;;  %vm6152_vm1 = vcmp.ge.f32.partialorder %v6146_v34, 0.0  ;;  %v6156_v10 = vmul.f32 %v6154_v57, %v6143_v1  ;;  %v6159_v9 = vmul.f32 %v6154_v57, %v6146_v34  ;;  %v6577_v57 = vld [vmem:[#allocation5 + $0x8] sm:$0xff]  ;;  %v6583_v18 = vld [vmem:[#allocation5 + $0x38] sm:$0xff] }
0x1e8f   :  { %v6167_v32 = vpack.c.bf16 %v6164_v4, %v6161_v26  ;;  %v6163_v45 = vsel %vm6150_vm13, %v6144_v33, %v6157_v27  ;;  %v6166_v54 = vsel %vm6153_vm14, %v6147_v44, %v6160_v31  ;;  %v6582_v33 = vld [vmem:[#allocation5 + $0x30] sm:$0xff]  ;;  %v6589_v39 = vld [vmem:[#allocation5 + $0x68] sm:$0xff]  ;;  %v6592_v31 = vld [vmem:[#allocation5 + $0x80] sm:$0xff] }
0x1e90   :  { %v6162_v13 = vsel %vm6149_vm15, %v6143_v1, %v6156_v10  ;;  %v6165_v47 = vsel %vm6152_vm1, %v6146_v34, %v6159_v9  ;;  %v6169_v8 = vpack.c.bf16 %v6166_v54, %v6163_v45  ;;  %v6586_v44 = vld [vmem:[#allocation5 + $0x50] sm:$0xff]  ;;  %v6591_v34 = vld [vmem:[#allocation5 + $0x78] sm:$0xff]  ;;  %v6597_v27 = vld [vmem:[#allocation5 + $0xa8] sm:$0xff] }
0x1e91   :  { %v6168_v11 = vpack.c.bf16 %v6165_v47, %v6162_v13  ;;  %v6595_v1 = vld [vmem:[#allocation5 + $0x98] sm:$0xff]  ;;  %v6594_v26 = vld [vmem:[#allocation5 + $0x90] sm:$0xff]  ;;  %v6601_v10 = vld [vmem:[#allocation5 + $0xc8] sm:$0xff] }
0x1e92   :  { %v6598_v4 = vld [vmem:[#allocation5 + $0xb0] sm:$0xff]  ;;  %v6604_v54 = vld [vmem:[#allocation5 + $0xe0] sm:$0xff]  ;;  %v6605_v13 = vld [vmem:[#allocation5 + $0xe8] sm:$0xff] }
0x1e93   :  { %6286 = vmatprep.mubr.bf16.mxu1 %v6168_v11  ;;  %6372 = vmatprep.mubr.bf16.mxu0 %v6168_v11  ;;  %v6602_v9 = vld [vmem:[#allocation5 + $0xd0] sm:$0xff]  ;;  %v6603_v47 = vld [vmem:[#allocation5 + $0xd8] sm:$0xff] }
0x1e94   :  { %6287 = vmatmul.mubr.bf16.vlgmr.msra.gmra.mrb[64].mxu1 %v6167_v32  ;;  %6373 = vmatmul.mubr.bf16.vlgmr.msra.gmra.mrb[56].mxu0 %v6167_v32  ;;  %v6600_v32 = vld [vmem:[#allocation5 + $0xc0] sm:$0xff]  ;;  %v6578_v45 = vld [vmem:[#allocation5 + $0x10] sm:$0xff]  ;;  %v6607_v11 = vld [vmem:[#allocation5 + $0xf8] sm:$0xff] }
0x1e95   :  { %6298 = vmatpush1.bf16.msra.mxu1 %v6218_v21  ;;  %8048 = vmatpush3.bf16.msra.mxu0 %v6220_v59  ;;  %v6608_v21 = vld [vmem:[#allocation5 + $0x100] sm:$0xff]  ;;  %v6606_v59 = vld [vmem:[#allocation5 + $0xf0] sm:$0xff] }
0x1e96   :  { %6299 = vmatprep.subr.bf16.mxu1 %v6222_v5  ;;  %8049 = vmatprep.subr.bf16.mxu0 %v11627_v15  ;;  %v6584_v5 = vld [vmem:[#allocation5 + $0x40] sm:$0xff] }
0x1e97   :  { %6329 = vmatprep.mubr.bf16.mxu1 %v11654_v61  ;;  %8063 = vmatprep.mubr.msk.bf16.mxu0 %vm8430_vm0, %v11627_v15 }
0x1e99   :  { %6300 = vmatpush1.bf16.msra.mxu1 %v6221_v41  ;;  %8050 = vmatpush3.bf16.msra.mxu0 %v6223_v37  ;;  %v6610_v41 = vld [vmem:[#allocation5 + $0x110] sm:$0xff]  ;;  %v6611_v37 = vld [vmem:[#allocation5 + $0x118] sm:$0xff] }
0x1e9a   :  { %6301 = vmatprep.subr.bf16.mxu1 %v6225_v19  ;;  %8051 = vmatprep.subr.bf16.mxu0 %v11627_v15  ;;  %v6609_v19 = vld [vmem:[#allocation5 + $0x108] sm:$0xff] }
0x1e9d   :  { %6302 = vmatpush1.bf16.msra.mxu1 %v6224_v46  ;;  %8052 = vmatpush3.bf16.msra.mxu0 %v6226_v48  ;;  %v6587_v46 = vld [vmem:[#allocation5 + $0x58] sm:$0xff]  ;;  %v6613_v48 = vld [vmem:[#allocation5 + $0x128] sm:$0xff] }
0x1e9e   :  { %6303 = vmatprep.subr.bf16.mxu1 %v6228_v12  ;;  %8053 = vmatprep.subr.bf16.mxu0 %v11627_v15  ;;  %v6614_v12 = vld [vmem:[#allocation5 + $0x130] sm:$0xff] }
0x1ea1   :  { %6304 = vmatpush1.bf16.msra.mxu1 %v6227_v35  ;;  %8054 = vmatpush3.bf16.msra.mxu0 %v6229_v43  ;;  %v6612_v35 = vld [vmem:[#allocation5 + $0x120] sm:$0xff]  ;;  %v6590_v43 = vld [vmem:[#allocation5 + $0x70] sm:$0xff] }
0x1ea2   :  { %6305 = vmatprep.subr.bf16.mxu1 %v6231_v3  ;;  %8055 = vmatprep.subr.bf16.mxu0 %v11627_v15  ;;  %v6616_v3 = vld [vmem:[#allocation5 + $0x140] sm:$0xff] }
0x1ea5   :  { %6306 = vmatpush1.bf16.msra.mxu1 %v6230_v53  ;;  %8056 = vmatpush3.bf16.msra.mxu0 %v6232_v24  ;;  %v6617_v53 = vld [vmem:[#allocation5 + $0x148] sm:$0xff]  ;;  %v6615_v24 = vld [vmem:[#allocation5 + $0x138] sm:$0xff] }
0x1ea6   :  { %6307 = vmatprep.subr.bf16.mxu1 %v6234_v16  ;;  %8057 = vmatprep.subr.bf16.mxu0 %v11627_v15  ;;  %v6593_v16 = vld [vmem:[#allocation5 + $0x88] sm:$0xff] }
0x1ea9   :  { %6308 = vmatpush1.bf16.msra.mxu1 %v6233_v29  ;;  %8058 = vmatpush3.bf16.msra.mxu0 %v6235_v50  ;;  %v6619_v29 = vld [vmem:[#allocation5 + $0x158] sm:$0xff]  ;;  %v6620_v50 = vld [vmem:[#allocation5 + $0x160] sm:$0xff] }
0x1eaa   :  { %6309 = vmatprep.subr.bf16.mxu1 %v6237_v0  ;;  %8059 = vmatprep.subr.bf16.mxu0 %v11627_v15  ;;  %v6618_v0 = vld [vmem:[#allocation5 + $0x150] sm:$0xff] }
0x1ead   :  { %6310 = vmatpush1.bf16.msra.mxu1 %v6236_v23  ;;  %8060 = vmatpush3.bf16.msra.mxu0 %v6238_v58  ;;  %v6596_v23 = vld [vmem:[#allocation5 + $0xa0] sm:$0xff]  ;;  %v6622_v58 = vld [vmem:[#allocation5 + $0x170] sm:$0xff] }
0x1eae   :  { %6311 = vmatprep.subr.bf16.mxu1 %v6240_v56  ;;  %8061 = vmatprep.subr.bf16.mxu0 %v11627_v15  ;;  %v6623_v56 = vld [vmem:[#allocation5 + $0x178] sm:$0xff] }
0x1eb1   :  { %6312 = vmatpush1.bf16.msra.mxu1 %v6239_v63  ;;  %8062 = vmatpush3.bf16.msra.mxu0 %v6241_v52  ;;  %v6621_v63 = vld [vmem:[#allocation5 + $0x168] sm:$0xff]  ;;  %v6599_v52 = vld [vmem:[#allocation5 + $0xb8] sm:$0xff] }
0x1eb2   :  { %6660 = vmatprep.subr.bf16.mxu0 %v6577_v57  ;;  %7609 = vmatprep.subr.bf16.mxu1 %v6602_v9  ;;  %v6625_v57 = vld [vmem:[#allocation5 + $0x188] sm:$0xff] }
0x1eb4   :  { %6330 = vmatmul.mubr.bf16.vlgmr.msra.gmra.mrb[64].mxu1 %v6169_v8  ;;  %8064 = vmatmul.mubr.bf16.vlgmr.msra.gmra.mrb[60].mxu0 %v6169_v8  ;;  %v6581_v8 = vld [vmem:[#allocation5 + $0x28] sm:$0xff] }
0x1eb5   :  { %6661 = vmatpush1.bf16.msra.mxu0 %v6576_v49  ;;  %7610 = vmatpush3.bf16.msra.mxu1 %v6578_v45 }
0x1eb6   :  { %6662 = vmatprep.subr.bf16.mxu0 %v6580_v25  ;;  %7611 = vmatprep.subr.bf16.mxu1 %v6605_v13 }
0x1eb9   :  { %6663 = vmatpush1.bf16.msra.mxu0 %v6579_v6  ;;  %7612 = vmatpush3.bf16.msra.mxu1 %v6581_v8 }
0x1eba   :  { %6664 = vmatprep.subr.bf16.mxu0 %v6583_v18  ;;  %7613 = vmatprep.subr.bf16.mxu1 %v6608_v21 }
0x1ebd   :  { %6665 = vmatpush1.bf16.msra.mxu0 %v6582_v33  ;;  %7614 = vmatpush3.bf16.msra.mxu1 %v6584_v5 }
0x1ebe   :  { %6666 = vmatprep.subr.bf16.mxu0 %v6586_v44  ;;  %7615 = vmatprep.subr.bf16.mxu1 %v6611_v37 }
0x1ec1   :  { %6667 = vmatpush1.bf16.msra.mxu0 %v6585_v2  ;;  %7616 = vmatpush3.bf16.msra.mxu1 %v6587_v46  ;;  %v11670_v2 = vld [vmem:[#allocation61_spill] sm:$0xff] }
0x1ec2   :  { %6668 = vmatprep.subr.bf16.mxu0 %v6589_v39  ;;  %7617 = vmatprep.subr.bf16.mxu1 %v6614_v12  ;;  %v6253_v39 = vrot.slane %v11663_v42, %v11670_v2 }
0x1ec5   :  { %6669 = vmatpush1.bf16.msra.mxu0 %v6588_v28  ;;  %7618 = vmatpush3.bf16.msra.mxu1 %v6590_v43  ;;  %v6245_v28 = vrot.slane %v11664_v40, %v11670_v2 }
0x1ec6   :  { %6670 = vmatprep.subr.bf16.mxu0 %v6592_v31  ;;  %7619 = vmatprep.subr.bf16.mxu1 %v6617_v53  ;;  %v6249_v31 = vrot.slane %v11665_v17, %v11670_v2 }
0x1ec9   :  { %6671 = vmatpush1.bf16.msra.mxu0 %v6591_v34  ;;  %7620 = vmatpush3.bf16.msra.mxu1 %v6593_v16 }
0x1eca   :  { %6672 = vmatprep.subr.bf16.mxu0 %v6595_v1  ;;  %7621 = vmatprep.subr.bf16.mxu1 %v6620_v50 }
0x1ecd   :  { %6673 = vmatpush1.bf16.msra.mxu0 %v6594_v26  ;;  %7622 = vmatpush3.bf16.msra.mxu1 %v6596_v23 }
0x1ece   :  { %6674 = vmatprep.subr.bf16.mxu0 %v6598_v4  ;;  %7623 = vmatprep.subr.bf16.mxu1 %v6623_v56 }
0x1ed1   :  { %6675 = vmatpush1.bf16.msra.mxu0 %v6597_v27  ;;  %7624 = vmatpush3.bf16.msra.mxu1 %v6599_v52 }
0x1ed2   :  { %6676 = vmatprep.subr.bf16.mxu0 %v6601_v10  ;;  %8067 = vmatprep.subr.bf16.mxu1 %v11627_v15 }
0x1ed5   :  { %6677 = vmatpush1.bf16.msra.mxu0 %v6600_v32 }
0x1ed6   :  { %6678 = vmatprep.subr.bf16.mxu0 %v6604_v54 }
0x1ed9   :  { %6679 = vmatpush1.bf16.msra.mxu0 %v6603_v47 }
0x1eda   :  { %6680 = vmatprep.subr.bf16.mxu0 %v6607_v11 }
0x1edd   :  { %6681 = vmatpush1.bf16.msra.mxu0 %v6606_v59 }
0x1ede   :  { %6682 = vmatprep.subr.bf16.mxu0 %v6610_v41 }
0x1ee1   :  { %6683 = vmatpush1.bf16.msra.mxu0 %v6609_v19 }
0x1ee2   :  { %6684 = vmatprep.subr.bf16.mxu0 %v6613_v48 }
0x1ee5   :  { %6685 = vmatpush1.bf16.msra.mxu0 %v6612_v35 }
0x1ee6   :  { %6686 = vmatprep.subr.bf16.mxu0 %v6616_v3 }
0x1ee9   :  { %6687 = vmatpush1.bf16.msra.mxu0 %v6615_v24 }
0x1eea   :  { %6688 = vmatprep.subr.bf16.mxu0 %v6619_v29 }
0x1eed   :  { %6689 = vmatpush1.bf16.msra.mxu0 %v6618_v0 }
0x1eee   :  { %6690 = vmatprep.subr.bf16.mxu0 %v6622_v58 }
0x1ef1   :  { %6691 = vmatpush1.bf16.msra.mxu0 %v6621_v63 }
0x1ef2   :  { %6703 = vmatprep.subr.bf16.mxu0 %v6625_v57 }
0x1f67   :  { %v7594_v49 = vpop.f32.mrb[56].mxu0 }
0x1f68   :  { %v7595_v25 = vpop.f32.mrb[57].mxu0 }
0x1f69   :  { %v7596_v6 = vadd.f32 %v7595_v25, %v7594_v49  ;;  %v7597_v18 = vpop.f32.mrb[58].mxu0 }
0x1f6a   :  { %v7598_v33 = vpop.f32.mrb[59].mxu0 }
0x1f6b   :  { %v7599_v44 = vadd.f32 %v7598_v33, %v7597_v18  ;;  %v6375_v34 = vadd.f32 %v7596_v6, %v6253_v39 }
0x1f6d   :  { %v6378_v32 = vadd.f32 %v7599_v44, %v6253_v39 }
0x1f87   :  { %v6331_v1 = vpop.f32.mrb[64].mxu1  ;;  %v6415_v26 = vpop.f32.mrb[60].mxu0 }
0x1f88   :  { %v8111_v4 = vadd.f32 %v6331_v1, %v6245_v28  ;;  %v6416_v27 = vadd.f32 %v6415_v26, %v6375_v34  ;;  %v6333_v10 = vpop.f32.mrb[65].mxu1  ;;  %v8065_v9 = vpop.f32.mrb[61].mxu0 }
0x1f89   :  { %v8112_v45 = vadd.f32 %v6333_v10, %v6249_v31  ;;  %v6335_v54 = vpop.f32.mrb[66].mxu1  ;;  %v6418_v13 = vpop.f32.mrb[62].mxu0 }
0x1f8a   :  { %v6422_v47 = vadd.f32 %v8111_v4, %v11173_v36  ;;  %v6424_v8 = vadd.f32 %v6416_v27, %v11171_v38  ;;  %v8113_v11 = vadd.f32 %v6335_v54, %v6245_v28  ;;  %v6419_v21 = vadd.f32 %v6418_v13, %v6378_v32  ;;  %v6337_v59 = vpop.f32.mrb[67].mxu1  ;;  %v8066_v5 = vpop.f32.mrb[63].mxu0 }
0x1f8b   :  { %v6423_v41 = vadd.f32 %v8112_v45, %v11179_v51  ;;  %v8114_v37 = vadd.f32 %v6337_v59, %v6249_v31 }
0x1f8c   :  { %v6425_v19 = vadd.f32 %v8113_v11, %v11175_v20  ;;  %v6427_v46 = vadd.f32 %v6419_v21, %v11177_v14  ;;  %v11310_v12 = vmul.f32 0.5, %v6422_v47  ;;  %v11312_v35 = vmul.f32 0.5, %v6424_v8 }
0x1f8d   :  { %v6426_v48 = vadd.f32 %v8114_v37, %v11181_v22  ;;  %v11318_v43 = vmul.f32 0.5, %v6423_v41 }
0x1f8e   :  { %v11314_v36 = vmul.f32 0.5, %v6425_v19  ;;  %v11316_v38 = vmul.f32 0.5, %v6427_v46 }
0x1f8f   :  { %v11320_v3 = vmul.f32 0.5, %v6426_v48 }
0x1f90   :  { %v6434_v51 = vadd.f32 %v11314_v36, %v11310_v12  ;;  %v6448_v20 = vadd.f32 %v11316_v38, %v11312_v35 }
0x1f91   :  { %v6441_v14 = vadd.f32 %v11320_v3, %v11318_v43 }
0x1f92   :  { %v6435_v22 = vrot.slane %v6434_v51, 4  ;;  %v6449_v53 = vrot.slane %v6448_v20, 4 }
0x1f93   :  { %v6442_v24 = vrot.slane %v6441_v14, 4 }
0x1f94   :  { %v6436_v16 = vadd.f32 %v6435_v22, %v6434_v51  ;;  %v6450_v29 = vadd.f32 %v6449_v53, %v6448_v20 }
0x1f95   :  { %v6443_v50 = vadd.f32 %v6442_v24, %v6441_v14 }
0x1f96   :  { %v6437_v0 = vrot.slane %v6436_v16, 2  ;;  %v6451_v23 = vrot.slane %v6450_v29, 2 }
0x1f97   :  { %v6444_v58 = vrot.slane %v6443_v50, 2 }
0x1f98   :  { %v6438_v56 = vadd.f32 %v6437_v0, %v6436_v16  ;;  %v6452_v63 = vadd.f32 %v6451_v23, %v6450_v29 }
0x1f99   :  { %v6445_v52 = vadd.f32 %v6444_v58, %v6443_v50 }
0x1f9a   :  { %v6439_v57 = vrot.slane %v6438_v56, 1  ;;  %v6453_v49 = vrot.slane %v6452_v63, 1 }
0x1f9b   :  { %v6446_v25 = vrot.slane %v6445_v52, 1 }
0x1f9c   :  { %v6440_v6 = vadd.f32 %v6439_v57, %v6438_v56  ;;  %v6454_v18 = vadd.f32 %v6453_v49, %v6452_v63 }
0x1f9d   :  { %v6447_v33 = vadd.f32 %v6446_v25, %v6445_v52 }
0x1f9e   :  { %v6455_v44 = vmul.f32 0.0625, %v6440_v6  ;;  %v11328_v2 = vmul.f32 0.0625, %v6454_v18 }
0x1f9f   :  { %v6456_v39 = vmul.f32 0.0625, %v6447_v33 }
0x1fa0   :  { %v6458_v28 = vsub.f32 %v11310_v12, %v6455_v44  ;;  %v6461_v31 = vsub.f32 %v11314_v36, %v6455_v44  ;;  %v6460_v34 = vsub.f32 %v11312_v35, %v11328_v2  ;;  %v6463_v1 = vsub.f32 %v11316_v38, %v11328_v2 }
0x1fa1   :  { %v6459_v26 = vsub.f32 %v11318_v43, %v6456_v39  ;;  %v6462_v4 = vsub.f32 %v11320_v3, %v6456_v39 }
0x1fa2   :  { %v6464_v27 = vmul.f32 %v6458_v28, %v6458_v28  ;;  %v6467_v10 = vmul.f32 %v6461_v31, %v6461_v31  ;;  %v6466_v9 = vmul.f32 %v6460_v34, %v6460_v34  ;;  %v6469_v32 = vmul.f32 %v6463_v1, %v6463_v1  ;;  %v11671_v28 = vld [vmem:[#allocation77_spill] sm:$0xff] }
0x1fa3   :  { %v6465_v45 = vmul.f32 %v6459_v26, %v6459_v26  ;;  %v6468_v54 = vmul.f32 %v6462_v4, %v6462_v4  ;;  %v11672_v4 = vld [vmem:[#allocation52_spill] sm:$0xff] }
0x1fa4   :  { %v6470_v13 = vadd.f32 %v6467_v10, %v6464_v27  ;;  %v6484_v47 = vadd.f32 %v6469_v32, %v6466_v9  ;;  %v11673_v10 = vld [vmem:[#allocation53_spill] sm:$0xff] }
0x1fa5   :  { %v6477_v8 = vadd.f32 %v6468_v54, %v6465_v45  ;;  %v11351_v54 = vstv %s8583_s4  ;;  %s8392_s4 = scalar_lea.vmem %s7100_s8, 256 }
0x1fa6   :  { %v6471_v11 = vrot.slane %v6470_v13, 4  ;;  %v6485_v21 = vrot.slane %v6484_v47, 4  ;;  %p8393_p5 = scmp.ne.s32.totalorder %s7100_s8, %s8392_s4  ;;  %p8398_p7 = scmp.lt.s32.totalorder %s8392_s4, %s8392_s4 }
0x1fa7   :  { %v6478_v59 = vrot.slane %v6477_v8, 4 }
0x1fa8   :  { %v6472_v5 = vadd.f32 %v6471_v11, %v6470_v13  ;;  %v6486_v19 = vadd.f32 %v6485_v21, %v6484_v47  ;;  %p8399_p8 = por %p8398_p7, %p8397_p6 }
0x1fa9   :  { %v6479_v41 = vadd.f32 %v6478_v59, %v6477_v8 }
0x1faa   :  { %v6473_v37 = vrot.slane %v6472_v5, 2  ;;  %v6487_v14 = vrot.slane %v6486_v19, 2  ;;  %p8400_p9 = pnand %p8399_p8, %p8393_p5 }
0x1fab   :  { %v6480_v46 = vrot.slane %v6479_v41, 2 }
0x1fac   :  { %v6474_v48 = vadd.f32 %v6473_v37, %v6472_v5  ;;  %v6488_v29 = vadd.f32 %v6487_v14, %v6486_v19 }
0x1fad   :  { %v6481_v51 = vadd.f32 %v6480_v46, %v6479_v41 }
0x1fae   :  { %v6475_v20 = vrot.slane %v6474_v48, 1  ;;  %v6489_v58 = vrot.slane %v6488_v29, 1 }
0x1faf   :  { %v6482_v22 = vrot.slane %v6481_v51, 1 }
0x1fb0   :  { %v6476_v53 = vadd.f32 %v6475_v20, %v6474_v48  ;;  %v6490_v56 = vadd.f32 %v6489_v58, %v6488_v29  ;;  %v6627_v29 = vld [vmem:[#allocation5 + $0x198] sm:$0xff]  ;;  %v6632_v58 = vld [vmem:[#allocation5 + $0x1c0] sm:$0xff] }
0x1fb1   :  { %v6483_v24 = vadd.f32 %v6482_v22, %v6481_v51  ;;  %v6624_v22 = vld [vmem:[#allocation5 + $0x180] sm:$0xff] }
0x1fb2   :  { %v6491_v16 = vmul.f32 0.0625, %v6476_v53  ;;  %v6493_v63 = vmul.f32 0.0625, %v6490_v56  ;;  %v6626_v53 = vld [vmem:[#allocation5 + $0x190] sm:$0xff] }
0x1fb3   :  { %v6492_v50 = vmul.f32 0.0625, %v6483_v24  ;;  %v6634_v56 = vld [vmem:[#allocation5 + $0x1d0] sm:$0xff] }
0x1fb4   :  { %v6494_v0 = vadd.f32 1e-05, %v6491_v16  ;;  %v6496_v25 = vadd.f32 1e-05, %v6493_v63  ;;  %v6628_v16 = vld [vmem:[#allocation5 + $0x1a0] sm:$0xff] }
0x1fb5   :  { %v6495_v23 = vadd.f32 1e-05, %v6492_v50  ;;  %v6629_v50 = vld [vmem:[#allocation5 + $0x1a8] sm:$0xff] }
0x1fb6   :  { %8368 = vrsqrt.f32 %v6494_v0  ;;  %v6631_v0 = vld [vmem:[#allocation5 + $0x1b8] sm:$0xff] }
0x1fb7   :  { %8370 = vrsqrt.f32 %v6495_v23  ;;  %v6630_v23 = vld [vmem:[#allocation5 + $0x1b0] sm:$0xff] }
0x1fb8   :  { %8372 = vrsqrt.f32 %v6496_v25 }
0x1fc0   :  { %v8369_v52 = vpop.eup %8368 }
0x1fc1   :  { %v6500_v57 = vmul.f32 %v8369_v52, %v11664_v40  ;;  %v8371_v49 = vpop.eup %8370  ;;  %v6635_v52 = vld [vmem:[#allocation5 + $0x1d8] sm:$0xff] }
0x1fc2   :  { %v6501_v6 = vmul.f32 %v8371_v49, %v11665_v17  ;;  %v8373_v46 = vpop.eup %8372  ;;  %v11674_v49 = vld [vmem:[#allocation54_spill] sm:$0xff] }
0x1fc3   :  { %v6521_v18 = vmul.f32 %v6500_v57, %v6455_v44  ;;  %v6506_v31 = vrot.slane %v6500_v57, %v11671_v28  ;;  %v6502_v24 = vmul.f32 %v8373_v46, %v11663_v42  ;;  %v6637_v57 = vld [vmem:[#allocation5 + $0x1e8] sm:$0xff]  ;;  %v11682_v46 = vld [vmem:[#allocation42_spill] sm:$0xff] }
0x1fc4   :  { %v6522_v33 = vmul.f32 %v6501_v6, %v6456_v39  ;;  %v6510_v1 = vrot.slane %v6501_v6, %v11671_v28  ;;  %v6636_v6 = vld [vmem:[#allocation5 + $0x1e0] sm:$0xff] }
0x1fc5   :  { %v6527_v34 = vrot.slane %v6521_v18, 7  ;;  %v6518_v40 = vmul.f32 %v6506_v31, %v11314_v36  ;;  %v6515_v32 = vmul.f32 %v6506_v31, %v11310_v12  ;;  %v6523_v42 = vmul.f32 %v6502_v24, %v11328_v2  ;;  %v6638_v18 = vld [vmem:[#allocation5 + $0x1f0] sm:$0xff] }
0x1fc6   :  { %v6528_v26 = vrot.slane %v6522_v33, 7  ;;  %v6519_v44 = vmul.f32 %v6510_v1, %v11320_v3  ;;  %v6516_v39 = vmul.f32 %v6510_v1, %v11318_v43  ;;  %v6514_v2 = vrot.slane %v6502_v24, %v11671_v28  ;;  %v6640_v33 = vld [vmem:[#allocation5 + $0x200] sm:$0xff]  ;;  %v6639_v28 = vld [vmem:[#allocation5 + $0x1f8] sm:$0xff]  ;;  %v11689_v24 = vld [vmem:[#allocation28_spill] sm:$0xff] }
0x1fc7   :  { %v6533_v27 = vsub.f32 %v11672_v4, %v6527_v34  ;;  %v6529_v63 = vrot.slane %v6523_v42, 7  ;;  %v11694_v42 = vld [vmem:[#allocation46_spill] sm:$0xff] }
0x1fc8   :  { %v6534_v9 = vsub.f32 %v11673_v10, %v6528_v26  ;;  %v6520_v34 = vmul.f32 %v6514_v2, %v11316_v38  ;;  %v6517_v1 = vmul.f32 %v6514_v2, %v11312_v35  ;;  %v6641_v26 = vld [vmem:[#allocation5 + $0x208] sm:$0xff] }
0x1fc9   :  { %v6539_v17 = vrot.slane %v6533_v27, %v11651_v55  ;;  %v6535_v25 = vsub.f32 %v11674_v49, %v6529_v63  ;;  %v6643_v27 = vld [vmem:[#allocation5 + $0x218] sm:$0xff]  ;;  %v11698_v63 = vld [vmem:[#allocation31_spill] sm:$0xff] }
0x1fca   :  { %v6543_v45 = vrot.slane %v6534_v9, %v11651_v55 }
0x1fcb   :  { %v6548_v13 = vadd.f32 %v6539_v17, %v6515_v32  ;;  %v6551_v47 = vadd.f32 %v6539_v17, %v6518_v40  ;;  %v6547_v31 = vrot.slane %v6535_v25, %v11651_v55  ;;  %v6642_v55 = vld [vmem:[#allocation5 + $0x210] sm:$0xff]  ;;  %v6644_v32 = vld [vmem:[#allocation5 + $0x220] sm:$0xff] }
0x1fcc   :  { %v6549_v8 = vadd.f32 %v6543_v45, %v6516_v39  ;;  %v6552_v11 = vadd.f32 %v6543_v45, %v6519_v44  ;;  %v6646_v17 = vld [vmem:[#allocation5 + $0x230] sm:$0xff]  ;;  %v6645_v45 = vld [vmem:[#allocation5 + $0x228] sm:$0xff] }
0x1fcd   :  { %vm6554_vm2 = vcmp.ge.f32.partialorder %v6548_v13, 0.0  ;;  %vm6557_vm3 = vcmp.ge.f32.partialorder %v6551_v47, 0.0  ;;  %v6561_v21 = vmul.f32 %v11351_v54, %v6548_v13  ;;  %v6564_v59 = vmul.f32 %v11351_v54, %v6551_v47 }
0x1fce   :  { %vm6555_vm4 = vcmp.ge.f32.partialorder %v6549_v8, 0.0  ;;  %vm6558_vm5 = vcmp.ge.f32.partialorder %v6552_v11, 0.0  ;;  %v6562_v5 = vmul.f32 %v11351_v54, %v6549_v8  ;;  %v6565_v41 = vmul.f32 %v11351_v54, %v6552_v11 }
0x1fcf   :  { %v6567_v37 = vsel %vm6554_vm2, %v6548_v13, %v6561_v21  ;;  %v6570_v19 = vsel %vm6557_vm3, %v6551_v47, %v6564_v59  ;;  %v6550_v9 = vadd.f32 %v6547_v31, %v6517_v1  ;;  %v6553_v40 = vadd.f32 %v6547_v31, %v6520_v34  ;;  %v6647_v13 = vld [vmem:[#allocation5 + $0x238] sm:$0xff]  ;;  %v11675_v21 = vld [vmem:[#allocation32_spill] sm:$0xff] }
0x1fd0   :  { %v6568_v48 = vsel %vm6555_vm4, %v6549_v8, %v6562_v5  ;;  %v6571_v51 = vsel %vm6558_vm5, %v6552_v11, %v6565_v41  ;;  %v6573_v14 = vpack.c.bf16 %v6570_v19, %v6567_v37  ;;  %v11677_v59 = vld [vmem:[#allocation24_spill] sm:$0xff]  ;;  %v11678_v5 = vld [vmem:[#allocation33_spill] sm:$0xff]  ;;  %v11681_v19 = vld [vmem:[#allocation34_spill] sm:$0xff] }
0x1fd1   :  { %v6574_v20 = vpack.c.bf16 %v6571_v51, %v6568_v48  ;;  %v6563_v44 = vmul.f32 %v11351_v54, %v6550_v9  ;;  %v6566_v39 = vmul.f32 %v11351_v54, %v6553_v40  ;;  %vm6556_vm6 = vcmp.ge.f32.partialorder %v6550_v9, 0.0  ;;  %v11676_v54 = vld [vmem:[#allocation40_spill] sm:$0xff]  ;;  %v11679_v41 = vld [vmem:[#allocation41_spill] sm:$0xff]  ;;  %v11683_v48 = vld [vmem:[#allocation26_spill] sm:$0xff] }
0x1fd2   :  { %vm6559_vm7 = vcmp.ge.f32.partialorder %v6553_v40, 0.0  ;;  %v11680_v37 = vld [vmem:[#allocation25_spill] sm:$0xff]  ;;  %v11684_v51 = vld [vmem:[#allocation35_spill] sm:$0xff] }
0x1fd3   :  { %6692 = vmatprep.mubr.bf16.mxu0 %v6574_v20  ;;  %6778 = vmatprep.mubr.bf16.mxu1 %v6574_v20  ;;  %v6569_v47 = vsel %vm6556_vm6, %v6550_v9, %v6563_v44  ;;  %v6572_v8 = vsel %vm6559_vm7, %v6553_v40, %v6566_v39  ;;  %v11685_v20 = vld [vmem:[#allocation43_spill] sm:$0xff] }
0x1fd4   :  { %6693 = vmatmul.mubr.bf16.vlgmr.msra.gmra.mrb[64].mxu0 %v6573_v14  ;;  %6779 = vmatmul.mubr.bf16.vlgmr.msra.gmra.mrb[68].mxu1 %v6573_v14  ;;  %v6575_v11 = vpack.c.bf16 %v6572_v8, %v6569_v47  ;;  %v11686_v14 = vld [vmem:[#allocation27_spill] sm:$0xff] }
0x1fd5   :  { %6704 = vmatpush1.bf16.msra.mxu0 %v6624_v22  ;;  %8068 = vmatpush3.bf16.msra.mxu1 %v6626_v53  ;;  %v11687_v22 = vld [vmem:[#allocation36_spill] sm:$0xff] }
0x1fd6   :  { %6705 = vmatprep.subr.bf16.mxu0 %v6628_v16  ;;  %8069 = vmatprep.subr.bf16.mxu1 %v11627_v15  ;;  %v11688_v53 = vld [vmem:[#allocation44_spill] sm:$0xff]  ;;  %v11690_v16 = vld [vmem:[#allocation37_spill] sm:$0xff] }
0x1fd7   :  { %6735 = vmatprep.mubr.bf16.mxu0 %v11654_v61  ;;  %8083 = vmatprep.mubr.msk.bf16.mxu1 %vm8430_vm0, %v11627_v15  ;;  %v6633_v61 = vld [vmem:[#allocation5 + $0x1c8] sm:$0xff] }
0x1fd9   :  { %6706 = vmatpush1.bf16.msra.mxu0 %v6627_v29  ;;  %8070 = vmatpush3.bf16.msra.mxu1 %v6629_v50  ;;  %v11691_v29 = vld [vmem:[#allocation45_spill] sm:$0xff] }
0x1fda   :  { %6707 = vmatprep.subr.bf16.mxu0 %v6631_v0  ;;  %8071 = vmatprep.subr.bf16.mxu1 %v11627_v15  ;;  %v11692_v50 = vld [vmem:[#allocation29_spill] sm:$0xff]  ;;  %v11693_v0 = vld [vmem:[#allocation38_spill] sm:$0xff] }
0x1fdd   :  { %6708 = vmatpush1.bf16.msra.mxu0 %v6630_v23  ;;  %8072 = vmatpush3.bf16.msra.mxu1 %v6632_v58  ;;  %v11695_v23 = vld [vmem:[#allocation30_spill] sm:$0xff]  ;;  %v11696_v58 = vld [vmem:[#allocation39_spill] sm:$0xff] }
0x1fde   :  { %6709 = vmatprep.subr.bf16.mxu0 %v6634_v56  ;;  %8073 = vmatprep.subr.bf16.mxu1 %v11627_v15  ;;  %v11697_v56 = vld [vmem:[#allocation47_spill] sm:$0xff] }
0x1fe1   :  { %6710 = vmatpush1.bf16.msra.mxu0 %v6633_v61  ;;  %8074 = vmatpush3.bf16.msra.mxu1 %v6635_v52 }
0x1fe2   :  { %6711 = vmatprep.subr.bf16.mxu0 %v6637_v57  ;;  %8075 = vmatprep.subr.bf16.mxu1 %v11627_v15 }
0x1fe5   :  { %6712 = vmatpush1.bf16.msra.mxu0 %v6636_v6  ;;  %8076 = vmatpush3.bf16.msra.mxu1 %v6638_v18  ;;  %v6659_v18 = vrot.slane %v11674_v49, %v11652_v60 }
0x1fe6   :  { %6713 = vmatprep.subr.bf16.mxu0 %v6640_v33  ;;  %8077 = vmatprep.subr.bf16.mxu1 %v11627_v15  ;;  %v6651_v33 = vrot.slane %v11672_v4, %v11652_v60 }
0x1fe9   :  { %6714 = vmatpush1.bf16.msra.mxu0 %v6639_v28  ;;  %8078 = vmatpush3.bf16.msra.mxu1 %v6641_v26 }
0x1fea   :  { %6715 = vmatprep.subr.bf16.mxu0 %v6643_v27  ;;  %8079 = vmatprep.subr.bf16.mxu1 %v11627_v15 }
0x1fed   :  { %6716 = vmatpush1.bf16.msra.mxu0 %v6642_v55  ;;  %8080 = vmatpush3.bf16.msra.mxu1 %v6644_v32 }
0x1fee   :  { %6717 = vmatprep.subr.bf16.mxu0 %v6646_v17  ;;  %8081 = vmatprep.subr.bf16.mxu1 %v11627_v15 }
0x1ff1   :  { %6718 = vmatpush1.bf16.msra.mxu0 %v6645_v45  ;;  %8082 = vmatpush3.bf16.msra.mxu1 %v6647_v13 }
0x1ff2   :  { %8087 = vmatprep.subr.bf16.mxu0 %v11627_v15  ;;  %7640 = vmatprep.subr.bf16.mxu1 %v11675_v21 }
0x1ff4   :  { %6736 = vmatmul.mubr.bf16.vlgmr.msra.gmra.mrb[64].mxu0 %v6575_v11  ;;  %8084 = vmatmul.mubr.bf16.vlgmr.msra.gmra.mrb[72].mxu1 %v6575_v11 }
0x1ff5   :  { %8088 = vmatpush3.bf16.msra.mxu0 %v11676_v54  ;;  %7641 = vmatpush3.bf16.msra.mxu1 %v11677_v59 }
0x1ff6   :  { %8089 = vmatprep.subr.bf16.mxu0 %v11627_v15  ;;  %7642 = vmatprep.subr.bf16.mxu1 %v11678_v5 }
0x1ff7   :  { %8103 = vmatprep.mubr.msk.bf16.mxu0 %vm8430_vm0, %v11627_v15 }
0x1ff9   :  { %8090 = vmatpush3.bf16.msra.mxu0 %v11679_v41  ;;  %7643 = vmatpush3.bf16.msra.mxu1 %v11680_v37 }
0x1ffa   :  { %8091 = vmatprep.subr.bf16.mxu0 %v11627_v15  ;;  %7644 = vmatprep.subr.bf16.mxu1 %v11681_v19 }
0x1ffd   :  { %8092 = vmatpush3.bf16.msra.mxu0 %v11682_v46  ;;  %7645 = vmatpush3.bf16.msra.mxu1 %v11683_v48 }
0x1ffe   :  { %8093 = vmatprep.subr.bf16.mxu0 %v11627_v15  ;;  %7646 = vmatprep.subr.bf16.mxu1 %v11684_v51 }
0x2001   :  { %8094 = vmatpush3.bf16.msra.mxu0 %v11685_v20  ;;  %7647 = vmatpush3.bf16.msra.mxu1 %v11686_v14 }
0x2002   :  { %8095 = vmatprep.subr.bf16.mxu0 %v11627_v15  ;;  %7648 = vmatprep.subr.bf16.mxu1 %v11687_v22 }
0x2005   :  { %8096 = vmatpush3.bf16.msra.mxu0 %v11688_v53  ;;  %7649 = vmatpush3.bf16.msra.mxu1 %v11689_v24 }
0x2006   :  { %8097 = vmatprep.subr.bf16.mxu0 %v11627_v15  ;;  %7650 = vmatprep.subr.bf16.mxu1 %v11690_v16 }
0x2009   :  { %8098 = vmatpush3.bf16.msra.mxu0 %v11691_v29  ;;  %7651 = vmatpush3.bf16.msra.mxu1 %v11692_v50 }
0x200a   :  { %8099 = vmatprep.subr.bf16.mxu0 %v11627_v15  ;;  %7652 = vmatprep.subr.bf16.mxu1 %v11693_v0 }
0x200d   :  { %8100 = vmatpush3.bf16.msra.mxu0 %v11694_v42  ;;  %7653 = vmatpush3.bf16.msra.mxu1 %v11695_v23 }
0x200e   :  { %8101 = vmatprep.subr.bf16.mxu0 %v11627_v15  ;;  %7654 = vmatprep.subr.bf16.mxu1 %v11696_v58  ;;  %v6655_v15 = vrot.slane %v11673_v10, %v11652_v60 }
0x2011   :  { %8102 = vmatpush3.bf16.msra.mxu0 %v11697_v56  ;;  %7655 = vmatpush3.bf16.msra.mxu1 %v11698_v63 }
0x20a7   :  { %v7625_v61 = vpop.f32.mrb[68].mxu1 }
0x20a8   :  { %v7626_v52 = vpop.f32.mrb[69].mxu1 }
0x20a9   :  { %v7627_v57 = vadd.f32 %v7626_v52, %v7625_v61  ;;  %v7628_v25 = vpop.f32.mrb[70].mxu1 }
0x20aa   :  { %v7629_v2 = vpop.f32.mrb[71].mxu1 }
0x20ab   :  { %v7630_v6 = vadd.f32 %v7629_v2, %v7628_v25  ;;  %v6781_v31 = vadd.f32 %v7627_v57, %v6659_v18 }
0x20ad   :  { %v6784_v40 = vadd.f32 %v7630_v6, %v6659_v18 }
0x20c7   :  { %v6737_v34 = vpop.f32.mrb[64].mxu0  ;;  %v6821_v1 = vpop.f32.mrb[72].mxu1 }
0x20c8   :  { %v8115_v28 = vadd.f32 %v6737_v34, %v6651_v33  ;;  %v6822_v26 = vadd.f32 %v6821_v1, %v6781_v31  ;;  %v6739_v27 = vpop.f32.mrb[65].mxu0  ;;  %v8085_v9 = vpop.f32.mrb[73].mxu1 }
0x20c9   :  { %v8116_v55 = vadd.f32 %v6739_v27, %v6655_v15  ;;  %v6741_v32 = vpop.f32.mrb[66].mxu0  ;;  %v6824_v17 = vpop.f32.mrb[74].mxu1 }
0x20ca   :  { %v6828_v44 = vadd.f32 %v8115_v28, %v11310_v12  ;;  %v6830_v39 = vadd.f32 %v6822_v26, %v11312_v35  ;;  %v8117_v45 = vadd.f32 %v6741_v32, %v6651_v33  ;;  %v6825_v13 = vadd.f32 %v6824_v17, %v6784_v40  ;;  %v6743_v47 = vpop.f32.mrb[67].mxu0  ;;  %v8086_v8 = vpop.f32.mrb[75].mxu1 }
0x20cb   :  { %v6829_v60 = vadd.f32 %v8116_v55, %v11318_v43  ;;  %v8118_v11 = vadd.f32 %v6743_v47, %v6655_v15 }
0x20cc   :  { %v6831_v21 = vadd.f32 %v8117_v45, %v11314_v36  ;;  %v6833_v54 = vadd.f32 %v6825_v13, %v11316_v38  ;;  %v11422_v5 = vmul.f32 0.5, %v6828_v44  ;;  %v11424_v41 = vmul.f32 0.5, %v6830_v39 }
0x20cd   :  { %v6832_v59 = vadd.f32 %v8118_v11, %v11320_v3  ;;  %v11430_v37 = vmul.f32 0.5, %v6829_v60 }
0x20ce   :  { %v11426_v12 = vmul.f32 0.5, %v6831_v21  ;;  %v11428_v35 = vmul.f32 0.5, %v6833_v54 }
0x20cf   :  { %v11432_v19 = vmul.f32 0.5, %v6832_v59 }
0x20d0   :  { %v6840_v43 = vadd.f32 %v11426_v12, %v11422_v5  ;;  %v6854_v36 = vadd.f32 %v11428_v35, %v11424_v41 }
0x20d1   :  { %v6847_v38 = vadd.f32 %v11432_v19, %v11430_v37 }
0x20d2   :  { %v6841_v3 = vrot.slane %v6840_v43, 4  ;;  %v6855_v46 = vrot.slane %v6854_v36, 4 }
0x20d3   :  { %v6848_v48 = vrot.slane %v6847_v38, 4 }
0x20d4   :  { %v6842_v51 = vadd.f32 %v6841_v3, %v6840_v43  ;;  %v6856_v20 = vadd.f32 %v6855_v46, %v6854_v36 }
0x20d5   :  { %v6849_v14 = vadd.f32 %v6848_v48, %v6847_v38 }
0x20d6   :  { %v6843_v22 = vrot.slane %v6842_v51, 2  ;;  %v6857_v53 = vrot.slane %v6856_v20, 2 }
0x20d7   :  { %v6850_v24 = vrot.slane %v6849_v14, 2 }
0x20d8   :  { %v6844_v16 = vadd.f32 %v6843_v22, %v6842_v51  ;;  %v6858_v29 = vadd.f32 %v6857_v53, %v6856_v20 }
0x20d9   :  { %v6851_v50 = vadd.f32 %v6850_v24, %v6849_v14 }
0x20da   :  { %v6845_v0 = vrot.slane %v6844_v16, 1  ;;  %v6859_v42 = vrot.slane %v6858_v29, 1 }
0x20db   :  { %v6852_v23 = vrot.slane %v6851_v50, 1 }
0x20dc   :  { %v6846_v58 = vadd.f32 %v6845_v0, %v6844_v16  ;;  %v6860_v56 = vadd.f32 %v6859_v42, %v6858_v29 }
0x20dd   :  { %v6853_v63 = vadd.f32 %v6852_v23, %v6851_v50 }
0x20de   :  { %v6861_v61 = vmul.f32 0.0625, %v6846_v58  ;;  %v6863_v52 = vmul.f32 0.0625, %v6860_v56 }
0x20df   :  { %v6862_v57 = vmul.f32 0.0625, %v6853_v63 }
0x20e0   :  { %v6864_v25 = vsub.f32 %v11422_v5, %v6861_v61  ;;  %v6867_v2 = vsub.f32 %v11426_v12, %v6861_v61  ;;  %v6866_v6 = vsub.f32 %v11424_v41, %v6863_v52  ;;  %v6869_v18 = vsub.f32 %v11428_v35, %v6863_v52 }
0x20e1   :  { %v6865_v33 = vsub.f32 %v11430_v37, %v6862_v57  ;;  %v6868_v15 = vsub.f32 %v11432_v19, %v6862_v57 }
0x20e2   :  { %v6870_v31 = vmul.f32 %v6864_v25, %v6864_v25  ;;  %v6873_v34 = vmul.f32 %v6867_v2, %v6867_v2  ;;  %v6872_v1 = vmul.f32 %v6866_v6, %v6866_v6  ;;  %v6875_v28 = vmul.f32 %v6869_v18, %v6869_v18 }
0x20e3   :  { %v6871_v26 = vmul.f32 %v6865_v33, %v6865_v33  ;;  %v6874_v27 = vmul.f32 %v6868_v15, %v6868_v15 }
0x20e4   :  { %v6876_v9 = vadd.f32 %v6873_v34, %v6870_v31  ;;  %v6890_v40 = vadd.f32 %v6875_v28, %v6872_v1 }
0x20e5   :  { %v6883_v55 = vadd.f32 %v6874_v27, %v6871_v26  ;;  %v6966_v27 = vstv %s8588_s26 }
0x20e6   :  { %v6877_v32 = vrot.slane %v6876_v9, 4  ;;  %v6891_v17 = vrot.slane %v6890_v40, 4 }
0x20e7   :  { %v6884_v44 = vrot.slane %v6883_v55, 4 }
0x20e8   :  { %v6878_v39 = vadd.f32 %v6877_v32, %v6876_v9  ;;  %v6892_v45 = vadd.f32 %v6891_v17, %v6890_v40 }
0x20e9   :  { %v6885_v13 = vadd.f32 %v6884_v44, %v6883_v55 }
0x20ea   :  { %v6879_v47 = vrot.slane %v6878_v39, 2  ;;  %v6893_v8 = vrot.slane %v6892_v45, 2 }
0x20eb   :  { %v6886_v60 = vrot.slane %v6885_v13, 2 }
0x20ec   :  { %v6880_v11 = vadd.f32 %v6879_v47, %v6878_v39  ;;  %v6894_v21 = vadd.f32 %v6893_v8, %v6892_v45 }
0x20ed   :  { %v6887_v54 = vadd.f32 %v6886_v60, %v6885_v13 }
0x20ee   :  { %v6881_v59 = vrot.slane %v6880_v11, 1  ;;  %v6895_v43 = vrot.slane %v6894_v21, 1 }
0x20ef   :  { %v6888_v36 = vrot.slane %v6887_v54, 1 }
0x20f0   :  { %v6882_v38 = vadd.f32 %v6881_v59, %v6880_v11  ;;  %v6896_v3 = vadd.f32 %v6895_v43, %v6894_v21 }
0x20f1   :  { %v6889_v46 = vadd.f32 %v6888_v36, %v6887_v54 }
0x20f2   :  { %v6897_v48 = vmul.f32 0.0625, %v6882_v38  ;;  %v6899_v51 = vmul.f32 0.0625, %v6896_v3  ;;  %v7009_v3 = vrot.slane %v11662_v62, %v11666_v7 }
0x20f3   :  { %v6898_v20 = vmul.f32 0.0625, %v6889_v46 }
0x20f4   :  { %v6900_v14 = vadd.f32 1e-05, %v6897_v48  ;;  %v6902_v22 = vadd.f32 1e-05, %v6899_v51 }
0x20f5   :  { %v6901_v53 = vadd.f32 1e-05, %v6898_v20 }
0x20f6   :  { %8374 = vrsqrt.f32 %v6900_v14 }
0x20f7   :  { %8376 = vrsqrt.f32 %v6902_v22 }
0x20f8   :  { %8378 = vrsqrt.f32 %v6901_v53 }
0x2100   :  { %v8375_v24 = vpop.eup %8374 }
0x2101   :  { %v8377_v16 = vpop.eup %8376  ;;  %v6906_v29 = vmul.f32 %v8375_v24, %v11672_v4 }
0x2102   :  { %v8379_v50 = vpop.eup %8378  ;;  %v6908_v0 = vmul.f32 %v8377_v16, %v11674_v49 }
0x2103   :  { %v6912_v42 = vrot.slane %v6906_v29, %v11666_v7  ;;  %v6927_v23 = vmul.f32 %v6906_v29, %v6861_v61  ;;  %v6907_v58 = vmul.f32 %v8379_v50, %v11673_v10 }
0x2104   :  { %v6920_v56 = vrot.slane %v6908_v0, %v11666_v7  ;;  %v6929_v63 = vmul.f32 %v6908_v0, %v6863_v52 }
0x2105   :  { %v6921_v25 = vmul.f32 %v6912_v42, %v11422_v5  ;;  %v6924_v2 = vmul.f32 %v6912_v42, %v11426_v12  ;;  %v6933_v6 = vrot.slane %v6927_v23, 7  ;;  %v6916_v18 = vrot.slane %v6907_v58, %v11666_v7 }
0x2106   :  { %v6923_v33 = vmul.f32 %v6920_v56, %v11424_v41  ;;  %v6926_v15 = vmul.f32 %v6920_v56, %v11428_v35  ;;  %v6935_v31 = vrot.slane %v6929_v63, 7  ;;  %v6928_v34 = vmul.f32 %v6907_v58, %v6862_v57 }
0x2107   :  { %v6939_v61 = vsub.f32 %v11672_v4, %v6933_v6  ;;  %v6925_v1 = vmul.f32 %v6916_v18, %v11432_v19  ;;  %v6922_v52 = vmul.f32 %v6916_v18, %v11430_v37 }
0x2108   :  { %v6941_v28 = vsub.f32 %v11674_v49, %v6935_v31  ;;  %v6934_v5 = vrot.slane %v6928_v34, 7 }
0x2109   :  { %v6945_v12 = vrot.slane %v6939_v61, %v11667_v30 }
0x210a   :  { %v6953_v26 = vrot.slane %v6941_v28, %v11667_v30  ;;  %v6940_v41 = vsub.f32 %v11673_v10, %v6934_v5 }
0x210b   :  { %v6957_v9 = vadd.f32 %v6945_v12, %v6924_v2  ;;  %v6954_v35 = vadd.f32 %v6945_v12, %v6921_v25 }
0x210c   :  { %v6959_v40 = vadd.f32 %v6953_v26, %v6926_v15  ;;  %v6956_v57 = vadd.f32 %v6953_v26, %v6923_v33  ;;  %v6949_v4 = vrot.slane %v6940_v41, %v11667_v30 }
0x210d   :  { %vm6960_vm0 = vcmp.ge.f32.partialorder %v6954_v35, 0.0  ;;  %vm6963_vm8 = vcmp.ge.f32.partialorder %v6957_v9, 0.0  ;;  %v6967_v19 = vmul.f32 %v6966_v27, %v6954_v35  ;;  %v6970_v37 = vmul.f32 %v6966_v27, %v6957_v9 }
0x210e   :  { %vm6962_vm9 = vcmp.ge.f32.partialorder %v6956_v57, 0.0  ;;  %vm6965_vm10 = vcmp.ge.f32.partialorder %v6959_v40, 0.0  ;;  %v6969_v49 = vmul.f32 %v6966_v27, %v6956_v57  ;;  %v6972_v55 = vmul.f32 %v6966_v27, %v6959_v40 }
0x210f   :  { %v6955_v32 = vadd.f32 %v6949_v4, %v6922_v52  ;;  %v6958_v17 = vadd.f32 %v6949_v4, %v6925_v1  ;;  %v6973_v44 = vsel %vm6960_vm0, %v6954_v35, %v6967_v19  ;;  %v6976_v39 = vsel %vm6963_vm8, %v6957_v9, %v6970_v37 }
0x2110   :  { %v6975_v45 = vsel %vm6962_vm9, %v6956_v57, %v6969_v49  ;;  %v6978_v10 = vsel %vm6965_vm10, %v6959_v40, %v6972_v55  ;;  %v6979_v13 = vpack.c.bf16 %v6976_v39, %v6973_v44 }
0x2111   :  { %v6981_v47 = vpack.c.bf16 %v6978_v10, %v6975_v45  ;;  %vm6961_vm11 = vcmp.ge.f32.partialorder %v6955_v32, 0.0  ;;  %vm6964_vm12 = vcmp.ge.f32.partialorder %v6958_v17, 0.0  ;;  %v6968_v8 = vmul.f32 %v6966_v27, %v6955_v32 }
0x2112   :  { %v6971_v30 = vmul.f32 %v6966_v27, %v6958_v17 }
0x2113   :  { %8104 = vmatmul.mubr.bf16.vlgmr.msra.gmra.mrb[68].mxu0 %v6981_v47  ;;  %v6974_v60 = vsel %vm6961_vm11, %v6955_v32, %v6968_v8 }
0x2114   :  { %v6977_v11 = vsel %vm6964_vm12, %v6958_v17, %v6971_v30 }
0x2115   :  { %v6980_v21 = vpack.c.bf16 %v6977_v11, %v6974_v60 }
0x2117   :  { %7042 = vmatprep.mubr.bf16.mxu1 %v6980_v21 }
0x2118   :  { %7043 = vmatmul.mubr.bf16.vlgmr.msra.gmra.mrb[76].mxu1 %v6979_v13 }
0x21e6   :  { %v7085_v54 = vpop.f32.mrb[68].mxu0 }
0x21e7   :  { %v8105_v59 = vpop.f32.mrb[69].mxu0 }
0x21e8   :  { %v7088_v43 = vpop.f32.mrb[70].mxu0 }
0x21e9   :  { %v8106_v36 = vpop.f32.mrb[71].mxu0 }
0x21eb   :  { %v7656_v38 = vpop.f32.mrb[76].mxu1 }
0x21ec   :  { %v7657_v46 = vpop.f32.mrb[77].mxu1 }
0x21ed   :  { %v7658_v48 = vadd.f32 %v7657_v46, %v7656_v38  ;;  %v7659_v51 = vpop.f32.mrb[78].mxu1 }
0x21ee   :  { %v7660_v20 = vpop.f32.mrb[79].mxu1 }
0x21ef   :  { %v7045_v14 = vadd.f32 %v7658_v48, %v7009_v3  ;;  %v7661_v22 = vadd.f32 %v7660_v20, %v7659_v51 }
0x21f1   :  { %v7086_v53 = vadd.f32 %v7085_v54, %v7045_v14  ;;  %v7048_v24 = vadd.f32 %v7661_v22, %v7009_v3 }
0x21f3   :  { %7092 = vst [vmem:[#allocation11] sm:$0xff] %v7086_v53  ;;  %v7089_v16 = vadd.f32 %v7088_v43, %v7048_v24 }
0x21f5   :  { %7093 = vst [vmem:[#allocation11 + $0x8] sm:$0xff] %v7089_v16 }
0x21f6   :  { %8403 = shalt.err (!%p8400_p9)
}
0x21f7   :  { %s11699_s20 = sld [smem:[#allocation87_spill]] }
0x21fd   :  { %s8404_s17 = scalar_lea.hbm %s11699_s20, 256 }
0x21fe   :  { %p8405_p10 = scmp.ne.s32.totalorder %s11699_s20, %s8404_s17  ;;  %p8408_p11 = scmp.lt.u32.totalorder %s8404_s17, %s11699_s20 }
0x2200   :  { %p8410_p12 = pnand %p8408_p11, %p8405_p10 }
0x2202   :  { %8413 = shalt.err (!%p8410_p12)
}
0x2203   :  { %s8437_s23 = smov 128   ;;  %s8438_s7 = smov 8  }
0x2204   :  { %7105 = dma.vmem_to_hbm [thread:$0]  %s7100_s8, 256, %s11699_s20, [#allocation9], %s8437_s23, %s8437_s23, %s8438_s7  }
0x2205   :  { %8426 = dma.done.wait [#allocation9], 256  }
0x2206   :  { %8427 = vsyncadd [#allocation9], 4294967040 }
0x2207   :  { %7109 = vsyncpa [#allocation9], 1 }
0x2208   :  { %7110 = vsyncpa [#allocation10], 1 }
0x2209   :  { %7111 = vsyncmov [#allocation7] }
0x220c   :  { %s7112_s18 = vpop.sfrf %7111 }
0x220d   :  { %p7331_p13 = scmp.ne.s32.totalorder %s7112_s18, 0 }
0x220f   :  { %7116 = shalt.err (%p7331_p13)  }
0x2210   :  { %7118 = vsyncmov [#allocation7 + $0x1] }
0x2213   :  { %s7119_s3 = vpop.sfrf %7118 }
0x2214   :  { %p7332_p0 = scmp.ne.s32.totalorder %s7119_s3, 0 }
0x2216   :  { %7123 = shalt.err (%p7332_p0)  }
0x2217   :  { %7125 = vsyncmov [#allocation7 + $0x2] }
0x221a   :  { %s7126_s25 = vpop.sfrf %7125 }
0x221b   :  { %p7333_p1 = scmp.ne.s32.totalorder %s7126_s25, 0 }
0x221d   :  { %7130 = shalt.err (%p7333_p1)  }
0x221e   :  { %7132 = vsyncmov [#allocation7 + $0x3] }
0x2221   :  { %s7133_s13 = vpop.sfrf %7132 }
0x2222   :  { %p7334_p2 = scmp.ne.s32.totalorder %s7133_s13, 0 }
0x2224   :  { %7137 = shalt.err (%p7334_p2)  }
0x2225   :  { %7139 = vsyncmov [#allocation7 + $0x4] }
0x2228   :  { %s7140_s24 = vpop.sfrf %7139 }
0x2229   :  { %p7335_p3 = scmp.ne.s32.totalorder %s7140_s24, 0 }
0x222b   :  { %7144 = shalt.err (%p7335_p3)  }

</bundles_post_ra>
